<compile_context>
chip_gen: v5e
topology: v5e:2x2
jax: 0.10.0
libtpu: 0.0.40
codegen_flags: <defaults>
</compile_context>

<pallas_src>
import jax
import jax.numpy as jnp
from jax import lax
from jax.experimental import pallas as pl
from jax.experimental.pallas import tpu as pltpu

LOG2 = 0.6931471805599453
VMEM_SPEC = pl.BlockSpec(memory_space=pltpu.MemorySpace.VMEM)

NBLOCKS = 3
NITERS_S2S = 2
HIDDEN_INPUT = (64, 32)
HIDDEN_CONV = (64, 64, 32)


def _rup(n, m):
    return ((n + m - 1) // m) * m


# ----------------------------------------------------------------------------
# Parameter initialization: torch-like raw weights, packed ONCE into a few
# dense, lane-aligned, bf16 arrays (biases stay f32).
# ----------------------------------------------------------------------------
def init_params(key, ntypes=8, dim_node=16, dim_edge=100, dim_state=2,
                hidden_input=HIDDEN_INPUT, hidden_conv=HIDDEN_CONV,
                nblocks=NBLOCKS, scale=0.1):
    assert hidden_input[0] <= 64 and hidden_input[-1] <= 32
    assert hidden_conv[0] <= 128 and hidden_conv[-1] == hidden_input[-1]
    bf16 = jnp.bfloat16
    kiter = iter(jax.random.split(key, 256))

    def linear(din, dout):
        kw, kb = jax.random.split(next(kiter))
        return (scale * jax.random.normal(kw, (din, dout), jnp.float32),
                scale * jax.random.normal(kb, (dout,), jnp.float32))

    def pad_w(w):
        return jnp.zeros((128, 128), jnp.float32).at[:w.shape[0], :w.shape[1]].set(w)

    def pad_b(b):
        return jnp.zeros((128,), jnp.float32).at[:b.shape[0]].set(b)

    d_h = hidden_input[-1]     # 32
    d_c = hidden_conv[-1]      # 32

    # Embedding table (values at lanes 0:dim_node)
    emb = scale * jax.random.normal(next(kiter), (ntypes, dim_node), jnp.float32)
    emb_p = jnp.zeros((_rup(ntypes, 8), 128), jnp.float32).at[:ntypes, :dim_node].set(emb)

    # --- fused 3-branch (edge/node/state) dense stages -----------------------
    # stage 0: the three encoders (dim_edge/dim_node/dim_state -> 64 -> 32)
    # stage b>0: dense_edge/dense_node/dense_state of MEGNet block b (32->64->32)
    # Layer-1 outputs live in disjoint 64-lane blocks (edge 0:64, node 64:128,
    # state 128:192); layer-2 outputs all land at lanes 0:32 (per-row biases
    # are selected by row-block inside the kernel).
    n_stages = 1 + (nblocks - 1)
    Wf1 = jnp.zeros((n_stages, 128, 256), jnp.float32)
    Wf2 = jnp.zeros((n_stages, 256, 128), jnp.float32)
    Bf1 = jnp.zeros((n_stages * 3, 256), jnp.float32)
    Bf2 = jnp.zeros((n_stages * 3, 128), jnp.float32)
    stage_in = [(dim_edge, dim_node, dim_state)] + [(d_c, d_c, d_c)] * (nblocks - 1)
    for s, dins in enumerate(stage_in):
        for br, din in enumerate(dins):            # 0=edge, 1=node, 2=state
            w1, b1 = linear(din, hidden_input[0])
            w2, b2 = linear(hidden_input[0], hidden_input[1])
            Wf1 = Wf1.at[s, :din, 64 * br:64 * br + hidden_input[0]].set(w1)
            Bf1 = Bf1.at[3 * s + br, 64 * br:64 * br + hidden_input[0]].set(b1)
            Wf2 = Wf2.at[s, 64 * br:64 * br + hidden_input[0], :hidden_input[1]].set(w2)
            Bf2 = Bf2.at[3 * s + br, :hidden_input[1]].set(b2)

    # --- MEGNet conv MLPs -----------------------------------------------------
    # First layers are stored "wide": inputs arrive lane-concatenated in
    # 128-lane blocks ([vi|vj|e|u] edge conv; [v|ve|u] node conv; [u|uv|ue]
    # state conv), so each conv's first layer is ONE matmul.
    Wce = jnp.zeros((nblocks, 512, 128), jnp.float32)       # edge conv layer 1
    Wc3 = jnp.zeros((2 * nblocks, 384, 128), jnp.float32)   # node / state conv layer 1
    Ws, Bs = [], []
    for b in range(nblocks):
        # conv_edge : 4*d_h -> hidden_conv
        w1, b1 = linear(4 * d_h, hidden_conv[0])
        for blk in range(4):
            Wce = Wce.at[b, 128 * blk:128 * blk + d_h, :hidden_conv[0]].set(
                w1[blk * d_h:(blk + 1) * d_h, :])
        Bs.append(pad_b(b1))
        for din, dout in zip(hidden_conv[:-1], hidden_conv[1:]):
            w, bb = linear(din, dout)
            Ws.append(pad_w(w)); Bs.append(pad_b(bb))
        # conv_node (c=0) and conv_state (c=1) : 3*d_h -> hidden_conv
        for c in range(2):
            w1, b1 = linear(3 * d_h, hidden_conv[0])
            for blk in range(3):
                Wc3 = Wc3.at[2 * b + c, 128 * blk:128 * blk + d_h, :hidden_conv[0]].set(
                    w1[blk * d_h:(blk + 1) * d_h, :])
            Bs.append(pad_b(b1))
            for din, dout in zip(hidden_conv[:-1], hidden_conv[1:]):
                w, bb = linear(din, dout)
                Ws.append(pad_w(w)); Bs.append(pad_b(bb))
    assert len(Ws) == 6 * nblocks and len(Bs) == 9 * nblocks

    # --- Set2Set LSTMs (node, edge): gate order i,f,g,o, b_ih+b_hh folded -----
    hid = d_c

    def pack_gate_w(w):                            # (din, 4*hid) -> (128, 512)
        out = jnp.zeros((128, 512), jnp.float32)
        for g in range(4):
            out = out.at[:w.shape[0], g * 128:g * 128 + hid].set(w[:, g * hid:(g + 1) * hid])
        return out

    def pack_gate_b(bv):                           # (4*hid,) -> (512,)
        out = jnp.zeros((512,), jnp.float32)
        for g in range(4):
            out = out.at[g * 128:g * 128 + hid].set(bv[g * hid:(g + 1) * hid])
        return out

    LW, LB = [], []
    for _ in range(2):                             # 0 = node_s2s, 1 = edge_s2s
        k1, k2, k3 = jax.random.split(next(kiter), 3)
        wih = scale * jax.random.normal(k1, (2 * hid, 4 * hid), jnp.float32)
        whh = scale * jax.random.normal(k2, (hid, 4 * hid), jnp.float32)
        bias = scale * jax.random.normal(k3, (4 * hid,), jnp.float32)
        LW += [pack_gate_w(wih[:hid, :]),          # acts on q
               pack_gate_w(wih[hid:, :]),          # acts on readout
               pack_gate_w(whh)]                   # acts on h
        LB.append(pack_gate_b(bias))

    return {
        "emb": emb_p.astype(bf16),
        "Wf1": Wf1.astype(bf16), "Wf2": Wf2.astype(bf16),
        "Bf1": Bf1, "Bf2": Bf2,
        "Wce": Wce.astype(bf16), "Wc3": Wc3.astype(bf16),
        "W": jnp.stack(Ws).astype(bf16), "B": jnp.stack(Bs),
        "LW": jnp.stack(LW).astype(bf16), "LB": jnp.stack(LB),
    }


# ----------------------------------------------------------------------------
# The single fused kernel
# ----------------------------------------------------------------------------
def _make_fused_kernel(N, E, NP, EP, nblocks=NBLOCKS, niters=NITERS_S2S):
    D = 128
    MR = EP + NP + 8          # rows of the stacked [edge; node; state] tile

    def kernel(nt_ref, src_ref, dst_ref, dstr_ref, erbf_ref, st_ref, emb_ref,
               wf1_ref, wf2_ref, bf1_ref, bf2_ref, wce_ref, wc3_ref,
               w_ref, b_ref, lw_ref, lb_ref,
               qn_ref, rn_ref, qe_ref, re_ref, state_out_ref):
        f32, bf16 = jnp.float32, jnp.bfloat16
        wc, bc = [0], [0]

        def W():
            k = wc[0]; wc[0] += 1
            return w_ref[k]                        # (128,128) bf16

        def B():
            k = bc[0]; bc[0] += 1
            return b_ref[k]                        # (128,) f32

        def sp2(x):                                # matgl SoftPlus2 (stable, f32)
            return jnp.maximum(x, 0.0) + jnp.log1p(jnp.exp(-jnp.abs(x))) - LOG2

        def mm(a, b):                              # bf16 MXU inputs, f32 accumulate
            return jnp.dot(a.astype(bf16), b.astype(bf16),
                           preferred_element_type=f32)

        def dense(h):                              # Linear + softplus2
            return sp2(mm(h, W()) + B())

        nt = nt_ref[...]                           # (NP,1) int32, pad = -1
        srcc = src_ref[...]                        # (EP,1)
        dstc = dst_ref[...]                        # (EP,1)
        dstr = dstr_ref[...]                       # (1,EP)

        # --- graph operators (one-hot gather / exact 0-1 sum + f32 scale) ----
        T = emb_ref.shape[0]
        nt_oh = (lax.broadcasted_iota(jnp.int32, (NP, T), 1) == nt).astype(f32)
        ncol = lax.broadcasted_iota(jnp.int32, (EP, NP), 1)
        S_src = (ncol == srcc).astype(f32)                       # (EP,NP)
        S_dst = (ncol == dstc).astype(f32)                       # (EP,NP)
        nrow = lax.broadcasted_iota(jnp.int32, (NP, EP), 0)
        S_in = (nrow == dstr).astype(f32)                        # (NP,EP) 0/1
        indeg = jnp.sum(S_in, axis=1, keepdims=True)             # (NP,1)
        # DGL mean reducer: zero in-degree nodes get zero aggregated edge feats
        inv_in = 1.0 / jnp.maximum(indeg, 1.0)
        node_valid = (lax.broadcasted_iota(jnp.int32, (NP, 1), 0) < N).astype(f32)
        edge_valid = (lax.broadcasted_iota(jnp.int32, (EP, 1), 0) < E).astype(f32)
        node_sum = (lax.broadcasted_iota(jnp.int32, (1, NP), 1) < N).astype(f32)
        edge_sum = (lax.broadcasted_iota(jnp.int32, (1, EP), 1) < E).astype(f32)

        # --- masks for the fused 3-branch dense stages ------------------------
        row = lax.broadcasted_iota(jnp.int32, (MR, 1), 0)
        rm_e = (row < EP).astype(f32)
        rm_n = ((row >= EP) & (row < EP + NP)).astype(f32)
        rm_s = (row >= EP + NP).astype(f32)
        lane2 = lax.broadcasted_iota(jnp.int32, (1, 256), 1)
        m1 = (rm_e * (lane2 < 64).astype(f32)
              + rm_n * ((lane2 >= 64) & (lane2 < 128)).astype(f32)
              + rm_s * ((lane2 >= 128) & (lane2 < 192)).astype(f32))   # (MR,256)
        srow0 = (lax.broadcasted_iota(jnp.int32, (8, 1), 0) == 0).astype(f32)

        def fused_stage(e, v, u, s):
            # rows [edge(EP); node(NP); state(8)] through block-diagonal 2-layer MLP
            x = jnp.concatenate([e, v, u * srow0], axis=0)        # (MR,128)
            b1 = (rm_e * bf1_ref[3 * s + 0] + rm_n * bf1_ref[3 * s + 1]
                  + rm_s * bf1_ref[3 * s + 2])                    # (MR,256)
            h = sp2(mm(x, wf1_ref[s]) * m1 + b1)                  # (MR,256)
            b2 = (rm_e * bf2_ref[3 * s + 0] + rm_n * bf2_ref[3 * s + 1]
                  + rm_s * bf2_ref[3 * s + 2])                    # (MR,128)
            y = sp2(mm(h, wf2_ref[s]) + b2)                       # (MR,128), real lanes 0:32
            return y[0:EP], y[EP:EP + NP], y[EP + NP:EP + NP + 8][0:1]

        # --- EmbeddingBlock + encoders (all 3 branches fused in one tile) -----
        node0 = mm(nt_oh, emb_ref[...])            # (NP,128), real lanes 0:16
        edge, node, state = fused_stage(erbf_ref[...], node0, st_ref[...], 0)

        # --- MEGNet blocks -----------------------------------------------------
        # NOTE: padded edge/node rows carry sp2(bias) garbage; every consumer
        # below (S_*, inv_in, *_sum, Set2Set valid masks) masks them out.
        for b in range(nblocks):
            e0, v0, u0 = edge, node, state
            if b > 0:
                edge, node, state = fused_stage(edge, node, state, b)

            # edge update: MLP([v_src | v_dst | e | u])  -- one wide matmul
            vi = mm(S_src, node)                   # (EP,128) gather v_src
            vj = mm(S_dst, node)                   # (EP,128) gather v_dst
            ub_e = state + jnp.zeros((EP, 1), f32)
            h = sp2(mm(jnp.concatenate([vi, vj, edge, ub_e], axis=1), wce_ref[b]) + B())
            e_new = dense(dense(h))                # (EP,128) real 0:32

            # node update: MLP([v | mean_in_edges(e_new) | u])
            ve = mm(S_in, e_new) * inv_in          # (NP,128) exact-sum then f32 scale
            ub_n = state + jnp.zeros((NP, 1), f32)
            h = sp2(mm(jnp.concatenate([node, ve, ub_n], axis=1), wc3_ref[2 * b]) + B())
            v_new = dense(dense(h))                # (NP,128)

            # state update: MLP([u | mean_nodes(v_new) | mean_edges(e_new)])
            uv = mm(node_sum, v_new) * (1.0 / N)
            ue = mm(edge_sum, e_new) * (1.0 / E)
            h = sp2(mm(jnp.concatenate([state, uv, ue], axis=1), wc3_ref[2 * b + 1]) + B())
            u_new = dense(dense(h))                # (1,128)

            # skip connections against the pre-dense block inputs
            edge = e_new + e0
            node = v_new + v0
            state = u_new + u0

        assert wc[0] == w_ref.shape[0] and bc[0] == b_ref.shape[0]

        # --- Set2Set (LSTM with lane-stacked gates + masked softmax, f32) -----
        def set2set(feat, valid, s):
            wq = lw_ref[3 * s + 0]                 # (128,512) bf16
            wr = lw_ref[3 * s + 1]
            wh = lw_ref[3 * s + 2]
            bias = lb_ref[s]                       # (512,) f32
            h = jnp.zeros((1, D), f32)
            c = jnp.zeros((1, D), f32)
            q = jnp.zeros((1, D), f32)             # q_star = [q, r] starts at zero
            r = jnp.zeros((1, D), f32)
            for _ in range(niters):
                gates = mm(q, wq) + mm(r, wr) + mm(h, wh) + bias   # (1,512)
                i_g = jax.nn.sigmoid(gates[:, 0:128])
                f_g = jax.nn.sigmoid(gates[:, 128:256])
                g_g = jnp.tanh(gates[:, 256:384])
                o_g = jax.nn.sigmoid(gates[:, 384:512])
                c = f_g * c + i_g * g_g
                h = o_g * jnp.tanh(c)
                q = h                                               # (1,128)
                logits = jnp.sum(feat * q, axis=1, keepdims=True)   # (R,1)
                logits = jnp.where(valid > 0, logits, -1e30)
                m = jnp.max(logits, axis=0, keepdims=True)
                a = jnp.exp(logits - m) * valid
                a = a / jnp.sum(a, axis=0, keepdims=True)
                r = jnp.sum(feat * a, axis=0, keepdims=True)        # (1,128)
            return q, r

        qn, rn = set2set(node, node_valid, 0)
        qe, re = set2set(edge, edge_valid, 1)

        qn_ref[...] = qn
        rn_ref[...] = rn
        qe_ref[...] = qe
        re_ref[...] = re
        state_out_ref[...] = state

    return kernel


# ----------------------------------------------------------------------------
# Forward wrapper (mirrors FeatureExtractor.forward)
# ----------------------------------------------------------------------------
def feature_extractor_forward(params, src, dst, edge_feat, node_type, state_feat):
    N = node_type.shape[0]
    E = src.shape[0]
    NP, EP = _rup(N, 8), _rup(E, 8)
    D = 128

    # TODO(synk): move src/dst/node_type in via SMEM scalar prefetch to drop
    # these tiny host-side pad/scatter ops (minor at this size).
    nt = jnp.full((NP, 1), -1, jnp.int32).at[:N, 0].set(node_type.astype(jnp.int32))
    srcc = jnp.full((EP, 1), -1, jnp.int32).at[:E, 0].set(src.astype(jnp.int32))
    dstc = jnp.full((EP, 1), -1, jnp.int32).at[:E, 0].set(dst.astype(jnp.int32))
    dstr = jnp.full((1, EP), -1, jnp.int32).at[0, :E].set(dst.astype(jnp.int32))
    erbf = jnp.zeros((EP, D), jnp.float32).at[:E, :edge_feat.shape[1]].set(edge_feat)
    st = jnp.zeros((1, D), jnp.float32).at[:, :state_feat.shape[-1]].set(
        state_feat.reshape(1, -1))

    out_shape = tuple(jax.ShapeDtypeStruct((1, D), jnp.float32) for _ in range(5))
    qn, rn, qe, re, st_out = pl.pallas_call(
        _make_fused_kernel(N, E, NP, EP),
        out_shape=out_shape,
        in_specs=[VMEM_SPEC] * 17,
        out_specs=tuple(VMEM_SPEC for _ in range(5)),
    )(nt, srcc, dstc, dstr, erbf, st,
      params["emb"], params["Wf1"], params["Wf2"], params["Bf1"], params["Bf2"],
      params["Wce"], params["Wc3"], params["W"], params["B"],
      params["LW"], params["LB"])

    # squeeze + hstack ; dropout=0.0 -> identity
    vec = jnp.concatenate([qn[0, :32], rn[0, :32],        # node Set2Set (64)
                           qe[0, :32], re[0, :32],        # edge Set2Set (64)
                           st_out[0, :32]], axis=0)       # state (32)
    return vec


# ----------------------------------------------------------------------------
if __name__ == "__main__":
    key = jax.random.PRNGKey(0)
    kp, kg = jax.random.split(key)

    N_NODES, N_EDGES, NTYPES = 6, 12, 8
    DIM_EDGE_EMB, DIM_STATE_EMB = 100, 2

    params = init_params(kp, ntypes=NTYPES, dim_node=16,
                         dim_edge=DIM_EDGE_EMB, dim_state=DIM_STATE_EMB)

    k1, k2, k3, k4, k5 = jax.random.split(kg, 5)
    src = jax.random.randint(k1, (N_EDGES,), 0, N_NODES)
    dst = jax.random.randint(k2, (N_EDGES,), 0, N_NODES)
    node_type = jax.random.randint(k3, (N_NODES,), 0, NTYPES)
    edge_feat = jax.random.normal(k4, (N_EDGES, DIM_EDGE_EMB), jnp.float32)  # RBF expansion
    state_feat = jax.random.normal(k5, (1, DIM_STATE_EMB), jnp.float32)

    # TODO(synk): DGL graph construction / BondExpansion preprocessing of
    # get_features() are out of scope; the graph is given as (src, dst) arrays.
    fwd = jax.jit(feature_extractor_forward)
    vec = jax.block_until_ready(fwd(params, src, dst, edge_feat, node_type, state_feat))

    assert vec.shape == (160,), vec.shape          # 64 + 64 + 32
    assert bool(jnp.all(jnp.isfinite(vec)))
    print("KERNEL_OK")
</pallas_src>

<mosaic_0001>
module attributes {stable_mosaic.version = 11 : i64} {
  func.func @kernel(%arg0: memref<8x1xi32, #tpu.memory_space<vmem>>, %arg1: memref<16x1xi32, #tpu.memory_space<vmem>>, %arg2: memref<16x1xi32, #tpu.memory_space<vmem>>, %arg3: memref<1x16xi32, #tpu.memory_space<vmem>>, %arg4: memref<16x128xf32, #tpu.memory_space<vmem>>, %arg5: memref<1x128xf32, #tpu.memory_space<vmem>>, %arg6: memref<8x128xbf16, #tpu.memory_space<vmem>>, %arg7: memref<3x128x256xbf16, #tpu.memory_space<vmem>>, %arg8: memref<3x256x128xbf16, #tpu.memory_space<vmem>>, %arg9: memref<9x256xf32, #tpu.memory_space<vmem>>, %arg10: memref<9x128xf32, #tpu.memory_space<vmem>>, %arg11: memref<3x512x128xbf16, #tpu.memory_space<vmem>>, %arg12: memref<6x384x128xbf16, #tpu.memory_space<vmem>>, %arg13: memref<18x128x128xbf16, #tpu.memory_space<vmem>>, %arg14: memref<27x128xf32, #tpu.memory_space<vmem>>, %arg15: memref<6x128x512xbf16, #tpu.memory_space<vmem>>, %arg16: memref<2x512xf32, #tpu.memory_space<vmem>>, %arg17: memref<1x128xf32, #tpu.memory_space<vmem>>, %arg18: memref<1x128xf32, #tpu.memory_space<vmem>>, %arg19: memref<1x128xf32, #tpu.memory_space<vmem>>, %arg20: memref<1x128xf32, #tpu.memory_space<vmem>>, %arg21: memref<1x128xf32, #tpu.memory_space<vmem>>) attributes {dimension_semantics = [], scalar_prefetch = 0 : i64, scratch_operands = 0 : i64, tpu.core_type = #tpu.core_type<tc>} {
    %c0 = arith.constant 0 : index
    %c0_0 = arith.constant 0 : index
    %0 = vector.load %arg0[%c0, %c0_0] : memref<8x1xi32, #tpu.memory_space<vmem>>, vector<8x1xi32>
    %c0_1 = arith.constant 0 : index
    %c0_2 = arith.constant 0 : index
    %1 = vector.load %arg1[%c0_1, %c0_2] : memref<16x1xi32, #tpu.memory_space<vmem>>, vector<16x1xi32>
    %c0_3 = arith.constant 0 : index
    %c0_4 = arith.constant 0 : index
    %2 = vector.load %arg2[%c0_3, %c0_4] : memref<16x1xi32, #tpu.memory_space<vmem>>, vector<16x1xi32>
    %c0_5 = arith.constant 0 : index
    %c0_6 = arith.constant 0 : index
    %3 = vector.load %arg3[%c0_5, %c0_6] : memref<1x16xi32, #tpu.memory_space<vmem>>, vector<1x16xi32>
    %4 = tpu.iota {dimensions = array<i32: 1>} : vector<8x8xi32>
    %5 = vector.broadcast %0 : vector<8x1xi32> to vector<8x8xi32>
    %6 = arith.cmpi eq, %4, %5 : vector<8x8xi32>
    %7 = arith.extui %6 : vector<8x8xi1> to vector<8x8xi32>
    %8 = arith.sitofp %7 : vector<8x8xi32> to vector<8x8xf32>
    %9 = tpu.iota {dimensions = array<i32: 1>} : vector<16x8xi32>
    %10 = vector.broadcast %1 : vector<16x1xi32> to vector<16x8xi32>
    %11 = arith.cmpi eq, %9, %10 : vector<16x8xi32>
    %12 = arith.extui %11 : vector<16x8xi1> to vector<16x8xi32>
    %13 = arith.sitofp %12 : vector<16x8xi32> to vector<16x8xf32>
    %14 = vector.broadcast %2 : vector<16x1xi32> to vector<16x8xi32>
    %15 = arith.cmpi eq, %9, %14 : vector<16x8xi32>
    %16 = arith.extui %15 : vector<16x8xi1> to vector<16x8xi32>
    %17 = arith.sitofp %16 : vector<16x8xi32> to vector<16x8xf32>
    %18 = tpu.iota {dimensions = array<i32: 0>} : vector<8x16xi32>
    %19 = vector.broadcast %3 : vector<1x16xi32> to vector<8x16xi32>
    %20 = arith.cmpi eq, %18, %19 : vector<8x16xi32>
    %21 = arith.extui %20 : vector<8x16xi1> to vector<8x16xi32>
    %22 = arith.sitofp %21 : vector<8x16xi32> to vector<8x16xf32>
    %cst = arith.constant dense<0.000000e+00> : vector<8xf32>
    %23 = vector.multi_reduction <add>, %22, %cst [1] : vector<8x16xf32> to vector<8xf32>
    %24 = vector.shape_cast %23 : vector<8xf32> to vector<8x1xf32>
    %cst_7 = arith.constant 1.000000e+00 : f32
    %25 = vector.broadcast %cst_7 : f32 to vector<8x1xf32>
    %26 = arith.maximumf %24, %25 : vector<8x1xf32>
    %cst_8 = arith.constant 1.000000e+00 : f32
    %27 = vector.broadcast %cst_8 : f32 to vector<8x1xf32>
    %28 = arith.divf %27, %26 : vector<8x1xf32>
    %29 = tpu.iota {dimensions = array<i32: 0>} : vector<8x1xi32>
    %c6_i32 = arith.constant 6 : i32
    %30 = vector.broadcast %c6_i32 : i32 to vector<8x1xi32>
    %31 = arith.cmpi slt, %29, %30 : vector<8x1xi32>
    %32 = arith.extui %31 : vector<8x1xi1> to vector<8x1xi32>
    %33 = arith.sitofp %32 : vector<8x1xi32> to vector<8x1xf32>
    %34 = tpu.iota {dimensions = array<i32: 0>} : vector<16x1xi32>
    %c12_i32 = arith.constant 12 : i32
    %35 = vector.broadcast %c12_i32 : i32 to vector<16x1xi32>
    %36 = arith.cmpi slt, %34, %35 : vector<16x1xi32>
    %37 = arith.extui %36 : vector<16x1xi1> to vector<16x1xi32>
    %38 = arith.sitofp %37 : vector<16x1xi32> to vector<16x1xf32>
    %39 = tpu.iota {dimensions = array<i32: 1>} : vector<1x8xi32>
    %c6_i32_9 = arith.constant 6 : i32
    %40 = vector.broadcast %c6_i32_9 : i32 to vector<1x8xi32>
    %41 = arith.cmpi slt, %39, %40 : vector<1x8xi32>
    %42 = arith.extui %41 : vector<1x8xi1> to vector<1x8xi32>
    %43 = arith.sitofp %42 : vector<1x8xi32> to vector<1x8xf32>
    %44 = tpu.iota {dimensions = array<i32: 1>} : vector<1x16xi32>
    %c12_i32_10 = arith.constant 12 : i32
    %45 = vector.broadcast %c12_i32_10 : i32 to vector<1x16xi32>
    %46 = arith.cmpi slt, %44, %45 : vector<1x16xi32>
    %47 = arith.extui %46 : vector<1x16xi1> to vector<1x16xi32>
    %48 = arith.sitofp %47 : vector<1x16xi32> to vector<1x16xf32>
    %49 = tpu.iota {dimensions = array<i32: 0>} : vector<32x1xi32>
    %c16_i32 = arith.constant 16 : i32
    %50 = vector.broadcast %c16_i32 : i32 to vector<32x1xi32>
    %51 = arith.cmpi slt, %49, %50 : vector<32x1xi32>
    %52 = arith.extui %51 : vector<32x1xi1> to vector<32x1xi32>
    %53 = arith.sitofp %52 : vector<32x1xi32> to vector<32x1xf32>
    %c16_i32_11 = arith.constant 16 : i32
    %54 = vector.broadcast %c16_i32_11 : i32 to vector<32x1xi32>
    %55 = arith.cmpi sge, %49, %54 : vector<32x1xi32>
    %c24_i32 = arith.constant 24 : i32
    %56 = vector.broadcast %c24_i32 : i32 to vector<32x1xi32>
    %57 = arith.cmpi slt, %49, %56 : vector<32x1xi32>
    %58 = arith.andi %55, %57 : vector<32x1xi1>
    %59 = arith.extui %58 : vector<32x1xi1> to vector<32x1xi32>
    %60 = arith.sitofp %59 : vector<32x1xi32> to vector<32x1xf32>
    %c24_i32_12 = arith.constant 24 : i32
    %61 = vector.broadcast %c24_i32_12 : i32 to vector<32x1xi32>
    %62 = arith.cmpi sge, %49, %61 : vector<32x1xi32>
    %63 = arith.extui %62 : vector<32x1xi1> to vector<32x1xi32>
    %64 = arith.sitofp %63 : vector<32x1xi32> to vector<32x1xf32>
    %65 = tpu.iota {dimensions = array<i32: 1>} : vector<1x256xi32>
    %c64_i32 = arith.constant 64 : i32
    %66 = vector.broadcast %c64_i32 : i32 to vector<1x256xi32>
    %67 = arith.cmpi slt, %65, %66 : vector<1x256xi32>
    %68 = arith.extui %67 : vector<1x256xi1> to vector<1x256xi32>
    %69 = arith.sitofp %68 : vector<1x256xi32> to vector<1x256xf32>
    %70 = vector.broadcast %53 : vector<32x1xf32> to vector<32x256xf32>
    %71 = vector.broadcast %69 : vector<1x256xf32> to vector<32x256xf32>
    %72 = arith.mulf %70, %71 : vector<32x256xf32>
    %c64_i32_13 = arith.constant 64 : i32
    %73 = vector.broadcast %c64_i32_13 : i32 to vector<1x256xi32>
    %74 = arith.cmpi sge, %65, %73 : vector<1x256xi32>
    %c128_i32 = arith.constant 128 : i32
    %75 = vector.broadcast %c128_i32 : i32 to vector<1x256xi32>
    %76 = arith.cmpi slt, %65, %75 : vector<1x256xi32>
    %77 = arith.andi %74, %76 : vector<1x256xi1>
    %78 = arith.extui %77 : vector<1x256xi1> to vector<1x256xi32>
    %79 = arith.sitofp %78 : vector<1x256xi32> to vector<1x256xf32>
    %80 = vector.broadcast %60 : vector<32x1xf32> to vector<32x256xf32>
    %81 = vector.broadcast %79 : vector<1x256xf32> to vector<32x256xf32>
    %82 = arith.mulf %80, %81 : vector<32x256xf32>
    %83 = arith.addf %72, %82 : vector<32x256xf32>
    %c128_i32_14 = arith.constant 128 : i32
    %84 = vector.broadcast %c128_i32_14 : i32 to vector<1x256xi32>
    %85 = arith.cmpi sge, %65, %84 : vector<1x256xi32>
    %c192_i32 = arith.constant 192 : i32
    %86 = vector.broadcast %c192_i32 : i32 to vector<1x256xi32>
    %87 = arith.cmpi slt, %65, %86 : vector<1x256xi32>
    %88 = arith.andi %85, %87 : vector<1x256xi1>
    %89 = arith.extui %88 : vector<1x256xi1> to vector<1x256xi32>
    %90 = arith.sitofp %89 : vector<1x256xi32> to vector<1x256xf32>
    %91 = vector.broadcast %64 : vector<32x1xf32> to vector<32x256xf32>
    %92 = vector.broadcast %90 : vector<1x256xf32> to vector<32x256xf32>
    %93 = arith.mulf %91, %92 : vector<32x256xf32>
    %94 = arith.addf %83, %93 : vector<32x256xf32>
    %95 = tpu.iota {dimensions = array<i32: 0>} : vector<8x1xi32>
    %c0_i32 = arith.constant 0 : i32
    %96 = vector.broadcast %c0_i32 : i32 to vector<8x1xi32>
    %97 = arith.cmpi eq, %95, %96 : vector<8x1xi32>
    %98 = arith.extui %97 : vector<8x1xi1> to vector<8x1xi32>
    %99 = arith.sitofp %98 : vector<8x1xi32> to vector<8x1xf32>
    %c0_15 = arith.constant 0 : index
    %c0_16 = arith.constant 0 : index
    %100 = vector.load %arg6[%c0_15, %c0_16] : memref<8x128xbf16, #tpu.memory_space<vmem>>, vector<8x128xbf16>
    %101 = arith.truncf %8 : vector<8x8xf32> to vector<8x8xbf16>
    %cst_17 = arith.constant dense<0.000000e+00> : vector<8x128xf32>
    %102 = tpu.matmul %101, %100, %cst_17 {dimension_numbers = #tpu.dot_dimension_numbers<[1], [0], [0], [1], [0, 0, 1, 1], [], []>} : vector<8x8xbf16>, vector<8x128xbf16>, vector<8x128xf32> -> vector<8x128xf32>
    %c0_18 = arith.constant 0 : index
    %c0_19 = arith.constant 0 : index
    %103 = vector.load %arg4[%c0_18, %c0_19] : memref<16x128xf32, #tpu.memory_space<vmem>>, vector<16x128xf32>
    %c0_20 = arith.constant 0 : index
    %c0_21 = arith.constant 0 : index
    %104 = vector.load %arg5[%c0_20, %c0_21] : memref<1x128xf32, #tpu.memory_space<vmem>>, vector<1x128xf32>
    %105 = vector.broadcast %104 : vector<1x128xf32> to vector<8x128xf32>
    %106 = vector.broadcast %99 : vector<8x1xf32> to vector<8x128xf32>
    %107 = arith.mulf %105, %106 : vector<8x128xf32>
    %108 = tpu.concatenate %103, %102, %107 in 0 : vector<16x128xf32>, vector<8x128xf32>, vector<8x128xf32> -> vector<32x128xf32>
    %c0_22 = arith.constant 0 : index
    %c0_23 = arith.constant 0 : index
    %109 = vector.load %arg9[%c0_22, %c0_23] : memref<9x256xf32, #tpu.memory_space<vmem>>, vector<1x256xf32>
    %110 = vector.shape_cast %109 : vector<1x256xf32> to vector<256xf32>
    %111 = vector.shape_cast %110 : vector<256xf32> to vector<1x256xf32>
    %112 = vector.broadcast %53 : vector<32x1xf32> to vector<32x256xf32>
    %113 = vector.broadcast %111 : vector<1x256xf32> to vector<32x256xf32>
    %114 = arith.mulf %112, %113 : vector<32x256xf32>
    %c1 = arith.constant 1 : index
    %c0_24 = arith.constant 0 : index
    %115 = vector.load %arg9[%c1, %c0_24] : memref<9x256xf32, #tpu.memory_space<vmem>>, vector<1x256xf32>
    %116 = vector.shape_cast %115 : vector<1x256xf32> to vector<256xf32>
    %117 = vector.shape_cast %116 : vector<256xf32> to vector<1x256xf32>
    %118 = vector.broadcast %60 : vector<32x1xf32> to vector<32x256xf32>
    %119 = vector.broadcast %117 : vector<1x256xf32> to vector<32x256xf32>
    %120 = arith.mulf %118, %119 : vector<32x256xf32>
    %121 = arith.addf %114, %120 : vector<32x256xf32>
    %c2 = arith.constant 2 : index
    %c0_25 = arith.constant 0 : index
    %122 = vector.load %arg9[%c2, %c0_25] : memref<9x256xf32, #tpu.memory_space<vmem>>, vector<1x256xf32>
    %123 = vector.shape_cast %122 : vector<1x256xf32> to vector<256xf32>
    %124 = vector.shape_cast %123 : vector<256xf32> to vector<1x256xf32>
    %125 = vector.broadcast %64 : vector<32x1xf32> to vector<32x256xf32>
    %126 = vector.broadcast %124 : vector<1x256xf32> to vector<32x256xf32>
    %127 = arith.mulf %125, %126 : vector<32x256xf32>
    %128 = arith.addf %121, %127 : vector<32x256xf32>
    %c0_26 = arith.constant 0 : index
    %c0_27 = arith.constant 0 : index
    %c0_28 = arith.constant 0 : index
    %129 = vector.load %arg7[%c0_26, %c0_27, %c0_28] : memref<3x128x256xbf16, #tpu.memory_space<vmem>>, vector<1x128x256xbf16>
    %130 = vector.shape_cast %129 : vector<1x128x256xbf16> to vector<128x256xbf16>
    %131 = arith.truncf %108 : vector<32x128xf32> to vector<32x128xbf16>
    %cst_29 = arith.constant dense<0.000000e+00> : vector<32x256xf32>
    %132 = tpu.matmul %131, %130, %cst_29 {dimension_numbers = #tpu.dot_dimension_numbers<[1], [0], [0], [1], [0, 0, 1, 1], [], []>} : vector<32x128xbf16>, vector<128x256xbf16>, vector<32x256xf32> -> vector<32x256xf32>
    %133 = arith.mulf %132, %94 : vector<32x256xf32>
    %134 = arith.addf %133, %128 : vector<32x256xf32>
    %cst_30 = arith.constant 0.000000e+00 : f32
    %135 = vector.broadcast %cst_30 : f32 to vector<32x256xf32>
    %136 = arith.maximumf %134, %135 : vector<32x256xf32>
    %137 = math.absf %134 : vector<32x256xf32>
    %cst_31 = arith.constant 0.000000e+00 : f32
    %138 = vector.broadcast %cst_31 : f32 to vector<32x256xf32>
    %139 = arith.subf %138, %137 : vector<32x256xf32>
    %140 = math.exp %139 : vector<32x256xf32>
    %141 = math.log1p %140 : vector<32x256xf32>
    %142 = arith.addf %136, %141 : vector<32x256xf32>
    %cst_32 = arith.constant 0.693147182 : f32
    %143 = vector.broadcast %cst_32 : f32 to vector<32x256xf32>
    %144 = arith.subf %142, %143 : vector<32x256xf32>
    %c0_33 = arith.constant 0 : index
    %c0_34 = arith.constant 0 : index
    %145 = vector.load %arg10[%c0_33, %c0_34] : memref<9x128xf32, #tpu.memory_space<vmem>>, vector<1x128xf32>
    %146 = vector.shape_cast %145 : vector<1x128xf32> to vector<128xf32>
    %147 = vector.shape_cast %146 : vector<128xf32> to vector<1x128xf32>
    %148 = vector.broadcast %53 : vector<32x1xf32> to vector<32x128xf32>
    %149 = vector.broadcast %147 : vector<1x128xf32> to vector<32x128xf32>
    %150 = arith.mulf %148, %149 : vector<32x128xf32>
    %c1_35 = arith.constant 1 : index
    %c0_36 = arith.constant 0 : index
    %151 = vector.load %arg10[%c1_35, %c0_36] : memref<9x128xf32, #tpu.memory_space<vmem>>, vector<1x128xf32>
    %152 = vector.shape_cast %151 : vector<1x128xf32> to vector<128xf32>
    %153 = vector.shape_cast %152 : vector<128xf32> to vector<1x128xf32>
    %154 = vector.broadcast %60 : vector<32x1xf32> to vector<32x128xf32>
    %155 = vector.broadcast %153 : vector<1x128xf32> to vector<32x128xf32>
    %156 = arith.mulf %154, %155 : vector<32x128xf32>
    %157 = arith.addf %150, %156 : vector<32x128xf32>
    %c2_37 = arith.constant 2 : index
    %c0_38 = arith.constant 0 : index
    %158 = vector.load %arg10[%c2_37, %c0_38] : memref<9x128xf32, #tpu.memory_space<vmem>>, vector<1x128xf32>
    %159 = vector.shape_cast %158 : vector<1x128xf32> to vector<128xf32>
    %160 = vector.shape_cast %159 : vector<128xf32> to vector<1x128xf32>
    %161 = vector.broadcast %64 : vector<32x1xf32> to vector<32x128xf32>
    %162 = vector.broadcast %160 : vector<1x128xf32> to vector<32x128xf32>
    %163 = arith.mulf %161, %162 : vector<32x128xf32>
    %164 = arith.addf %157, %163 : vector<32x128xf32>
    %c0_39 = arith.constant 0 : index
    %c0_40 = arith.constant 0 : index
    %c0_41 = arith.constant 0 : index
    %165 = vector.load %arg8[%c0_39, %c0_40, %c0_41] : memref<3x256x128xbf16, #tpu.memory_space<vmem>>, vector<1x256x128xbf16>
    %166 = vector.shape_cast %165 : vector<1x256x128xbf16> to vector<256x128xbf16>
    %167 = arith.truncf %144 : vector<32x256xf32> to vector<32x256xbf16>
    %cst_42 = arith.constant dense<0.000000e+00> : vector<32x128xf32>
    %168 = tpu.matmul %167, %166, %cst_42 {dimension_numbers = #tpu.dot_dimension_numbers<[1], [0], [0], [1], [0, 0, 1, 1], [], []>} : vector<32x256xbf16>, vector<256x128xbf16>, vector<32x128xf32> -> vector<32x128xf32>
    %169 = arith.addf %168, %164 : vector<32x128xf32>
    %cst_43 = arith.constant 0.000000e+00 : f32
    %170 = vector.broadcast %cst_43 : f32 to vector<32x128xf32>
    %171 = arith.maximumf %169, %170 : vector<32x128xf32>
    %172 = math.absf %169 : vector<32x128xf32>
    %cst_44 = arith.constant 0.000000e+00 : f32
    %173 = vector.broadcast %cst_44 : f32 to vector<32x128xf32>
    %174 = arith.subf %173, %172 : vector<32x128xf32>
    %175 = math.exp %174 : vector<32x128xf32>
    %176 = math.log1p %175 : vector<32x128xf32>
    %177 = arith.addf %171, %176 : vector<32x128xf32>
    %cst_45 = arith.constant 0.693147182 : f32
    %178 = vector.broadcast %cst_45 : f32 to vector<32x128xf32>
    %179 = arith.subf %177, %178 : vector<32x128xf32>
    %180 = vector.extract_strided_slice %179 {offsets = [0, 0], sizes = [16, 128], strides = [1, 1]} : vector<32x128xf32> to vector<16x128xf32>
    %181 = vector.extract_strided_slice %179 {offsets = [16, 0], sizes = [8, 128], strides = [1, 1]} : vector<32x128xf32> to vector<8x128xf32>
    %182 = vector.extract_strided_slice %179 {offsets = [24, 0], sizes = [8, 128], strides = [1, 1]} : vector<32x128xf32> to vector<8x128xf32>
    %183 = vector.extract_strided_slice %182 {offsets = [0, 0], sizes = [1, 128], strides = [1, 1]} : vector<8x128xf32> to vector<1x128xf32>
    %184 = arith.truncf %13 : vector<16x8xf32> to vector<16x8xbf16>
    %185 = arith.truncf %181 : vector<8x128xf32> to vector<8x128xbf16>
    %cst_46 = arith.constant dense<0.000000e+00> : vector<16x128xf32>
    %186 = tpu.matmul %184, %185, %cst_46 {dimension_numbers = #tpu.dot_dimension_numbers<[1], [0], [0], [1], [0, 0, 1, 1], [], []>} : vector<16x8xbf16>, vector<8x128xbf16>, vector<16x128xf32> -> vector<16x128xf32>
    %187 = arith.truncf %17 : vector<16x8xf32> to vector<16x8xbf16>
    %188 = arith.truncf %181 : vector<8x128xf32> to vector<8x128xbf16>
    %cst_47 = arith.constant dense<0.000000e+00> : vector<16x128xf32>
    %189 = tpu.matmul %187, %188, %cst_47 {dimension_numbers = #tpu.dot_dimension_numbers<[1], [0], [0], [1], [0, 0, 1, 1], [], []>} : vector<16x8xbf16>, vector<8x128xbf16>, vector<16x128xf32> -> vector<16x128xf32>
    %cst_48 = arith.constant 0.000000e+00 : f32
    %190 = vector.broadcast %cst_48 : f32 to vector<16x1xf32>
    %191 = vector.broadcast %183 : vector<1x128xf32> to vector<16x128xf32>
    %192 = vector.broadcast %190 : vector<16x1xf32> to vector<16x128xf32>
    %193 = arith.addf %191, %192 : vector<16x128xf32>
    %194 = tpu.concatenate %186, %189, %180, %193 in 1 : vector<16x128xf32>, vector<16x128xf32>, vector<16x128xf32>, vector<16x128xf32> -> vector<16x512xf32>
    %c0_49 = arith.constant 0 : index
    %c0_50 = arith.constant 0 : index
    %c0_51 = arith.constant 0 : index
    %195 = vector.load %arg11[%c0_49, %c0_50, %c0_51] : memref<3x512x128xbf16, #tpu.memory_space<vmem>>, vector<1x512x128xbf16>
    %196 = vector.shape_cast %195 : vector<1x512x128xbf16> to vector<512x128xbf16>
    %197 = arith.truncf %194 : vector<16x512xf32> to vector<16x512xbf16>
    %cst_52 = arith.constant dense<0.000000e+00> : vector<16x128xf32>
    %198 = tpu.matmul %197, %196, %cst_52 {dimension_numbers = #tpu.dot_dimension_numbers<[1], [0], [0], [1], [0, 0, 1, 1], [], []>} : vector<16x512xbf16>, vector<512x128xbf16>, vector<16x128xf32> -> vector<16x128xf32>
    %c0_53 = arith.constant 0 : index
    %c0_54 = arith.constant 0 : index
    %199 = vector.load %arg14[%c0_53, %c0_54] : memref<27x128xf32, #tpu.memory_space<vmem>>, vector<1x128xf32>
    %200 = vector.shape_cast %199 : vector<1x128xf32> to vector<128xf32>
    %201 = vector.shape_cast %200 : vector<128xf32> to vector<1x128xf32>
    %202 = vector.broadcast %201 : vector<1x128xf32> to vector<16x128xf32>
    %203 = arith.addf %198, %202 : vector<16x128xf32>
    %cst_55 = arith.constant 0.000000e+00 : f32
    %204 = vector.broadcast %cst_55 : f32 to vector<16x128xf32>
    %205 = arith.maximumf %203, %204 : vector<16x128xf32>
    %206 = math.absf %203 : vector<16x128xf32>
    %cst_56 = arith.constant 0.000000e+00 : f32
    %207 = vector.broadcast %cst_56 : f32 to vector<16x128xf32>
    %208 = arith.subf %207, %206 : vector<16x128xf32>
    %209 = math.exp %208 : vector<16x128xf32>
    %210 = math.log1p %209 : vector<16x128xf32>
    %211 = arith.addf %205, %210 : vector<16x128xf32>
    %cst_57 = arith.constant 0.693147182 : f32
    %212 = vector.broadcast %cst_57 : f32 to vector<16x128xf32>
    %213 = arith.subf %211, %212 : vector<16x128xf32>
    %c0_58 = arith.constant 0 : index
    %c0_59 = arith.constant 0 : index
    %c0_60 = arith.constant 0 : index
    %214 = vector.load %arg13[%c0_58, %c0_59, %c0_60] : memref<18x128x128xbf16, #tpu.memory_space<vmem>>, vector<1x128x128xbf16>
    %215 = vector.shape_cast %214 : vector<1x128x128xbf16> to vector<128x128xbf16>
    %216 = arith.truncf %213 : vector<16x128xf32> to vector<16x128xbf16>
    %cst_61 = arith.constant dense<0.000000e+00> : vector<16x128xf32>
    %217 = tpu.matmul %216, %215, %cst_61 {dimension_numbers = #tpu.dot_dimension_numbers<[1], [0], [0], [1], [0, 0, 1, 1], [], []>} : vector<16x128xbf16>, vector<128x128xbf16>, vector<16x128xf32> -> vector<16x128xf32>
    %c1_62 = arith.constant 1 : index
    %c0_63 = arith.constant 0 : index
    %218 = vector.load %arg14[%c1_62, %c0_63] : memref<27x128xf32, #tpu.memory_space<vmem>>, vector<1x128xf32>
    %219 = vector.shape_cast %218 : vector<1x128xf32> to vector<128xf32>
    %220 = vector.shape_cast %219 : vector<128xf32> to vector<1x128xf32>
    %221 = vector.broadcast %220 : vector<1x128xf32> to vector<16x128xf32>
    %222 = arith.addf %217, %221 : vector<16x128xf32>
    %cst_64 = arith.constant 0.000000e+00 : f32
    %223 = vector.broadcast %cst_64 : f32 to vector<16x128xf32>
    %224 = arith.maximumf %222, %223 : vector<16x128xf32>
    %225 = math.absf %222 : vector<16x128xf32>
    %cst_65 = arith.constant 0.000000e+00 : f32
    %226 = vector.broadcast %cst_65 : f32 to vector<16x128xf32>
    %227 = arith.subf %226, %225 : vector<16x128xf32>
    %228 = math.exp %227 : vector<16x128xf32>
    %229 = math.log1p %228 : vector<16x128xf32>
    %230 = arith.addf %224, %229 : vector<16x128xf32>
    %cst_66 = arith.constant 0.693147182 : f32
    %231 = vector.broadcast %cst_66 : f32 to vector<16x128xf32>
    %232 = arith.subf %230, %231 : vector<16x128xf32>
    %c1_67 = arith.constant 1 : index
    %c0_68 = arith.constant 0 : index
    %c0_69 = arith.constant 0 : index
    %233 = vector.load %arg13[%c1_67, %c0_68, %c0_69] : memref<18x128x128xbf16, #tpu.memory_space<vmem>>, vector<1x128x128xbf16>
    %234 = vector.shape_cast %233 : vector<1x128x128xbf16> to vector<128x128xbf16>
    %235 = arith.truncf %232 : vector<16x128xf32> to vector<16x128xbf16>
    %cst_70 = arith.constant dense<0.000000e+00> : vector<16x128xf32>
    %236 = tpu.matmul %235, %234, %cst_70 {dimension_numbers = #tpu.dot_dimension_numbers<[1], [0], [0], [1], [0, 0, 1, 1], [], []>} : vector<16x128xbf16>, vector<128x128xbf16>, vector<16x128xf32> -> vector<16x128xf32>
    %c2_71 = arith.constant 2 : index
    %c0_72 = arith.constant 0 : index
    %237 = vector.load %arg14[%c2_71, %c0_72] : memref<27x128xf32, #tpu.memory_space<vmem>>, vector<1x128xf32>
    %238 = vector.shape_cast %237 : vector<1x128xf32> to vector<128xf32>
    %239 = vector.shape_cast %238 : vector<128xf32> to vector<1x128xf32>
    %240 = vector.broadcast %239 : vector<1x128xf32> to vector<16x128xf32>
    %241 = arith.addf %236, %240 : vector<16x128xf32>
    %cst_73 = arith.constant 0.000000e+00 : f32
    %242 = vector.broadcast %cst_73 : f32 to vector<16x128xf32>
    %243 = arith.maximumf %241, %242 : vector<16x128xf32>
    %244 = math.absf %241 : vector<16x128xf32>
    %cst_74 = arith.constant 0.000000e+00 : f32
    %245 = vector.broadcast %cst_74 : f32 to vector<16x128xf32>
    %246 = arith.subf %245, %244 : vector<16x128xf32>
    %247 = math.exp %246 : vector<16x128xf32>
    %248 = math.log1p %247 : vector<16x128xf32>
    %249 = arith.addf %243, %248 : vector<16x128xf32>
    %cst_75 = arith.constant 0.693147182 : f32
    %250 = vector.broadcast %cst_75 : f32 to vector<16x128xf32>
    %251 = arith.subf %249, %250 : vector<16x128xf32>
    %252 = arith.truncf %22 : vector<8x16xf32> to vector<8x16xbf16>
    %253 = arith.truncf %251 : vector<16x128xf32> to vector<16x128xbf16>
    %cst_76 = arith.constant dense<0.000000e+00> : vector<8x128xf32>
    %254 = tpu.matmul %252, %253, %cst_76 {dimension_numbers = #tpu.dot_dimension_numbers<[1], [0], [0], [1], [0, 0, 1, 1], [], []>} : vector<8x16xbf16>, vector<16x128xbf16>, vector<8x128xf32> -> vector<8x128xf32>
    %255 = vector.broadcast %28 : vector<8x1xf32> to vector<8x128xf32>
    %256 = arith.mulf %254, %255 : vector<8x128xf32>
    %cst_77 = arith.constant 0.000000e+00 : f32
    %257 = vector.broadcast %cst_77 : f32 to vector<8x1xf32>
    %258 = vector.broadcast %183 : vector<1x128xf32> to vector<8x128xf32>
    %259 = vector.broadcast %257 : vector<8x1xf32> to vector<8x128xf32>
    %260 = arith.addf %258, %259 : vector<8x128xf32>
    %261 = tpu.concatenate %181, %256, %260 in 1 : vector<8x128xf32>, vector<8x128xf32>, vector<8x128xf32> -> vector<8x384xf32>
    %c0_78 = arith.constant 0 : index
    %c0_79 = arith.constant 0 : index
    %c0_80 = arith.constant 0 : index
    %262 = vector.load %arg12[%c0_78, %c0_79, %c0_80] : memref<6x384x128xbf16, #tpu.memory_space<vmem>>, vector<1x384x128xbf16>
    %263 = vector.shape_cast %262 : vector<1x384x128xbf16> to vector<384x128xbf16>
    %264 = arith.truncf %261 : vector<8x384xf32> to vector<8x384xbf16>
    %cst_81 = arith.constant dense<0.000000e+00> : vector<8x128xf32>
    %265 = tpu.matmul %264, %263, %cst_81 {dimension_numbers = #tpu.dot_dimension_numbers<[1], [0], [0], [1], [0, 0, 1, 1], [], []>} : vector<8x384xbf16>, vector<384x128xbf16>, vector<8x128xf32> -> vector<8x128xf32>
    %c3 = arith.constant 3 : index
    %c0_82 = arith.constant 0 : index
    %266 = vector.load %arg14[%c3, %c0_82] : memref<27x128xf32, #tpu.memory_space<vmem>>, vector<1x128xf32>
    %267 = vector.shape_cast %266 : vector<1x128xf32> to vector<128xf32>
    %268 = vector.shape_cast %267 : vector<128xf32> to vector<1x128xf32>
    %269 = vector.broadcast %268 : vector<1x128xf32> to vector<8x128xf32>
    %270 = arith.addf %265, %269 : vector<8x128xf32>
    %cst_83 = arith.constant 0.000000e+00 : f32
    %271 = vector.broadcast %cst_83 : f32 to vector<8x128xf32>
    %272 = arith.maximumf %270, %271 : vector<8x128xf32>
    %273 = math.absf %270 : vector<8x128xf32>
    %cst_84 = arith.constant 0.000000e+00 : f32
    %274 = vector.broadcast %cst_84 : f32 to vector<8x128xf32>
    %275 = arith.subf %274, %273 : vector<8x128xf32>
    %276 = math.exp %275 : vector<8x128xf32>
    %277 = math.log1p %276 : vector<8x128xf32>
    %278 = arith.addf %272, %277 : vector<8x128xf32>
    %cst_85 = arith.constant 0.693147182 : f32
    %279 = vector.broadcast %cst_85 : f32 to vector<8x128xf32>
    %280 = arith.subf %278, %279 : vector<8x128xf32>
    %c2_86 = arith.constant 2 : index
    %c0_87 = arith.constant 0 : index
    %c0_88 = arith.constant 0 : index
    %281 = vector.load %arg13[%c2_86, %c0_87, %c0_88] : memref<18x128x128xbf16, #tpu.memory_space<vmem>>, vector<1x128x128xbf16>
    %282 = vector.shape_cast %281 : vector<1x128x128xbf16> to vector<128x128xbf16>
    %283 = arith.truncf %280 : vector<8x128xf32> to vector<8x128xbf16>
    %cst_89 = arith.constant dense<0.000000e+00> : vector<8x128xf32>
    %284 = tpu.matmul %283, %282, %cst_89 {dimension_numbers = #tpu.dot_dimension_numbers<[1], [0], [0], [1], [0, 0, 1, 1], [], []>} : vector<8x128xbf16>, vector<128x128xbf16>, vector<8x128xf32> -> vector<8x128xf32>
    %c4 = arith.constant 4 : index
    %c0_90 = arith.constant 0 : index
    %285 = vector.load %arg14[%c4, %c0_90] : memref<27x128xf32, #tpu.memory_space<vmem>>, vector<1x128xf32>
    %286 = vector.shape_cast %285 : vector<1x128xf32> to vector<128xf32>
    %287 = vector.shape_cast %286 : vector<128xf32> to vector<1x128xf32>
    %288 = vector.broadcast %287 : vector<1x128xf32> to vector<8x128xf32>
    %289 = arith.addf %284, %288 : vector<8x128xf32>
    %cst_91 = arith.constant 0.000000e+00 : f32
    %290 = vector.broadcast %cst_91 : f32 to vector<8x128xf32>
    %291 = arith.maximumf %289, %290 : vector<8x128xf32>
    %292 = math.absf %289 : vector<8x128xf32>
    %cst_92 = arith.constant 0.000000e+00 : f32
    %293 = vector.broadcast %cst_92 : f32 to vector<8x128xf32>
    %294 = arith.subf %293, %292 : vector<8x128xf32>
    %295 = math.exp %294 : vector<8x128xf32>
    %296 = math.log1p %295 : vector<8x128xf32>
    %297 = arith.addf %291, %296 : vector<8x128xf32>
    %cst_93 = arith.constant 0.693147182 : f32
    %298 = vector.broadcast %cst_93 : f32 to vector<8x128xf32>
    %299 = arith.subf %297, %298 : vector<8x128xf32>
    %c3_94 = arith.constant 3 : index
    %c0_95 = arith.constant 0 : index
    %c0_96 = arith.constant 0 : index
    %300 = vector.load %arg13[%c3_94, %c0_95, %c0_96] : memref<18x128x128xbf16, #tpu.memory_space<vmem>>, vector<1x128x128xbf16>
    %301 = vector.shape_cast %300 : vector<1x128x128xbf16> to vector<128x128xbf16>
    %302 = arith.truncf %299 : vector<8x128xf32> to vector<8x128xbf16>
    %cst_97 = arith.constant dense<0.000000e+00> : vector<8x128xf32>
    %303 = tpu.matmul %302, %301, %cst_97 {dimension_numbers = #tpu.dot_dimension_numbers<[1], [0], [0], [1], [0, 0, 1, 1], [], []>} : vector<8x128xbf16>, vector<128x128xbf16>, vector<8x128xf32> -> vector<8x128xf32>
    %c5 = arith.constant 5 : index
    %c0_98 = arith.constant 0 : index
    %304 = vector.load %arg14[%c5, %c0_98] : memref<27x128xf32, #tpu.memory_space<vmem>>, vector<1x128xf32>
    %305 = vector.shape_cast %304 : vector<1x128xf32> to vector<128xf32>
    %306 = vector.shape_cast %305 : vector<128xf32> to vector<1x128xf32>
    %307 = vector.broadcast %306 : vector<1x128xf32> to vector<8x128xf32>
    %308 = arith.addf %303, %307 : vector<8x128xf32>
    %cst_99 = arith.constant 0.000000e+00 : f32
    %309 = vector.broadcast %cst_99 : f32 to vector<8x128xf32>
    %310 = arith.maximumf %308, %309 : vector<8x128xf32>
    %311 = math.absf %308 : vector<8x128xf32>
    %cst_100 = arith.constant 0.000000e+00 : f32
    %312 = vector.broadcast %cst_100 : f32 to vector<8x128xf32>
    %313 = arith.subf %312, %311 : vector<8x128xf32>
    %314 = math.exp %313 : vector<8x128xf32>
    %315 = math.log1p %314 : vector<8x128xf32>
    %316 = arith.addf %310, %315 : vector<8x128xf32>
    %cst_101 = arith.constant 0.693147182 : f32
    %317 = vector.broadcast %cst_101 : f32 to vector<8x128xf32>
    %318 = arith.subf %316, %317 : vector<8x128xf32>
    %319 = arith.truncf %43 : vector<1x8xf32> to vector<1x8xbf16>
    %320 = arith.truncf %318 : vector<8x128xf32> to vector<8x128xbf16>
    %cst_102 = arith.constant dense<0.000000e+00> : vector<1x128xf32>
    %321 = tpu.matmul %319, %320, %cst_102 {dimension_numbers = #tpu.dot_dimension_numbers<[1], [0], [0], [1], [0, 0, 1, 1], [], []>} : vector<1x8xbf16>, vector<8x128xbf16>, vector<1x128xf32> -> vector<1x128xf32>
    %cst_103 = arith.constant 0.166666672 : f32
    %322 = vector.broadcast %cst_103 : f32 to vector<1x128xf32>
    %323 = arith.mulf %321, %322 : vector<1x128xf32>
    %324 = arith.truncf %48 : vector<1x16xf32> to vector<1x16xbf16>
    %325 = arith.truncf %251 : vector<16x128xf32> to vector<16x128xbf16>
    %cst_104 = arith.constant dense<0.000000e+00> : vector<1x128xf32>
    %326 = tpu.matmul %324, %325, %cst_104 {dimension_numbers = #tpu.dot_dimension_numbers<[1], [0], [0], [1], [0, 0, 1, 1], [], []>} : vector<1x16xbf16>, vector<16x128xbf16>, vector<1x128xf32> -> vector<1x128xf32>
    %cst_105 = arith.constant 0.0833333358 : f32
    %327 = vector.broadcast %cst_105 : f32 to vector<1x128xf32>
    %328 = arith.mulf %326, %327 : vector<1x128xf32>
    %329 = tpu.concatenate %183, %323, %328 in 1 : vector<1x128xf32>, vector<1x128xf32>, vector<1x128xf32> -> vector<1x384xf32>
    %c1_106 = arith.constant 1 : index
    %c0_107 = arith.constant 0 : index
    %c0_108 = arith.constant 0 : index
    %330 = vector.load %arg12[%c1_106, %c0_107, %c0_108] : memref<6x384x128xbf16, #tpu.memory_space<vmem>>, vector<1x384x128xbf16>
    %331 = vector.shape_cast %330 : vector<1x384x128xbf16> to vector<384x128xbf16>
    %332 = arith.truncf %329 : vector<1x384xf32> to vector<1x384xbf16>
    %cst_109 = arith.constant dense<0.000000e+00> : vector<1x128xf32>
    %333 = tpu.matmul %332, %331, %cst_109 {dimension_numbers = #tpu.dot_dimension_numbers<[1], [0], [0], [1], [0, 0, 1, 1], [], []>} : vector<1x384xbf16>, vector<384x128xbf16>, vector<1x128xf32> -> vector<1x128xf32>
    %c6 = arith.constant 6 : index
    %c0_110 = arith.constant 0 : index
    %334 = vector.load %arg14[%c6, %c0_110] : memref<27x128xf32, #tpu.memory_space<vmem>>, vector<1x128xf32>
    %335 = vector.shape_cast %334 : vector<1x128xf32> to vector<128xf32>
    %336 = vector.shape_cast %335 : vector<128xf32> to vector<1x128xf32>
    %337 = arith.addf %333, %336 : vector<1x128xf32>
    %cst_111 = arith.constant 0.000000e+00 : f32
    %338 = vector.broadcast %cst_111 : f32 to vector<1x128xf32>
    %339 = arith.maximumf %337, %338 : vector<1x128xf32>
    %340 = math.absf %337 : vector<1x128xf32>
    %cst_112 = arith.constant 0.000000e+00 : f32
    %341 = vector.broadcast %cst_112 : f32 to vector<1x128xf32>
    %342 = arith.subf %341, %340 : vector<1x128xf32>
    %343 = math.exp %342 : vector<1x128xf32>
    %344 = math.log1p %343 : vector<1x128xf32>
    %345 = arith.addf %339, %344 : vector<1x128xf32>
    %cst_113 = arith.constant 0.693147182 : f32
    %346 = vector.broadcast %cst_113 : f32 to vector<1x128xf32>
    %347 = arith.subf %345, %346 : vector<1x128xf32>
    %c4_114 = arith.constant 4 : index
    %c0_115 = arith.constant 0 : index
    %c0_116 = arith.constant 0 : index
    %348 = vector.load %arg13[%c4_114, %c0_115, %c0_116] : memref<18x128x128xbf16, #tpu.memory_space<vmem>>, vector<1x128x128xbf16>
    %349 = vector.shape_cast %348 : vector<1x128x128xbf16> to vector<128x128xbf16>
    %350 = arith.truncf %347 : vector<1x128xf32> to vector<1x128xbf16>
    %cst_117 = arith.constant dense<0.000000e+00> : vector<1x128xf32>
    %351 = tpu.matmul %350, %349, %cst_117 {dimension_numbers = #tpu.dot_dimension_numbers<[1], [0], [0], [1], [0, 0, 1, 1], [], []>} : vector<1x128xbf16>, vector<128x128xbf16>, vector<1x128xf32> -> vector<1x128xf32>
    %c7 = arith.constant 7 : index
    %c0_118 = arith.constant 0 : index
    %352 = vector.load %arg14[%c7, %c0_118] : memref<27x128xf32, #tpu.memory_space<vmem>>, vector<1x128xf32>
    %353 = vector.shape_cast %352 : vector<1x128xf32> to vector<128xf32>
    %354 = vector.shape_cast %353 : vector<128xf32> to vector<1x128xf32>
    %355 = arith.addf %351, %354 : vector<1x128xf32>
    %cst_119 = arith.constant 0.000000e+00 : f32
    %356 = vector.broadcast %cst_119 : f32 to vector<1x128xf32>
    %357 = arith.maximumf %355, %356 : vector<1x128xf32>
    %358 = math.absf %355 : vector<1x128xf32>
    %cst_120 = arith.constant 0.000000e+00 : f32
    %359 = vector.broadcast %cst_120 : f32 to vector<1x128xf32>
    %360 = arith.subf %359, %358 : vector<1x128xf32>
    %361 = math.exp %360 : vector<1x128xf32>
    %362 = math.log1p %361 : vector<1x128xf32>
    %363 = arith.addf %357, %362 : vector<1x128xf32>
    %cst_121 = arith.constant 0.693147182 : f32
    %364 = vector.broadcast %cst_121 : f32 to vector<1x128xf32>
    %365 = arith.subf %363, %364 : vector<1x128xf32>
    %c5_122 = arith.constant 5 : index
    %c0_123 = arith.constant 0 : index
    %c0_124 = arith.constant 0 : index
    %366 = vector.load %arg13[%c5_122, %c0_123, %c0_124] : memref<18x128x128xbf16, #tpu.memory_space<vmem>>, vector<1x128x128xbf16>
    %367 = vector.shape_cast %366 : vector<1x128x128xbf16> to vector<128x128xbf16>
    %368 = arith.truncf %365 : vector<1x128xf32> to vector<1x128xbf16>
    %cst_125 = arith.constant dense<0.000000e+00> : vector<1x128xf32>
    %369 = tpu.matmul %368, %367, %cst_125 {dimension_numbers = #tpu.dot_dimension_numbers<[1], [0], [0], [1], [0, 0, 1, 1], [], []>} : vector<1x128xbf16>, vector<128x128xbf16>, vector<1x128xf32> -> vector<1x128xf32>
    %c8 = arith.constant 8 : index
    %c0_126 = arith.constant 0 : index
    %370 = vector.load %arg14[%c8, %c0_126] : memref<27x128xf32, #tpu.memory_space<vmem>>, vector<1x128xf32>
    %371 = vector.shape_cast %370 : vector<1x128xf32> to vector<128xf32>
    %372 = vector.shape_cast %371 : vector<128xf32> to vector<1x128xf32>
    %373 = arith.addf %369, %372 : vector<1x128xf32>
    %cst_127 = arith.constant 0.000000e+00 : f32
    %374 = vector.broadcast %cst_127 : f32 to vector<1x128xf32>
    %375 = arith.maximumf %373, %374 : vector<1x128xf32>
    %376 = math.absf %373 : vector<1x128xf32>
    %cst_128 = arith.constant 0.000000e+00 : f32
    %377 = vector.broadcast %cst_128 : f32 to vector<1x128xf32>
    %378 = arith.subf %377, %376 : vector<1x128xf32>
    %379 = math.exp %378 : vector<1x128xf32>
    %380 = math.log1p %379 : vector<1x128xf32>
    %381 = arith.addf %375, %380 : vector<1x128xf32>
    %cst_129 = arith.constant 0.693147182 : f32
    %382 = vector.broadcast %cst_129 : f32 to vector<1x128xf32>
    %383 = arith.subf %381, %382 : vector<1x128xf32>
    %384 = arith.addf %251, %180 : vector<16x128xf32>
    %385 = arith.addf %318, %181 : vector<8x128xf32>
    %386 = arith.addf %383, %183 : vector<1x128xf32>
    %387 = vector.broadcast %386 : vector<1x128xf32> to vector<8x128xf32>
    %388 = vector.broadcast %99 : vector<8x1xf32> to vector<8x128xf32>
    %389 = arith.mulf %387, %388 : vector<8x128xf32>
    %390 = tpu.concatenate %384, %385, %389 in 0 : vector<16x128xf32>, vector<8x128xf32>, vector<8x128xf32> -> vector<32x128xf32>
    %c3_130 = arith.constant 3 : index
    %c0_131 = arith.constant 0 : index
    %391 = vector.load %arg9[%c3_130, %c0_131] : memref<9x256xf32, #tpu.memory_space<vmem>>, vector<1x256xf32>
    %392 = vector.shape_cast %391 : vector<1x256xf32> to vector<256xf32>
    %393 = vector.shape_cast %392 : vector<256xf32> to vector<1x256xf32>
    %394 = vector.broadcast %53 : vector<32x1xf32> to vector<32x256xf32>
    %395 = vector.broadcast %393 : vector<1x256xf32> to vector<32x256xf32>
    %396 = arith.mulf %394, %395 : vector<32x256xf32>
    %c4_132 = arith.constant 4 : index
    %c0_133 = arith.constant 0 : index
    %397 = vector.load %arg9[%c4_132, %c0_133] : memref<9x256xf32, #tpu.memory_space<vmem>>, vector<1x256xf32>
    %398 = vector.shape_cast %397 : vector<1x256xf32> to vector<256xf32>
    %399 = vector.shape_cast %398 : vector<256xf32> to vector<1x256xf32>
    %400 = vector.broadcast %60 : vector<32x1xf32> to vector<32x256xf32>
    %401 = vector.broadcast %399 : vector<1x256xf32> to vector<32x256xf32>
    %402 = arith.mulf %400, %401 : vector<32x256xf32>
    %403 = arith.addf %396, %402 : vector<32x256xf32>
    %c5_134 = arith.constant 5 : index
    %c0_135 = arith.constant 0 : index
    %404 = vector.load %arg9[%c5_134, %c0_135] : memref<9x256xf32, #tpu.memory_space<vmem>>, vector<1x256xf32>
    %405 = vector.shape_cast %404 : vector<1x256xf32> to vector<256xf32>
    %406 = vector.shape_cast %405 : vector<256xf32> to vector<1x256xf32>
    %407 = vector.broadcast %64 : vector<32x1xf32> to vector<32x256xf32>
    %408 = vector.broadcast %406 : vector<1x256xf32> to vector<32x256xf32>
    %409 = arith.mulf %407, %408 : vector<32x256xf32>
    %410 = arith.addf %403, %409 : vector<32x256xf32>
    %c1_136 = arith.constant 1 : index
    %c0_137 = arith.constant 0 : index
    %c0_138 = arith.constant 0 : index
    %411 = vector.load %arg7[%c1_136, %c0_137, %c0_138] : memref<3x128x256xbf16, #tpu.memory_space<vmem>>, vector<1x128x256xbf16>
    %412 = vector.shape_cast %411 : vector<1x128x256xbf16> to vector<128x256xbf16>
    %413 = arith.truncf %390 : vector<32x128xf32> to vector<32x128xbf16>
    %cst_139 = arith.constant dense<0.000000e+00> : vector<32x256xf32>
    %414 = tpu.matmul %413, %412, %cst_139 {dimension_numbers = #tpu.dot_dimension_numbers<[1], [0], [0], [1], [0, 0, 1, 1], [], []>} : vector<32x128xbf16>, vector<128x256xbf16>, vector<32x256xf32> -> vector<32x256xf32>
    %415 = arith.mulf %414, %94 : vector<32x256xf32>
    %416 = arith.addf %415, %410 : vector<32x256xf32>
    %cst_140 = arith.constant 0.000000e+00 : f32
    %417 = vector.broadcast %cst_140 : f32 to vector<32x256xf32>
    %418 = arith.maximumf %416, %417 : vector<32x256xf32>
    %419 = math.absf %416 : vector<32x256xf32>
    %cst_141 = arith.constant 0.000000e+00 : f32
    %420 = vector.broadcast %cst_141 : f32 to vector<32x256xf32>
    %421 = arith.subf %420, %419 : vector<32x256xf32>
    %422 = math.exp %421 : vector<32x256xf32>
    %423 = math.log1p %422 : vector<32x256xf32>
    %424 = arith.addf %418, %423 : vector<32x256xf32>
    %cst_142 = arith.constant 0.693147182 : f32
    %425 = vector.broadcast %cst_142 : f32 to vector<32x256xf32>
    %426 = arith.subf %424, %425 : vector<32x256xf32>
    %c3_143 = arith.constant 3 : index
    %c0_144 = arith.constant 0 : index
    %427 = vector.load %arg10[%c3_143, %c0_144] : memref<9x128xf32, #tpu.memory_space<vmem>>, vector<1x128xf32>
    %428 = vector.shape_cast %427 : vector<1x128xf32> to vector<128xf32>
    %429 = vector.shape_cast %428 : vector<128xf32> to vector<1x128xf32>
    %430 = vector.broadcast %53 : vector<32x1xf32> to vector<32x128xf32>
    %431 = vector.broadcast %429 : vector<1x128xf32> to vector<32x128xf32>
    %432 = arith.mulf %430, %431 : vector<32x128xf32>
    %c4_145 = arith.constant 4 : index
    %c0_146 = arith.constant 0 : index
    %433 = vector.load %arg10[%c4_145, %c0_146] : memref<9x128xf32, #tpu.memory_space<vmem>>, vector<1x128xf32>
    %434 = vector.shape_cast %433 : vector<1x128xf32> to vector<128xf32>
    %435 = vector.shape_cast %434 : vector<128xf32> to vector<1x128xf32>
    %436 = vector.broadcast %60 : vector<32x1xf32> to vector<32x128xf32>
    %437 = vector.broadcast %435 : vector<1x128xf32> to vector<32x128xf32>
    %438 = arith.mulf %436, %437 : vector<32x128xf32>
    %439 = arith.addf %432, %438 : vector<32x128xf32>
    %c5_147 = arith.constant 5 : index
    %c0_148 = arith.constant 0 : index
    %440 = vector.load %arg10[%c5_147, %c0_148] : memref<9x128xf32, #tpu.memory_space<vmem>>, vector<1x128xf32>
    %441 = vector.shape_cast %440 : vector<1x128xf32> to vector<128xf32>
    %442 = vector.shape_cast %441 : vector<128xf32> to vector<1x128xf32>
    %443 = vector.broadcast %64 : vector<32x1xf32> to vector<32x128xf32>
    %444 = vector.broadcast %442 : vector<1x128xf32> to vector<32x128xf32>
    %445 = arith.mulf %443, %444 : vector<32x128xf32>
    %446 = arith.addf %439, %445 : vector<32x128xf32>
    %c1_149 = arith.constant 1 : index
    %c0_150 = arith.constant 0 : index
    %c0_151 = arith.constant 0 : index
    %447 = vector.load %arg8[%c1_149, %c0_150, %c0_151] : memref<3x256x128xbf16, #tpu.memory_space<vmem>>, vector<1x256x128xbf16>
    %448 = vector.shape_cast %447 : vector<1x256x128xbf16> to vector<256x128xbf16>
    %449 = arith.truncf %426 : vector<32x256xf32> to vector<32x256xbf16>
    %cst_152 = arith.constant dense<0.000000e+00> : vector<32x128xf32>
    %450 = tpu.matmul %449, %448, %cst_152 {dimension_numbers = #tpu.dot_dimension_numbers<[1], [0], [0], [1], [0, 0, 1, 1], [], []>} : vector<32x256xbf16>, vector<256x128xbf16>, vector<32x128xf32> -> vector<32x128xf32>
    %451 = arith.addf %450, %446 : vector<32x128xf32>
    %cst_153 = arith.constant 0.000000e+00 : f32
    %452 = vector.broadcast %cst_153 : f32 to vector<32x128xf32>
    %453 = arith.maximumf %451, %452 : vector<32x128xf32>
    %454 = math.absf %451 : vector<32x128xf32>
    %cst_154 = arith.constant 0.000000e+00 : f32
    %455 = vector.broadcast %cst_154 : f32 to vector<32x128xf32>
    %456 = arith.subf %455, %454 : vector<32x128xf32>
    %457 = math.exp %456 : vector<32x128xf32>
    %458 = math.log1p %457 : vector<32x128xf32>
    %459 = arith.addf %453, %458 : vector<32x128xf32>
    %cst_155 = arith.constant 0.693147182 : f32
    %460 = vector.broadcast %cst_155 : f32 to vector<32x128xf32>
    %461 = arith.subf %459, %460 : vector<32x128xf32>
    %462 = vector.extract_strided_slice %461 {offsets = [0, 0], sizes = [16, 128], strides = [1, 1]} : vector<32x128xf32> to vector<16x128xf32>
    %463 = vector.extract_strided_slice %461 {offsets = [16, 0], sizes = [8, 128], strides = [1, 1]} : vector<32x128xf32> to vector<8x128xf32>
    %464 = vector.extract_strided_slice %461 {offsets = [24, 0], sizes = [8, 128], strides = [1, 1]} : vector<32x128xf32> to vector<8x128xf32>
    %465 = vector.extract_strided_slice %464 {offsets = [0, 0], sizes = [1, 128], strides = [1, 1]} : vector<8x128xf32> to vector<1x128xf32>
    %466 = arith.truncf %13 : vector<16x8xf32> to vector<16x8xbf16>
    %467 = arith.truncf %463 : vector<8x128xf32> to vector<8x128xbf16>
    %cst_156 = arith.constant dense<0.000000e+00> : vector<16x128xf32>
    %468 = tpu.matmul %466, %467, %cst_156 {dimension_numbers = #tpu.dot_dimension_numbers<[1], [0], [0], [1], [0, 0, 1, 1], [], []>} : vector<16x8xbf16>, vector<8x128xbf16>, vector<16x128xf32> -> vector<16x128xf32>
    %469 = arith.truncf %17 : vector<16x8xf32> to vector<16x8xbf16>
    %470 = arith.truncf %463 : vector<8x128xf32> to vector<8x128xbf16>
    %cst_157 = arith.constant dense<0.000000e+00> : vector<16x128xf32>
    %471 = tpu.matmul %469, %470, %cst_157 {dimension_numbers = #tpu.dot_dimension_numbers<[1], [0], [0], [1], [0, 0, 1, 1], [], []>} : vector<16x8xbf16>, vector<8x128xbf16>, vector<16x128xf32> -> vector<16x128xf32>
    %cst_158 = arith.constant 0.000000e+00 : f32
    %472 = vector.broadcast %cst_158 : f32 to vector<16x1xf32>
    %473 = vector.broadcast %465 : vector<1x128xf32> to vector<16x128xf32>
    %474 = vector.broadcast %472 : vector<16x1xf32> to vector<16x128xf32>
    %475 = arith.addf %473, %474 : vector<16x128xf32>
    %476 = tpu.concatenate %468, %471, %462, %475 in 1 : vector<16x128xf32>, vector<16x128xf32>, vector<16x128xf32>, vector<16x128xf32> -> vector<16x512xf32>
    %c1_159 = arith.constant 1 : index
    %c0_160 = arith.constant 0 : index
    %c0_161 = arith.constant 0 : index
    %477 = vector.load %arg11[%c1_159, %c0_160, %c0_161] : memref<3x512x128xbf16, #tpu.memory_space<vmem>>, vector<1x512x128xbf16>
    %478 = vector.shape_cast %477 : vector<1x512x128xbf16> to vector<512x128xbf16>
    %479 = arith.truncf %476 : vector<16x512xf32> to vector<16x512xbf16>
    %cst_162 = arith.constant dense<0.000000e+00> : vector<16x128xf32>
    %480 = tpu.matmul %479, %478, %cst_162 {dimension_numbers = #tpu.dot_dimension_numbers<[1], [0], [0], [1], [0, 0, 1, 1], [], []>} : vector<16x512xbf16>, vector<512x128xbf16>, vector<16x128xf32> -> vector<16x128xf32>
    %c9 = arith.constant 9 : index
    %c0_163 = arith.constant 0 : index
    %481 = vector.load %arg14[%c9, %c0_163] : memref<27x128xf32, #tpu.memory_space<vmem>>, vector<1x128xf32>
    %482 = vector.shape_cast %481 : vector<1x128xf32> to vector<128xf32>
    %483 = vector.shape_cast %482 : vector<128xf32> to vector<1x128xf32>
    %484 = vector.broadcast %483 : vector<1x128xf32> to vector<16x128xf32>
    %485 = arith.addf %480, %484 : vector<16x128xf32>
    %cst_164 = arith.constant 0.000000e+00 : f32
    %486 = vector.broadcast %cst_164 : f32 to vector<16x128xf32>
    %487 = arith.maximumf %485, %486 : vector<16x128xf32>
    %488 = math.absf %485 : vector<16x128xf32>
    %cst_165 = arith.constant 0.000000e+00 : f32
    %489 = vector.broadcast %cst_165 : f32 to vector<16x128xf32>
    %490 = arith.subf %489, %488 : vector<16x128xf32>
    %491 = math.exp %490 : vector<16x128xf32>
    %492 = math.log1p %491 : vector<16x128xf32>
    %493 = arith.addf %487, %492 : vector<16x128xf32>
    %cst_166 = arith.constant 0.693147182 : f32
    %494 = vector.broadcast %cst_166 : f32 to vector<16x128xf32>
    %495 = arith.subf %493, %494 : vector<16x128xf32>
    %c6_167 = arith.constant 6 : index
    %c0_168 = arith.constant 0 : index
    %c0_169 = arith.constant 0 : index
    %496 = vector.load %arg13[%c6_167, %c0_168, %c0_169] : memref<18x128x128xbf16, #tpu.memory_space<vmem>>, vector<1x128x128xbf16>
    %497 = vector.shape_cast %496 : vector<1x128x128xbf16> to vector<128x128xbf16>
    %498 = arith.truncf %495 : vector<16x128xf32> to vector<16x128xbf16>
    %cst_170 = arith.constant dense<0.000000e+00> : vector<16x128xf32>
    %499 = tpu.matmul %498, %497, %cst_170 {dimension_numbers = #tpu.dot_dimension_numbers<[1], [0], [0], [1], [0, 0, 1, 1], [], []>} : vector<16x128xbf16>, vector<128x128xbf16>, vector<16x128xf32> -> vector<16x128xf32>
    %c10 = arith.constant 10 : index
    %c0_171 = arith.constant 0 : index
    %500 = vector.load %arg14[%c10, %c0_171] : memref<27x128xf32, #tpu.memory_space<vmem>>, vector<1x128xf32>
    %501 = vector.shape_cast %500 : vector<1x128xf32> to vector<128xf32>
    %502 = vector.shape_cast %501 : vector<128xf32> to vector<1x128xf32>
    %503 = vector.broadcast %502 : vector<1x128xf32> to vector<16x128xf32>
    %504 = arith.addf %499, %503 : vector<16x128xf32>
    %cst_172 = arith.constant 0.000000e+00 : f32
    %505 = vector.broadcast %cst_172 : f32 to vector<16x128xf32>
    %506 = arith.maximumf %504, %505 : vector<16x128xf32>
    %507 = math.absf %504 : vector<16x128xf32>
    %cst_173 = arith.constant 0.000000e+00 : f32
    %508 = vector.broadcast %cst_173 : f32 to vector<16x128xf32>
    %509 = arith.subf %508, %507 : vector<16x128xf32>
    %510 = math.exp %509 : vector<16x128xf32>
    %511 = math.log1p %510 : vector<16x128xf32>
    %512 = arith.addf %506, %511 : vector<16x128xf32>
    %cst_174 = arith.constant 0.693147182 : f32
    %513 = vector.broadcast %cst_174 : f32 to vector<16x128xf32>
    %514 = arith.subf %512, %513 : vector<16x128xf32>
    %c7_175 = arith.constant 7 : index
    %c0_176 = arith.constant 0 : index
    %c0_177 = arith.constant 0 : index
    %515 = vector.load %arg13[%c7_175, %c0_176, %c0_177] : memref<18x128x128xbf16, #tpu.memory_space<vmem>>, vector<1x128x128xbf16>
    %516 = vector.shape_cast %515 : vector<1x128x128xbf16> to vector<128x128xbf16>
    %517 = arith.truncf %514 : vector<16x128xf32> to vector<16x128xbf16>
    %cst_178 = arith.constant dense<0.000000e+00> : vector<16x128xf32>
    %518 = tpu.matmul %517, %516, %cst_178 {dimension_numbers = #tpu.dot_dimension_numbers<[1], [0], [0], [1], [0, 0, 1, 1], [], []>} : vector<16x128xbf16>, vector<128x128xbf16>, vector<16x128xf32> -> vector<16x128xf32>
    %c11 = arith.constant 11 : index
    %c0_179 = arith.constant 0 : index
    %519 = vector.load %arg14[%c11, %c0_179] : memref<27x128xf32, #tpu.memory_space<vmem>>, vector<1x128xf32>
    %520 = vector.shape_cast %519 : vector<1x128xf32> to vector<128xf32>
    %521 = vector.shape_cast %520 : vector<128xf32> to vector<1x128xf32>
    %522 = vector.broadcast %521 : vector<1x128xf32> to vector<16x128xf32>
    %523 = arith.addf %518, %522 : vector<16x128xf32>
    %cst_180 = arith.constant 0.000000e+00 : f32
    %524 = vector.broadcast %cst_180 : f32 to vector<16x128xf32>
    %525 = arith.maximumf %523, %524 : vector<16x128xf32>
    %526 = math.absf %523 : vector<16x128xf32>
    %cst_181 = arith.constant 0.000000e+00 : f32
    %527 = vector.broadcast %cst_181 : f32 to vector<16x128xf32>
    %528 = arith.subf %527, %526 : vector<16x128xf32>
    %529 = math.exp %528 : vector<16x128xf32>
    %530 = math.log1p %529 : vector<16x128xf32>
    %531 = arith.addf %525, %530 : vector<16x128xf32>
    %cst_182 = arith.constant 0.693147182 : f32
    %532 = vector.broadcast %cst_182 : f32 to vector<16x128xf32>
    %533 = arith.subf %531, %532 : vector<16x128xf32>
    %534 = arith.truncf %22 : vector<8x16xf32> to vector<8x16xbf16>
    %535 = arith.truncf %533 : vector<16x128xf32> to vector<16x128xbf16>
    %cst_183 = arith.constant dense<0.000000e+00> : vector<8x128xf32>
    %536 = tpu.matmul %534, %535, %cst_183 {dimension_numbers = #tpu.dot_dimension_numbers<[1], [0], [0], [1], [0, 0, 1, 1], [], []>} : vector<8x16xbf16>, vector<16x128xbf16>, vector<8x128xf32> -> vector<8x128xf32>
    %537 = vector.broadcast %28 : vector<8x1xf32> to vector<8x128xf32>
    %538 = arith.mulf %536, %537 : vector<8x128xf32>
    %cst_184 = arith.constant 0.000000e+00 : f32
    %539 = vector.broadcast %cst_184 : f32 to vector<8x1xf32>
    %540 = vector.broadcast %465 : vector<1x128xf32> to vector<8x128xf32>
    %541 = vector.broadcast %539 : vector<8x1xf32> to vector<8x128xf32>
    %542 = arith.addf %540, %541 : vector<8x128xf32>
    %543 = tpu.concatenate %463, %538, %542 in 1 : vector<8x128xf32>, vector<8x128xf32>, vector<8x128xf32> -> vector<8x384xf32>
    %c2_185 = arith.constant 2 : index
    %c0_186 = arith.constant 0 : index
    %c0_187 = arith.constant 0 : index
    %544 = vector.load %arg12[%c2_185, %c0_186, %c0_187] : memref<6x384x128xbf16, #tpu.memory_space<vmem>>, vector<1x384x128xbf16>
    %545 = vector.shape_cast %544 : vector<1x384x128xbf16> to vector<384x128xbf16>
    %546 = arith.truncf %543 : vector<8x384xf32> to vector<8x384xbf16>
    %cst_188 = arith.constant dense<0.000000e+00> : vector<8x128xf32>
    %547 = tpu.matmul %546, %545, %cst_188 {dimension_numbers = #tpu.dot_dimension_numbers<[1], [0], [0], [1], [0, 0, 1, 1], [], []>} : vector<8x384xbf16>, vector<384x128xbf16>, vector<8x128xf32> -> vector<8x128xf32>
    %c12 = arith.constant 12 : index
    %c0_189 = arith.constant 0 : index
    %548 = vector.load %arg14[%c12, %c0_189] : memref<27x128xf32, #tpu.memory_space<vmem>>, vector<1x128xf32>
    %549 = vector.shape_cast %548 : vector<1x128xf32> to vector<128xf32>
    %550 = vector.shape_cast %549 : vector<128xf32> to vector<1x128xf32>
    %551 = vector.broadcast %550 : vector<1x128xf32> to vector<8x128xf32>
    %552 = arith.addf %547, %551 : vector<8x128xf32>
    %cst_190 = arith.constant 0.000000e+00 : f32
    %553 = vector.broadcast %cst_190 : f32 to vector<8x128xf32>
    %554 = arith.maximumf %552, %553 : vector<8x128xf32>
    %555 = math.absf %552 : vector<8x128xf32>
    %cst_191 = arith.constant 0.000000e+00 : f32
    %556 = vector.broadcast %cst_191 : f32 to vector<8x128xf32>
    %557 = arith.subf %556, %555 : vector<8x128xf32>
    %558 = math.exp %557 : vector<8x128xf32>
    %559 = math.log1p %558 : vector<8x128xf32>
    %560 = arith.addf %554, %559 : vector<8x128xf32>
    %cst_192 = arith.constant 0.693147182 : f32
    %561 = vector.broadcast %cst_192 : f32 to vector<8x128xf32>
    %562 = arith.subf %560, %561 : vector<8x128xf32>
    %c8_193 = arith.constant 8 : index
    %c0_194 = arith.constant 0 : index
    %c0_195 = arith.constant 0 : index
    %563 = vector.load %arg13[%c8_193, %c0_194, %c0_195] : memref<18x128x128xbf16, #tpu.memory_space<vmem>>, vector<1x128x128xbf16>
    %564 = vector.shape_cast %563 : vector<1x128x128xbf16> to vector<128x128xbf16>
    %565 = arith.truncf %562 : vector<8x128xf32> to vector<8x128xbf16>
    %cst_196 = arith.constant dense<0.000000e+00> : vector<8x128xf32>
    %566 = tpu.matmul %565, %564, %cst_196 {dimension_numbers = #tpu.dot_dimension_numbers<[1], [0], [0], [1], [0, 0, 1, 1], [], []>} : vector<8x128xbf16>, vector<128x128xbf16>, vector<8x128xf32> -> vector<8x128xf32>
    %c13 = arith.constant 13 : index
    %c0_197 = arith.constant 0 : index
    %567 = vector.load %arg14[%c13, %c0_197] : memref<27x128xf32, #tpu.memory_space<vmem>>, vector<1x128xf32>
    %568 = vector.shape_cast %567 : vector<1x128xf32> to vector<128xf32>
    %569 = vector.shape_cast %568 : vector<128xf32> to vector<1x128xf32>
    %570 = vector.broadcast %569 : vector<1x128xf32> to vector<8x128xf32>
    %571 = arith.addf %566, %570 : vector<8x128xf32>
    %cst_198 = arith.constant 0.000000e+00 : f32
    %572 = vector.broadcast %cst_198 : f32 to vector<8x128xf32>
    %573 = arith.maximumf %571, %572 : vector<8x128xf32>
    %574 = math.absf %571 : vector<8x128xf32>
    %cst_199 = arith.constant 0.000000e+00 : f32
    %575 = vector.broadcast %cst_199 : f32 to vector<8x128xf32>
    %576 = arith.subf %575, %574 : vector<8x128xf32>
    %577 = math.exp %576 : vector<8x128xf32>
    %578 = math.log1p %577 : vector<8x128xf32>
    %579 = arith.addf %573, %578 : vector<8x128xf32>
    %cst_200 = arith.constant 0.693147182 : f32
    %580 = vector.broadcast %cst_200 : f32 to vector<8x128xf32>
    %581 = arith.subf %579, %580 : vector<8x128xf32>
    %c9_201 = arith.constant 9 : index
    %c0_202 = arith.constant 0 : index
    %c0_203 = arith.constant 0 : index
    %582 = vector.load %arg13[%c9_201, %c0_202, %c0_203] : memref<18x128x128xbf16, #tpu.memory_space<vmem>>, vector<1x128x128xbf16>
    %583 = vector.shape_cast %582 : vector<1x128x128xbf16> to vector<128x128xbf16>
    %584 = arith.truncf %581 : vector<8x128xf32> to vector<8x128xbf16>
    %cst_204 = arith.constant dense<0.000000e+00> : vector<8x128xf32>
    %585 = tpu.matmul %584, %583, %cst_204 {dimension_numbers = #tpu.dot_dimension_numbers<[1], [0], [0], [1], [0, 0, 1, 1], [], []>} : vector<8x128xbf16>, vector<128x128xbf16>, vector<8x128xf32> -> vector<8x128xf32>
    %c14 = arith.constant 14 : index
    %c0_205 = arith.constant 0 : index
    %586 = vector.load %arg14[%c14, %c0_205] : memref<27x128xf32, #tpu.memory_space<vmem>>, vector<1x128xf32>
    %587 = vector.shape_cast %586 : vector<1x128xf32> to vector<128xf32>
    %588 = vector.shape_cast %587 : vector<128xf32> to vector<1x128xf32>
    %589 = vector.broadcast %588 : vector<1x128xf32> to vector<8x128xf32>
    %590 = arith.addf %585, %589 : vector<8x128xf32>
    %cst_206 = arith.constant 0.000000e+00 : f32
    %591 = vector.broadcast %cst_206 : f32 to vector<8x128xf32>
    %592 = arith.maximumf %590, %591 : vector<8x128xf32>
    %593 = math.absf %590 : vector<8x128xf32>
    %cst_207 = arith.constant 0.000000e+00 : f32
    %594 = vector.broadcast %cst_207 : f32 to vector<8x128xf32>
    %595 = arith.subf %594, %593 : vector<8x128xf32>
    %596 = math.exp %595 : vector<8x128xf32>
    %597 = math.log1p %596 : vector<8x128xf32>
    %598 = arith.addf %592, %597 : vector<8x128xf32>
    %cst_208 = arith.constant 0.693147182 : f32
    %599 = vector.broadcast %cst_208 : f32 to vector<8x128xf32>
    %600 = arith.subf %598, %599 : vector<8x128xf32>
    %601 = arith.truncf %43 : vector<1x8xf32> to vector<1x8xbf16>
    %602 = arith.truncf %600 : vector<8x128xf32> to vector<8x128xbf16>
    %cst_209 = arith.constant dense<0.000000e+00> : vector<1x128xf32>
    %603 = tpu.matmul %601, %602, %cst_209 {dimension_numbers = #tpu.dot_dimension_numbers<[1], [0], [0], [1], [0, 0, 1, 1], [], []>} : vector<1x8xbf16>, vector<8x128xbf16>, vector<1x128xf32> -> vector<1x128xf32>
    %cst_210 = arith.constant 0.166666672 : f32
    %604 = vector.broadcast %cst_210 : f32 to vector<1x128xf32>
    %605 = arith.mulf %603, %604 : vector<1x128xf32>
    %606 = arith.truncf %48 : vector<1x16xf32> to vector<1x16xbf16>
    %607 = arith.truncf %533 : vector<16x128xf32> to vector<16x128xbf16>
    %cst_211 = arith.constant dense<0.000000e+00> : vector<1x128xf32>
    %608 = tpu.matmul %606, %607, %cst_211 {dimension_numbers = #tpu.dot_dimension_numbers<[1], [0], [0], [1], [0, 0, 1, 1], [], []>} : vector<1x16xbf16>, vector<16x128xbf16>, vector<1x128xf32> -> vector<1x128xf32>
    %cst_212 = arith.constant 0.0833333358 : f32
    %609 = vector.broadcast %cst_212 : f32 to vector<1x128xf32>
    %610 = arith.mulf %608, %609 : vector<1x128xf32>
    %611 = tpu.concatenate %465, %605, %610 in 1 : vector<1x128xf32>, vector<1x128xf32>, vector<1x128xf32> -> vector<1x384xf32>
    %c3_213 = arith.constant 3 : index
    %c0_214 = arith.constant 0 : index
    %c0_215 = arith.constant 0 : index
    %612 = vector.load %arg12[%c3_213, %c0_214, %c0_215] : memref<6x384x128xbf16, #tpu.memory_space<vmem>>, vector<1x384x128xbf16>
    %613 = vector.shape_cast %612 : vector<1x384x128xbf16> to vector<384x128xbf16>
    %614 = arith.truncf %611 : vector<1x384xf32> to vector<1x384xbf16>
    %cst_216 = arith.constant dense<0.000000e+00> : vector<1x128xf32>
    %615 = tpu.matmul %614, %613, %cst_216 {dimension_numbers = #tpu.dot_dimension_numbers<[1], [0], [0], [1], [0, 0, 1, 1], [], []>} : vector<1x384xbf16>, vector<384x128xbf16>, vector<1x128xf32> -> vector<1x128xf32>
    %c15 = arith.constant 15 : index
    %c0_217 = arith.constant 0 : index
    %616 = vector.load %arg14[%c15, %c0_217] : memref<27x128xf32, #tpu.memory_space<vmem>>, vector<1x128xf32>
    %617 = vector.shape_cast %616 : vector<1x128xf32> to vector<128xf32>
    %618 = vector.shape_cast %617 : vector<128xf32> to vector<1x128xf32>
    %619 = arith.addf %615, %618 : vector<1x128xf32>
    %cst_218 = arith.constant 0.000000e+00 : f32
    %620 = vector.broadcast %cst_218 : f32 to vector<1x128xf32>
    %621 = arith.maximumf %619, %620 : vector<1x128xf32>
    %622 = math.absf %619 : vector<1x128xf32>
    %cst_219 = arith.constant 0.000000e+00 : f32
    %623 = vector.broadcast %cst_219 : f32 to vector<1x128xf32>
    %624 = arith.subf %623, %622 : vector<1x128xf32>
    %625 = math.exp %624 : vector<1x128xf32>
    %626 = math.log1p %625 : vector<1x128xf32>
    %627 = arith.addf %621, %626 : vector<1x128xf32>
    %cst_220 = arith.constant 0.693147182 : f32
    %628 = vector.broadcast %cst_220 : f32 to vector<1x128xf32>
    %629 = arith.subf %627, %628 : vector<1x128xf32>
    %c10_221 = arith.constant 10 : index
    %c0_222 = arith.constant 0 : index
    %c0_223 = arith.constant 0 : index
    %630 = vector.load %arg13[%c10_221, %c0_222, %c0_223] : memref<18x128x128xbf16, #tpu.memory_space<vmem>>, vector<1x128x128xbf16>
    %631 = vector.shape_cast %630 : vector<1x128x128xbf16> to vector<128x128xbf16>
    %632 = arith.truncf %629 : vector<1x128xf32> to vector<1x128xbf16>
    %cst_224 = arith.constant dense<0.000000e+00> : vector<1x128xf32>
    %633 = tpu.matmul %632, %631, %cst_224 {dimension_numbers = #tpu.dot_dimension_numbers<[1], [0], [0], [1], [0, 0, 1, 1], [], []>} : vector<1x128xbf16>, vector<128x128xbf16>, vector<1x128xf32> -> vector<1x128xf32>
    %c16 = arith.constant 16 : index
    %c0_225 = arith.constant 0 : index
    %634 = vector.load %arg14[%c16, %c0_225] : memref<27x128xf32, #tpu.memory_space<vmem>>, vector<1x128xf32>
    %635 = vector.shape_cast %634 : vector<1x128xf32> to vector<128xf32>
    %636 = vector.shape_cast %635 : vector<128xf32> to vector<1x128xf32>
    %637 = arith.addf %633, %636 : vector<1x128xf32>
    %cst_226 = arith.constant 0.000000e+00 : f32
    %638 = vector.broadcast %cst_226 : f32 to vector<1x128xf32>
    %639 = arith.maximumf %637, %638 : vector<1x128xf32>
    %640 = math.absf %637 : vector<1x128xf32>
    %cst_227 = arith.constant 0.000000e+00 : f32
    %641 = vector.broadcast %cst_227 : f32 to vector<1x128xf32>
    %642 = arith.subf %641, %640 : vector<1x128xf32>
    %643 = math.exp %642 : vector<1x128xf32>
    %644 = math.log1p %643 : vector<1x128xf32>
    %645 = arith.addf %639, %644 : vector<1x128xf32>
    %cst_228 = arith.constant 0.693147182 : f32
    %646 = vector.broadcast %cst_228 : f32 to vector<1x128xf32>
    %647 = arith.subf %645, %646 : vector<1x128xf32>
    %c11_229 = arith.constant 11 : index
    %c0_230 = arith.constant 0 : index
    %c0_231 = arith.constant 0 : index
    %648 = vector.load %arg13[%c11_229, %c0_230, %c0_231] : memref<18x128x128xbf16, #tpu.memory_space<vmem>>, vector<1x128x128xbf16>
    %649 = vector.shape_cast %648 : vector<1x128x128xbf16> to vector<128x128xbf16>
    %650 = arith.truncf %647 : vector<1x128xf32> to vector<1x128xbf16>
    %cst_232 = arith.constant dense<0.000000e+00> : vector<1x128xf32>
    %651 = tpu.matmul %650, %649, %cst_232 {dimension_numbers = #tpu.dot_dimension_numbers<[1], [0], [0], [1], [0, 0, 1, 1], [], []>} : vector<1x128xbf16>, vector<128x128xbf16>, vector<1x128xf32> -> vector<1x128xf32>
    %c17 = arith.constant 17 : index
    %c0_233 = arith.constant 0 : index
    %652 = vector.load %arg14[%c17, %c0_233] : memref<27x128xf32, #tpu.memory_space<vmem>>, vector<1x128xf32>
    %653 = vector.shape_cast %652 : vector<1x128xf32> to vector<128xf32>
    %654 = vector.shape_cast %653 : vector<128xf32> to vector<1x128xf32>
    %655 = arith.addf %651, %654 : vector<1x128xf32>
    %cst_234 = arith.constant 0.000000e+00 : f32
    %656 = vector.broadcast %cst_234 : f32 to vector<1x128xf32>
    %657 = arith.maximumf %655, %656 : vector<1x128xf32>
    %658 = math.absf %655 : vector<1x128xf32>
    %cst_235 = arith.constant 0.000000e+00 : f32
    %659 = vector.broadcast %cst_235 : f32 to vector<1x128xf32>
    %660 = arith.subf %659, %658 : vector<1x128xf32>
    %661 = math.exp %660 : vector<1x128xf32>
    %662 = math.log1p %661 : vector<1x128xf32>
    %663 = arith.addf %657, %662 : vector<1x128xf32>
    %cst_236 = arith.constant 0.693147182 : f32
    %664 = vector.broadcast %cst_236 : f32 to vector<1x128xf32>
    %665 = arith.subf %663, %664 : vector<1x128xf32>
    %666 = arith.addf %533, %384 : vector<16x128xf32>
    %667 = arith.addf %600, %385 : vector<8x128xf32>
    %668 = arith.addf %665, %386 : vector<1x128xf32>
    %669 = vector.broadcast %668 : vector<1x128xf32> to vector<8x128xf32>
    %670 = vector.broadcast %99 : vector<8x1xf32> to vector<8x128xf32>
    %671 = arith.mulf %669, %670 : vector<8x128xf32>
    %672 = tpu.concatenate %666, %667, %671 in 0 : vector<16x128xf32>, vector<8x128xf32>, vector<8x128xf32> -> vector<32x128xf32>
    %c6_237 = arith.constant 6 : index
    %c0_238 = arith.constant 0 : index
    %673 = vector.load %arg9[%c6_237, %c0_238] : memref<9x256xf32, #tpu.memory_space<vmem>>, vector<1x256xf32>
    %674 = vector.shape_cast %673 : vector<1x256xf32> to vector<256xf32>
    %675 = vector.shape_cast %674 : vector<256xf32> to vector<1x256xf32>
    %676 = vector.broadcast %53 : vector<32x1xf32> to vector<32x256xf32>
    %677 = vector.broadcast %675 : vector<1x256xf32> to vector<32x256xf32>
    %678 = arith.mulf %676, %677 : vector<32x256xf32>
    %c7_239 = arith.constant 7 : index
    %c0_240 = arith.constant 0 : index
    %679 = vector.load %arg9[%c7_239, %c0_240] : memref<9x256xf32, #tpu.memory_space<vmem>>, vector<1x256xf32>
    %680 = vector.shape_cast %679 : vector<1x256xf32> to vector<256xf32>
    %681 = vector.shape_cast %680 : vector<256xf32> to vector<1x256xf32>
    %682 = vector.broadcast %60 : vector<32x1xf32> to vector<32x256xf32>
    %683 = vector.broadcast %681 : vector<1x256xf32> to vector<32x256xf32>
    %684 = arith.mulf %682, %683 : vector<32x256xf32>
    %685 = arith.addf %678, %684 : vector<32x256xf32>
    %c8_241 = arith.constant 8 : index
    %c0_242 = arith.constant 0 : index
    %686 = vector.load %arg9[%c8_241, %c0_242] : memref<9x256xf32, #tpu.memory_space<vmem>>, vector<1x256xf32>
    %687 = vector.shape_cast %686 : vector<1x256xf32> to vector<256xf32>
    %688 = vector.shape_cast %687 : vector<256xf32> to vector<1x256xf32>
    %689 = vector.broadcast %64 : vector<32x1xf32> to vector<32x256xf32>
    %690 = vector.broadcast %688 : vector<1x256xf32> to vector<32x256xf32>
    %691 = arith.mulf %689, %690 : vector<32x256xf32>
    %692 = arith.addf %685, %691 : vector<32x256xf32>
    %c2_243 = arith.constant 2 : index
    %c0_244 = arith.constant 0 : index
    %c0_245 = arith.constant 0 : index
    %693 = vector.load %arg7[%c2_243, %c0_244, %c0_245] : memref<3x128x256xbf16, #tpu.memory_space<vmem>>, vector<1x128x256xbf16>
    %694 = vector.shape_cast %693 : vector<1x128x256xbf16> to vector<128x256xbf16>
    %695 = arith.truncf %672 : vector<32x128xf32> to vector<32x128xbf16>
    %cst_246 = arith.constant dense<0.000000e+00> : vector<32x256xf32>
    %696 = tpu.matmul %695, %694, %cst_246 {dimension_numbers = #tpu.dot_dimension_numbers<[1], [0], [0], [1], [0, 0, 1, 1], [], []>} : vector<32x128xbf16>, vector<128x256xbf16>, vector<32x256xf32> -> vector<32x256xf32>
    %697 = arith.mulf %696, %94 : vector<32x256xf32>
    %698 = arith.addf %697, %692 : vector<32x256xf32>
    %cst_247 = arith.constant 0.000000e+00 : f32
    %699 = vector.broadcast %cst_247 : f32 to vector<32x256xf32>
    %700 = arith.maximumf %698, %699 : vector<32x256xf32>
    %701 = math.absf %698 : vector<32x256xf32>
    %cst_248 = arith.constant 0.000000e+00 : f32
    %702 = vector.broadcast %cst_248 : f32 to vector<32x256xf32>
    %703 = arith.subf %702, %701 : vector<32x256xf32>
    %704 = math.exp %703 : vector<32x256xf32>
    %705 = math.log1p %704 : vector<32x256xf32>
    %706 = arith.addf %700, %705 : vector<32x256xf32>
    %cst_249 = arith.constant 0.693147182 : f32
    %707 = vector.broadcast %cst_249 : f32 to vector<32x256xf32>
    %708 = arith.subf %706, %707 : vector<32x256xf32>
    %c6_250 = arith.constant 6 : index
    %c0_251 = arith.constant 0 : index
    %709 = vector.load %arg10[%c6_250, %c0_251] : memref<9x128xf32, #tpu.memory_space<vmem>>, vector<1x128xf32>
    %710 = vector.shape_cast %709 : vector<1x128xf32> to vector<128xf32>
    %711 = vector.shape_cast %710 : vector<128xf32> to vector<1x128xf32>
    %712 = vector.broadcast %53 : vector<32x1xf32> to vector<32x128xf32>
    %713 = vector.broadcast %711 : vector<1x128xf32> to vector<32x128xf32>
    %714 = arith.mulf %712, %713 : vector<32x128xf32>
    %c7_252 = arith.constant 7 : index
    %c0_253 = arith.constant 0 : index
    %715 = vector.load %arg10[%c7_252, %c0_253] : memref<9x128xf32, #tpu.memory_space<vmem>>, vector<1x128xf32>
    %716 = vector.shape_cast %715 : vector<1x128xf32> to vector<128xf32>
    %717 = vector.shape_cast %716 : vector<128xf32> to vector<1x128xf32>
    %718 = vector.broadcast %60 : vector<32x1xf32> to vector<32x128xf32>
    %719 = vector.broadcast %717 : vector<1x128xf32> to vector<32x128xf32>
    %720 = arith.mulf %718, %719 : vector<32x128xf32>
    %721 = arith.addf %714, %720 : vector<32x128xf32>
    %c8_254 = arith.constant 8 : index
    %c0_255 = arith.constant 0 : index
    %722 = vector.load %arg10[%c8_254, %c0_255] : memref<9x128xf32, #tpu.memory_space<vmem>>, vector<1x128xf32>
    %723 = vector.shape_cast %722 : vector<1x128xf32> to vector<128xf32>
    %724 = vector.shape_cast %723 : vector<128xf32> to vector<1x128xf32>
    %725 = vector.broadcast %64 : vector<32x1xf32> to vector<32x128xf32>
    %726 = vector.broadcast %724 : vector<1x128xf32> to vector<32x128xf32>
    %727 = arith.mulf %725, %726 : vector<32x128xf32>
    %728 = arith.addf %721, %727 : vector<32x128xf32>
    %c2_256 = arith.constant 2 : index
    %c0_257 = arith.constant 0 : index
    %c0_258 = arith.constant 0 : index
    %729 = vector.load %arg8[%c2_256, %c0_257, %c0_258] : memref<3x256x128xbf16, #tpu.memory_space<vmem>>, vector<1x256x128xbf16>
    %730 = vector.shape_cast %729 : vector<1x256x128xbf16> to vector<256x128xbf16>
    %731 = arith.truncf %708 : vector<32x256xf32> to vector<32x256xbf16>
    %cst_259 = arith.constant dense<0.000000e+00> : vector<32x128xf32>
    %732 = tpu.matmul %731, %730, %cst_259 {dimension_numbers = #tpu.dot_dimension_numbers<[1], [0], [0], [1], [0, 0, 1, 1], [], []>} : vector<32x256xbf16>, vector<256x128xbf16>, vector<32x128xf32> -> vector<32x128xf32>
    %733 = arith.addf %732, %728 : vector<32x128xf32>
    %cst_260 = arith.constant 0.000000e+00 : f32
    %734 = vector.broadcast %cst_260 : f32 to vector<32x128xf32>
    %735 = arith.maximumf %733, %734 : vector<32x128xf32>
    %736 = math.absf %733 : vector<32x128xf32>
    %cst_261 = arith.constant 0.000000e+00 : f32
    %737 = vector.broadcast %cst_261 : f32 to vector<32x128xf32>
    %738 = arith.subf %737, %736 : vector<32x128xf32>
    %739 = math.exp %738 : vector<32x128xf32>
    %740 = math.log1p %739 : vector<32x128xf32>
    %741 = arith.addf %735, %740 : vector<32x128xf32>
    %cst_262 = arith.constant 0.693147182 : f32
    %742 = vector.broadcast %cst_262 : f32 to vector<32x128xf32>
    %743 = arith.subf %741, %742 : vector<32x128xf32>
    %744 = vector.extract_strided_slice %743 {offsets = [0, 0], sizes = [16, 128], strides = [1, 1]} : vector<32x128xf32> to vector<16x128xf32>
    %745 = vector.extract_strided_slice %743 {offsets = [16, 0], sizes = [8, 128], strides = [1, 1]} : vector<32x128xf32> to vector<8x128xf32>
    %746 = vector.extract_strided_slice %743 {offsets = [24, 0], sizes = [8, 128], strides = [1, 1]} : vector<32x128xf32> to vector<8x128xf32>
    %747 = vector.extract_strided_slice %746 {offsets = [0, 0], sizes = [1, 128], strides = [1, 1]} : vector<8x128xf32> to vector<1x128xf32>
    %748 = arith.truncf %13 : vector<16x8xf32> to vector<16x8xbf16>
    %749 = arith.truncf %745 : vector<8x128xf32> to vector<8x128xbf16>
    %cst_263 = arith.constant dense<0.000000e+00> : vector<16x128xf32>
    %750 = tpu.matmul %748, %749, %cst_263 {dimension_numbers = #tpu.dot_dimension_numbers<[1], [0], [0], [1], [0, 0, 1, 1], [], []>} : vector<16x8xbf16>, vector<8x128xbf16>, vector<16x128xf32> -> vector<16x128xf32>
    %751 = arith.truncf %17 : vector<16x8xf32> to vector<16x8xbf16>
    %752 = arith.truncf %745 : vector<8x128xf32> to vector<8x128xbf16>
    %cst_264 = arith.constant dense<0.000000e+00> : vector<16x128xf32>
    %753 = tpu.matmul %751, %752, %cst_264 {dimension_numbers = #tpu.dot_dimension_numbers<[1], [0], [0], [1], [0, 0, 1, 1], [], []>} : vector<16x8xbf16>, vector<8x128xbf16>, vector<16x128xf32> -> vector<16x128xf32>
    %cst_265 = arith.constant 0.000000e+00 : f32
    %754 = vector.broadcast %cst_265 : f32 to vector<16x1xf32>
    %755 = vector.broadcast %747 : vector<1x128xf32> to vector<16x128xf32>
    %756 = vector.broadcast %754 : vector<16x1xf32> to vector<16x128xf32>
    %757 = arith.addf %755, %756 : vector<16x128xf32>
    %758 = tpu.concatenate %750, %753, %744, %757 in 1 : vector<16x128xf32>, vector<16x128xf32>, vector<16x128xf32>, vector<16x128xf32> -> vector<16x512xf32>
    %c2_266 = arith.constant 2 : index
    %c0_267 = arith.constant 0 : index
    %c0_268 = arith.constant 0 : index
    %759 = vector.load %arg11[%c2_266, %c0_267, %c0_268] : memref<3x512x128xbf16, #tpu.memory_space<vmem>>, vector<1x512x128xbf16>
    %760 = vector.shape_cast %759 : vector<1x512x128xbf16> to vector<512x128xbf16>
    %761 = arith.truncf %758 : vector<16x512xf32> to vector<16x512xbf16>
    %cst_269 = arith.constant dense<0.000000e+00> : vector<16x128xf32>
    %762 = tpu.matmul %761, %760, %cst_269 {dimension_numbers = #tpu.dot_dimension_numbers<[1], [0], [0], [1], [0, 0, 1, 1], [], []>} : vector<16x512xbf16>, vector<512x128xbf16>, vector<16x128xf32> -> vector<16x128xf32>
    %c18 = arith.constant 18 : index
    %c0_270 = arith.constant 0 : index
    %763 = vector.load %arg14[%c18, %c0_270] : memref<27x128xf32, #tpu.memory_space<vmem>>, vector<1x128xf32>
    %764 = vector.shape_cast %763 : vector<1x128xf32> to vector<128xf32>
    %765 = vector.shape_cast %764 : vector<128xf32> to vector<1x128xf32>
    %766 = vector.broadcast %765 : vector<1x128xf32> to vector<16x128xf32>
    %767 = arith.addf %762, %766 : vector<16x128xf32>
    %cst_271 = arith.constant 0.000000e+00 : f32
    %768 = vector.broadcast %cst_271 : f32 to vector<16x128xf32>
    %769 = arith.maximumf %767, %768 : vector<16x128xf32>
    %770 = math.absf %767 : vector<16x128xf32>
    %cst_272 = arith.constant 0.000000e+00 : f32
    %771 = vector.broadcast %cst_272 : f32 to vector<16x128xf32>
    %772 = arith.subf %771, %770 : vector<16x128xf32>
    %773 = math.exp %772 : vector<16x128xf32>
    %774 = math.log1p %773 : vector<16x128xf32>
    %775 = arith.addf %769, %774 : vector<16x128xf32>
    %cst_273 = arith.constant 0.693147182 : f32
    %776 = vector.broadcast %cst_273 : f32 to vector<16x128xf32>
    %777 = arith.subf %775, %776 : vector<16x128xf32>
    %c12_274 = arith.constant 12 : index
    %c0_275 = arith.constant 0 : index
    %c0_276 = arith.constant 0 : index
    %778 = vector.load %arg13[%c12_274, %c0_275, %c0_276] : memref<18x128x128xbf16, #tpu.memory_space<vmem>>, vector<1x128x128xbf16>
    %779 = vector.shape_cast %778 : vector<1x128x128xbf16> to vector<128x128xbf16>
    %780 = arith.truncf %777 : vector<16x128xf32> to vector<16x128xbf16>
    %cst_277 = arith.constant dense<0.000000e+00> : vector<16x128xf32>
    %781 = tpu.matmul %780, %779, %cst_277 {dimension_numbers = #tpu.dot_dimension_numbers<[1], [0], [0], [1], [0, 0, 1, 1], [], []>} : vector<16x128xbf16>, vector<128x128xbf16>, vector<16x128xf32> -> vector<16x128xf32>
    %c19 = arith.constant 19 : index
    %c0_278 = arith.constant 0 : index
    %782 = vector.load %arg14[%c19, %c0_278] : memref<27x128xf32, #tpu.memory_space<vmem>>, vector<1x128xf32>
    %783 = vector.shape_cast %782 : vector<1x128xf32> to vector<128xf32>
    %784 = vector.shape_cast %783 : vector<128xf32> to vector<1x128xf32>
    %785 = vector.broadcast %784 : vector<1x128xf32> to vector<16x128xf32>
    %786 = arith.addf %781, %785 : vector<16x128xf32>
    %cst_279 = arith.constant 0.000000e+00 : f32
    %787 = vector.broadcast %cst_279 : f32 to vector<16x128xf32>
    %788 = arith.maximumf %786, %787 : vector<16x128xf32>
    %789 = math.absf %786 : vector<16x128xf32>
    %cst_280 = arith.constant 0.000000e+00 : f32
    %790 = vector.broadcast %cst_280 : f32 to vector<16x128xf32>
    %791 = arith.subf %790, %789 : vector<16x128xf32>
    %792 = math.exp %791 : vector<16x128xf32>
    %793 = math.log1p %792 : vector<16x128xf32>
    %794 = arith.addf %788, %793 : vector<16x128xf32>
    %cst_281 = arith.constant 0.693147182 : f32
    %795 = vector.broadcast %cst_281 : f32 to vector<16x128xf32>
    %796 = arith.subf %794, %795 : vector<16x128xf32>
    %c13_282 = arith.constant 13 : index
    %c0_283 = arith.constant 0 : index
    %c0_284 = arith.constant 0 : index
    %797 = vector.load %arg13[%c13_282, %c0_283, %c0_284] : memref<18x128x128xbf16, #tpu.memory_space<vmem>>, vector<1x128x128xbf16>
    %798 = vector.shape_cast %797 : vector<1x128x128xbf16> to vector<128x128xbf16>
    %799 = arith.truncf %796 : vector<16x128xf32> to vector<16x128xbf16>
    %cst_285 = arith.constant dense<0.000000e+00> : vector<16x128xf32>
    %800 = tpu.matmul %799, %798, %cst_285 {dimension_numbers = #tpu.dot_dimension_numbers<[1], [0], [0], [1], [0, 0, 1, 1], [], []>} : vector<16x128xbf16>, vector<128x128xbf16>, vector<16x128xf32> -> vector<16x128xf32>
    %c20 = arith.constant 20 : index
    %c0_286 = arith.constant 0 : index
    %801 = vector.load %arg14[%c20, %c0_286] : memref<27x128xf32, #tpu.memory_space<vmem>>, vector<1x128xf32>
    %802 = vector.shape_cast %801 : vector<1x128xf32> to vector<128xf32>
    %803 = vector.shape_cast %802 : vector<128xf32> to vector<1x128xf32>
    %804 = vector.broadcast %803 : vector<1x128xf32> to vector<16x128xf32>
    %805 = arith.addf %800, %804 : vector<16x128xf32>
    %cst_287 = arith.constant 0.000000e+00 : f32
    %806 = vector.broadcast %cst_287 : f32 to vector<16x128xf32>
    %807 = arith.maximumf %805, %806 : vector<16x128xf32>
    %808 = math.absf %805 : vector<16x128xf32>
    %cst_288 = arith.constant 0.000000e+00 : f32
    %809 = vector.broadcast %cst_288 : f32 to vector<16x128xf32>
    %810 = arith.subf %809, %808 : vector<16x128xf32>
    %811 = math.exp %810 : vector<16x128xf32>
    %812 = math.log1p %811 : vector<16x128xf32>
    %813 = arith.addf %807, %812 : vector<16x128xf32>
    %cst_289 = arith.constant 0.693147182 : f32
    %814 = vector.broadcast %cst_289 : f32 to vector<16x128xf32>
    %815 = arith.subf %813, %814 : vector<16x128xf32>
    %816 = arith.truncf %22 : vector<8x16xf32> to vector<8x16xbf16>
    %817 = arith.truncf %815 : vector<16x128xf32> to vector<16x128xbf16>
    %cst_290 = arith.constant dense<0.000000e+00> : vector<8x128xf32>
    %818 = tpu.matmul %816, %817, %cst_290 {dimension_numbers = #tpu.dot_dimension_numbers<[1], [0], [0], [1], [0, 0, 1, 1], [], []>} : vector<8x16xbf16>, vector<16x128xbf16>, vector<8x128xf32> -> vector<8x128xf32>
    %819 = vector.broadcast %28 : vector<8x1xf32> to vector<8x128xf32>
    %820 = arith.mulf %818, %819 : vector<8x128xf32>
    %cst_291 = arith.constant 0.000000e+00 : f32
    %821 = vector.broadcast %cst_291 : f32 to vector<8x1xf32>
    %822 = vector.broadcast %747 : vector<1x128xf32> to vector<8x128xf32>
    %823 = vector.broadcast %821 : vector<8x1xf32> to vector<8x128xf32>
    %824 = arith.addf %822, %823 : vector<8x128xf32>
    %825 = tpu.concatenate %745, %820, %824 in 1 : vector<8x128xf32>, vector<8x128xf32>, vector<8x128xf32> -> vector<8x384xf32>
    %c4_292 = arith.constant 4 : index
    %c0_293 = arith.constant 0 : index
    %c0_294 = arith.constant 0 : index
    %826 = vector.load %arg12[%c4_292, %c0_293, %c0_294] : memref<6x384x128xbf16, #tpu.memory_space<vmem>>, vector<1x384x128xbf16>
    %827 = vector.shape_cast %826 : vector<1x384x128xbf16> to vector<384x128xbf16>
    %828 = arith.truncf %825 : vector<8x384xf32> to vector<8x384xbf16>
    %cst_295 = arith.constant dense<0.000000e+00> : vector<8x128xf32>
    %829 = tpu.matmul %828, %827, %cst_295 {dimension_numbers = #tpu.dot_dimension_numbers<[1], [0], [0], [1], [0, 0, 1, 1], [], []>} : vector<8x384xbf16>, vector<384x128xbf16>, vector<8x128xf32> -> vector<8x128xf32>
    %c21 = arith.constant 21 : index
    %c0_296 = arith.constant 0 : index
    %830 = vector.load %arg14[%c21, %c0_296] : memref<27x128xf32, #tpu.memory_space<vmem>>, vector<1x128xf32>
    %831 = vector.shape_cast %830 : vector<1x128xf32> to vector<128xf32>
    %832 = vector.shape_cast %831 : vector<128xf32> to vector<1x128xf32>
    %833 = vector.broadcast %832 : vector<1x128xf32> to vector<8x128xf32>
    %834 = arith.addf %829, %833 : vector<8x128xf32>
    %cst_297 = arith.constant 0.000000e+00 : f32
    %835 = vector.broadcast %cst_297 : f32 to vector<8x128xf32>
    %836 = arith.maximumf %834, %835 : vector<8x128xf32>
    %837 = math.absf %834 : vector<8x128xf32>
    %cst_298 = arith.constant 0.000000e+00 : f32
    %838 = vector.broadcast %cst_298 : f32 to vector<8x128xf32>
    %839 = arith.subf %838, %837 : vector<8x128xf32>
    %840 = math.exp %839 : vector<8x128xf32>
    %841 = math.log1p %840 : vector<8x128xf32>
    %842 = arith.addf %836, %841 : vector<8x128xf32>
    %cst_299 = arith.constant 0.693147182 : f32
    %843 = vector.broadcast %cst_299 : f32 to vector<8x128xf32>
    %844 = arith.subf %842, %843 : vector<8x128xf32>
    %c14_300 = arith.constant 14 : index
    %c0_301 = arith.constant 0 : index
    %c0_302 = arith.constant 0 : index
    %845 = vector.load %arg13[%c14_300, %c0_301, %c0_302] : memref<18x128x128xbf16, #tpu.memory_space<vmem>>, vector<1x128x128xbf16>
    %846 = vector.shape_cast %845 : vector<1x128x128xbf16> to vector<128x128xbf16>
    %847 = arith.truncf %844 : vector<8x128xf32> to vector<8x128xbf16>
    %cst_303 = arith.constant dense<0.000000e+00> : vector<8x128xf32>
    %848 = tpu.matmul %847, %846, %cst_303 {dimension_numbers = #tpu.dot_dimension_numbers<[1], [0], [0], [1], [0, 0, 1, 1], [], []>} : vector<8x128xbf16>, vector<128x128xbf16>, vector<8x128xf32> -> vector<8x128xf32>
    %c22 = arith.constant 22 : index
    %c0_304 = arith.constant 0 : index
    %849 = vector.load %arg14[%c22, %c0_304] : memref<27x128xf32, #tpu.memory_space<vmem>>, vector<1x128xf32>
    %850 = vector.shape_cast %849 : vector<1x128xf32> to vector<128xf32>
    %851 = vector.shape_cast %850 : vector<128xf32> to vector<1x128xf32>
    %852 = vector.broadcast %851 : vector<1x128xf32> to vector<8x128xf32>
    %853 = arith.addf %848, %852 : vector<8x128xf32>
    %cst_305 = arith.constant 0.000000e+00 : f32
    %854 = vector.broadcast %cst_305 : f32 to vector<8x128xf32>
    %855 = arith.maximumf %853, %854 : vector<8x128xf32>
    %856 = math.absf %853 : vector<8x128xf32>
    %cst_306 = arith.constant 0.000000e+00 : f32
    %857 = vector.broadcast %cst_306 : f32 to vector<8x128xf32>
    %858 = arith.subf %857, %856 : vector<8x128xf32>
    %859 = math.exp %858 : vector<8x128xf32>
    %860 = math.log1p %859 : vector<8x128xf32>
    %861 = arith.addf %855, %860 : vector<8x128xf32>
    %cst_307 = arith.constant 0.693147182 : f32
    %862 = vector.broadcast %cst_307 : f32 to vector<8x128xf32>
    %863 = arith.subf %861, %862 : vector<8x128xf32>
    %c15_308 = arith.constant 15 : index
    %c0_309 = arith.constant 0 : index
    %c0_310 = arith.constant 0 : index
    %864 = vector.load %arg13[%c15_308, %c0_309, %c0_310] : memref<18x128x128xbf16, #tpu.memory_space<vmem>>, vector<1x128x128xbf16>
    %865 = vector.shape_cast %864 : vector<1x128x128xbf16> to vector<128x128xbf16>
    %866 = arith.truncf %863 : vector<8x128xf32> to vector<8x128xbf16>
    %cst_311 = arith.constant dense<0.000000e+00> : vector<8x128xf32>
    %867 = tpu.matmul %866, %865, %cst_311 {dimension_numbers = #tpu.dot_dimension_numbers<[1], [0], [0], [1], [0, 0, 1, 1], [], []>} : vector<8x128xbf16>, vector<128x128xbf16>, vector<8x128xf32> -> vector<8x128xf32>
    %c23 = arith.constant 23 : index
    %c0_312 = arith.constant 0 : index
    %868 = vector.load %arg14[%c23, %c0_312] : memref<27x128xf32, #tpu.memory_space<vmem>>, vector<1x128xf32>
    %869 = vector.shape_cast %868 : vector<1x128xf32> to vector<128xf32>
    %870 = vector.shape_cast %869 : vector<128xf32> to vector<1x128xf32>
    %871 = vector.broadcast %870 : vector<1x128xf32> to vector<8x128xf32>
    %872 = arith.addf %867, %871 : vector<8x128xf32>
    %cst_313 = arith.constant 0.000000e+00 : f32
    %873 = vector.broadcast %cst_313 : f32 to vector<8x128xf32>
    %874 = arith.maximumf %872, %873 : vector<8x128xf32>
    %875 = math.absf %872 : vector<8x128xf32>
    %cst_314 = arith.constant 0.000000e+00 : f32
    %876 = vector.broadcast %cst_314 : f32 to vector<8x128xf32>
    %877 = arith.subf %876, %875 : vector<8x128xf32>
    %878 = math.exp %877 : vector<8x128xf32>
    %879 = math.log1p %878 : vector<8x128xf32>
    %880 = arith.addf %874, %879 : vector<8x128xf32>
    %cst_315 = arith.constant 0.693147182 : f32
    %881 = vector.broadcast %cst_315 : f32 to vector<8x128xf32>
    %882 = arith.subf %880, %881 : vector<8x128xf32>
    %883 = arith.truncf %43 : vector<1x8xf32> to vector<1x8xbf16>
    %884 = arith.truncf %882 : vector<8x128xf32> to vector<8x128xbf16>
    %cst_316 = arith.constant dense<0.000000e+00> : vector<1x128xf32>
    %885 = tpu.matmul %883, %884, %cst_316 {dimension_numbers = #tpu.dot_dimension_numbers<[1], [0], [0], [1], [0, 0, 1, 1], [], []>} : vector<1x8xbf16>, vector<8x128xbf16>, vector<1x128xf32> -> vector<1x128xf32>
    %cst_317 = arith.constant 0.166666672 : f32
    %886 = vector.broadcast %cst_317 : f32 to vector<1x128xf32>
    %887 = arith.mulf %885, %886 : vector<1x128xf32>
    %888 = arith.truncf %48 : vector<1x16xf32> to vector<1x16xbf16>
    %889 = arith.truncf %815 : vector<16x128xf32> to vector<16x128xbf16>
    %cst_318 = arith.constant dense<0.000000e+00> : vector<1x128xf32>
    %890 = tpu.matmul %888, %889, %cst_318 {dimension_numbers = #tpu.dot_dimension_numbers<[1], [0], [0], [1], [0, 0, 1, 1], [], []>} : vector<1x16xbf16>, vector<16x128xbf16>, vector<1x128xf32> -> vector<1x128xf32>
    %cst_319 = arith.constant 0.0833333358 : f32
    %891 = vector.broadcast %cst_319 : f32 to vector<1x128xf32>
    %892 = arith.mulf %890, %891 : vector<1x128xf32>
    %893 = tpu.concatenate %747, %887, %892 in 1 : vector<1x128xf32>, vector<1x128xf32>, vector<1x128xf32> -> vector<1x384xf32>
    %c5_320 = arith.constant 5 : index
    %c0_321 = arith.constant 0 : index
    %c0_322 = arith.constant 0 : index
    %894 = vector.load %arg12[%c5_320, %c0_321, %c0_322] : memref<6x384x128xbf16, #tpu.memory_space<vmem>>, vector<1x384x128xbf16>
    %895 = vector.shape_cast %894 : vector<1x384x128xbf16> to vector<384x128xbf16>
    %896 = arith.truncf %893 : vector<1x384xf32> to vector<1x384xbf16>
    %cst_323 = arith.constant dense<0.000000e+00> : vector<1x128xf32>
    %897 = tpu.matmul %896, %895, %cst_323 {dimension_numbers = #tpu.dot_dimension_numbers<[1], [0], [0], [1], [0, 0, 1, 1], [], []>} : vector<1x384xbf16>, vector<384x128xbf16>, vector<1x128xf32> -> vector<1x128xf32>
    %c24 = arith.constant 24 : index
    %c0_324 = arith.constant 0 : index
    %898 = vector.load %arg14[%c24, %c0_324] : memref<27x128xf32, #tpu.memory_space<vmem>>, vector<1x128xf32>
    %899 = vector.shape_cast %898 : vector<1x128xf32> to vector<128xf32>
    %900 = vector.shape_cast %899 : vector<128xf32> to vector<1x128xf32>
    %901 = arith.addf %897, %900 : vector<1x128xf32>
    %cst_325 = arith.constant 0.000000e+00 : f32
    %902 = vector.broadcast %cst_325 : f32 to vector<1x128xf32>
    %903 = arith.maximumf %901, %902 : vector<1x128xf32>
    %904 = math.absf %901 : vector<1x128xf32>
    %cst_326 = arith.constant 0.000000e+00 : f32
    %905 = vector.broadcast %cst_326 : f32 to vector<1x128xf32>
    %906 = arith.subf %905, %904 : vector<1x128xf32>
    %907 = math.exp %906 : vector<1x128xf32>
    %908 = math.log1p %907 : vector<1x128xf32>
    %909 = arith.addf %903, %908 : vector<1x128xf32>
    %cst_327 = arith.constant 0.693147182 : f32
    %910 = vector.broadcast %cst_327 : f32 to vector<1x128xf32>
    %911 = arith.subf %909, %910 : vector<1x128xf32>
    %c16_328 = arith.constant 16 : index
    %c0_329 = arith.constant 0 : index
    %c0_330 = arith.constant 0 : index
    %912 = vector.load %arg13[%c16_328, %c0_329, %c0_330] : memref<18x128x128xbf16, #tpu.memory_space<vmem>>, vector<1x128x128xbf16>
    %913 = vector.shape_cast %912 : vector<1x128x128xbf16> to vector<128x128xbf16>
    %914 = arith.truncf %911 : vector<1x128xf32> to vector<1x128xbf16>
    %cst_331 = arith.constant dense<0.000000e+00> : vector<1x128xf32>
    %915 = tpu.matmul %914, %913, %cst_331 {dimension_numbers = #tpu.dot_dimension_numbers<[1], [0], [0], [1], [0, 0, 1, 1], [], []>} : vector<1x128xbf16>, vector<128x128xbf16>, vector<1x128xf32> -> vector<1x128xf32>
    %c25 = arith.constant 25 : index
    %c0_332 = arith.constant 0 : index
    %916 = vector.load %arg14[%c25, %c0_332] : memref<27x128xf32, #tpu.memory_space<vmem>>, vector<1x128xf32>
    %917 = vector.shape_cast %916 : vector<1x128xf32> to vector<128xf32>
    %918 = vector.shape_cast %917 : vector<128xf32> to vector<1x128xf32>
    %919 = arith.addf %915, %918 : vector<1x128xf32>
    %cst_333 = arith.constant 0.000000e+00 : f32
    %920 = vector.broadcast %cst_333 : f32 to vector<1x128xf32>
    %921 = arith.maximumf %919, %920 : vector<1x128xf32>
    %922 = math.absf %919 : vector<1x128xf32>
    %cst_334 = arith.constant 0.000000e+00 : f32
    %923 = vector.broadcast %cst_334 : f32 to vector<1x128xf32>
    %924 = arith.subf %923, %922 : vector<1x128xf32>
    %925 = math.exp %924 : vector<1x128xf32>
    %926 = math.log1p %925 : vector<1x128xf32>
    %927 = arith.addf %921, %926 : vector<1x128xf32>
    %cst_335 = arith.constant 0.693147182 : f32
    %928 = vector.broadcast %cst_335 : f32 to vector<1x128xf32>
    %929 = arith.subf %927, %928 : vector<1x128xf32>
    %c17_336 = arith.constant 17 : index
    %c0_337 = arith.constant 0 : index
    %c0_338 = arith.constant 0 : index
    %930 = vector.load %arg13[%c17_336, %c0_337, %c0_338] : memref<18x128x128xbf16, #tpu.memory_space<vmem>>, vector<1x128x128xbf16>
    %931 = vector.shape_cast %930 : vector<1x128x128xbf16> to vector<128x128xbf16>
    %932 = arith.truncf %929 : vector<1x128xf32> to vector<1x128xbf16>
    %cst_339 = arith.constant dense<0.000000e+00> : vector<1x128xf32>
    %933 = tpu.matmul %932, %931, %cst_339 {dimension_numbers = #tpu.dot_dimension_numbers<[1], [0], [0], [1], [0, 0, 1, 1], [], []>} : vector<1x128xbf16>, vector<128x128xbf16>, vector<1x128xf32> -> vector<1x128xf32>
    %c26 = arith.constant 26 : index
    %c0_340 = arith.constant 0 : index
    %934 = vector.load %arg14[%c26, %c0_340] : memref<27x128xf32, #tpu.memory_space<vmem>>, vector<1x128xf32>
    %935 = vector.shape_cast %934 : vector<1x128xf32> to vector<128xf32>
    %936 = vector.shape_cast %935 : vector<128xf32> to vector<1x128xf32>
    %937 = arith.addf %933, %936 : vector<1x128xf32>
    %cst_341 = arith.constant 0.000000e+00 : f32
    %938 = vector.broadcast %cst_341 : f32 to vector<1x128xf32>
    %939 = arith.maximumf %937, %938 : vector<1x128xf32>
    %940 = math.absf %937 : vector<1x128xf32>
    %cst_342 = arith.constant 0.000000e+00 : f32
    %941 = vector.broadcast %cst_342 : f32 to vector<1x128xf32>
    %942 = arith.subf %941, %940 : vector<1x128xf32>
    %943 = math.exp %942 : vector<1x128xf32>
    %944 = math.log1p %943 : vector<1x128xf32>
    %945 = arith.addf %939, %944 : vector<1x128xf32>
    %cst_343 = arith.constant 0.693147182 : f32
    %946 = vector.broadcast %cst_343 : f32 to vector<1x128xf32>
    %947 = arith.subf %945, %946 : vector<1x128xf32>
    %948 = arith.addf %815, %666 : vector<16x128xf32>
    %949 = arith.addf %882, %667 : vector<8x128xf32>
    %950 = arith.addf %947, %668 : vector<1x128xf32>
    %c0_344 = arith.constant 0 : index
    %c0_345 = arith.constant 0 : index
    %c0_346 = arith.constant 0 : index
    %951 = vector.load %arg15[%c0_344, %c0_345, %c0_346] : memref<6x128x512xbf16, #tpu.memory_space<vmem>>, vector<1x128x512xbf16>
    %952 = vector.shape_cast %951 : vector<1x128x512xbf16> to vector<128x512xbf16>
    %c1_347 = arith.constant 1 : index
    %c0_348 = arith.constant 0 : index
    %c0_349 = arith.constant 0 : index
    %953 = vector.load %arg15[%c1_347, %c0_348, %c0_349] : memref<6x128x512xbf16, #tpu.memory_space<vmem>>, vector<1x128x512xbf16>
    %954 = vector.shape_cast %953 : vector<1x128x512xbf16> to vector<128x512xbf16>
    %c2_350 = arith.constant 2 : index
    %c0_351 = arith.constant 0 : index
    %c0_352 = arith.constant 0 : index
    %955 = vector.load %arg15[%c2_350, %c0_351, %c0_352] : memref<6x128x512xbf16, #tpu.memory_space<vmem>>, vector<1x128x512xbf16>
    %956 = vector.shape_cast %955 : vector<1x128x512xbf16> to vector<128x512xbf16>
    %c0_353 = arith.constant 0 : index
    %c0_354 = arith.constant 0 : index
    %957 = vector.load %arg16[%c0_353, %c0_354] : memref<2x512xf32, #tpu.memory_space<vmem>>, vector<1x512xf32>
    %958 = vector.shape_cast %957 : vector<1x512xf32> to vector<512xf32>
    %cst_355 = arith.constant 0.000000e+00 : f32
    %959 = vector.broadcast %cst_355 : f32 to vector<1x128xf32>
    %cst_356 = arith.constant 0.000000e+00 : f32
    %960 = vector.broadcast %cst_356 : f32 to vector<1x128xf32>
    %cst_357 = arith.constant 0.000000e+00 : f32
    %961 = vector.broadcast %cst_357 : f32 to vector<1x128xf32>
    %cst_358 = arith.constant 0.000000e+00 : f32
    %962 = vector.broadcast %cst_358 : f32 to vector<1x128xf32>
    %963 = arith.truncf %961 : vector<1x128xf32> to vector<1x128xbf16>
    %cst_359 = arith.constant dense<0.000000e+00> : vector<1x512xf32>
    %964 = tpu.matmul %963, %952, %cst_359 {dimension_numbers = #tpu.dot_dimension_numbers<[1], [0], [0], [1], [0, 0, 1, 1], [], []>} : vector<1x128xbf16>, vector<128x512xbf16>, vector<1x512xf32> -> vector<1x512xf32>
    %965 = arith.truncf %962 : vector<1x128xf32> to vector<1x128xbf16>
    %cst_360 = arith.constant dense<0.000000e+00> : vector<1x512xf32>
    %966 = tpu.matmul %965, %954, %cst_360 {dimension_numbers = #tpu.dot_dimension_numbers<[1], [0], [0], [1], [0, 0, 1, 1], [], []>} : vector<1x128xbf16>, vector<128x512xbf16>, vector<1x512xf32> -> vector<1x512xf32>
    %967 = arith.addf %964, %966 : vector<1x512xf32>
    %968 = arith.truncf %959 : vector<1x128xf32> to vector<1x128xbf16>
    %cst_361 = arith.constant dense<0.000000e+00> : vector<1x512xf32>
    %969 = tpu.matmul %968, %956, %cst_361 {dimension_numbers = #tpu.dot_dimension_numbers<[1], [0], [0], [1], [0, 0, 1, 1], [], []>} : vector<1x128xbf16>, vector<128x512xbf16>, vector<1x512xf32> -> vector<1x512xf32>
    %970 = arith.addf %967, %969 : vector<1x512xf32>
    %971 = vector.shape_cast %958 : vector<512xf32> to vector<1x512xf32>
    %972 = arith.addf %970, %971 : vector<1x512xf32>
    %973 = vector.extract_strided_slice %972 {offsets = [0, 0], sizes = [1, 128], strides = [1, 1]} : vector<1x512xf32> to vector<1x128xf32>
    %974 = arith.negf %973 : vector<1x128xf32>
    %975 = math.exp %974 : vector<1x128xf32>
    %cst_362 = arith.constant 1.000000e+00 : f32
    %976 = vector.broadcast %cst_362 : f32 to vector<1x128xf32>
    %977 = arith.addf %976, %975 : vector<1x128xf32>
    %978 = arith.divf %976, %977 : vector<1x128xf32>
    %979 = vector.extract_strided_slice %972 {offsets = [0, 128], sizes = [1, 128], strides = [1, 1]} : vector<1x512xf32> to vector<1x128xf32>
    %980 = arith.negf %979 : vector<1x128xf32>
    %981 = math.exp %980 : vector<1x128xf32>
    %cst_363 = arith.constant 1.000000e+00 : f32
    %982 = vector.broadcast %cst_363 : f32 to vector<1x128xf32>
    %983 = arith.addf %982, %981 : vector<1x128xf32>
    %984 = arith.divf %982, %983 : vector<1x128xf32>
    %985 = vector.extract_strided_slice %972 {offsets = [0, 256], sizes = [1, 128], strides = [1, 1]} : vector<1x512xf32> to vector<1x128xf32>
    %986 = math.tanh %985 : vector<1x128xf32>
    %987 = vector.extract_strided_slice %972 {offsets = [0, 384], sizes = [1, 128], strides = [1, 1]} : vector<1x512xf32> to vector<1x128xf32>
    %988 = arith.negf %987 : vector<1x128xf32>
    %989 = math.exp %988 : vector<1x128xf32>
    %cst_364 = arith.constant 1.000000e+00 : f32
    %990 = vector.broadcast %cst_364 : f32 to vector<1x128xf32>
    %991 = arith.addf %990, %989 : vector<1x128xf32>
    %992 = arith.divf %990, %991 : vector<1x128xf32>
    %993 = arith.mulf %984, %960 : vector<1x128xf32>
    %994 = arith.mulf %978, %986 : vector<1x128xf32>
    %995 = arith.addf %993, %994 : vector<1x128xf32>
    %996 = math.tanh %995 : vector<1x128xf32>
    %997 = arith.mulf %992, %996 : vector<1x128xf32>
    %998 = vector.broadcast %997 : vector<1x128xf32> to vector<8x128xf32>
    %999 = arith.mulf %949, %998 : vector<8x128xf32>
    %cst_365 = arith.constant dense<0.000000e+00> : vector<8xf32>
    %1000 = vector.multi_reduction <add>, %999, %cst_365 [1] : vector<8x128xf32> to vector<8xf32>
    %1001 = vector.shape_cast %1000 : vector<8xf32> to vector<8x1xf32>
    %cst_366 = arith.constant 0.000000e+00 : f32
    %1002 = vector.broadcast %cst_366 : f32 to vector<8x1xf32>
    %1003 = arith.cmpf ogt, %33, %1002 : vector<8x1xf32>
    %cst_367 = arith.constant -1.000000e+30 : f32
    %1004 = vector.broadcast %cst_367 : f32 to vector<8x1xf32>
    %1005 = arith.select %1003, %1001, %1004 : vector<8x1xi1>, vector<8x1xf32>
    %cst_368 = arith.constant dense<0xFF800000> : vector<1xf32>
    %1006 = vector.multi_reduction <maximumf>, %1005, %cst_368 [0] : vector<8x1xf32> to vector<1xf32>
    %1007 = vector.shape_cast %1006 : vector<1xf32> to vector<1x1xf32>
    %1008 = vector.broadcast %1007 : vector<1x1xf32> to vector<8x1xf32>
    %1009 = arith.subf %1005, %1008 : vector<8x1xf32>
    %1010 = math.exp %1009 : vector<8x1xf32>
    %1011 = arith.mulf %1010, %33 : vector<8x1xf32>
    %cst_369 = arith.constant dense<0.000000e+00> : vector<1xf32>
    %1012 = vector.multi_reduction <add>, %1011, %cst_369 [0] : vector<8x1xf32> to vector<1xf32>
    %1013 = vector.shape_cast %1012 : vector<1xf32> to vector<1x1xf32>
    %1014 = vector.broadcast %1013 : vector<1x1xf32> to vector<8x1xf32>
    %1015 = arith.divf %1011, %1014 : vector<8x1xf32>
    %1016 = vector.broadcast %1015 : vector<8x1xf32> to vector<8x128xf32>
    %1017 = arith.mulf %949, %1016 : vector<8x128xf32>
    %cst_370 = arith.constant dense<0.000000e+00> : vector<128xf32>
    %1018 = vector.multi_reduction <add>, %1017, %cst_370 [0] : vector<8x128xf32> to vector<128xf32>
    %1019 = vector.shape_cast %1018 : vector<128xf32> to vector<1x128xf32>
    %1020 = arith.truncf %997 : vector<1x128xf32> to vector<1x128xbf16>
    %cst_371 = arith.constant dense<0.000000e+00> : vector<1x512xf32>
    %1021 = tpu.matmul %1020, %952, %cst_371 {dimension_numbers = #tpu.dot_dimension_numbers<[1], [0], [0], [1], [0, 0, 1, 1], [], []>} : vector<1x128xbf16>, vector<128x512xbf16>, vector<1x512xf32> -> vector<1x512xf32>
    %1022 = arith.truncf %1019 : vector<1x128xf32> to vector<1x128xbf16>
    %cst_372 = arith.constant dense<0.000000e+00> : vector<1x512xf32>
    %1023 = tpu.matmul %1022, %954, %cst_372 {dimension_numbers = #tpu.dot_dimension_numbers<[1], [0], [0], [1], [0, 0, 1, 1], [], []>} : vector<1x128xbf16>, vector<128x512xbf16>, vector<1x512xf32> -> vector<1x512xf32>
    %1024 = arith.addf %1021, %1023 : vector<1x512xf32>
    %1025 = arith.truncf %997 : vector<1x128xf32> to vector<1x128xbf16>
    %cst_373 = arith.constant dense<0.000000e+00> : vector<1x512xf32>
    %1026 = tpu.matmul %1025, %956, %cst_373 {dimension_numbers = #tpu.dot_dimension_numbers<[1], [0], [0], [1], [0, 0, 1, 1], [], []>} : vector<1x128xbf16>, vector<128x512xbf16>, vector<1x512xf32> -> vector<1x512xf32>
    %1027 = arith.addf %1024, %1026 : vector<1x512xf32>
    %1028 = vector.shape_cast %958 : vector<512xf32> to vector<1x512xf32>
    %1029 = arith.addf %1027, %1028 : vector<1x512xf32>
    %1030 = vector.extract_strided_slice %1029 {offsets = [0, 0], sizes = [1, 128], strides = [1, 1]} : vector<1x512xf32> to vector<1x128xf32>
    %1031 = arith.negf %1030 : vector<1x128xf32>
    %1032 = math.exp %1031 : vector<1x128xf32>
    %cst_374 = arith.constant 1.000000e+00 : f32
    %1033 = vector.broadcast %cst_374 : f32 to vector<1x128xf32>
    %1034 = arith.addf %1033, %1032 : vector<1x128xf32>
    %1035 = arith.divf %1033, %1034 : vector<1x128xf32>
    %1036 = vector.extract_strided_slice %1029 {offsets = [0, 128], sizes = [1, 128], strides = [1, 1]} : vector<1x512xf32> to vector<1x128xf32>
    %1037 = arith.negf %1036 : vector<1x128xf32>
    %1038 = math.exp %1037 : vector<1x128xf32>
    %cst_375 = arith.constant 1.000000e+00 : f32
    %1039 = vector.broadcast %cst_375 : f32 to vector<1x128xf32>
    %1040 = arith.addf %1039, %1038 : vector<1x128xf32>
    %1041 = arith.divf %1039, %1040 : vector<1x128xf32>
    %1042 = vector.extract_strided_slice %1029 {offsets = [0, 256], sizes = [1, 128], strides = [1, 1]} : vector<1x512xf32> to vector<1x128xf32>
    %1043 = math.tanh %1042 : vector<1x128xf32>
    %1044 = vector.extract_strided_slice %1029 {offsets = [0, 384], sizes = [1, 128], strides = [1, 1]} : vector<1x512xf32> to vector<1x128xf32>
    %1045 = arith.negf %1044 : vector<1x128xf32>
    %1046 = math.exp %1045 : vector<1x128xf32>
    %cst_376 = arith.constant 1.000000e+00 : f32
    %1047 = vector.broadcast %cst_376 : f32 to vector<1x128xf32>
    %1048 = arith.addf %1047, %1046 : vector<1x128xf32>
    %1049 = arith.divf %1047, %1048 : vector<1x128xf32>
    %1050 = arith.mulf %1041, %995 : vector<1x128xf32>
    %1051 = arith.mulf %1035, %1043 : vector<1x128xf32>
    %1052 = arith.addf %1050, %1051 : vector<1x128xf32>
    %1053 = math.tanh %1052 : vector<1x128xf32>
    %1054 = arith.mulf %1049, %1053 : vector<1x128xf32>
    %1055 = vector.broadcast %1054 : vector<1x128xf32> to vector<8x128xf32>
    %1056 = arith.mulf %949, %1055 : vector<8x128xf32>
    %cst_377 = arith.constant dense<0.000000e+00> : vector<8xf32>
    %1057 = vector.multi_reduction <add>, %1056, %cst_377 [1] : vector<8x128xf32> to vector<8xf32>
    %1058 = vector.shape_cast %1057 : vector<8xf32> to vector<8x1xf32>
    %cst_378 = arith.constant 0.000000e+00 : f32
    %1059 = vector.broadcast %cst_378 : f32 to vector<8x1xf32>
    %1060 = arith.cmpf ogt, %33, %1059 : vector<8x1xf32>
    %cst_379 = arith.constant -1.000000e+30 : f32
    %1061 = vector.broadcast %cst_379 : f32 to vector<8x1xf32>
    %1062 = arith.select %1060, %1058, %1061 : vector<8x1xi1>, vector<8x1xf32>
    %cst_380 = arith.constant dense<0xFF800000> : vector<1xf32>
    %1063 = vector.multi_reduction <maximumf>, %1062, %cst_380 [0] : vector<8x1xf32> to vector<1xf32>
    %1064 = vector.shape_cast %1063 : vector<1xf32> to vector<1x1xf32>
    %1065 = vector.broadcast %1064 : vector<1x1xf32> to vector<8x1xf32>
    %1066 = arith.subf %1062, %1065 : vector<8x1xf32>
    %1067 = math.exp %1066 : vector<8x1xf32>
    %1068 = arith.mulf %1067, %33 : vector<8x1xf32>
    %cst_381 = arith.constant dense<0.000000e+00> : vector<1xf32>
    %1069 = vector.multi_reduction <add>, %1068, %cst_381 [0] : vector<8x1xf32> to vector<1xf32>
    %1070 = vector.shape_cast %1069 : vector<1xf32> to vector<1x1xf32>
    %1071 = vector.broadcast %1070 : vector<1x1xf32> to vector<8x1xf32>
    %1072 = arith.divf %1068, %1071 : vector<8x1xf32>
    %1073 = vector.broadcast %1072 : vector<8x1xf32> to vector<8x128xf32>
    %1074 = arith.mulf %949, %1073 : vector<8x128xf32>
    %cst_382 = arith.constant dense<0.000000e+00> : vector<128xf32>
    %1075 = vector.multi_reduction <add>, %1074, %cst_382 [0] : vector<8x128xf32> to vector<128xf32>
    %1076 = vector.shape_cast %1075 : vector<128xf32> to vector<1x128xf32>
    %c3_383 = arith.constant 3 : index
    %c0_384 = arith.constant 0 : index
    %c0_385 = arith.constant 0 : index
    %1077 = vector.load %arg15[%c3_383, %c0_384, %c0_385] : memref<6x128x512xbf16, #tpu.memory_space<vmem>>, vector<1x128x512xbf16>
    %1078 = vector.shape_cast %1077 : vector<1x128x512xbf16> to vector<128x512xbf16>
    %c4_386 = arith.constant 4 : index
    %c0_387 = arith.constant 0 : index
    %c0_388 = arith.constant 0 : index
    %1079 = vector.load %arg15[%c4_386, %c0_387, %c0_388] : memref<6x128x512xbf16, #tpu.memory_space<vmem>>, vector<1x128x512xbf16>
    %1080 = vector.shape_cast %1079 : vector<1x128x512xbf16> to vector<128x512xbf16>
    %c5_389 = arith.constant 5 : index
    %c0_390 = arith.constant 0 : index
    %c0_391 = arith.constant 0 : index
    %1081 = vector.load %arg15[%c5_389, %c0_390, %c0_391] : memref<6x128x512xbf16, #tpu.memory_space<vmem>>, vector<1x128x512xbf16>
    %1082 = vector.shape_cast %1081 : vector<1x128x512xbf16> to vector<128x512xbf16>
    %c1_392 = arith.constant 1 : index
    %c0_393 = arith.constant 0 : index
    %1083 = vector.load %arg16[%c1_392, %c0_393] : memref<2x512xf32, #tpu.memory_space<vmem>>, vector<1x512xf32>
    %1084 = vector.shape_cast %1083 : vector<1x512xf32> to vector<512xf32>
    %cst_394 = arith.constant 0.000000e+00 : f32
    %1085 = vector.broadcast %cst_394 : f32 to vector<1x128xf32>
    %cst_395 = arith.constant 0.000000e+00 : f32
    %1086 = vector.broadcast %cst_395 : f32 to vector<1x128xf32>
    %cst_396 = arith.constant 0.000000e+00 : f32
    %1087 = vector.broadcast %cst_396 : f32 to vector<1x128xf32>
    %cst_397 = arith.constant 0.000000e+00 : f32
    %1088 = vector.broadcast %cst_397 : f32 to vector<1x128xf32>
    %1089 = arith.truncf %1087 : vector<1x128xf32> to vector<1x128xbf16>
    %cst_398 = arith.constant dense<0.000000e+00> : vector<1x512xf32>
    %1090 = tpu.matmul %1089, %1078, %cst_398 {dimension_numbers = #tpu.dot_dimension_numbers<[1], [0], [0], [1], [0, 0, 1, 1], [], []>} : vector<1x128xbf16>, vector<128x512xbf16>, vector<1x512xf32> -> vector<1x512xf32>
    %1091 = arith.truncf %1088 : vector<1x128xf32> to vector<1x128xbf16>
    %cst_399 = arith.constant dense<0.000000e+00> : vector<1x512xf32>
    %1092 = tpu.matmul %1091, %1080, %cst_399 {dimension_numbers = #tpu.dot_dimension_numbers<[1], [0], [0], [1], [0, 0, 1, 1], [], []>} : vector<1x128xbf16>, vector<128x512xbf16>, vector<1x512xf32> -> vector<1x512xf32>
    %1093 = arith.addf %1090, %1092 : vector<1x512xf32>
    %1094 = arith.truncf %1085 : vector<1x128xf32> to vector<1x128xbf16>
    %cst_400 = arith.constant dense<0.000000e+00> : vector<1x512xf32>
    %1095 = tpu.matmul %1094, %1082, %cst_400 {dimension_numbers = #tpu.dot_dimension_numbers<[1], [0], [0], [1], [0, 0, 1, 1], [], []>} : vector<1x128xbf16>, vector<128x512xbf16>, vector<1x512xf32> -> vector<1x512xf32>
    %1096 = arith.addf %1093, %1095 : vector<1x512xf32>
    %1097 = vector.shape_cast %1084 : vector<512xf32> to vector<1x512xf32>
    %1098 = arith.addf %1096, %1097 : vector<1x512xf32>
    %1099 = vector.extract_strided_slice %1098 {offsets = [0, 0], sizes = [1, 128], strides = [1, 1]} : vector<1x512xf32> to vector<1x128xf32>
    %1100 = arith.negf %1099 : vector<1x128xf32>
    %1101 = math.exp %1100 : vector<1x128xf32>
    %cst_401 = arith.constant 1.000000e+00 : f32
    %1102 = vector.broadcast %cst_401 : f32 to vector<1x128xf32>
    %1103 = arith.addf %1102, %1101 : vector<1x128xf32>
    %1104 = arith.divf %1102, %1103 : vector<1x128xf32>
    %1105 = vector.extract_strided_slice %1098 {offsets = [0, 128], sizes = [1, 128], strides = [1, 1]} : vector<1x512xf32> to vector<1x128xf32>
    %1106 = arith.negf %1105 : vector<1x128xf32>
    %1107 = math.exp %1106 : vector<1x128xf32>
    %cst_402 = arith.constant 1.000000e+00 : f32
    %1108 = vector.broadcast %cst_402 : f32 to vector<1x128xf32>
    %1109 = arith.addf %1108, %1107 : vector<1x128xf32>
    %1110 = arith.divf %1108, %1109 : vector<1x128xf32>
    %1111 = vector.extract_strided_slice %1098 {offsets = [0, 256], sizes = [1, 128], strides = [1, 1]} : vector<1x512xf32> to vector<1x128xf32>
    %1112 = math.tanh %1111 : vector<1x128xf32>
    %1113 = vector.extract_strided_slice %1098 {offsets = [0, 384], sizes = [1, 128], strides = [1, 1]} : vector<1x512xf32> to vector<1x128xf32>
    %1114 = arith.negf %1113 : vector<1x128xf32>
    %1115 = math.exp %1114 : vector<1x128xf32>
    %cst_403 = arith.constant 1.000000e+00 : f32
    %1116 = vector.broadcast %cst_403 : f32 to vector<1x128xf32>
    %1117 = arith.addf %1116, %1115 : vector<1x128xf32>
    %1118 = arith.divf %1116, %1117 : vector<1x128xf32>
    %1119 = arith.mulf %1110, %1086 : vector<1x128xf32>
    %1120 = arith.mulf %1104, %1112 : vector<1x128xf32>
    %1121 = arith.addf %1119, %1120 : vector<1x128xf32>
    %1122 = math.tanh %1121 : vector<1x128xf32>
    %1123 = arith.mulf %1118, %1122 : vector<1x128xf32>
    %1124 = vector.broadcast %1123 : vector<1x128xf32> to vector<16x128xf32>
    %1125 = arith.mulf %948, %1124 : vector<16x128xf32>
    %cst_404 = arith.constant dense<0.000000e+00> : vector<16xf32>
    %1126 = vector.multi_reduction <add>, %1125, %cst_404 [1] : vector<16x128xf32> to vector<16xf32>
    %1127 = vector.shape_cast %1126 : vector<16xf32> to vector<16x1xf32>
    %cst_405 = arith.constant 0.000000e+00 : f32
    %1128 = vector.broadcast %cst_405 : f32 to vector<16x1xf32>
    %1129 = arith.cmpf ogt, %38, %1128 : vector<16x1xf32>
    %cst_406 = arith.constant -1.000000e+30 : f32
    %1130 = vector.broadcast %cst_406 : f32 to vector<16x1xf32>
    %1131 = arith.select %1129, %1127, %1130 : vector<16x1xi1>, vector<16x1xf32>
    %cst_407 = arith.constant dense<0xFF800000> : vector<1xf32>
    %1132 = vector.multi_reduction <maximumf>, %1131, %cst_407 [0] : vector<16x1xf32> to vector<1xf32>
    %1133 = vector.shape_cast %1132 : vector<1xf32> to vector<1x1xf32>
    %1134 = vector.broadcast %1133 : vector<1x1xf32> to vector<16x1xf32>
    %1135 = arith.subf %1131, %1134 : vector<16x1xf32>
    %1136 = math.exp %1135 : vector<16x1xf32>
    %1137 = arith.mulf %1136, %38 : vector<16x1xf32>
    %cst_408 = arith.constant dense<0.000000e+00> : vector<1xf32>
    %1138 = vector.multi_reduction <add>, %1137, %cst_408 [0] : vector<16x1xf32> to vector<1xf32>
    %1139 = vector.shape_cast %1138 : vector<1xf32> to vector<1x1xf32>
    %1140 = vector.broadcast %1139 : vector<1x1xf32> to vector<16x1xf32>
    %1141 = arith.divf %1137, %1140 : vector<16x1xf32>
    %1142 = vector.broadcast %1141 : vector<16x1xf32> to vector<16x128xf32>
    %1143 = arith.mulf %948, %1142 : vector<16x128xf32>
    %cst_409 = arith.constant dense<0.000000e+00> : vector<128xf32>
    %1144 = vector.multi_reduction <add>, %1143, %cst_409 [0] : vector<16x128xf32> to vector<128xf32>
    %1145 = vector.shape_cast %1144 : vector<128xf32> to vector<1x128xf32>
    %1146 = arith.truncf %1123 : vector<1x128xf32> to vector<1x128xbf16>
    %cst_410 = arith.constant dense<0.000000e+00> : vector<1x512xf32>
    %1147 = tpu.matmul %1146, %1078, %cst_410 {dimension_numbers = #tpu.dot_dimension_numbers<[1], [0], [0], [1], [0, 0, 1, 1], [], []>} : vector<1x128xbf16>, vector<128x512xbf16>, vector<1x512xf32> -> vector<1x512xf32>
    %1148 = arith.truncf %1145 : vector<1x128xf32> to vector<1x128xbf16>
    %cst_411 = arith.constant dense<0.000000e+00> : vector<1x512xf32>
    %1149 = tpu.matmul %1148, %1080, %cst_411 {dimension_numbers = #tpu.dot_dimension_numbers<[1], [0], [0], [1], [0, 0, 1, 1], [], []>} : vector<1x128xbf16>, vector<128x512xbf16>, vector<1x512xf32> -> vector<1x512xf32>
    %1150 = arith.addf %1147, %1149 : vector<1x512xf32>
    %1151 = arith.truncf %1123 : vector<1x128xf32> to vector<1x128xbf16>
    %cst_412 = arith.constant dense<0.000000e+00> : vector<1x512xf32>
    %1152 = tpu.matmul %1151, %1082, %cst_412 {dimension_numbers = #tpu.dot_dimension_numbers<[1], [0], [0], [1], [0, 0, 1, 1], [], []>} : vector<1x128xbf16>, vector<128x512xbf16>, vector<1x512xf32> -> vector<1x512xf32>
    %1153 = arith.addf %1150, %1152 : vector<1x512xf32>
    %1154 = vector.shape_cast %1084 : vector<512xf32> to vector<1x512xf32>
    %1155 = arith.addf %1153, %1154 : vector<1x512xf32>
    %1156 = vector.extract_strided_slice %1155 {offsets = [0, 0], sizes = [1, 128], strides = [1, 1]} : vector<1x512xf32> to vector<1x128xf32>
    %1157 = arith.negf %1156 : vector<1x128xf32>
    %1158 = math.exp %1157 : vector<1x128xf32>
    %cst_413 = arith.constant 1.000000e+00 : f32
    %1159 = vector.broadcast %cst_413 : f32 to vector<1x128xf32>
    %1160 = arith.addf %1159, %1158 : vector<1x128xf32>
    %1161 = arith.divf %1159, %1160 : vector<1x128xf32>
    %1162 = vector.extract_strided_slice %1155 {offsets = [0, 128], sizes = [1, 128], strides = [1, 1]} : vector<1x512xf32> to vector<1x128xf32>
    %1163 = arith.negf %1162 : vector<1x128xf32>
    %1164 = math.exp %1163 : vector<1x128xf32>
    %cst_414 = arith.constant 1.000000e+00 : f32
    %1165 = vector.broadcast %cst_414 : f32 to vector<1x128xf32>
    %1166 = arith.addf %1165, %1164 : vector<1x128xf32>
    %1167 = arith.divf %1165, %1166 : vector<1x128xf32>
    %1168 = vector.extract_strided_slice %1155 {offsets = [0, 256], sizes = [1, 128], strides = [1, 1]} : vector<1x512xf32> to vector<1x128xf32>
    %1169 = math.tanh %1168 : vector<1x128xf32>
    %1170 = vector.extract_strided_slice %1155 {offsets = [0, 384], sizes = [1, 128], strides = [1, 1]} : vector<1x512xf32> to vector<1x128xf32>
    %1171 = arith.negf %1170 : vector<1x128xf32>
    %1172 = math.exp %1171 : vector<1x128xf32>
    %cst_415 = arith.constant 1.000000e+00 : f32
    %1173 = vector.broadcast %cst_415 : f32 to vector<1x128xf32>
    %1174 = arith.addf %1173, %1172 : vector<1x128xf32>
    %1175 = arith.divf %1173, %1174 : vector<1x128xf32>
    %1176 = arith.mulf %1167, %1121 : vector<1x128xf32>
    %1177 = arith.mulf %1161, %1169 : vector<1x128xf32>
    %1178 = arith.addf %1176, %1177 : vector<1x128xf32>
    %1179 = math.tanh %1178 : vector<1x128xf32>
    %1180 = arith.mulf %1175, %1179 : vector<1x128xf32>
    %1181 = vector.broadcast %1180 : vector<1x128xf32> to vector<16x128xf32>
    %1182 = arith.mulf %948, %1181 : vector<16x128xf32>
    %cst_416 = arith.constant dense<0.000000e+00> : vector<16xf32>
    %1183 = vector.multi_reduction <add>, %1182, %cst_416 [1] : vector<16x128xf32> to vector<16xf32>
    %1184 = vector.shape_cast %1183 : vector<16xf32> to vector<16x1xf32>
    %cst_417 = arith.constant 0.000000e+00 : f32
    %1185 = vector.broadcast %cst_417 : f32 to vector<16x1xf32>
    %1186 = arith.cmpf ogt, %38, %1185 : vector<16x1xf32>
    %cst_418 = arith.constant -1.000000e+30 : f32
    %1187 = vector.broadcast %cst_418 : f32 to vector<16x1xf32>
    %1188 = arith.select %1186, %1184, %1187 : vector<16x1xi1>, vector<16x1xf32>
    %cst_419 = arith.constant dense<0xFF800000> : vector<1xf32>
    %1189 = vector.multi_reduction <maximumf>, %1188, %cst_419 [0] : vector<16x1xf32> to vector<1xf32>
    %1190 = vector.shape_cast %1189 : vector<1xf32> to vector<1x1xf32>
    %1191 = vector.broadcast %1190 : vector<1x1xf32> to vector<16x1xf32>
    %1192 = arith.subf %1188, %1191 : vector<16x1xf32>
    %1193 = math.exp %1192 : vector<16x1xf32>
    %1194 = arith.mulf %1193, %38 : vector<16x1xf32>
    %cst_420 = arith.constant dense<0.000000e+00> : vector<1xf32>
    %1195 = vector.multi_reduction <add>, %1194, %cst_420 [0] : vector<16x1xf32> to vector<1xf32>
    %1196 = vector.shape_cast %1195 : vector<1xf32> to vector<1x1xf32>
    %1197 = vector.broadcast %1196 : vector<1x1xf32> to vector<16x1xf32>
    %1198 = arith.divf %1194, %1197 : vector<16x1xf32>
    %1199 = vector.broadcast %1198 : vector<16x1xf32> to vector<16x128xf32>
    %1200 = arith.mulf %948, %1199 : vector<16x128xf32>
    %cst_421 = arith.constant dense<0.000000e+00> : vector<128xf32>
    %1201 = vector.multi_reduction <add>, %1200, %cst_421 [0] : vector<16x128xf32> to vector<128xf32>
    %1202 = vector.shape_cast %1201 : vector<128xf32> to vector<1x128xf32>
    %c0_422 = arith.constant 0 : index
    %c0_423 = arith.constant 0 : index
    %1203 = vector.load %arg17[%c0_422, %c0_423] : memref<1x128xf32, #tpu.memory_space<vmem>>, vector<1x128xf32>
    tpu.vector_store %arg17[%c0_422, %c0_423], %1054 {strides = array<i32>} : memref<1x128xf32, #tpu.memory_space<vmem>>, vector<1x128xf32>,
    %c0_424 = arith.constant 0 : index
    %c0_425 = arith.constant 0 : index
    %1204 = vector.load %arg18[%c0_424, %c0_425] : memref<1x128xf32, #tpu.memory_space<vmem>>, vector<1x128xf32>
    tpu.vector_store %arg18[%c0_424, %c0_425], %1076 {strides = array<i32>} : memref<1x128xf32, #tpu.memory_space<vmem>>, vector<1x128xf32>,
    %c0_426 = arith.constant 0 : index
    %c0_427 = arith.constant 0 : index
    %1205 = vector.load %arg19[%c0_426, %c0_427] : memref<1x128xf32, #tpu.memory_space<vmem>>, vector<1x128xf32>
    tpu.vector_store %arg19[%c0_426, %c0_427], %1180 {strides = array<i32>} : memref<1x128xf32, #tpu.memory_space<vmem>>, vector<1x128xf32>,
    %c0_428 = arith.constant 0 : index
    %c0_429 = arith.constant 0 : index
    %1206 = vector.load %arg20[%c0_428, %c0_429] : memref<1x128xf32, #tpu.memory_space<vmem>>, vector<1x128xf32>
    tpu.vector_store %arg20[%c0_428, %c0_429], %1202 {strides = array<i32>} : memref<1x128xf32, #tpu.memory_space<vmem>>, vector<1x128xf32>,
    %c0_430 = arith.constant 0 : index
    %c0_431 = arith.constant 0 : index
    %1207 = vector.load %arg21[%c0_430, %c0_431] : memref<1x128xf32, #tpu.memory_space<vmem>>, vector<1x128xf32>
    tpu.vector_store %arg21[%c0_430, %c0_431], %950 {strides = array<i32>} : memref<1x128xf32, #tpu.memory_space<vmem>>, vector<1x128xf32>,
    return
  }
}

</mosaic_0001>

<bundles_post_ra>
// kernel: feature_extractor_forward.1
= control target key start
LH: loop header
LB: loop body
LE: loop exit
PB: predicated region body
PF: predicated region fallthrough
CT: control target
= control target key end

     0   :  { %s15105_s0 = inlined_call_operand.vmem [shape: s32[8,1], index: 0, kind: input, shape index: {}]   ;;  %s15106_s1 = inlined_call_operand.vmem [shape: s32[16,1], index: 1, kind: input, shape index: {}]   ;;  %s15107_s2 = inlined_call_operand.vmem [shape: s32[16,1], index: 2, kind: input, shape index: {}]   ;;  %s15108_s3 = inlined_call_operand.vmem [shape: s32[1,16], index: 3, kind: input, shape index: {}]   ;;  %s15109_s4 = inlined_call_operand.vmem [shape: f32[16,128], index: 4, kind: input, shape index: {}]   ;;  %s15110_s5 = inlined_call_operand.vmem [shape: f32[1,128], index: 5, kind: input, shape index: {}]   ;;  %s15111_s6 = inlined_call_operand.vmem [shape: bf16[8,128], index: 6, kind: input, shape index: {}]   ;;  %s15112_s7 = inlined_call_operand.hbm [shape: bf16[3,128,256], index: 7, kind: input, shape index: {}]   ;;  %s15113_s8 = inlined_call_operand.hbm [shape: bf16[3,256,128], index: 8, kind: input, shape index: {}]   ;;  %s15114_s9 = inlined_call_operand.vmem [shape: f32[9,256], index: 9, kind: input, shape index: {}]   ;;  %s15115_s10 = inlined_call_operand.vmem [shape: f32[9,128], index: 10, kind: input, shape index: {}]   ;;  %s15116_s11 = inlined_call_operand.hbm [shape: bf16[3,512,128], index: 11, kind: input, shape index: {}]   ;;  %s15117_s12 = inlined_call_operand.hbm [shape: bf16[6,384,128], index: 12, kind: input, shape index: {}]   ;;  %s15118_s13 = inlined_call_operand.hbm [shape: bf16[18,128,128], index: 13, kind: input, shape index: {}]   ;;  %s15119_s14 = inlined_call_operand.vmem [shape: f32[27,128], index: 14, kind: input, shape index: {}]   ;;  %s15120_s15 = inlined_call_operand.hbm [shape: bf16[6,128,512], index: 15, kind: input, shape index: {}]   ;;  %s15121_s16 = inlined_call_operand.vmem [shape: f32[2,512], index: 16, kind: input, shape index: {}]   ;;  %s15122_s17 = inlined_call_operand.vmem [shape: f32[1,128], index: 17, kind: output, shape index: {0}]   ;;  %s15123_s18 = inlined_call_operand.vmem [shape: f32[1,128], index: 18, kind: output, shape index: {1}]   ;;  %s15124_s19 = inlined_call_operand.vmem [shape: f32[1,128], index: 19, kind: output, shape index: {2}]   ;;  %s15125_s20 = inlined_call_operand.vmem [shape: f32[1,128], index: 20, kind: output, shape index: {3}]   ;;  %s15126_s21 = inlined_call_operand.vmem [shape: f32[1,128], index: 21, kind: output, shape index: {4}]  }
   0x1   :  { %15223 = sst [smem:[#allocation70_spill]] %s15105_s0 }
   0x2   :  { %15224 = sst [smem:[#allocation71_spill]] %s15106_s1 }
   0x3   :  { %15225 = sst [smem:[#allocation72_spill]] %s15107_s2 }
   0x4   :  { %15226 = sst [smem:[#allocation73_spill]] %s15108_s3 }
   0x5   :  { %15227 = sst [smem:[#allocation74_spill]] %s15109_s4 }
   0x6   :  { %15228 = sst [smem:[#allocation75_spill]] %s15110_s5 }
   0x7   :  { %27 = vsyncpa [#allocation3], 0 }
   0x8   :  { %28 = vsyncpa [#allocation5], 0 }
   0x9   :  { %29 = vsyncpa [#allocation8], 0  ;;  %s62_s26 = sshll.u32 %s15113_s8, 4  ;;  %s63_s26 = int_to_ptr.hbm [resolvable:$true] %s62_s26 }
   0xa   :  { %30 = vsyncpa [#allocation11], 0  ;;  %s13243_s27 = smov [#allocation4]   ;;  %s92_s0 = sshll.u32 %s15117_s12, 4  ;;  %s93_s0 = int_to_ptr.hbm [resolvable:$true] %s92_s0 }
   0xb   :  { %s64_s3 = sshll.u32 %s13243_s27, 4  ;;  %s13244_s4 = smov 64   ;;  %s65_s3 = int_to_ptr.vmem [resolvable:$true] %s64_s3 }
   0xc   :  { %s13245_s30 = smov 4   ;;  %s13246_s5 = smov [#allocation7]  }
   0xd   :  { %70 = dma.hbm_to_vmem [thread:$0]  %s63_s26, 6144, %s65_s3, [#allocation5], %s13244_s4, %s13244_s4, %s13245_s30  }
   0xe   :  { %s94_s22 = sshll.u32 %s13246_s5, 4  ;;  %s49_s1 = sshll.u32 %s15112_s7, 4  ;;  %s95_s22 = int_to_ptr.vmem [resolvable:$true] %s94_s22  ;;  %s50_s1 = int_to_ptr.hbm [resolvable:$true] %s49_s1 }
   0xf   :  { %100 = dma.hbm_to_vmem [thread:$0]  %s93_s0, 18432, %s95_s22, [#allocation8], %s13244_s4, %s13244_s4, %s13245_s30  }
  0x10   :  { %s13247_s12 = smov [#allocation2]   ;;  %s79_s26 = sshll.u32 %s15116_s11, 4  ;;  %s80_s26 = int_to_ptr.hbm [resolvable:$true] %s79_s26 }
  0x11   :  { %s51_s24 = sshll.u32 %s13247_s12, 4  ;;  %s13248_s27 = smov 128   ;;  %s52_s24 = int_to_ptr.vmem [resolvable:$true] %s51_s24 }
  0x12   :  { %s13249_s3 = smov 8   ;;  %s13250_s28 = smov [#allocation6]  }
  0x13   :  { %57 = dma.hbm_to_vmem [thread:$0]  %s50_s1, 6144, %s52_s24, [#allocation3], %s13248_s27, %s13248_s27, %s13249_s3  }
  0x14   :  { %s81_s29 = sshll.u32 %s13250_s28, 4  ;;  %s105_s23 = sshll.u32 %s15118_s13, 4  ;;  %s82_s29 = int_to_ptr.vmem [resolvable:$true] %s81_s29  ;;  %s106_s23 = int_to_ptr.hbm [resolvable:$true] %s105_s23 }
  0x15   :  { %87 = dma.hbm_to_vmem [thread:$0]  %s80_s26, 12288, %s82_s29, [#allocation5], %s13244_s4, %s13244_s4, %s13245_s30  }
  0x16   :  { %s120_s11 = sshll.u32 %s15120_s15, 4  ;;  %s13251_s8 = smov [#allocation9]   ;;  %s121_s11 = int_to_ptr.hbm [resolvable:$true] %s120_s11 }
  0x17   :  { %s107_s12 = sshll.u32 %s13251_s8, 4  ;;  %s13252_s1 = smov [#allocation10]   ;;  %s108_s12 = int_to_ptr.vmem [resolvable:$true] %s107_s12 }
  0x18   :  { %113 = dma.hbm_to_vmem [thread:$0]  %s106_s23, 18432, %s108_s12, [#allocation8], %s13244_s4, %s13244_s4, %s13245_s30  }
  0x19   :  { %s122_s13 = sshll.u32 %s13252_s1, 4  ;;  %s13253_s24 = smov 256   ;;  %s123_s13 = int_to_ptr.vmem [resolvable:$true] %s122_s13 }
  0x1a   :  { %s13254_s2 = smov 16  }
  0x1b   :  { %128 = dma.hbm_to_vmem [thread:$0]  %s121_s11, 24576, %s123_s13, [#allocation11], %s13253_s24, %s13253_s24, %s13254_s2  }
  0x1c   :  { %13235 = dma.done.wait [#allocation3], 6144  }
  0x1d   :  { %13236 = vsyncadd [#allocation3], 4294961152 }
  0x1e   :  { %13237 = dma.done.wait [#allocation5], 18432  }
  0x1f   :  { %13238 = vsyncadd [#allocation5], 4294948864 }
  0x20   :  { %13239 = dma.done.wait [#allocation8], 36864  }
  0x21   :  { %13240 = vsyncadd [#allocation8], 4294930432 }
  0x22   :  { %13241 = dma.done.wait [#allocation11], 24576  }
  0x23   :  { %13242 = vsyncadd [#allocation11], 4294942720  ;;  %v15132_v0 = vmov 0   ;;  %s15229_s30 = sld [smem:[#allocation70_spill]]  ;;  %v338_v4 = vld [vmem:[%s15111_s6] sm:$0xf]  ;;  %v162_v34 = vlaneseq }
  0x24   :  { %12685 = vset.pattern.permute.xlu0 %v15132_v0  ;;  %12686 = vset.pattern.permute.xlu1 %v15132_v0  ;;  %s15230_s27 = sld [smem:[#allocation71_spill]]  ;;  %vm346_vm0 = vcmask 1043456   ;;  %v9257_v6 = vld [vmem:[#allocation2 + $0x70] sm:$0xf]  ;;  %v12014_v7 = vld [vmem:[#allocation2 + $0x74] sm:$0xf0] }
  0x25   :  { %12687 = vset.pattern.permute.xlu2 %v15132_v0  ;;  %v348_v5 = vsel %vm346_vm0, %v338_v4, 0  ;;  %v12013_v8 = vld [vmem:[#allocation2 + $0x74] sm:$0xf]  ;;  %v9258_v9 = vor.u32 %v12014_v7, %v9257_v6  ;;  %v9259_v10 = vld [vmem:[#allocation2 + $0x78] sm:$0xf0]  ;;  %v13413_v41 = vand.u32 127, %v162_v34 }
  0x26   :  { %357 = vmatpush.bf16.msra.mxu1 %v348_v5  ;;  %v9249_v11 = vld [vmem:[#allocation2 + $0x60] sm:$0xf]  ;;  %v12012_v12 = vld [vmem:[#allocation2 + $0x64] sm:$0xf0]  ;;  %v9262_v13 = vor.u32 %v12013_v8, %v9259_v10  ;;  %v12011_v14 = vld [vmem:[#allocation2 + $0x64] sm:$0xf] }
  0x27   :  { %v9251_v15 = vld [vmem:[#allocation2 + $0x68] sm:$0xf0]  ;;  %v9250_v16 = vor.u32 %v12012_v12, %v9249_v11  ;;  %v9241_v18 = vld [vmem:[#allocation2 + $0x50] sm:$0xf]  ;;  %v12010_v19 = vld [vmem:[#allocation2 + $0x54] sm:$0xf0] }
  0x28   :  { %547 = vmatpush.bf16.msra.mxu2 %v9262_v13  ;;  %v9254_v17 = vor.u32 %v12011_v14, %v9251_v15  ;;  %v12009_v20 = vld [vmem:[#allocation2 + $0x54] sm:$0xf]  ;;  %v9243_v21 = vld [vmem:[#allocation2 + $0x58] sm:$0xf0]  ;;  %v9242_v22 = vor.u32 %v12010_v19, %v9241_v18  ;;  %v9233_v24 = vld [vmem:[#allocation2 + $0x40] sm:$0xf] }
  0x29   :  { %v156_v1 = vld [vmem:[%s15229_s30] sm:$0xff]  ;;  %v9246_v23 = vor.u32 %v12009_v20, %v9243_v21  ;;  %v12008_v25 = vld [vmem:[#allocation2 + $0x44] sm:$0xf0]  ;;  %v9235_v27 = vld [vmem:[#allocation2 + $0x48] sm:$0xf0]  ;;  %v15130_v49 = vmov 0.0  }
  0x2a   :  { %v158_v2 = vld [vmem:[%s15230_s27 + $0x8] sm:$0xff]  ;;  %165 = vperm.xlu0 %12685, %v156_v1   ;;  %v157_v3 = vld [vmem:[%s15230_s27] sm:$0xff]  ;;  %528 = vmatpush.bf16.msrb.mxu1 %v9258_v9  ;;  %v9234_v28 = vor.u32 %v12008_v25, %v9233_v24  ;;  %v9225_v30 = vld [vmem:[#allocation2 + $0x30] sm:$0xf]  ;;  %vm342_vm2 = vcmask 64512   ;;  %s15231_s23 = sld [smem:[#allocation74_spill]] }
  0x2b   :  { %172 = vperm.xlu1 %12686, %v158_v2   ;;  %v12007_v26 = vld [vmem:[#allocation2 + $0x44] sm:$0xf]  ;;  %v12006_v31 = vld [vmem:[#allocation2 + $0x34] sm:$0xf0]  ;;  %v12005_v32 = vld [vmem:[#allocation2 + $0x34] sm:$0xf] }
  0x2c   :  { %548 = vmatpush.bf16.msra.mxu2 %v9254_v17  ;;  %v9238_v29 = vor.u32 %v12007_v26, %v9235_v27  ;;  %v9227_v33 = vld [vmem:[#allocation2 + $0x38] sm:$0xf0]  ;;  %v9226_v35 = vor.u32 %v12006_v31, %v9225_v30  ;;  %v9217_v37 = vld [vmem:[#allocation2 + $0x20] sm:$0xf]  ;;  %v12004_v38 = vld [vmem:[#allocation2 + $0x24] sm:$0xf0] }
  0x2d   :  { %v9230_v36 = vor.u32 %v12005_v32, %v9227_v33  ;;  %v12003_v39 = vld [vmem:[#allocation2 + $0x24] sm:$0xf]  ;;  %v9219_v40 = vld [vmem:[#allocation2 + $0x28] sm:$0xf0]  ;;  %v9218_v42 = vor.u32 %v12004_v38, %v9217_v37  ;;  %v9209_v44 = vld [vmem:[#allocation2 + $0x10] sm:$0xf] }
  0x2e   :  { %529 = vmatpush.bf16.msrb.mxu1 %v9250_v16  ;;  %v9222_v43 = vor.u32 %v12003_v39, %v9219_v40  ;;  %v12002_v45 = vld [vmem:[#allocation2 + $0x14] sm:$0xf0]  ;;  %v12001_v47 = vld [vmem:[#allocation2 + $0x14] sm:$0xf]  ;;  %v9211_v48 = vld [vmem:[#allocation2 + $0x18] sm:$0xf0] }
  0x2f   :  { %v9210_v51 = vor.u32 %v12002_v45, %v9209_v44  ;;  %v9214_v53 = vor.u32 %v12001_v47, %v9211_v48  ;;  %v9201_v54 = vld [vmem:[#allocation2] sm:$0xf]  ;;  %v12000_v55 = vld [vmem:[#allocation2 + $0x4] sm:$0xf0]  ;;  %v11999_v56 = vld [vmem:[#allocation2 + $0x4] sm:$0xf] }
  0x30   :  { %549 = vmatpush.bf16.msra.mxu2 %v9246_v23  ;;  %v9203_v57 = vld [vmem:[#allocation2 + $0x8] sm:$0xf0]  ;;  %v9202_v58 = vor.u32 %v12000_v55, %v9201_v54  ;;  %v363_v60 = vld [vmem:[%s15231_s23] sm:$0xff]  ;;  %v13424_v63 = vshrl.u32 %v162_v34, 7  ;;  %s15233_s12 = sld [smem:[#allocation75_spill]]  ;;  %vm283_vm4 = vcmp.ge.s32.totalorder %v13413_v41, 64 }
  0x31   :  { %v9206_v59 = vor.u32 %v11999_v56, %v9203_v57  ;;  %v364_v61 = vld [vmem:[%s15231_s23 + $0x8] sm:$0xff]  ;;  %v268_v9 = vadd.s32 128, %v13413_v41  ;;  %v12022_v11 = vld [vmem:[#allocation4 + $0x38] sm:$0xff]  ;;  %v13454_v14 = vsel %vm283_vm4, 1.0, %v15130_v49  ;;  %v12021_v15 = vld [vmem:[#allocation4 + $0x30] sm:$0xff]  ;;  %vm269_vm6 = vcmp.lt.s32.totalorder %v13413_v41, 64 }
  0x32   :  { %169 = vperm.xlu0 %12685, %v157_v3   ;;  %530 = vmatpush.bf16.msrb.mxu1 %v9242_v22  ;;  %v446_v62 = vpack.c.bf16 %v364_v61, %v363_v60  ;;  %15232 = vst [vmem:[#allocation16_spill] sm:$0xff] %v13424_v63  ;;  %vm335_vm3 = vcmp.eq.s32.totalorder %v13424_v63, 0  ;;  %v13437_v5 = vld [vmem:[%s15114_s9 + $0x1] ss:$8 sm:$0x3]  ;;  %v12030_v13 = vld [vmem:[#allocation4 + $0x78] sm:$0xff] }
  0x33   :  { %v13431_v2 = vsel %vm335_vm3, 1.0, %v15130_v49  ;;  %v13443_v7 = vld [vmem:[%s15114_s9] ss:$8 sm:$0x3]  ;;  %v387_v8 = vperm.slane %v13437_v5, 0  ;;  %v388_v10 = vperm.slane %v13437_v5, 1  ;;  %868 = vmatpush.bf16.msra.mxu3 %v12022_v11  ;;  %887 = vmatpush.bf16.msra.mxu0 %v12030_v13 }
  0x34   :  { %550 = vmatpush.bf16.msra.mxu2 %v9238_v29  ;;  %v13451_v12 = vld [vmem:[%s15114_s9 + $0x2] ss:$8 sm:$0x3]  ;;  %vm312_vm5 = vcmp.lt.s32.totalorder %v268_v9, 192  ;;  %v373_v16 = vperm.slane %v13443_v7, 1  ;;  %v12029_v19 = vld [vmem:[#allocation4 + $0x70] sm:$0xff] }
  0x35   :  { %v13459_v17 = vmul.f32 0.0, %v388_v10  ;;  %v411_v18 = vperm.slane %v13451_v12, 1  ;;  %v372_v20 = vperm.slane %v13443_v7, 0  ;;  %v13466_v21 = vmul.f32 0.0, %v387_v8  ;;  %v12020_v26 = vld [vmem:[#allocation4 + $0x28] sm:$0xff]  ;;  %v12027_v37 = vld [vmem:[#allocation4 + $0x60] sm:$0xff] }
  0x36   :  { %531 = vmatpush.bf16.msrb.mxu1 %v9234_v28  ;;  %v12688_v1 = vld [vmem:[%s15233_s12] ss:$0 sm:$0xff]  ;;  %v410_v22 = vperm.slane %v13451_v12, 0  ;;  %v13470_v24 = vmul.f32 0.0, %v13454_v14  ;;  %v13473_v25 = vsel %vm312_vm5, 1.0, %v15130_v49  ;;  %v9191_v27 = vsel %vm269_vm6, 1.0, %v15130_v49 }
  0x37   :  { %v369_v3 = vmul.f32 %v12688_v1, %v13431_v2  ;;  %869 = vmatpush.bf16.msra.mxu3 %v12021_v15  ;;  %v400_v28 = vadd.f32 %v13459_v17, %v373_v16  ;;  %v13481_v29 = vmul.f32 0.0, %v411_v18  ;;  %888 = vmatpush.bf16.msra.mxu0 %v12029_v19  ;;  %v12028_v30 = vld [vmem:[#allocation4 + $0x68] sm:$0xff]  ;;  %v399_v31 = vadd.f32 %v13466_v21, %v372_v20  ;;  %v12018_v44 = vld [vmem:[#allocation4 + $0x18] sm:$0xff]  ;;  %v12015_v11 = vld [vmem:[#allocation4] sm:$0xff]  ;;  %s15238_s26 = sld [smem:[#allocation72_spill]] }
  0x38   :  { %551 = vmatpush.bf16.msra.mxu2 %v9230_v36  ;;  %v13486_v32 = vmul.f32 0.0, %v410_v22  ;;  %v13489_v33 = vmul.f32 0.0, %v13473_v25  ;;  %v13492_v34 = vadd.f32 %v9191_v27, %v13470_v24  ;;  %v12016_v61 = vld [vmem:[#allocation4 + $0x8] sm:$0xff]  ;;  %v13514_v13 = vmul.f32 0.0, %v372_v20  ;;  %v12023_v19 = vld [vmem:[#allocation4 + $0x40] sm:$0xff]  ;;  %s15243_s13 = sld [smem:[#allocation73_spill]] }
  0x39   :  { %v423_v36 = vadd.f32 %v13481_v29, %v400_v28 }
  0x3a   :  { %532 = vmatpush.bf16.msrb.mxu1 %v9226_v35  ;;  %v12019_v35 = vld [vmem:[#allocation4 + $0x20] sm:$0xff]  ;;  %v422_v38 = vadd.f32 %v13486_v32, %v399_v31  ;;  %v403_v28 = vadd.f32 %v387_v8, %v13514_v13 }
  0x3b   :  { %870 = vmatpush.bf16.msra.mxu3 %v12020_v26  ;;  %889 = vmatpush.bf16.msra.mxu0 %v12028_v30 }
  0x3c   :  { %552 = vmatpush.bf16.msra.mxu2 %v9222_v43 }
  0x3e   :  { %533 = vmatpush.bf16.msrb.mxu1 %v9218_v42 }
  0x3f   :  { %871 = vmatpush.bf16.msra.mxu3 %v12019_v35  ;;  %890 = vmatpush.bf16.msra.mxu0 %v12027_v37 }
  0x40   :  { %553 = vmatpush.bf16.msra.mxu2 %v9214_v53  ;;  %v12025_v53 = vld [vmem:[#allocation4 + $0x50] sm:$0xff] }
  0x42   :  { %534 = vmatpush.bf16.msrb.mxu1 %v9210_v51  ;;  %v12017_v51 = vld [vmem:[#allocation4 + $0x10] sm:$0xff] }
  0x43   :  { %872 = vmatpush.bf16.msra.mxu3 %v12018_v44 }
  0x44   :  { %554 = vmatpush.bf16.msra.mxu2 %v9206_v59 }
  0x46   :  { %535 = vmatpush.bf16.msrb.mxu1 %v9202_v58 }
  0x47   :  { %555 = vmatmul.bf16.vlgmr.msra.gmra.mxu2 %v446_v62  ;;  %873 = vmatpush.bf16.msra.mxu3 %v12017_v51 }
  0x4b   :  { %874 = vmatpush.bf16.msra.mxu3 %v12016_v61 }
  0x4f   :  { %875 = vmatpush.bf16.msra.mxu3 %v12015_v11 }
  0x9c   :  { %v166_v46 = vpop.permute.xlu0 %165 }
  0x9d   :  { %vm167_vm1 = vcmp.eq.s32.totalorder %v13413_v41, %v166_v46  ;;  %v12026_v46 = vld [vmem:[#allocation4 + $0x58] sm:$0xff] }
  0x9e   :  { %v9195_v50 = vsel %vm167_vm1, 1.0, %v15130_v49  ;;  %891 = vmatpush.bf16.msra.mxu0 %v12026_v46 }
  0x9f   :  { %v341_v52 = vpack.c.bf16 %v9195_v50, %v9195_v50 }
  0xa1   :  { %9196 = vmatmul.msk.bf16.vlgmr.msra.gmra.mxu1 %vm342_vm2, %v341_v52 }
  0xa2   :  { %892 = vmatpush.bf16.msra.mxu0 %v12025_v53 }
  0xb1   :  { %536 = vmatmul.bf16.vlgmr.msrb.gmra.mxu1 %v446_v62 }
  0xca   :  { %v556_v39 = vpop.f32.mrf.mxu2 }
  0xcb   :  { %v567_v42 = vmul.f32 %v556_v39, %v13489_v33 }
  0xcd   :  { %v13498_v45 = vadd.f32 %v567_v42, %v423_v36 }
  0xcf   :  { %v591_v48 = vand.u32 2147483647, %v13498_v45 }
  0xd1   :  { %v599_v52 = vsub.f32 0.0, %v591_v48 }
  0xd2   :  { %v558_v55 = vpop.f32.mrf.mxu2 }
  0xd3   :  { %v608_v57 = vmul.f32 1.442695, %v599_v52  ;;  %v569_v58 = vmul.f32 %v558_v55, %v13489_v33 }
  0xd5   :  { %12717 = vpow2.f32 %v608_v57  ;;  %v13506_v62 = vadd.f32 %v569_v58, %v423_v36 }
 0x11e   :  { %v359_v4 = vpop.f32.mrf.mxu1 }
 0x11f   :  { %v447_v6 = vpack.c.bf16 %v369_v3, %v359_v4  ;;  %v593_v3 = vand.u32 2147483647, %v13506_v62  ;;  %v12024_v4 = vld [vmem:[#allocation4 + $0x48] sm:$0xff] }
 0x120   :  { %893 = vmatpush.bf16.msra.mxu0 %v12024_v4 }
 0x121   :  { %541 = vmatmul.bf16.gmra.mxu1 %v447_v6  ;;  %560 = vmatmul.bf16.gmra.mxu2 %v447_v6  ;;  %v13511_v6 = vmul.f32 0.0, %v9191_v27  ;;  %v601_v15 = vsub.f32 0.0, %v593_v3  ;;  %v12718_v27 = vpop.eup %12717 }
 0x122   :  { %v631_v36 = vadd.f32 1.0, %v12718_v27  ;;  %v634_v37 = vmul.f32 -0.5, %v12718_v27  ;;  %v637_v42 = vand.u32 2147483647, %v12718_v27 }
 0x123   :  { %v612_v30 = vmul.f32 1.442695, %v601_v15 }
 0x124   :  { %894 = vmatpush.bf16.msra.mxu0 %v12023_v19  ;;  %v635_v39 = vadd.f32 1.0, %v634_v37  ;;  %vm13524_vm7 = vcmp.lt.f32.partialorder %v637_v42, 0.0004427343 }
 0x126   :  { %v361_v23 = vpop.f32.mrf.mxu1  ;;  %v636_v53 = vmul.f32 %v12718_v27, %v635_v39 }
 0x127   :  { %v13518_v23 = vadd.f32 %v13454_v14, %v13511_v6  ;;  %v426_v14 = vadd.f32 %v13486_v32, %v403_v28  ;;  %v585_v28 = vmax.f32 %v13506_v62, 0.0 }
 0x12e   :  { %v537_v40 = vpop.f32.mrf.mxu1 }
 0x12f   :  { %v566_v43 = vmul.f32 %v537_v40, %v13492_v34 }
 0x131   :  { %v13500_v47 = vadd.f32 %v566_v43, %v422_v38 }
 0x133   :  { %v590_v50 = vand.u32 2147483647, %v13500_v47  ;;  %v582_v4 = vmax.f32 %v13500_v47, 0.0 }
 0x135   :  { %v598_v54 = vsub.f32 0.0, %v590_v50 }
 0x136   :  { %v539_v56 = vpop.f32.mrf.mxu1 }
 0x137   :  { %v606_v59 = vmul.f32 1.442695, %v598_v54  ;;  %v568_v60 = vmul.f32 %v539_v56, %v13492_v34 }
 0x139   :  { %12719 = vpow2.f32 %v606_v59  ;;  %v13508_v1 = vadd.f32 %v568_v60, %v422_v38  ;;  %v583_v60 = vmax.f32 %v13498_v45, 0.0 }
 0x13a   :  { %12721 = vpow2.f32 %v612_v30 }
 0x13b   :  { %v592_v9 = vand.u32 2147483647, %v13508_v1  ;;  %v584_v45 = vmax.f32 %v13508_v1, 0.0 }
 0x13d   :  { %v600_v26 = vsub.f32 0.0, %v592_v9 }
 0x13f   :  { %v12720_v31 = vpop.eup %12719  ;;  %v610_v35 = vmul.f32 1.442695, %v600_v26 }
 0x140   :  { %v622_v20 = vadd.f32 1.0, %v12720_v31  ;;  %v625_v38 = vmul.f32 -0.5, %v12720_v31  ;;  %v12722_v8 = vpop.eup %12721  ;;  %v628_v43 = vand.u32 2147483647, %v12720_v31 }
 0x141   :  { %12723 = vpow2.f32 %v610_v35  ;;  %v649_v46 = vadd.f32 1.0, %v12722_v8  ;;  %v652_v48 = vmul.f32 -0.5, %v12722_v8  ;;  %v655_v3 = vand.u32 2147483647, %v12722_v8 }
 0x142   :  { %12725 = vlog2.f32 %v622_v20  ;;  %v626_v40 = vadd.f32 1.0, %v625_v38  ;;  %vm13528_vm8 = vcmp.lt.f32.partialorder %v628_v43, 0.0004427343 }
 0x143   :  { %12727 = vlog2.f32 %v631_v36  ;;  %v653_v59 = vadd.f32 1.0, %v652_v48  ;;  %vm656_vm9 = vcmp.lt.f32.partialorder %v655_v3, 0.0004427343 }
 0x144   :  { %v627_v56 = vmul.f32 %v12720_v31, %v626_v40  ;;  %12729 = vlog2.f32 %v649_v46 }
 0x145   :  { %v654_v19 = vmul.f32 %v12722_v8, %v653_v59 }
 0x147   :  { %v12724_v44 = vpop.eup %12723 }
 0x148   :  { %v12726_v50 = vpop.eup %12725  ;;  %v640_v51 = vadd.f32 1.0, %v12724_v44  ;;  %v643_v52 = vmul.f32 -0.5, %v12724_v44  ;;  %v646_v9 = vand.u32 2147483647, %v12724_v44 }
 0x149   :  { %v12728_v54 = vpop.eup %12727  ;;  %v624_v55 = vmul.f32 0.6931472, %v12726_v50 }
 0x14a   :  { %12731 = vlog2.f32 %v640_v51  ;;  %v633_v58 = vmul.f32 0.6931472, %v12728_v54  ;;  %v644_v61 = vadd.f32 1.0, %v643_v52  ;;  %v12730_v26 = vpop.eup %12729  ;;  %vm647_vm10 = vcmp.lt.f32.partialorder %v646_v9, 0.0004427343 }
 0x14b   :  { %v630_v15 = vsel %vm13528_vm8, %v627_v56, %v624_v55  ;;  %v651_v47 = vmul.f32 0.6931472, %v12730_v26  ;;  %v405_v52 = vadd.f32 %v13466_v21, %v13514_v13  ;;  %v13553_v55 = vadd.f32 %v13470_v24, %v13511_v6 }
 0x14c   :  { %v639_v11 = vsel %vm13524_vm7, %v636_v53, %v633_v58  ;;  %v645_v27 = vmul.f32 %v12724_v44, %v644_v61  ;;  %v694_v35 = vadd.f32 %v630_v15, %v582_v4  ;;  %v381_v44 = vmul.f32 0.0, %v373_v16 }
 0x14d   :  { %v695_v30 = vadd.f32 %v639_v11, %v583_v60  ;;  %v657_v20 = vsel %vm656_vm9, %v654_v19, %v651_v47  ;;  %v428_v5 = vadd.f32 %v410_v22, %v405_v52  ;;  %v159_v11 = vld [vmem:[%s15238_s26] sm:$0xff] }
 0x14e   :  { %v697_v38 = vadd.f32 %v657_v20, %v585_v28  ;;  %v9263_v42 = vadd.f32 -0.6931472, %v694_v35  ;;  %v404_v50 = vadd.f32 %v388_v10, %v381_v44  ;;  %v406_v13 = vadd.f32 %v13459_v17, %v381_v44  ;;  %177 = vperm.xlu1 %12686, %v159_v11  }
 0x14f   :  { %v9264_v39 = vadd.f32 -0.6931472, %v695_v30 }
 0x150   :  { %v12732_v31 = vpop.eup %12731  ;;  %v9266_v8 = vadd.f32 -0.6931472, %v697_v38  ;;  %v427_v54 = vadd.f32 %v13481_v29, %v404_v50  ;;  %v429_v58 = vadd.f32 %v411_v18, %v406_v13 }
 0x151   :  { %v642_v36 = vmul.f32 0.6931472, %v12732_v31 }
 0x152   :  { %v769_v46 = vpack.c.bf16 %v9266_v8, %v9264_v39 }
 0x153   :  { %v648_v37 = vsel %vm647_vm10, %v645_v27, %v642_v36 }
 0x154   :  { %v696_v40 = vadd.f32 %v648_v37, %v584_v45  ;;  %895 = vmatmul.bf16.vlgmr.msra.gmra.mxu0 %v769_v46 }
 0x156   :  { %v9265_v43 = vadd.f32 -0.6931472, %v696_v40 }
 0x158   :  { %v768_v62 = vpack.c.bf16 %v9265_v43, %v9263_v42 }
 0x15a   :  { %876 = vmatmul.bf16.vlgmr.msra.gmra.mxu3 %v768_v62 }
 0x19e   :  { %v542_v1 = vpop.f32.mrf.mxu1 }
 0x19f   :  { %v570_v48 = vmul.f32 %v542_v1, %v13518_v23 }
 0x1a1   :  { %v13545_v51 = vadd.f32 %v570_v48, %v426_v14 }
 0x1a3   :  { %v594_v53 = vand.u32 2147483647, %v13545_v51  ;;  %v586_v1 = vmax.f32 %v13545_v51, 0.0 }
 0x1a4   :  { %v561_v7 = vpop.f32.mrf.mxu2 }
 0x1a5   :  { %v602_v16 = vsub.f32 0.0, %v594_v53  ;;  %v571_v56 = vmul.f32 %v561_v7, %v13489_v33 }
 0x1a6   :  { %v544_v10 = vpop.f32.mrf.mxu1 }
 0x1a7   :  { %v614_v14 = vmul.f32 1.442695, %v602_v16  ;;  %v13558_v57 = vadd.f32 %v571_v56, %v427_v54  ;;  %v572_v21 = vmul.f32 %v544_v10, %v13553_v55 }
 0x1a9   :  { %12733 = vpow2.f32 %v614_v14  ;;  %v595_v29 = vand.u32 2147483647, %v13558_v57  ;;  %v580_v24 = vadd.f32 %v572_v21, %v428_v5 }
 0x1ab   :  { %v603_v6 = vsub.f32 0.0, %v595_v29  ;;  %v596_v32 = vand.u32 2147483647, %v580_v24  ;;  %v588_v54 = vmax.f32 %v580_v24, 0.0  ;;  %v587_v29 = vmax.f32 %v13558_v57, 0.0  ;;  %v160_v57 = vld [vmem:[%s15238_s26 + $0x8] sm:$0xff] }
 0x1ac   :  { %v563_v59 = vpop.f32.mrf.mxu2  ;;  %180 = vperm.xlu2 %12687, %v160_v57  }
 0x1ad   :  { %v616_v60 = vmul.f32 1.442695, %v603_v6  ;;  %v604_v22 = vsub.f32 0.0, %v596_v32  ;;  %v573_v61 = vmul.f32 %v13473_v25, %v563_v59 }
 0x1af   :  { %v12734_v3 = vpop.eup %12733  ;;  %12735 = vpow2.f32 %v616_v60  ;;  %v618_v4 = vmul.f32 1.442695, %v604_v22  ;;  %v13566_v9 = vadd.f32 %v573_v61, %v429_v58 }
 0x1b0   :  { %v658_v17 = vadd.f32 1.0, %v12734_v3  ;;  %v661_v26 = vmul.f32 -0.5, %v12734_v3  ;;  %v664_v47 = vand.u32 2147483647, %v12734_v3 }
 0x1b1   :  { %12737 = vpow2.f32 %v618_v4  ;;  %v597_v15 = vand.u32 2147483647, %v13566_v9  ;;  %v589_v59 = vmax.f32 %v13566_v9, 0.0  ;;  %v12689_v9 = vld [vmem:[%s15115_s10] ss:$0 sm:$0xff] }
 0x1b2   :  { %12739 = vlog2.f32 %v658_v17  ;;  %v662_v45 = vadd.f32 1.0, %v661_v26  ;;  %vm665_vm11 = vcmp.lt.f32.partialorder %v664_v47, 0.0004427343 }
 0x1b3   :  { %v605_v12 = vsub.f32 0.0, %v597_v15 }
 0x1b4   :  { %v663_v38 = vmul.f32 %v12734_v3, %v662_v45 }
 0x1b5   :  { %v12736_v18 = vpop.eup %12735  ;;  %v620_v19 = vmul.f32 1.442695, %v605_v12  ;;  %v714_v12 = vmul.f32 0.0, %v12689_v9 }
 0x1b6   :  { %v667_v28 = vadd.f32 1.0, %v12736_v18  ;;  %v670_v20 = vmul.f32 -0.5, %v12736_v18  ;;  %v673_v48 = vand.u32 2147483647, %v12736_v18 }
 0x1b7   :  { %v12738_v27 = vpop.eup %12737  ;;  %12741 = vpow2.f32 %v620_v19  ;;  %v12691_v19 = vld [vmem:[%s15115_s10 + $0x2] ss:$0 sm:$0xff] }
 0x1b8   :  { %v12740_v30 = vpop.eup %12739  ;;  %v676_v31 = vadd.f32 1.0, %v12738_v27  ;;  %12743 = vlog2.f32 %v667_v28  ;;  %v679_v35 = vmul.f32 -0.5, %v12738_v27  ;;  %v682_v42 = vand.u32 2147483647, %v12738_v27 }
 0x1b9   :  { %v660_v36 = vmul.f32 0.6931472, %v12740_v30  ;;  %v671_v46 = vadd.f32 1.0, %v670_v20  ;;  %vm674_vm13 = vcmp.lt.f32.partialorder %v673_v48, 0.0004427343  ;;  %v728_v30 = vmul.f32 0.0, %v12691_v19 }
 0x1ba   :  { %12745 = vlog2.f32 %v676_v31  ;;  %v680_v39 = vadd.f32 1.0, %v679_v35  ;;  %vm683_vm12 = vcmp.lt.f32.partialorder %v682_v42, 0.0004427343 }
 0x1bb   :  { %v666_v43 = vsel %vm665_vm11, %v663_v38, %v660_v36  ;;  %v672_v56 = vmul.f32 %v12736_v18, %v671_v46  ;;  %v12690_v18 = vld [vmem:[%s15115_s10 + $0x1] ss:$0 sm:$0xff] }
 0x1bc   :  { %v681_v52 = vmul.f32 %v12738_v27, %v680_v39  ;;  %v698_v7 = vadd.f32 %v666_v43, %v586_v1  ;;  %v724_v27 = vadd.f32 %v12690_v18, %v714_v12  ;;  %v718_v31 = vmul.f32 0.0, %v12690_v18 }
 0x1bd   :  { %v12742_v37 = vpop.eup %12741 }
 0x1be   :  { %v12744_v40 = vpop.eup %12743  ;;  %v685_v8 = vadd.f32 1.0, %v12742_v37  ;;  %v688_v62 = vmul.f32 -0.5, %v12742_v37  ;;  %v691_v14 = vand.u32 2147483647, %v12742_v37  ;;  %v9267_v6 = vadd.f32 -0.6931472, %v698_v7 }
 0x1bf   :  { %v669_v53 = vmul.f32 0.6931472, %v12744_v40  ;;  %v734_v45 = vadd.f32 %v728_v30, %v724_v27  ;;  %v722_v36 = vadd.f32 %v12689_v9, %v718_v31 }
 0x1c0   :  { %v12746_v44 = vpop.eup %12745  ;;  %12747 = vlog2.f32 %v685_v8  ;;  %v689_v5 = vadd.f32 1.0, %v688_v62  ;;  %vm692_vm14 = vcmp.lt.f32.partialorder %v691_v14, 0.0004427343 }
 0x1c1   :  { %v678_v50 = vmul.f32 0.6931472, %v12746_v44  ;;  %v675_v21 = vsel %vm674_vm13, %v672_v56, %v669_v53  ;;  %v732_v39 = vadd.f32 %v728_v30, %v722_v36 }
 0x1c2   :  { %v690_v58 = vmul.f32 %v12742_v37, %v689_v5  ;;  %v699_v24 = vadd.f32 %v675_v21, %v587_v29  ;;  %v725_v37 = vadd.f32 %v718_v31, %v714_v12  ;;  %v173_v21 = vpop.permute.xlu1 %172 }
 0x1c3   :  { %v684_v16 = vsel %vm683_vm12, %v681_v52, %v678_v50  ;;  %vm175_vm1 = vcmp.eq.s32.totalorder %v13413_v41, %v173_v21 }
 0x1c4   :  { %v700_v10 = vadd.f32 %v684_v16, %v588_v54  ;;  %v9268_v3 = vadd.f32 -0.6931472, %v699_v24  ;;  %v735_v42 = vadd.f32 %v12691_v19, %v725_v37  ;;  %v9340_v12 = vsel %vm175_vm1, 1.0, %v15130_v49  ;;  %v12054_v19 = vld [vmem:[#allocation6 + $0xb8] sm:$0xff] }
 0x1c6   :  { %v12748_v13 = vpop.eup %12747  ;;  %v9269_v51 = vadd.f32 -0.6931472, %v700_v10 }
 0x1c7   :  { %v687_v32 = vmul.f32 0.6931472, %v12748_v13 }
 0x1c8   :  { %v770_v60 = vpack.c.bf16 %v9269_v51, %v9267_v6 }
 0x1c9   :  { %v693_v22 = vsel %vm692_vm14, %v690_v58, %v687_v32  ;;  %vm190_vm14 = vcmask 130048  }
 0x1ca   :  { %881 = vmatmul.bf16.gmra.mxu3 %v770_v60  ;;  %v701_v61 = vadd.f32 %v693_v22, %v589_v59  ;;  %v178_v57 = vpop.permute.xlu1 %177 }
 0x1cb   :  { %vm182_vm5 = vcmp.eq.s32.totalorder %v13413_v41, %v178_v57 }
 0x1cc   :  { %v9270_v4 = vadd.f32 -0.6931472, %v701_v61  ;;  %v170_v61 = vpop.permute.xlu0 %169 }
 0x1cd   :  { %vm174_vm3 = vcmp.eq.s32.totalorder %v13413_v41, %v170_v61 }
 0x1ce   :  { %v771_v17 = vpack.c.bf16 %v9270_v4, %v9268_v3  ;;  %v9339_v27 = vsel %vm174_vm3, 1.0, %v15130_v49  ;;  %vm221_vm3 = vcmp.lt.s32.totalorder %v13413_v41, 12 }
 0x1cf   :  { %v13612_v36 = vpack.c.bf16 %v9340_v12, %v9339_v27 }
 0x1d0   :  { %900 = vmatmul.bf16.gmra.mxu0 %v771_v17 }
 0x1d1   :  { %v896_v15 = vpop.f32.mrf.mxu0 }
 0x1d9   :  { %v898_v28 = vpop.f32.mrf.mxu0 }
 0x1dd   :  { %v877_v11 = vpop.f32.mrf.mxu3 }
 0x1de   :  { %v878_v46 = vadd.f32 %v877_v11, %v732_v39 }
 0x1e0   :  { %v13589_v52 = vadd.f32 %v896_v15, %v878_v46 }
 0x1e2   :  { %v910_v16 = vand.u32 2147483647, %v13589_v52  ;;  %v906_v57 = vmax.f32 %v13589_v52, 0.0  ;;  %v12047_v52 = vld [vmem:[#allocation6 + $0x80] sm:$0xff] }
 0x1e4   :  { %v914_v13 = vsub.f32 0.0, %v910_v16 }
 0x1e5   :  { %v879_v26 = vpop.f32.mrf.mxu3 }
 0x1e6   :  { %v880_v1 = vadd.f32 %v879_v26, %v732_v39  ;;  %v918_v58 = vmul.f32 1.442695, %v914_v13  ;;  %v12062_v26 = vld [vmem:[#allocation6 + $0xf8] sm:$0xff]  ;;  %v12061_v39 = vld [vmem:[#allocation6 + $0xf0] sm:$0xff] }
 0x1e8   :  { %v13591_v53 = vadd.f32 %v898_v28, %v880_v1 }
 0x1ea   :  { %v911_v56 = vand.u32 2147483647, %v13591_v53 }
 0x1ec   :  { %v915_v29 = vsub.f32 0.0, %v911_v56 }
 0x1ee   :  { %v920_v60 = vmul.f32 1.442695, %v915_v29 }
 0x206   :  { %v181_v17 = vpop.permute.xlu2 %180 }
 0x207   :  { %vm183_vm4 = vcmp.eq.s32.totalorder %v13413_v41, %v181_v17  ;;  %v12057_v17 = vld [vmem:[#allocation6 + $0xd0] sm:$0xff] }
 0x208   :  { %v9343_v31 = vsel %vm183_vm4, 1.0, %v15130_v49 }
 0x24d   :  { %v882_v35 = vpop.f32.mrf.mxu3  ;;  %v901_v47 = vpop.f32.mrf.mxu0 }
 0x24e   :  { %v883_v20 = vadd.f32 %v882_v35, %v734_v45  ;;  %v9342_v45 = vsel %vm182_vm5, 1.0, %v15130_v49 }
 0x24f   :  { %v13614_v37 = vpack.c.bf16 %v9343_v31, %v9342_v45  ;;  %v12055_v31 = vld [vmem:[#allocation6 + $0xc0] sm:$0xff] }
 0x250   :  { %v902_v38 = vadd.f32 %v901_v47, %v883_v20 }
 0x252   :  { %v912_v40 = vand.u32 2147483647, %v902_v38  ;;  %v908_v3 = vmax.f32 %v902_v38, 0.0  ;;  %v12053_v38 = vld [vmem:[#allocation6 + $0xb0] sm:$0xff] }
 0x254   :  { %v916_v8 = vsub.f32 0.0, %v912_v40 }
 0x255   :  { %v884_v43 = vpop.f32.mrf.mxu3  ;;  %v903_v48 = vpop.f32.mrf.mxu0 }
 0x256   :  { %v922_v62 = vmul.f32 1.442695, %v916_v8  ;;  %v885_v44 = vadd.f32 %v884_v43, %v735_v42  ;;  %v12052_v8 = vld [vmem:[#allocation6 + $0xa8] sm:$0xff] }
 0x257   :  { %v12060_v43 = vld [vmem:[#allocation6 + $0xe8] sm:$0xff] }
 0x258   :  { %12749 = vpow2.f32 %v922_v62  ;;  %v13587_v50 = vadd.f32 %v903_v48, %v885_v44  ;;  %v12051_v48 = vld [vmem:[#allocation6 + $0xa0] sm:$0xff] }
 0x25a   :  { %v913_v54 = vand.u32 2147483647, %v13587_v50 }
 0x25c   :  { %v917_v10 = vsub.f32 0.0, %v913_v54  ;;  %v12059_v54 = vld [vmem:[#allocation6 + $0xe0] sm:$0xff] }
 0x25e   :  { %v12750_v7 = vpop.eup %12749  ;;  %v924_v6 = vmul.f32 1.442695, %v917_v10 }
 0x25f   :  { %v944_v5 = vadd.f32 1.0, %v12750_v7  ;;  %v947_v14 = vmul.f32 -0.5, %v12750_v7  ;;  %v950_v32 = vand.u32 2147483647, %v12750_v7 }
 0x261   :  { %12751 = vlog2.f32 %v944_v5  ;;  %v948_v51 = vadd.f32 1.0, %v947_v14  ;;  %vm951_vm15 = vcmp.lt.f32.partialorder %v950_v32, 0.0004427343 }
 0x262   :  { %12753 = vpow2.f32 %v924_v6  ;;  %v12050_v6 = vld [vmem:[#allocation6 + $0x98] sm:$0xff] }
 0x263   :  { %v949_v22 = vmul.f32 %v12750_v7, %v948_v51  ;;  %12755 = vpow2.f32 %v918_v58  ;;  %v12058_v51 = vld [vmem:[#allocation6 + $0xd8] sm:$0xff] }
 0x264   :  { %12757 = vpow2.f32 %v920_v60 }
 0x267   :  { %v12752_v59 = vpop.eup %12751 }
 0x268   :  { %v946_v24 = vmul.f32 0.6931472, %v12752_v59  ;;  %v12754_v15 = vpop.eup %12753 }
 0x269   :  { %v12756_v28 = vpop.eup %12755  ;;  %v953_v30 = vadd.f32 1.0, %v12754_v15  ;;  %v956_v42 = vmul.f32 -0.5, %v12754_v15  ;;  %v959_v16 = vand.u32 2147483647, %v12754_v15 }
 0x26a   :  { %v952_v4 = vsel %vm951_vm15, %v949_v22, %v946_v24  ;;  %v12758_v35 = vpop.eup %12757  ;;  %v926_v20 = vadd.f32 1.0, %v12756_v28  ;;  %v929_v46 = vmul.f32 -0.5, %v12756_v28  ;;  %v932_v21 = vand.u32 2147483647, %v12756_v28 }
 0x26b   :  { %v964_v11 = vadd.f32 %v952_v4, %v908_v3  ;;  %v935_v40 = vadd.f32 1.0, %v12758_v35  ;;  %12759 = vlog2.f32 %v953_v30  ;;  %v938_v62 = vmul.f32 -0.5, %v12758_v35  ;;  %v12049_v4 = vld [vmem:[#allocation6 + $0x90] sm:$0xff] }
 0x26c   :  { %12761 = vlog2.f32 %v926_v20  ;;  %v957_v1 = vadd.f32 1.0, %v956_v42  ;;  %v930_v7 = vadd.f32 1.0, %v929_v46  ;;  %v941_v13 = vand.u32 2147483647, %v12758_v35  ;;  %v12038_v20 = vld [vmem:[#allocation6 + $0x38] sm:$0xff]  ;;  %v12085_v42 = vld [vmem:[#allocation7 + $0x30] sm:$0xff] }
 0x26d   :  { %v13598_v9 = vadd.f32 -0.6931472, %v964_v11  ;;  %12763 = vlog2.f32 %v935_v40  ;;  %v939_v5 = vadd.f32 1.0, %v938_v62  ;;  %vm960_vm6 = vcmp.lt.f32.partialorder %v959_v16, 0.0004427343  ;;  %1282 = vmatpush.bf16.msrb.mxu3 %v12038_v20  ;;  %v12084_v46 = vld [vmem:[#allocation7 + $0x28] sm:$0xff] }
 0x26e   :  { %v958_v29 = vmul.f32 %v12754_v15, %v957_v1  ;;  %v931_v32 = vmul.f32 %v12756_v28, %v930_v7  ;;  %vm13620_vm7 = vcmp.lt.f32.partialorder %v932_v21, 0.0004427343  ;;  %vm13624_vm8 = vcmp.lt.f32.partialorder %v941_v13, 0.0004427343  ;;  %v12056_v28 = vld [vmem:[#allocation6 + $0xc8] sm:$0xff]  ;;  %v12083_v1 = vld [vmem:[#allocation7 + $0x20] sm:$0xff] }
 0x26f   :  { %v13605_v18 = vpack.c.bf16 %v13598_v9, %v13598_v9  ;;  %v940_v60 = vmul.f32 %v12758_v35, %v939_v5  ;;  %v909_v3 = vmax.f32 %v13587_v50, 0.0  ;;  %v907_v11 = vmax.f32 %v13591_v53, 0.0  ;;  %v12086_v35 = vld [vmem:[#allocation7 + $0x38] sm:$0xff]  ;;  %v12036_v62 = vld [vmem:[#allocation6 + $0x28] sm:$0xff] }
 0x270   :  { %v12082_v7 = vld [vmem:[#allocation7 + $0x18] sm:$0xff]  ;;  %v12080_v5 = vld [vmem:[#allocation7 + $0x8] sm:$0xff] }
 0x271   :  { %v980_v47 = vsel %vm346_vm0, %v13605_v18, 0  ;;  %v12760_v44 = vpop.eup %12759  ;;  %v12034_v16 = vld [vmem:[#allocation6 + $0x18] sm:$0xff]  ;;  %v12032_v13 = vld [vmem:[#allocation6 + $0x8] sm:$0xff] }
 0x272   :  { %989 = vmatpush.bf16.msra.mxu1 %v980_v47  ;;  %1011 = vmatpush.bf16.msrb.mxu2 %v980_v47  ;;  %v12762_v56 = vpop.eup %12761  ;;  %v955_v10 = vmul.f32 0.6931472, %v12760_v44  ;;  %v12044_v44 = vld [vmem:[#allocation6 + $0x68] sm:$0xff]  ;;  %v12042_v21 = vld [vmem:[#allocation6 + $0x58] sm:$0xff] }
 0x273   :  { %v12764_v14 = vpop.eup %12763  ;;  %v928_v58 = vmul.f32 0.6931472, %v12762_v56  ;;  %v12081_v56 = vld [vmem:[#allocation7 + $0x10] sm:$0xff] }
 0x274   :  { %v937_v59 = vmul.f32 0.6931472, %v12764_v14  ;;  %v961_v24 = vsel %vm960_vm6, %v958_v29, %v955_v10  ;;  %v12079_v10 = vld [vmem:[#allocation7] sm:$0xff]  ;;  %v12033_v14 = vld [vmem:[#allocation6 + $0x10] sm:$0xff] }
 0x275   :  { %9341 = vmatmul.msk.bf16.vlgmr.msra.gmra.mxu1 %vm342_vm2, %v13612_v36  ;;  %9344 = vmatmul.msk.bf16.vlgmr.msrb.gmra.mxu2 %vm342_vm2, %v13614_v37  ;;  %v965_v15 = vadd.f32 %v961_v24, %v909_v3  ;;  %v934_v12 = vsel %vm13620_vm7, %v931_v32, %v928_v58  ;;  %v12041_v29 = vld [vmem:[#allocation6 + $0x50] sm:$0xff]  ;;  %v12039_v32 = vld [vmem:[#allocation6 + $0x40] sm:$0xff] }
 0x276   :  { %1310 = vmatpush.bf16.msrb.mxu1 %v12054_v19  ;;  %1324 = vmatpush.bf16.msra.mxu2 %v12062_v26  ;;  %v943_v19 = vsel %vm13624_vm8, %v940_v60, %v937_v59  ;;  %v12048_v26 = vld [vmem:[#allocation6 + $0x88] sm:$0xff]  ;;  %v962_v50 = vadd.f32 %v934_v12, %v906_v57  ;;  %v12070_v57 = vld [vmem:[#allocation9 + $0x38] sm:$0xff]  ;;  %v12067_v12 = vld [vmem:[#allocation9 + $0x20] sm:$0xff] }
 0x277   :  { %v963_v27 = vadd.f32 %v943_v19, %v907_v11  ;;  %v13635_v30 = vadd.f32 -0.6931472, %v965_v15  ;;  %v12069_v11 = vld [vmem:[#allocation9 + $0x30] sm:$0xff]  ;;  %v12068_v15 = vld [vmem:[#allocation9 + $0x28] sm:$0xff]  ;;  %v12693_v19 = vld [vmem:[%s15119_s14] ss:$0 sm:$0xff] }
 0x278   :  { %v13637_v53 = vadd.f32 -0.6931472, %v962_v50  ;;  %v12066_v50 = vld [vmem:[#allocation9 + $0x18] sm:$0xff] }
 0x279   :  { %v13639_v45 = vadd.f32 -0.6931472, %v963_v27  ;;  %v1018_v47 = vperm.slane %v13635_v30, 0 }
 0x27a   :  { %1311 = vmatpush.bf16.msrb.mxu1 %v12053_v38  ;;  %1325 = vmatpush.bf16.msra.mxu2 %v12061_v39  ;;  %v12046_v38 = vld [vmem:[#allocation6 + $0x78] sm:$0xff] }
 0x27b   :  { %v1086_v39 = vpack.c.bf16 %v13639_v45, %v13637_v53  ;;  %v13644_v40 = vpack.c.bf16 %v1018_v47, %v1018_v47  ;;  %1296 = vmatpush.bf16.msrb.mxu0 %v12046_v38 }
 0x27e   :  { %1312 = vmatpush.bf16.msrb.mxu1 %v12052_v8  ;;  %1326 = vmatpush.bf16.msra.mxu2 %v12060_v43  ;;  %v12037_v8 = vld [vmem:[#allocation6 + $0x30] sm:$0xff] }
 0x27f   :  { %v12045_v43 = vld [vmem:[#allocation6 + $0x70] sm:$0xff]  ;;  %1283 = vmatpush.bf16.msrb.mxu3 %v12037_v8 }
 0x280   :  { %1297 = vmatpush.bf16.msrb.mxu0 %v12045_v43 }
 0x282   :  { %1313 = vmatpush.bf16.msrb.mxu1 %v12051_v48  ;;  %1327 = vmatpush.bf16.msra.mxu2 %v12059_v54  ;;  %v12035_v48 = vld [vmem:[#allocation6 + $0x20] sm:$0xff] }
 0x283   :  { %1284 = vmatpush.bf16.msrb.mxu3 %v12036_v62  ;;  %v12043_v54 = vld [vmem:[#allocation6 + $0x60] sm:$0xff] }
 0x284   :  { %1298 = vmatpush.bf16.msrb.mxu0 %v12044_v44 }
 0x286   :  { %1314 = vmatpush.bf16.msrb.mxu1 %v12050_v6  ;;  %1328 = vmatpush.bf16.msra.mxu2 %v12058_v51  ;;  %v12031_v6 = vld [vmem:[#allocation6] sm:$0xff]  ;;  %v12040_v51 = vld [vmem:[#allocation6 + $0x48] sm:$0xff] }
 0x287   :  { %1285 = vmatpush.bf16.msrb.mxu3 %v12035_v48 }
 0x288   :  { %1299 = vmatpush.bf16.msrb.mxu0 %v12043_v54 }
 0x28a   :  { %1315 = vmatpush.bf16.msrb.mxu1 %v12049_v4  ;;  %1329 = vmatpush.bf16.msra.mxu2 %v12057_v17 }
 0x28b   :  { %1286 = vmatpush.bf16.msrb.mxu3 %v12034_v16  ;;  %v12078_v16 = vld [vmem:[#allocation9 + $0x78] sm:$0xff] }
 0x28c   :  { %1300 = vmatpush.bf16.msrb.mxu0 %v12042_v21 }
 0x28e   :  { %1316 = vmatpush.bf16.msrb.mxu1 %v12048_v26  ;;  %1330 = vmatpush.bf16.msra.mxu2 %v12056_v28 }
 0x28f   :  { %1287 = vmatpush.bf16.msrb.mxu3 %v12033_v14 }
 0x290   :  { %1301 = vmatpush.bf16.msrb.mxu0 %v12041_v29 }
 0x292   :  { %1317 = vmatpush.bf16.msrb.mxu1 %v12047_v52  ;;  %1331 = vmatpush.bf16.msra.mxu2 %v12055_v31 }
 0x293   :  { %1288 = vmatpush.bf16.msrb.mxu3 %v12032_v13 }
 0x294   :  { %1302 = vmatpush.bf16.msrb.mxu0 %v12040_v51 }
 0x295   :  { %1318 = vmatmul.bf16.vlgmr.msrb.gmra.mxu1 %v1086_v39  ;;  %1332 = vmatmul.bf16.vlgmr.msra.gmra.mxu2 %v13644_v40  ;;  %v12064_v39 = vld [vmem:[#allocation9 + $0x8] sm:$0xff] }
 0x296   :  { %1811 = vmatpush.bf16.msrb.mxu2 %v12086_v35  ;;  %v12065_v35 = vld [vmem:[#allocation9 + $0x10] sm:$0xff] }
 0x297   :  { %1289 = vmatpush.bf16.msrb.mxu3 %v12031_v6 }
 0x298   :  { %1303 = vmatpush.bf16.msrb.mxu0 %v12039_v32 }
 0x29a   :  { %1812 = vmatpush.bf16.msrb.mxu2 %v12085_v42 }
 0x29b   :  { %1437 = vmatpush.bf16.msra.mxu3 %v12070_v57 }
 0x29c   :  { %1551 = vmatpush.bf16.msra.mxu0 %v12078_v16 }
 0x29e   :  { %1813 = vmatpush.bf16.msrb.mxu2 %v12084_v46  ;;  %v12063_v46 = vld [vmem:[#allocation9] sm:$0xff] }
 0x29f   :  { %1438 = vmatpush.bf16.msra.mxu3 %v12069_v11 }
 0x2a2   :  { %1814 = vmatpush.bf16.msrb.mxu2 %v12083_v1 }
 0x2a3   :  { %1439 = vmatpush.bf16.msra.mxu3 %v12068_v15 }
 0x2a6   :  { %1815 = vmatpush.bf16.msrb.mxu2 %v12082_v7 }
 0x2a7   :  { %1440 = vmatpush.bf16.msra.mxu3 %v12067_v12 }
 0x2aa   :  { %1816 = vmatpush.bf16.msrb.mxu2 %v12081_v56 }
 0x2ab   :  { %1441 = vmatpush.bf16.msra.mxu3 %v12066_v50 }
 0x2ae   :  { %1817 = vmatpush.bf16.msrb.mxu2 %v12080_v5 }
 0x2af   :  { %1442 = vmatpush.bf16.msra.mxu3 %v12065_v35  ;;  %v12075_v35 = vld [vmem:[#allocation9 + $0x60] sm:$0xff] }
 0x2b2   :  { %1818 = vmatpush.bf16.msrb.mxu2 %v12079_v10 }
 0x2b3   :  { %1443 = vmatpush.bf16.msra.mxu3 %v12064_v39  ;;  %v12071_v39 = vld [vmem:[#allocation9 + $0x40] sm:$0xff] }
 0x2b5   :  { %1819 = vmatmul.bf16.vlgmr.msrb.gmra.mxu2 %v13605_v18 }
 0x2b7   :  { %1444 = vmatpush.bf16.msra.mxu3 %v12063_v46 }
 0x2f2   :  { %v991_v58 = vpop.f32.mrf.mxu1 }
 0x2f8   :  { %v1013_v59 = vpop.f32.mrf.mxu2 }
 0x2fa   :  { %v993_v60 = vpop.f32.mrf.mxu1 }
 0x2fb   :  { %v1084_v24 = vpack.c.bf16 %v993_v60, %v991_v58 }
 0x2fd   :  { %1290 = vmatmul.bf16.vlgmr.msrb.gmra.mxu3 %v1084_v24 }
 0x300   :  { %v1015_v18 = vpop.f32.mrf.mxu2 }
 0x301   :  { %v1085_v22 = vpack.c.bf16 %v1015_v18, %v1013_v59 }
 0x303   :  { %1304 = vmatmul.bf16.vlgmr.msrb.gmra.mxu0 %v1085_v22 }
 0x312   :  { %v1319_v52 = vpop.f32.mrf.mxu1 }
 0x318   :  { %v1333_v61 = vpop.f32.mrf.mxu2 }
 0x31a   :  { %v1321_v1 = vpop.f32.mrf.mxu1 }
 0x320   :  { %v1335_v3 = vpop.f32.mrf.mxu2 }
 0x338   :  { %v13648_v4 = vpop.f32.mrf.mxu2 }
 0x340   :  { %v1822_v17 = vpop.f32.mrf.mxu2 }
 0x380   :  { %v1291_v26 = vpop.f32.mrf.mxu3  ;;  %v1305_v28 = vpop.f32.mrf.mxu0 }
 0x381   :  { %v1292_v27 = vadd.f32 %v12693_v19, %v1291_v26 }
 0x383   :  { %v1306_v31 = vadd.f32 %v1305_v28, %v1292_v27 }
 0x385   :  { %v1320_v47 = vadd.f32 %v1319_v52, %v1306_v31  ;;  %v12077_v52 = vld [vmem:[#allocation9 + $0x70] sm:$0xff]  ;;  %v12076_v31 = vld [vmem:[#allocation9 + $0x68] sm:$0xff] }
 0x386   :  { %1552 = vmatpush.bf16.msra.mxu0 %v12077_v52 }
 0x387   :  { %v1334_v20 = vadd.f32 %v1333_v61, %v1320_v47  ;;  %v12074_v47 = vld [vmem:[#allocation9 + $0x58] sm:$0xff] }
 0x388   :  { %v1293_v38 = vpop.f32.mrf.mxu3  ;;  %v1307_v43 = vpop.f32.mrf.mxu0 }
 0x389   :  { %v1340_v42 = vand.u32 2147483647, %v1334_v20  ;;  %v1294_v8 = vadd.f32 %v12693_v19, %v1293_v38  ;;  %v1338_v17 = vmax.f32 %v1334_v20, 0.0  ;;  %v12073_v20 = vld [vmem:[#allocation9 + $0x50] sm:$0xff]  ;;  %v12072_v38 = vld [vmem:[#allocation9 + $0x48] sm:$0xff] }
 0x38a   :  { %1553 = vmatpush.bf16.msra.mxu0 %v12076_v31 }
 0x38b   :  { %v1342_v62 = vsub.f32 0.0, %v1340_v42  ;;  %v1308_v44 = vadd.f32 %v1307_v43, %v1294_v8  ;;  %v12102_v42 = vld [vmem:[#allocation7 + $0xb8] sm:$0xff]  ;;  %v12694_v8 = vld [vmem:[%s15119_s14 + $0x1] ss:$0 sm:$0xff]  ;;  %v12101_v43 = vld [vmem:[#allocation7 + $0xb0] sm:$0xff] }
 0x38d   :  { %v1344_v48 = vmul.f32 1.442695, %v1342_v62  ;;  %v1322_v54 = vadd.f32 %v1321_v1, %v1308_v44  ;;  %v12100_v44 = vld [vmem:[#allocation7 + $0xa8] sm:$0xff] }
 0x38e   :  { %1554 = vmatpush.bf16.msra.mxu0 %v12075_v35 }
 0x38f   :  { %12765 = vpow2.f32 %v1344_v48  ;;  %v1336_v7 = vadd.f32 %v1335_v3, %v1322_v54  ;;  %v12099_v54 = vld [vmem:[#allocation7 + $0xa0] sm:$0xff] }
 0x391   :  { %v1341_v56 = vand.u32 2147483647, %v1336_v7  ;;  %v1339_v12 = vmax.f32 %v1336_v7, 0.0 }
 0x392   :  { %1555 = vmatpush.bf16.msra.mxu0 %v12074_v47 }
 0x393   :  { %v1343_v5 = vsub.f32 0.0, %v1341_v56 }
 0x395   :  { %v12766_v10 = vpop.eup %12765  ;;  %v1346_v14 = vmul.f32 1.442695, %v1343_v5  ;;  %v12098_v5 = vld [vmem:[#allocation7 + $0x98] sm:$0xff] }
 0x396   :  { %v1348_v21 = vadd.f32 1.0, %v12766_v10  ;;  %v1351_v13 = vmul.f32 -0.5, %v12766_v10  ;;  %v1354_v59 = vand.u32 2147483647, %v12766_v10  ;;  %1556 = vmatpush.bf16.msra.mxu0 %v12073_v20 }
 0x397   :  { %12767 = vpow2.f32 %v1346_v14  ;;  %v12097_v14 = vld [vmem:[#allocation7 + $0x90] sm:$0xff] }
 0x398   :  { %12769 = vlog2.f32 %v1348_v21  ;;  %v1352_v32 = vadd.f32 1.0, %v1351_v13  ;;  %vm1355_vm9 = vcmp.lt.f32.partialorder %v1354_v59, 0.0004427343 }
 0x39a   :  { %v1353_v24 = vmul.f32 %v12766_v10, %v1352_v32  ;;  %1557 = vmatpush.bf16.msra.mxu0 %v12072_v38  ;;  %v12095_v32 = vld [vmem:[#allocation7 + $0x80] sm:$0xff] }
 0x39b   :  { %v12696_v38 = vld [vmem:[%s15243_s13] ss:$0 sm:$0xff] }
 0x39c   :  { %vm187_vm13 = vcmp.eq.s32.totalorder %v13424_v63, %v12696_v38  ;;  %v12094_v38 = vld [vmem:[#allocation7 + $0x78] sm:$0xff]  ;;  %v11388_v63 = vld [vmem:[#allocation10 + $0x48] sm:$0xf] }
 0x39d   :  { %v12768_v29 = vpop.eup %12767  ;;  %1824 = vmatpush.bf16.msrb.mxu3 %v12094_v38 }
 0x39e   :  { %v12770_v6 = vpop.eup %12769  ;;  %v1357_v51 = vadd.f32 1.0, %v12768_v29  ;;  %v1360_v58 = vmul.f32 -0.5, %v12768_v29  ;;  %v1363_v22 = vand.u32 2147483647, %v12768_v29  ;;  %1558 = vmatpush.bf16.msra.mxu0 %v12071_v39  ;;  %v9188_v39 = vsel %vm187_vm13, 1.0, %v15130_v49 }
 0x39f   :  { %v1350_v60 = vmul.f32 0.6931472, %v12770_v6 }
 0x3a0   :  { %12771 = vlog2.f32 %v1357_v51  ;;  %v1361_v18 = vadd.f32 1.0, %v1360_v58  ;;  %vm1364_vm10 = vcmp.lt.f32.partialorder %v1363_v22, 0.0004427343  ;;  %v12096_v51 = vld [vmem:[#allocation7 + $0x88] sm:$0xff] }
 0x3a1   :  { %v1356_v61 = vsel %vm1355_vm9, %v1353_v24, %v1350_v60 }
 0x3a2   :  { %v1362_v11 = vmul.f32 %v12768_v29, %v1361_v18  ;;  %v1366_v15 = vadd.f32 %v1356_v61, %v1338_v17  ;;  %1837 = vmatpush.bf16.msrb.mxu0 %v12102_v42  ;;  %v191_v42 = vsel %vm190_vm14, %v9188_v39, 0.0 }
 0x3a3   :  { %192 = vadd.xlane.f32.xlu2 %v191_v42  ;;  %v12139_v42 = vld [vmem:[#allocation7 + $0x160] sm:$0xff] }
 0x3a4   :  { %v9473_v28 = vadd.f32 -0.6931472, %v1366_v15 }
 0x3a6   :  { %v12772_v3 = vpop.eup %12771  ;;  %1838 = vmatpush.bf16.msrb.mxu0 %v12101_v43 }
 0x3a7   :  { %v1359_v57 = vmul.f32 0.6931472, %v12772_v3 }
 0x3a9   :  { %v1365_v19 = vsel %vm1364_vm10, %v1362_v11, %v1359_v57 }
 0x3aa   :  { %v1367_v26 = vadd.f32 %v1365_v19, %v1339_v12  ;;  %1839 = vmatpush.bf16.msrb.mxu0 %v12100_v44 }
 0x3ac   :  { %v9474_v50 = vadd.f32 -0.6931472, %v1367_v26 }
 0x3ae   :  { %v1386_v27 = vpack.c.bf16 %v9474_v50, %v9473_v28  ;;  %1840 = vmatpush.bf16.msrb.mxu0 %v12099_v54 }
 0x3b0   :  { %1445 = vmatmul.bf16.vlgmr.msra.gmra.mxu3 %v1386_v27 }
 0x3b2   :  { %1841 = vmatpush.bf16.msrb.mxu0 %v12098_v5 }
 0x3b6   :  { %1842 = vmatpush.bf16.msrb.mxu0 %v12097_v14 }
 0x3ba   :  { %1843 = vmatpush.bf16.msrb.mxu0 %v12096_v51 }
 0x3be   :  { %1844 = vmatpush.bf16.msrb.mxu0 %v12095_v32 }
 0x433   :  { %v1446_v46 = vpop.f32.mrf.mxu3 }
 0x434   :  { %v1447_v62 = vadd.f32 %v12694_v8, %v1446_v46 }
 0x436   :  { %v1453_v1 = vand.u32 2147483647, %v1447_v62  ;;  %v1451_v19 = vmax.f32 %v1447_v62, 0.0 }
 0x438   :  { %v1455_v48 = vsub.f32 0.0, %v1453_v1 }
 0x43a   :  { %v1457_v7 = vmul.f32 1.442695, %v1455_v48 }
 0x43b   :  { %v1448_v16 = vpop.f32.mrf.mxu3 }
 0x43c   :  { %12773 = vpow2.f32 %v1457_v7  ;;  %v1449_v56 = vadd.f32 %v12694_v8, %v1448_v16  ;;  %v12695_v8 = vld [vmem:[%s15119_s14 + $0x2] ss:$0 sm:$0xff] }
 0x43e   :  { %v1454_v10 = vand.u32 2147483647, %v1449_v56  ;;  %v1452_v27 = vmax.f32 %v1449_v56, 0.0 }
 0x440   :  { %v1456_v21 = vsub.f32 0.0, %v1454_v10 }
 0x442   :  { %v12774_v13 = vpop.eup %12773  ;;  %v1459_v29 = vmul.f32 1.442695, %v1456_v21 }
 0x443   :  { %v1461_v6 = vadd.f32 1.0, %v12774_v13  ;;  %v1464_v58 = vmul.f32 -0.5, %v12774_v13  ;;  %v1467_v61 = vand.u32 2147483647, %v12774_v13 }
 0x444   :  { %12775 = vpow2.f32 %v1459_v29 }
 0x445   :  { %12777 = vlog2.f32 %v1461_v6  ;;  %v1465_v18 = vadd.f32 1.0, %v1464_v58  ;;  %vm1468_vm11 = vcmp.lt.f32.partialorder %v1467_v61, 0.0004427343 }
 0x447   :  { %v1466_v17 = vmul.f32 %v12774_v13, %v1465_v18 }
 0x44a   :  { %v12776_v59 = vpop.eup %12775 }
 0x44b   :  { %v12778_v60 = vpop.eup %12777  ;;  %v1470_v24 = vadd.f32 1.0, %v12776_v59  ;;  %v1473_v22 = vmul.f32 -0.5, %v12776_v59  ;;  %v1476_v11 = vand.u32 2147483647, %v12776_v59 }
 0x44c   :  { %v1463_v3 = vmul.f32 0.6931472, %v12778_v60 }
 0x44d   :  { %12779 = vlog2.f32 %v1470_v24  ;;  %v1474_v57 = vadd.f32 1.0, %v1473_v22  ;;  %vm1477_vm12 = vcmp.lt.f32.partialorder %v1476_v11, 0.0004427343 }
 0x44e   :  { %v1469_v15 = vsel %vm1468_vm11, %v1466_v17, %v1463_v3  ;;  %vm220_vm11 = vcmp.lt.s32.totalorder %v13413_v41, 6  ;;  %v12132_v41 = vld [vmem:[#allocation7 + $0x128] sm:$0xff] }
 0x44f   :  { %v1475_v28 = vmul.f32 %v12776_v59, %v1474_v57  ;;  %v1479_v50 = vadd.f32 %v1469_v15, %v1451_v19 }
 0x451   :  { %v9507_v35 = vadd.f32 -0.6931472, %v1479_v50  ;;  %v9709_v50 = vsel %vm221_vm3, 1.0, %v15130_v49 }
 0x453   :  { %v12780_v12 = vpop.eup %12779 }
 0x454   :  { %v1472_v26 = vmul.f32 0.6931472, %v12780_v12 }
 0x456   :  { %v1478_v52 = vsel %vm1477_vm12, %v1475_v28, %v1472_v26 }
 0x457   :  { %v1480_v31 = vadd.f32 %v1478_v52, %v1452_v27  ;;  %v12142_v27 = vld [vmem:[#allocation7 + $0x178] sm:$0xff] }
 0x459   :  { %v9508_v47 = vadd.f32 -0.6931472, %v1480_v31  ;;  %v13676_v31 = vpack.c.bf16 %v9188_v39, %v9188_v39  ;;  %v12093_v39 = vld [vmem:[#allocation7 + $0x70] sm:$0xff] }
 0x45a   :  { %1825 = vmatpush.bf16.msrb.mxu3 %v12093_v39 }
 0x45b   :  { %v1500_v20 = vpack.c.bf16 %v9508_v47, %v9507_v35  ;;  %v13678_v35 = vpack.c.bf16 %v9709_v50, %v9709_v50  ;;  %v12141_v47 = vld [vmem:[#allocation7 + $0x170] sm:$0xff]  ;;  %v12159_v50 = vld [vmem:[#allocation2 + $0x84] sm:$0xf] }
 0x45d   :  { %1559 = vmatmul.bf16.vlgmr.msra.gmra.mxu0 %v1500_v20  ;;  %v12140_v20 = vld [vmem:[#allocation7 + $0x168] sm:$0xff] }
 0x46d   :  { %1845 = vmatmul.bf16.vlgmr.msrb.gmra.mxu0 %v13644_v40 }
 0x4da   :  { %v1560_v43 = vpop.f32.mrf.mxu0 }
 0x4db   :  { %v1561_v46 = vadd.f32 %v12695_v8, %v1560_v43  ;;  %v12092_v43 = vld [vmem:[#allocation7 + $0x68] sm:$0xff] }
 0x4dc   :  { %1826 = vmatpush.bf16.msrb.mxu3 %v12092_v43 }
 0x4dd   :  { %v1567_v62 = vand.u32 2147483647, %v1561_v46  ;;  %v1565_v3 = vmax.f32 %v1561_v46, 0.0  ;;  %v12137_v46 = vld [vmem:[#allocation7 + $0x150] sm:$0xff] }
 0x4df   :  { %v1569_v40 = vsub.f32 0.0, %v1567_v62  ;;  %v12091_v62 = vld [vmem:[#allocation7 + $0x60] sm:$0xff] }
 0x4e0   :  { %1827 = vmatpush.bf16.msrb.mxu3 %v12091_v62 }
 0x4e1   :  { %v1571_v44 = vmul.f32 1.442695, %v1569_v40  ;;  %v12136_v40 = vld [vmem:[#allocation7 + $0x148] sm:$0xff] }
 0x4e2   :  { %v1562_v1 = vpop.f32.mrf.mxu0 }
 0x4e3   :  { %12781 = vpow2.f32 %v1571_v44  ;;  %v1563_v48 = vadd.f32 %v12695_v8, %v1562_v1  ;;  %v12138_v8 = vld [vmem:[#allocation7 + $0x158] sm:$0xff]  ;;  %v12173_v1 = vld [vmem:[#allocation2 + $0xf4] sm:$0xf] }
 0x4e4   :  { %v12090_v44 = vld [vmem:[#allocation7 + $0x58] sm:$0xff] }
 0x4e5   :  { %v1568_v54 = vand.u32 2147483647, %v1563_v48  ;;  %v1566_v15 = vmax.f32 %v1563_v48, 0.0  ;;  %v9937_v48 = vld [vmem:[#allocation2 + $0xf8] sm:$0xf0]  ;;  %1828 = vmatpush.bf16.msrb.mxu3 %v12090_v44 }
 0x4e7   :  { %v1570_v7 = vsub.f32 0.0, %v1568_v54  ;;  %v12135_v54 = vld [vmem:[#allocation7 + $0x140] sm:$0xff] }
 0x4e9   :  { %v12782_v16 = vpop.eup %12781  ;;  %v1573_v56 = vmul.f32 1.442695, %v1570_v7  ;;  %v12089_v7 = vld [vmem:[#allocation7 + $0x50] sm:$0xff] }
 0x4ea   :  { %v1575_v5 = vadd.f32 1.0, %v12782_v16  ;;  %v13666_v10 = vpop.f32.mrf.mxu0  ;;  %v1578_v14 = vmul.f32 -0.5, %v12782_v16  ;;  %v1581_v58 = vand.u32 2147483647, %v12782_v16  ;;  %1829 = vmatpush.bf16.msrb.mxu3 %v12089_v7 }
 0x4eb   :  { %12783 = vpow2.f32 %v1573_v56  ;;  %v12171_v56 = vld [vmem:[#allocation2 + $0xe4] sm:$0xf] }
 0x4ec   :  { %12785 = vlog2.f32 %v1575_v5  ;;  %v1579_v51 = vadd.f32 1.0, %v1578_v14  ;;  %vm1582_vm15 = vcmp.lt.f32.partialorder %v1581_v58, 0.0004427343  ;;  %v9929_v5 = vld [vmem:[#allocation2 + $0xe8] sm:$0xf0] }
 0x4ed   :  { %v12088_v14 = vld [vmem:[#allocation7 + $0x48] sm:$0xff]  ;;  %v12167_v58 = vld [vmem:[#allocation2 + $0xc4] sm:$0xf] }
 0x4ee   :  { %v1580_v60 = vmul.f32 %v12782_v16, %v1579_v51  ;;  %v9940_v16 = vor.u32 %v12173_v1, %v9937_v48  ;;  %1830 = vmatpush.bf16.msrb.mxu3 %v12088_v14  ;;  %v193_v51 = vpop.xlane.xlu2 %192 }
 0x4f1   :  { %v12784_v21 = vpop.eup %12783 }
 0x4f2   :  { %v12786_v13 = vpop.eup %12785  ;;  %v1584_v29 = vadd.f32 1.0, %v12784_v21  ;;  %v1848_v6 = vpop.f32.mrf.mxu0  ;;  %v1587_v32 = vmul.f32 -0.5, %v12784_v21  ;;  %v1590_v18 = vand.u32 2147483647, %v12784_v21 }
 0x4f3   :  { %v1577_v59 = vmul.f32 0.6931472, %v12786_v13  ;;  %v12169_v13 = vld [vmem:[#allocation2 + $0xd4] sm:$0xf] }
 0x4f4   :  { %12787 = vlog2.f32 %v1584_v29  ;;  %v1588_v24 = vadd.f32 1.0, %v1587_v32  ;;  %vm1591_vm1 = vcmp.lt.f32.partialorder %v1590_v18, 0.0004427343  ;;  %v9921_v29 = vld [vmem:[#allocation2 + $0xd8] sm:$0xf0]  ;;  %v194_v32 = vmax.f32 %v193_v51, 1.0 }
 0x4f5   :  { %v1583_v22 = vsel %vm1582_vm15, %v1580_v60, %v1577_v59  ;;  %v9924_v6 = vor.u32 %v12169_v13, %v9921_v29  ;;  %v9913_v59 = vld [vmem:[#allocation2 + $0xc8] sm:$0xf0]  ;;  %v12087_v60 = vld [vmem:[#allocation7 + $0x40] sm:$0xff]  ;;  %v12165_v18 = vld [vmem:[#allocation2 + $0xb4] sm:$0xf] }
 0x4f6   :  { %v1589_v57 = vmul.f32 %v12784_v21, %v1588_v24  ;;  %v1593_v11 = vadd.f32 %v1583_v22, %v1565_v3  ;;  %v9932_v21 = vor.u32 %v12171_v56, %v9929_v5  ;;  %v9916_v24 = vor.u32 %v12167_v58, %v9913_v59  ;;  %1831 = vmatpush.bf16.msrb.mxu3 %v12087_v60  ;;  %v9905_v22 = vld [vmem:[#allocation2 + $0xb8] sm:$0xf0]  ;;  %v12163_v3 = vld [vmem:[#allocation2 + $0xa4] sm:$0xf]  ;;  %v12109_v29 = vld [vmem:[#allocation9 + $0xb0] sm:$0xff] }
 0x4f7   :  { %12789 = vrcp.f32 %v194_v32  ;;  %vm200_vm4 = vweird.f32 %v194_v32  ;;  %v206_v39 = vand.u32 2147483648, %v194_v32  ;;  %v204_v43 = vand.u32 2147483647, %v194_v32  ;;  %v12107_v51 = vld [vmem:[#allocation9 + $0xa0] sm:$0xff]  ;;  %v12125_v58 = vld [vmem:[#allocation7 + $0xf0] sm:$0xff] }
 0x4f8   :  { %v13669_v26 = vadd.f32 -0.6931472, %v1593_v11  ;;  %v12692_v60 = vld [vmem:[%s15119_s14 + $0x3] ss:$0 sm:$0xff] }
 0x4f9   :  { %vm205_vm7 = vcmp.eq.f32.partialorder %v204_v43, 8.507059e+37 }
 0x4fa   :  { %v12788_v61 = vpop.eup %12787 }
 0x4fb   :  { %v1586_v17 = vmul.f32 0.6931472, %v12788_v61  ;;  %v9908_v61 = vor.u32 %v12165_v18, %v9905_v22  ;;  %v1821_v18 = vadd.f32 %v12692_v60, %v13648_v4 }
 0x4fd   :  { %v1592_v12 = vsel %vm1591_vm1, %v1589_v57, %v1586_v17  ;;  %v9897_v17 = vld [vmem:[#allocation2 + $0xa8] sm:$0xf0]  ;;  %v12161_v57 = vld [vmem:[#allocation2 + $0x94] sm:$0xf] }
 0x4fe   :  { %v1594_v19 = vadd.f32 %v1592_v12, %v1566_v15  ;;  %v9900_v11 = vor.u32 %v12163_v3, %v9897_v17  ;;  %v9889_v15 = vld [vmem:[#allocation2 + $0x98] sm:$0xf0]  ;;  %v12790_v12 = vpop.eup %12789 }
 0x4ff   :  { %vm201_vm5 = vweird.f32 %v12790_v12 }
 0x500   :  { %v13671_v28 = vadd.f32 -0.6931472, %v1594_v19  ;;  %v9892_v19 = vor.u32 %v12161_v57, %v9889_v15  ;;  %vm202_vm6 = vmor %vm200_vm4, %vm201_vm5 }
 0x502   :  { %v1598_v52 = vpack.c.bf16 %v13671_v28, %v13669_v26  ;;  %v13689_v14 = vadd.f32 %v13671_v28, %v13639_v45  ;;  %v12105_v45 = vld [vmem:[#allocation9 + $0x90] sm:$0xff]  ;;  %v12104_v28 = vld [vmem:[#allocation9 + $0x88] sm:$0xff] }
 0x504   :  { %1609 = vmatpush.bf16.msra.mxu1 %v1598_v52  ;;  %2097 = vmatpush.bf16.msra.mxu0 %v1598_v52  ;;  %v196_v52 = vmul.f32 %v12790_v12, %v194_v32  ;;  %v12106_v32 = vld [vmem:[#allocation9 + $0x98] sm:$0xff] }
 0x507   :  { %9543 = vmatmul.msk.bf16.vlgmr.msra.gmra.mxu1 %vm190_vm14, %v13676_v31  ;;  %9710 = vmatmul.msk.bf16.vlgmr.msra.gmra.mxu0 %vm190_vm14, %v13678_v35 }
 0x508   :  { %2327 = vmatpush.bf16.msrb.mxu0 %v12142_v27  ;;  %v9881_v27 = vld [vmem:[#allocation2 + $0x88] sm:$0xf0] }
 0x50c   :  { %2328 = vmatpush.bf16.msrb.mxu0 %v12141_v47  ;;  %v9884_v47 = vor.u32 %v12159_v50, %v9881_v27  ;;  %v12121_v50 = vld [vmem:[#allocation7 + $0xd0] sm:$0xff] }
 0x510   :  { %2329 = vmatpush.bf16.msrb.mxu0 %v12140_v20  ;;  %v197_v20 = vsub.f32 1.0, %v196_v52  ;;  %v12120_v52 = vld [vmem:[#allocation7 + $0xc8] sm:$0xff] }
 0x512   :  { %v198_v38 = vmul.f32 %v12790_v12, %v197_v20 }
 0x514   :  { %2330 = vmatpush.bf16.msrb.mxu0 %v12139_v42  ;;  %v12110_v42 = vld [vmem:[#allocation9 + $0xb8] sm:$0xff] }
 0x515   :  { %1934 = vmatpush.bf16.msrb.mxu1 %v12110_v42 }
 0x518   :  { %2331 = vmatpush.bf16.msrb.mxu0 %v12138_v8  ;;  %v199_v8 = vadd.f32 %v12790_v12, %v198_v38 }
 0x519   :  { %1935 = vmatpush.bf16.msrb.mxu1 %v12109_v29  ;;  %v12114_v29 = vld [vmem:[#allocation9 + $0xd8] sm:$0xff] }
 0x51a   :  { %v203_v62 = vsel %vm202_vm6, %v12790_v12, %v199_v8 }
 0x51c   :  { %2332 = vmatpush.bf16.msrb.mxu0 %v12137_v46  ;;  %v207_v46 = vor.u32 1.1754944e-38, %v206_v39 }
 0x520   :  { %2333 = vmatpush.bf16.msrb.mxu0 %v12136_v40  ;;  %v13684_v40 = vsel %vm205_vm7, %v207_v46, %v203_v62 }
 0x524   :  { %2334 = vmatpush.bf16.msrb.mxu0 %v12135_v54 }
 0x528   :  { %2733 = vmatpush.bf16.msra.mxu0 %v9940_v16 }
 0x52c   :  { %2734 = vmatpush.bf16.msra.mxu0 %v9932_v21  ;;  %v13693_v21 = vadd.f32 %v13669_v26, %v13637_v53  ;;  %v12103_v53 = vld [vmem:[#allocation9 + $0x80] sm:$0xff]  ;;  %v12126_v26 = vld [vmem:[#allocation7 + $0xf8] sm:$0xff] }
 0x52e   :  { %v13697_v13 = vpack.c.bf16 %v13689_v14, %v13693_v21 }
 0x530   :  { %2735 = vmatpush.bf16.msra.mxu0 %v9924_v6  ;;  %v12108_v6 = vld [vmem:[#allocation9 + $0xa8] sm:$0xff] }
 0x531   :  { %1936 = vmatpush.bf16.msrb.mxu1 %v12108_v6  ;;  %v12113_v6 = vld [vmem:[#allocation9 + $0xd0] sm:$0xff] }
 0x534   :  { %2736 = vmatpush.bf16.msra.mxu0 %v9916_v24  ;;  %v12124_v24 = vld [vmem:[#allocation7 + $0xe8] sm:$0xff] }
 0x535   :  { %1937 = vmatpush.bf16.msrb.mxu1 %v12107_v51  ;;  %v12112_v51 = vld [vmem:[#allocation9 + $0xc8] sm:$0xff] }
 0x538   :  { %2737 = vmatpush.bf16.msra.mxu0 %v9908_v61  ;;  %v12123_v61 = vld [vmem:[#allocation7 + $0xe0] sm:$0xff] }
 0x539   :  { %1938 = vmatpush.bf16.msrb.mxu1 %v12106_v32  ;;  %v12697_v32 = vld [vmem:[%s15119_s14 + $0x4] ss:$0 sm:$0xff] }
 0x53c   :  { %2738 = vmatpush.bf16.msra.mxu0 %v9900_v11  ;;  %v12122_v11 = vld [vmem:[#allocation7 + $0xd8] sm:$0xff] }
 0x53d   :  { %1939 = vmatpush.bf16.msrb.mxu1 %v12105_v45  ;;  %v12111_v45 = vld [vmem:[#allocation9 + $0xc0] sm:$0xff] }
 0x540   :  { %2739 = vmatpush.bf16.msra.mxu0 %v9892_v19 }
 0x541   :  { %1940 = vmatpush.bf16.msrb.mxu1 %v12104_v28 }
 0x544   :  { %2740 = vmatpush.bf16.msra.mxu0 %v9884_v47  ;;  %v12119_v47 = vld [vmem:[#allocation7 + $0xc0] sm:$0xff] }
 0x545   :  { %1941 = vmatpush.bf16.msrb.mxu1 %v12103_v53 }
 0x549   :  { %2301 = vmatpush.bf16.msra.mxu1 %v12126_v26 }
 0x54d   :  { %2302 = vmatpush.bf16.msra.mxu1 %v12125_v58 }
 0x551   :  { %2303 = vmatpush.bf16.msra.mxu1 %v12124_v24 }
 0x555   :  { %2304 = vmatpush.bf16.msra.mxu1 %v12123_v61 }
 0x559   :  { %2305 = vmatpush.bf16.msra.mxu1 %v12122_v11 }
 0x55d   :  { %2306 = vmatpush.bf16.msra.mxu1 %v12121_v50 }
 0x561   :  { %2307 = vmatpush.bf16.msra.mxu1 %v12120_v52 }
 0x565   :  { %2308 = vmatpush.bf16.msra.mxu1 %v12119_v47 }
 0x584   :  { %v1611_v44 = vpop.f32.mrf.mxu1  ;;  %v2099_v1 = vpop.f32.mrf.mxu0 }
 0x585   :  { %v1615_v48 = vmul.f32 %v1611_v44, %v13684_v40  ;;  %v2103_v54 = vmul.f32 0.083333336, %v2099_v1 }
 0x587   :  { %v1664_v7 = vpack.c.bf16 %v1615_v48, %v1615_v48  ;;  %v2155_v16 = vpack.c.bf16 %v2103_v54, %v2103_v54  ;;  %v2153_v54 = vpack.c.bf16 %v13635_v30, %v13635_v30 }
 0x589   :  { %1832 = vmatmul.bf16.vlgmr.msrb.gmra.mxu3 %v1664_v7  ;;  %2335 = vmatmul.bf16.vlgmr.msrb.gmra.mxu0 %v2155_v16  ;;  %v12118_v7 = vld [vmem:[#allocation9 + $0xf8] sm:$0xff]  ;;  %v12117_v16 = vld [vmem:[#allocation9 + $0xf0] sm:$0xff] }
 0x58a   :  { %2031 = vmatpush.bf16.msra.mxu2 %v12118_v7 }
 0x58c   :  { %v1613_v56 = vpop.f32.mrf.mxu1  ;;  %v2101_v5 = vpop.f32.mrf.mxu0 }
 0x58d   :  { %v12116_v56 = vld [vmem:[#allocation9 + $0xe8] sm:$0xff]  ;;  %v12115_v5 = vld [vmem:[#allocation9 + $0xe0] sm:$0xff] }
 0x58e   :  { %2032 = vmatpush.bf16.msra.mxu2 %v12117_v16 }
 0x592   :  { %2033 = vmatpush.bf16.msra.mxu2 %v12116_v56 }
 0x596   :  { %2034 = vmatpush.bf16.msra.mxu2 %v12115_v5 }
 0x599   :  { %2741 = vmatmul.bf16.vlgmr.msra.gmra.mxu0 %v13697_v13 }
 0x59a   :  { %2035 = vmatpush.bf16.msra.mxu2 %v12114_v29 }
 0x59e   :  { %2036 = vmatpush.bf16.msra.mxu2 %v12113_v6 }
 0x5a2   :  { %2037 = vmatpush.bf16.msra.mxu2 %v12112_v51  ;;  %v9707_v51 = vsel %vm220_vm11, 1.0, %v15130_v49 }
 0x5a6   :  { %2038 = vmatpush.bf16.msra.mxu2 %v12111_v45  ;;  %v12134_v45 = vld [vmem:[#allocation7 + $0x138] sm:$0xff] }
 0x606   :  { %v13700_v59 = vpop.f32.mrf.mxu0 }
 0x60c   :  { %v1833_v22 = vpop.f32.mrf.mxu3 }
 0x60d   :  { %v1834_v3 = vadd.f32 %v1833_v22, %v1821_v18 }
 0x60e   :  { %v2338_v17 = vpop.f32.mrf.mxu0 }
 0x60f   :  { %v1847_v57 = vadd.f32 %v13666_v10, %v1834_v3 }
 0x611   :  { %v1851_v15 = vand.u32 2147483647, %v1847_v57  ;;  %v1850_v46 = vmax.f32 %v1847_v57, 0.0 }
 0x613   :  { %v1852_v12 = vsub.f32 0.0, %v1851_v15 }
 0x614   :  { %v1835_v19 = vpop.f32.mrf.mxu3 }
 0x615   :  { %v1853_v27 = vmul.f32 1.442695, %v1852_v12 }
 0x617   :  { %12791 = vpow2.f32 %v1853_v27 }
 0x61d   :  { %v12792_v4 = vpop.eup %12791 }
 0x61e   :  { %v1855_v20 = vadd.f32 1.0, %v12792_v4  ;;  %v1858_v38 = vmul.f32 -0.5, %v12792_v4  ;;  %v1861_v39 = vand.u32 2147483647, %v12792_v4 }
 0x620   :  { %12793 = vlog2.f32 %v1855_v20  ;;  %v1859_v42 = vadd.f32 1.0, %v1858_v38  ;;  %vm1862_vm8 = vcmp.lt.f32.partialorder %v1861_v39, 0.0004427343  ;;  %v12698_v20 = vld [vmem:[%s15119_s14 + $0x5] ss:$0 sm:$0xff] }
 0x622   :  { %v1860_v43 = vmul.f32 %v12792_v4, %v1859_v42 }
 0x626   :  { %v12794_v10 = vpop.eup %12793 }
 0x627   :  { %v1857_v8 = vmul.f32 0.6931472, %v12794_v10 }
 0x629   :  { %v1863_v62 = vsel %vm1862_vm8, %v1860_v43, %v1857_v8 }
 0x62a   :  { %v1864_v44 = vadd.f32 %v1863_v62, %v1850_v46 }
 0x62c   :  { %v9640_v1 = vadd.f32 -0.6931472, %v1864_v44 }
 0x62e   :  { %v1883_v48 = vpack.c.bf16 %v9640_v1, %v9640_v1 }
 0x630   :  { %1942 = vmatmul.bf16.vlgmr.msrb.gmra.mxu1 %v1883_v48 }
 0x640   :  { %2309 = vmatmul.bf16.vlgmr.msra.gmra.mxu1 %v2153_v54 }
 0x6ad   :  { %v1943_v28 = vpop.f32.mrf.mxu1 }
 0x6ae   :  { %v1944_v53 = vadd.f32 %v12697_v32, %v1943_v28 }
 0x6b0   :  { %v1948_v26 = vand.u32 2147483647, %v1944_v53  ;;  %v1947_v50 = vmax.f32 %v1944_v53, 0.0  ;;  %v13724_v53 = vpack.c.bf16 %v9707_v51, %v9707_v51  ;;  %v12148_v51 = vld [vmem:[#allocation9 + $0x128] sm:$0xff] }
 0x6b2   :  { %v1949_v58 = vsub.f32 0.0, %v1948_v26  ;;  %v12133_v26 = vld [vmem:[#allocation7 + $0x130] sm:$0xff] }
 0x6b4   :  { %v1950_v60 = vmul.f32 1.442695, %v1949_v58  ;;  %v12131_v58 = vld [vmem:[#allocation7 + $0x120] sm:$0xff] }
 0x6b5   :  { %v1945_v24 = vpop.f32.mrf.mxu1 }
 0x6b6   :  { %12795 = vpow2.f32 %v1950_v60  ;;  %v12130_v60 = vld [vmem:[#allocation7 + $0x118] sm:$0xff]  ;;  %v12129_v24 = vld [vmem:[#allocation7 + $0x110] sm:$0xff] }
 0x6bc   :  { %v12796_v18 = vpop.eup %12795 }
 0x6bd   :  { %v1952_v22 = vadd.f32 1.0, %v12796_v18  ;;  %v13712_v61 = vpop.f32.mrf.mxu1  ;;  %v1955_v3 = vmul.f32 -0.5, %v12796_v18  ;;  %v1958_v57 = vand.u32 2147483647, %v12796_v18 }
 0x6bf   :  { %12797 = vlog2.f32 %v1952_v22  ;;  %v1956_v17 = vadd.f32 1.0, %v1955_v3  ;;  %vm1959_vm9 = vcmp.lt.f32.partialorder %v1958_v57, 0.0004427343  ;;  %v9935_v22 = vld [vmem:[#allocation2 + $0xf0] sm:$0xf] }
 0x6c0   :  { %v12174_v3 = vld [vmem:[#allocation2 + $0xf4] sm:$0xf0] }
 0x6c1   :  { %v1957_v19 = vmul.f32 %v12796_v18, %v1956_v17  ;;  %v12128_v18 = vld [vmem:[#allocation7 + $0x108] sm:$0xff]  ;;  %v12127_v17 = vld [vmem:[#allocation7 + $0x100] sm:$0xff]  ;;  %v9936_v57 = vor.u32 %v12174_v3, %v9935_v22 }
 0x6c2   :  { %v13736_v3 = vld [vmem:[%s15114_s9 + $0x4] ss:$8 sm:$0x3] }
 0x6c5   :  { %v12798_v11 = vpop.eup %12797  ;;  %v2312_v15 = vpop.f32.mrf.mxu1 }
 0x6c6   :  { %v1954_v12 = vmul.f32 0.6931472, %v12798_v11  ;;  %v9927_v11 = vld [vmem:[#allocation2 + $0xe0] sm:$0xf]  ;;  %v12172_v15 = vld [vmem:[#allocation2 + $0xe4] sm:$0xf0] }
 0x6c8   :  { %v1960_v27 = vsel %vm1959_vm9, %v1957_v19, %v1954_v12  ;;  %v9928_v12 = vor.u32 %v12172_v15, %v9927_v11  ;;  %v9919_v19 = vld [vmem:[#allocation2 + $0xd0] sm:$0xf]  ;;  %v12180_v11 = vld [vmem:[#allocation4 + $0xa8] sm:$0xff] }
 0x6c9   :  { %v1961_v52 = vadd.f32 %v1960_v27, %v1947_v50  ;;  %v12170_v50 = vld [vmem:[#allocation2 + $0xd4] sm:$0xf0] }
 0x6ca   :  { %v9920_v27 = vor.u32 %v12170_v50, %v9919_v19 }
 0x6cb   :  { %v9673_v47 = vadd.f32 -0.6931472, %v1961_v52  ;;  %v9911_v52 = vld [vmem:[#allocation2 + $0xc0] sm:$0xf] }
 0x6cd   :  { %v1980_v4 = vpack.c.bf16 %v9673_v47, %v9673_v47  ;;  %v12168_v47 = vld [vmem:[#allocation2 + $0xc4] sm:$0xf0] }
 0x6cf   :  { %2039 = vmatmul.bf16.vlgmr.msra.gmra.mxu2 %v1980_v4  ;;  %v9912_v4 = vor.u32 %v12168_v47, %v9911_v52  ;;  %v12179_v47 = vld [vmem:[#allocation4 + $0xa0] sm:$0xff] }
 0x752   :  { %v2040_v38 = vpop.f32.mrf.mxu2 }
 0x753   :  { %v2041_v42 = vadd.f32 %v12698_v20, %v2040_v38  ;;  %v9903_v20 = vld [vmem:[#allocation2 + $0xb0] sm:$0xf]  ;;  %v12166_v38 = vld [vmem:[#allocation2 + $0xb4] sm:$0xf0] }
 0x755   :  { %v2045_v39 = vand.u32 2147483647, %v2041_v42  ;;  %v2044_v56 = vmax.f32 %v2041_v42, 0.0  ;;  %v9904_v42 = vor.u32 %v12166_v38, %v9903_v20 }
 0x757   :  { %v2046_v10 = vsub.f32 0.0, %v2045_v39  ;;  %v9895_v39 = vld [vmem:[#allocation2 + $0xa0] sm:$0xf] }
 0x759   :  { %v2047_v8 = vmul.f32 1.442695, %v2046_v10  ;;  %v12164_v10 = vld [vmem:[#allocation2 + $0xa4] sm:$0xf0] }
 0x75a   :  { %v2042_v43 = vpop.f32.mrf.mxu2 }
 0x75b   :  { %12799 = vpow2.f32 %v2047_v8  ;;  %v9887_v8 = vld [vmem:[#allocation2 + $0x90] sm:$0xf]  ;;  %v9896_v43 = vor.u32 %v12164_v10, %v9895_v39 }
 0x761   :  { %v12800_v46 = vpop.eup %12799 }
 0x762   :  { %v2049_v62 = vadd.f32 1.0, %v12800_v46  ;;  %v2052_v44 = vmul.f32 -0.5, %v12800_v46  ;;  %v2055_v48 = vand.u32 2147483647, %v12800_v46 }
 0x764   :  { %12801 = vlog2.f32 %v2049_v62  ;;  %v2053_v1 = vadd.f32 1.0, %v2052_v44  ;;  %vm2056_vm10 = vcmp.lt.f32.partialorder %v2055_v48, 0.0004427343  ;;  %v9879_v44 = vld [vmem:[#allocation2 + $0x80] sm:$0xf] }
 0x766   :  { %v2054_v16 = vmul.f32 %v12800_v46, %v2053_v1  ;;  %v12162_v46 = vld [vmem:[#allocation2 + $0x94] sm:$0xf0]  ;;  %v12160_v1 = vld [vmem:[#allocation2 + $0x84] sm:$0xf0] }
 0x767   :  { %v9888_v62 = vor.u32 %v12162_v46, %v9887_v8  ;;  %v9880_v48 = vor.u32 %v12160_v1, %v9879_v44  ;;  %v12177_v8 = vld [vmem:[#allocation4 + $0x90] sm:$0xff] }
 0x76a   :  { %v12802_v54 = vpop.eup %12801 }
 0x76b   :  { %v2051_v7 = vmul.f32 0.6931472, %v12802_v54 }
 0x76d   :  { %v2057_v5 = vsel %vm2056_vm10, %v2054_v16, %v2051_v7 }
 0x76e   :  { %v2058_v29 = vadd.f32 %v2057_v5, %v2044_v56  ;;  %v12150_v5 = vld [vmem:[#allocation9 + $0x138] sm:$0xff] }
 0x76f   :  { %2423 = vmatpush.bf16.msrb.mxu2 %v12150_v5 }
 0x770   :  { %v13718_v6 = vadd.f32 -0.6931472, %v2058_v29  ;;  %v12149_v29 = vld [vmem:[#allocation9 + $0x130] sm:$0xff] }
 0x772   :  { %v2063_v32 = vpack.c.bf16 %v13718_v6, %v13718_v6 }
 0x773   :  { %2424 = vmatpush.bf16.msrb.mxu2 %v12149_v29  ;;  %v12175_v29 = vld [vmem:[#allocation4 + $0x80] sm:$0xff] }
 0x774   :  { %v2068_v28 = vsel %vm346_vm0, %v2063_v32, 0  ;;  %v12147_v32 = vld [vmem:[#allocation9 + $0x120] sm:$0xff] }
 0x775   :  { %2077 = vmatpush.bf16.msra.mxu3 %v2068_v28  ;;  %v12145_v28 = vld [vmem:[#allocation9 + $0x110] sm:$0xff] }
 0x777   :  { %2425 = vmatpush.bf16.msrb.mxu2 %v12148_v51 }
 0x778   :  { %9708 = vmatmul.msk.bf16.vlgmr.msra.gmra.mxu3 %vm342_vm2, %v13724_v53 }
 0x779   :  { %2314 = vmatpush.bf16.msrb.mxu3 %v12134_v45  ;;  %v12146_v45 = vld [vmem:[#allocation9 + $0x118] sm:$0xff] }
 0x77b   :  { %2426 = vmatpush.bf16.msrb.mxu2 %v12147_v32 }
 0x77d   :  { %2315 = vmatpush.bf16.msrb.mxu3 %v12133_v26  ;;  %v12144_v26 = vld [vmem:[#allocation9 + $0x108] sm:$0xff] }
 0x77f   :  { %2427 = vmatpush.bf16.msrb.mxu2 %v12146_v45 }
 0x781   :  { %2316 = vmatpush.bf16.msrb.mxu3 %v12132_v41  ;;  %v12143_v41 = vld [vmem:[#allocation9 + $0x100] sm:$0xff] }
 0x783   :  { %2428 = vmatpush.bf16.msrb.mxu2 %v12145_v28 }
 0x785   :  { %2317 = vmatpush.bf16.msrb.mxu3 %v12131_v58  ;;  %v2156_v58 = vld [vmem:[%s15119_s14 + $0x6] sm:$0x1] }
 0x787   :  { %2429 = vmatpush.bf16.msrb.mxu2 %v12144_v26 }
 0x789   :  { %2318 = vmatpush.bf16.msrb.mxu3 %v12130_v60  ;;  %v2311_v60 = vadd.f32 %v13712_v61, %v2156_v58  ;;  %v13748_v61 = vld [vmem:[%s15114_s9 + $0x5] ss:$8 sm:$0x3] }
 0x78b   :  { %2430 = vmatpush.bf16.msrb.mxu2 %v12143_v41 }
 0x78d   :  { %2319 = vmatpush.bf16.msrb.mxu3 %v12129_v24 }
 0x791   :  { %2320 = vmatpush.bf16.msrb.mxu3 %v12128_v18  ;;  %v12181_v18 = vld [vmem:[#allocation4 + $0xb0] sm:$0xff] }
 0x795   :  { %2321 = vmatpush.bf16.msrb.mxu3 %v12127_v17 }
 0x799   :  { %2714 = vmatpush.bf16.msra.mxu3 %v9936_v57  ;;  %v2572_v57 = vperm.slane %v13736_v3, 0 }
 0x79d   :  { %2715 = vmatpush.bf16.msra.mxu3 %v9928_v12  ;;  %v13743_v12 = vld [vmem:[%s15114_s9 + $0x3] ss:$8 sm:$0x3] }
 0x79e   :  { %v2557_v50 = vperm.slane %v13743_v12, 0 }
 0x7a1   :  { %2716 = vmatpush.bf16.msra.mxu3 %v9920_v27  ;;  %v2595_v27 = vperm.slane %v13748_v61, 0 }
 0x7a3   :  { %v13761_v38 = vmul.f32 0.0, %v2595_v27 }
 0x7a5   :  { %2717 = vmatpush.bf16.msra.mxu3 %v9912_v4 }
 0x7a9   :  { %2718 = vmatpush.bf16.msra.mxu3 %v9904_v42  ;;  %v12178_v42 = vld [vmem:[#allocation4 + $0x98] sm:$0xff] }
 0x7ad   :  { %2719 = vmatpush.bf16.msra.mxu3 %v9896_v43 }
 0x7b1   :  { %2720 = vmatpush.bf16.msra.mxu3 %v9888_v62 }
 0x7b5   :  { %2721 = vmatpush.bf16.msra.mxu3 %v9880_v48  ;;  %v12176_v48 = vld [vmem:[#allocation4 + $0x88] sm:$0xff] }
 0x7fb   :  { %v2079_v54 = vpop.f32.mrf.mxu3 }
 0x7fc   :  { %v2083_v7 = vmul.f32 0.16666667, %v2079_v54 }
 0x7fe   :  { %v2154_v16 = vpack.c.bf16 %v2083_v7, %v2083_v7 }
 0x800   :  { %2322 = vmatmul.bf16.vlgmr.msrb.gmra.mxu3 %v2154_v16 }
 0x803   :  { %v2081_v56 = vpop.f32.mrf.mxu3 }
 0x810   :  { %2722 = vmatmul.bf16.vlgmr.msra.gmra.mxu3 %v13697_v13  ;;  %v12182_v13 = vld [vmem:[#allocation4 + $0xb8] sm:$0xff] }
 0x811   :  { %3055 = vmatpush.bf16.msra.mxu2 %v12182_v13  ;;  %v12158_v13 = vld [vmem:[#allocation9 + $0x178] sm:$0xff] }
 0x812   :  { %2519 = vmatpush.bf16.msrb.mxu1 %v12158_v13 }
 0x815   :  { %3056 = vmatpush.bf16.msra.mxu2 %v12181_v18 }
 0x819   :  { %3057 = vmatpush.bf16.msra.mxu2 %v12180_v11 }
 0x81d   :  { %3058 = vmatpush.bf16.msra.mxu2 %v12179_v47 }
 0x821   :  { %3059 = vmatpush.bf16.msra.mxu2 %v12178_v42 }
 0x825   :  { %3060 = vmatpush.bf16.msra.mxu2 %v12177_v8 }
 0x829   :  { %3061 = vmatpush.bf16.msra.mxu2 %v12176_v48 }
 0x82d   :  { %3062 = vmatpush.bf16.msra.mxu2 %v12175_v29 }
 0x883   :  { %v2323_v24 = vpop.f32.mrf.mxu3 }
 0x884   :  { %v2324_v22 = vadd.f32 %v2323_v24, %v2311_v60 }
 0x886   :  { %v2337_v17 = vadd.f32 %v13700_v59, %v2324_v22  ;;  %v13753_v59 = vmul.f32 0.0, %v2572_v57  ;;  %v12157_v22 = vld [vmem:[#allocation9 + $0x170] sm:$0xff] }
 0x887   :  { %2520 = vmatpush.bf16.msrb.mxu1 %v12157_v22  ;;  %v2742_v22 = vpop.f32.mrf.mxu0 }
 0x888   :  { %v2341_v15 = vand.u32 2147483647, %v2337_v17  ;;  %v2584_v20 = vadd.f32 %v13753_v59, %v2557_v50  ;;  %v2340_v58 = vmax.f32 %v2337_v17, 0.0 }
 0x88a   :  { %v2342_v19 = vsub.f32 0.0, %v2341_v15  ;;  %v2607_v39 = vadd.f32 %v13761_v38, %v2584_v20  ;;  %v12156_v20 = vld [vmem:[#allocation9 + $0x168] sm:$0xff] }
 0x88b   :  { %v2325_v52 = vpop.f32.mrf.mxu3  ;;  %2521 = vmatpush.bf16.msrb.mxu1 %v12156_v20 }
 0x88c   :  { %v2343_v4 = vmul.f32 1.442695, %v2342_v19 }
 0x88e   :  { %12803 = vpow2.f32 %v2343_v4 }
 0x893   :  { %v2723_v10 = vpop.f32.mrf.mxu3 }
 0x894   :  { %v12804_v43 = vpop.eup %12803  ;;  %v2752_v46 = vmul.f32 %v2723_v10, %v13492_v34 }
 0x895   :  { %v2345_v62 = vadd.f32 1.0, %v12804_v43  ;;  %v2348_v44 = vmul.f32 -0.5, %v12804_v43  ;;  %v2351_v56 = vand.u32 2147483647, %v12804_v43 }
 0x896   :  { %v2760_v1 = vadd.f32 %v2752_v46, %v2607_v39 }
 0x897   :  { %12805 = vlog2.f32 %v2345_v62  ;;  %v2349_v7 = vadd.f32 1.0, %v2348_v44  ;;  %vm2352_vm12 = vcmp.lt.f32.partialorder %v2351_v56, 0.0004427343 }
 0x898   :  { %v2776_v54 = vand.u32 2147483647, %v2760_v1  ;;  %v2768_v56 = vmax.f32 %v2760_v1, 0.0  ;;  %v2573_v1 = vperm.slane %v13736_v3, 1 }
 0x899   :  { %v2350_v26 = vmul.f32 %v12804_v43, %v2349_v7 }
 0x89a   :  { %v2784_v16 = vsub.f32 0.0, %v2776_v54 }
 0x89b   :  { %v2725_v5 = vpop.f32.mrf.mxu3 }
 0x89c   :  { %v2792_v51 = vmul.f32 1.442695, %v2784_v16  ;;  %v2754_v32 = vmul.f32 %v2725_v5, %v13492_v34 }
 0x89d   :  { %v12806_v45 = vpop.eup %12805 }
 0x89e   :  { %v2347_v28 = vmul.f32 0.6931472, %v12806_v45  ;;  %12807 = vpow2.f32 %v2792_v51  ;;  %v2762_v41 = vadd.f32 %v2754_v32, %v2607_v39 }
 0x8a0   :  { %v2353_v60 = vsel %vm2352_vm12, %v2350_v26, %v2347_v28  ;;  %v2778_v24 = vand.u32 2147483647, %v2762_v41  ;;  %v2770_v32 = vmax.f32 %v2762_v41, 0.0  ;;  %v2558_v41 = vperm.slane %v13743_v12, 1 }
 0x8a1   :  { %v2354_v18 = vadd.f32 %v2353_v60, %v2340_v58  ;;  %v12155_v60 = vld [vmem:[#allocation9 + $0x160] sm:$0xff] }
 0x8a2   :  { %v2786_v11 = vsub.f32 0.0, %v2778_v24  ;;  %2522 = vmatpush.bf16.msrb.mxu1 %v12155_v60  ;;  %v12154_v24 = vld [vmem:[#allocation9 + $0x158] sm:$0xff]  ;;  %v12184_v60 = vld [vmem:[#allocation4 + $0xc8] sm:$0xff] }
 0x8a3   :  { %v9807_v15 = vadd.f32 -0.6931472, %v2354_v18  ;;  %v12153_v18 = vld [vmem:[#allocation9 + $0x150] sm:$0xff] }
 0x8a4   :  { %v12808_v19 = vpop.eup %12807  ;;  %v2796_v52 = vmul.f32 1.442695, %v2786_v11  ;;  %v12152_v11 = vld [vmem:[#allocation9 + $0x148] sm:$0xff] }
 0x8a5   :  { %v2808_v47 = vadd.f32 1.0, %v12808_v19  ;;  %v2373_v4 = vpack.c.bf16 %v9807_v15, %v9807_v15  ;;  %v2811_v17 = vmul.f32 -0.5, %v12808_v19  ;;  %v2814_v46 = vand.u32 2147483647, %v12808_v19 }
 0x8a6   :  { %12809 = vpow2.f32 %v2796_v52  ;;  %2523 = vmatpush.bf16.msrb.mxu1 %v12154_v24  ;;  %v13770_v15 = vmul.f32 0.0, %v2573_v1  ;;  %v12151_v52 = vld [vmem:[#allocation9 + $0x140] sm:$0xff] }
 0x8a7   :  { %12811 = vlog2.f32 %v2808_v47  ;;  %2431 = vmatmul.bf16.vlgmr.msrb.gmra.mxu2 %v2373_v4  ;;  %v2812_v8 = vadd.f32 1.0, %v2811_v17  ;;  %vm2815_vm13 = vcmp.lt.f32.partialorder %v2814_v46, 0.0004427343  ;;  %v12190_v47 = vld [vmem:[#allocation4 + $0xf8] sm:$0xff]  ;;  %v2744_v4 = vpop.f32.mrf.mxu0 }
 0x8a8   :  { %v2585_v20 = vadd.f32 %v13770_v15, %v2558_v41 }
 0x8a9   :  { %v2813_v44 = vmul.f32 %v12808_v19, %v2812_v8  ;;  %v2596_v19 = vperm.slane %v13748_v61, 1  ;;  %v2753_v8 = vmul.f32 %v2742_v22, %v13489_v33 }
 0x8aa   :  { %2524 = vmatpush.bf16.msrb.mxu1 %v12153_v18  ;;  %v12183_v18 = vld [vmem:[#allocation4 + $0xc0] sm:$0xff] }
 0x8ab   :  { %v13778_v17 = vmul.f32 0.0, %v2596_v19 }
 0x8ac   :  { %v12810_v42 = vpop.eup %12809 }
 0x8ad   :  { %v12812_v39 = vpop.eup %12811  ;;  %v2826_v10 = vadd.f32 1.0, %v12810_v42  ;;  %v2829_v43 = vmul.f32 -0.5, %v12810_v42  ;;  %v2832_v54 = vand.u32 2147483647, %v12810_v42 }
 0x8ae   :  { %v2810_v62 = vmul.f32 0.6931472, %v12812_v39  ;;  %2525 = vmatpush.bf16.msrb.mxu1 %v12152_v11  ;;  %v2755_v39 = vmul.f32 %v2744_v4, %v13489_v33 }
 0x8af   :  { %12813 = vlog2.f32 %v2826_v10  ;;  %v2830_v48 = vadd.f32 1.0, %v2829_v43  ;;  %vm2833_vm15 = vcmp.lt.f32.partialorder %v2832_v54, 0.0004427343  ;;  %v2608_v10 = vadd.f32 %v13778_v17, %v2585_v20  ;;  %v12188_v43 = vld [vmem:[#allocation4 + $0xe8] sm:$0xff] }
 0x8b0   :  { %v2816_v7 = vsel %vm2815_vm13, %v2813_v44, %v2810_v62  ;;  %v2374_v44 = vld [vmem:[%s15119_s14 + $0x7] sm:$0x1] }
 0x8b1   :  { %v2831_v29 = vmul.f32 %v12810_v42, %v2830_v48  ;;  %v2880_v51 = vadd.f32 %v2816_v7, %v2768_v56  ;;  %v12189_v42 = vld [vmem:[#allocation4 + $0xf0] sm:$0xff]  ;;  %v13783_v46 = vadd.f32 %v2755_v39, %v2608_v10  ;;  %v13785_v62 = vadd.f32 %v2753_v8, %v2608_v10  ;;  %v12187_v48 = vld [vmem:[#allocation4 + $0xe0] sm:$0xff] }
 0x8b2   :  { %2526 = vmatpush.bf16.msrb.mxu1 %v12151_v52 }
 0x8b3   :  { %v9941_v26 = vadd.f32 -0.6931472, %v2880_v51  ;;  %v2779_v54 = vand.u32 2147483647, %v13783_v46 }
 0x8b5   :  { %v12814_v16 = vpop.eup %12813 }
 0x8b6   :  { %v2828_v5 = vmul.f32 0.6931472, %v12814_v16  ;;  %3074 = vmatpush.bf16.msra.mxu1 %v12190_v47  ;;  %v2777_v16 = vand.u32 2147483647, %v13785_v62 }
 0x8b8   :  { %v2834_v45 = vsel %vm2833_vm15, %v2831_v29, %v2828_v5  ;;  %v12186_v5 = vld [vmem:[#allocation4 + $0xd8] sm:$0xff]  ;;  %v2787_v29 = vsub.f32 0.0, %v2779_v54 }
 0x8b9   :  { %v2882_v28 = vadd.f32 %v2834_v45, %v2770_v32  ;;  %v12185_v32 = vld [vmem:[#allocation4 + $0xd0] sm:$0xff]  ;;  %v2785_v45 = vsub.f32 0.0, %v2777_v16 }
 0x8ba   :  { %3075 = vmatpush.bf16.msra.mxu1 %v12189_v42 }
 0x8bb   :  { %v9943_v58 = vadd.f32 -0.6931472, %v2882_v28  ;;  %v2794_v24 = vmul.f32 1.442695, %v2785_v45 }
 0x8bd   :  { %v2955_v13 = vpack.c.bf16 %v9943_v58, %v9941_v26  ;;  %v2798_v26 = vmul.f32 1.442695, %v2787_v29 }
 0x8be   :  { %3076 = vmatpush.bf16.msra.mxu1 %v12188_v43 }
 0x8bf   :  { %3063 = vmatmul.bf16.vlgmr.msra.gmra.mxu2 %v2955_v13 }
 0x8c2   :  { %3077 = vmatpush.bf16.msra.mxu1 %v12187_v48 }
 0x8c6   :  { %3078 = vmatpush.bf16.msra.mxu1 %v12186_v5 }
 0x8ca   :  { %3079 = vmatpush.bf16.msra.mxu1 %v12185_v32 }
 0x8ce   :  { %3080 = vmatpush.bf16.msra.mxu1 %v12184_v60 }
 0x8d2   :  { %3081 = vmatpush.bf16.msra.mxu1 %v12183_v18 }
 0x92a   :  { %v2432_v7 = vpop.f32.mrf.mxu2 }
 0x92b   :  { %v2433_v56 = vadd.f32 %v2432_v7, %v2374_v44 }
 0x92d   :  { %v2437_v51 = vand.u32 2147483647, %v2433_v56  ;;  %v2436_v48 = vmax.f32 %v2433_v56, 0.0 }
 0x92f   :  { %v2438_v28 = vsub.f32 0.0, %v2437_v51 }
 0x931   :  { %v2439_v58 = vmul.f32 1.442695, %v2438_v28 }
 0x932   :  { %v2434_v13 = vpop.f32.mrf.mxu2 }
 0x933   :  { %12815 = vpow2.f32 %v2439_v58 }
 0x934   :  { %12817 = vpow2.f32 %v2798_v26 }
 0x935   :  { %12819 = vpow2.f32 %v2794_v24 }
 0x939   :  { %v12816_v22 = vpop.eup %12815 }
 0x93a   :  { %v2441_v11 = vadd.f32 1.0, %v12816_v22  ;;  %v12818_v52 = vpop.eup %12817  ;;  %v2444_v47 = vmul.f32 -0.5, %v12816_v22  ;;  %v2447_v10 = vand.u32 2147483647, %v12816_v22 }
 0x93b   :  { %v12820_v4 = vpop.eup %12819  ;;  %v2835_v20 = vadd.f32 1.0, %v12818_v52  ;;  %v2838_v54 = vmul.f32 -0.5, %v12818_v52  ;;  %v2841_v28 = vand.u32 2147483647, %v12818_v52 }
 0x93c   :  { %12821 = vlog2.f32 %v2441_v11  ;;  %v2445_v42 = vadd.f32 1.0, %v2444_v47  ;;  %v2817_v39 = vadd.f32 1.0, %v12820_v4  ;;  %vm2448_vm1 = vcmp.lt.f32.partialorder %v2447_v10, 0.0004427343 }
 0x93d   :  { %12823 = vlog2.f32 %v2835_v20  ;;  %v2820_v5 = vmul.f32 -0.5, %v12820_v4  ;;  %v2839_v32 = vadd.f32 1.0, %v2838_v54  ;;  %v2823_v60 = vand.u32 2147483647, %v12820_v4 }
 0x93e   :  { %v2446_v44 = vmul.f32 %v12816_v22, %v2445_v42  ;;  %12825 = vlog2.f32 %v2817_v39  ;;  %vm2842_vm3 = vcmp.lt.f32.partialorder %v2841_v28, 0.0004427343  ;;  %v2771_v11 = vmax.f32 %v13783_v46, 0.0 }
 0x93f   :  { %v2821_v58 = vadd.f32 1.0, %v2820_v5  ;;  %v2840_v18 = vmul.f32 %v12818_v52, %v2839_v32  ;;  %vm2824_vm4 = vcmp.lt.f32.partialorder %v2823_v60, 0.0004427343  ;;  %v2769_v20 = vmax.f32 %v13785_v62, 0.0 }
 0x941   :  { %v2822_v22 = vmul.f32 %v12820_v4, %v2821_v58 }
 0x942   :  { %v12822_v8 = vpop.eup %12821 }
 0x943   :  { %v2443_v43 = vmul.f32 0.6931472, %v12822_v8  ;;  %v12824_v29 = vpop.eup %12823 }
 0x944   :  { %v12826_v45 = vpop.eup %12825  ;;  %v2837_v13 = vmul.f32 0.6931472, %v12824_v29 }
 0x945   :  { %v2449_v7 = vsel %vm2448_vm1, %v2446_v44, %v2443_v43  ;;  %v2819_v24 = vmul.f32 0.6931472, %v12826_v45  ;;  %v2470_v44 = vld [vmem:[%s15119_s14 + $0x8] sm:$0x1] }
 0x946   :  { %v2450_v16 = vadd.f32 %v2449_v7, %v2436_v48  ;;  %v2843_v56 = vsel %vm2842_vm3, %v2840_v18, %v2837_v13 }
 0x947   :  { %v2825_v47 = vsel %vm2824_vm4, %v2822_v22, %v2819_v24  ;;  %v2883_v42 = vadd.f32 %v2843_v56, %v2771_v11  ;;  %v13803_v22 = vadd.f32 %v13718_v6, %v13598_v9 }
 0x948   :  { %v9840_v51 = vadd.f32 -0.6931472, %v2450_v16  ;;  %v2881_v39 = vadd.f32 %v2825_v47, %v2769_v20  ;;  %v2566_v47 = vmul.f32 0.0, %v2558_v41 }
 0x949   :  { %v9944_v10 = vadd.f32 -0.6931472, %v2883_v42 }
 0x94a   :  { %v2469_v26 = vpack.c.bf16 %v9840_v51, %v9840_v51  ;;  %v9942_v8 = vadd.f32 -0.6931472, %v2881_v39  ;;  %v2589_v20 = vadd.f32 %v2573_v1, %v2566_v47 }
 0x94c   :  { %2527 = vmatmul.bf16.vlgmr.msrb.gmra.mxu1 %v2469_v26  ;;  %v2956_v43 = vpack.c.bf16 %v9944_v10, %v9942_v8  ;;  %v2612_v42 = vadd.f32 %v13778_v17, %v2589_v20  ;;  %v2591_v8 = vadd.f32 %v13770_v15, %v2566_v47 }
 0x95c   :  { %3082 = vmatmul.bf16.vlgmr.msra.gmra.mxu1 %v2956_v43 }
 0x9c9   :  { %v2528_v52 = vpop.f32.mrf.mxu1 }
 0x9ca   :  { %v2529_v48 = vadd.f32 %v2528_v52, %v2470_v44 }
 0x9cc   :  { %v2533_v4 = vand.u32 2147483647, %v2529_v48  ;;  %v2532_v26 = vmax.f32 %v2529_v48, 0.0 }
 0x9ce   :  { %v2534_v54 = vsub.f32 0.0, %v2533_v4 }
 0x9d0   :  { %v2535_v7 = vmul.f32 1.442695, %v2534_v54 }
 0x9d1   :  { %v2530_v16 = vpop.f32.mrf.mxu1 }
 0x9d2   :  { %12827 = vpow2.f32 %v2535_v7 }
 0x9d8   :  { %v12828_v46 = vpop.eup %12827 }
 0x9d9   :  { %v2537_v5 = vadd.f32 1.0, %v12828_v46  ;;  %v2540_v62 = vmul.f32 -0.5, %v12828_v46  ;;  %v2543_v51 = vand.u32 2147483647, %v12828_v46 }
 0x9db   :  { %12829 = vlog2.f32 %v2537_v5  ;;  %v2541_v29 = vadd.f32 1.0, %v2540_v62  ;;  %vm2544_vm5 = vcmp.lt.f32.partialorder %v2543_v51, 0.0004427343 }
 0x9dd   :  { %v2542_v28 = vmul.f32 %v12828_v46, %v2541_v29 }
 0x9e1   :  { %v12830_v32 = vpop.eup %12829 }
 0x9e2   :  { %v2539_v45 = vmul.f32 0.6931472, %v12830_v32 }
 0x9e4   :  { %v2545_v58 = vsel %vm2544_vm5, %v2542_v28, %v2539_v45 }
 0x9e5   :  { %v2546_v13 = vadd.f32 %v2545_v58, %v2532_v26 }
 0x9e7   :  { %v9873_v60 = vadd.f32 -0.6931472, %v2546_v13 }
 0x9e9   :  { %v13798_v24 = vadd.f32 %v9873_v60, %v13635_v30  ;;  %v2565_v30 = vmul.f32 0.0, %v2557_v50  ;;  %v2614_v50 = vadd.f32 %v2596_v19, %v2591_v8 }
 0x9eb   :  { %v2552_v18 = vperm.slane %v13798_v24, 0  ;;  %v2588_v6 = vadd.f32 %v2572_v57, %v2565_v30  ;;  %v2590_v57 = vadd.f32 %v13753_v59, %v2565_v30 }
 0x9ed   :  { %v2553_v56 = vmul.f32 %v13431_v2, %v2552_v18  ;;  %v2611_v43 = vadd.f32 %v13761_v38, %v2588_v6  ;;  %v2613_v7 = vadd.f32 %v2595_v27, %v2590_v57 }
 0x9ef   :  { %v2633_v11 = vpack.c.bf16 %v2553_v56, %v13803_v22 }
 0x9f1   :  { %2727 = vmatmul.bf16.gmra.mxu3 %v2633_v11  ;;  %2746 = vmatmul.bf16.gmra.mxu0 %v2633_v11 }
 0xa6e   :  { %v2747_v39 = vpop.f32.mrf.mxu0 }
 0xa6f   :  { %v2757_v9 = vmul.f32 %v2747_v39, %v13489_v33 }
 0xa71   :  { %v13817_v10 = vadd.f32 %v2757_v9, %v2612_v42 }
 0xa73   :  { %v2781_v41 = vand.u32 2147483647, %v13817_v10 }
 0xa74   :  { %v2728_v1 = vpop.f32.mrf.mxu3 }
 0xa75   :  { %v2789_v44 = vsub.f32 0.0, %v2781_v41  ;;  %v2756_v12 = vmul.f32 %v2728_v1, %v13518_v23 }
 0xa76   :  { %v2749_v17 = vpop.f32.mrf.mxu0 }
 0xa77   :  { %v2802_v52 = vmul.f32 1.442695, %v2789_v44  ;;  %v13825_v48 = vadd.f32 %v2756_v12, %v2611_v43  ;;  %v2759_v3 = vmul.f32 %v13473_v25, %v2749_v17  ;;  %v2773_v12 = vmax.f32 %v13817_v10, 0.0 }
 0xa79   :  { %12831 = vpow2.f32 %v2802_v52  ;;  %v2780_v15 = vand.u32 2147483647, %v13825_v48  ;;  %v2767_v4 = vadd.f32 %v2759_v3, %v2614_v50 }
 0xa7b   :  { %v2788_v38 = vsub.f32 0.0, %v2780_v15  ;;  %v2783_v54 = vand.u32 2147483647, %v2767_v4  ;;  %v2775_v57 = vmax.f32 %v2767_v4, 0.0 }
 0xa7c   :  { %v2730_v16 = vpop.f32.mrf.mxu3 }
 0xa7d   :  { %v2800_v46 = vmul.f32 1.442695, %v2788_v38  ;;  %v2791_v19 = vsub.f32 0.0, %v2783_v54  ;;  %v2758_v5 = vmul.f32 %v2730_v16, %v13553_v55 }
 0xa7f   :  { %v12832_v62 = vpop.eup %12831  ;;  %12833 = vpow2.f32 %v2800_v46  ;;  %v2806_v29 = vmul.f32 1.442695, %v2791_v19  ;;  %v2766_v51 = vadd.f32 %v2758_v5, %v2613_v7 }
 0xa80   :  { %v2853_v32 = vadd.f32 1.0, %v12832_v62  ;;  %v2856_v58 = vmul.f32 -0.5, %v12832_v62  ;;  %v2859_v11 = vand.u32 2147483647, %v12832_v62 }
 0xa81   :  { %12835 = vpow2.f32 %v2806_v29  ;;  %v2782_v59 = vand.u32 2147483647, %v2766_v51 }
 0xa82   :  { %12837 = vlog2.f32 %v2853_v32  ;;  %v2857_v18 = vadd.f32 1.0, %v2856_v58  ;;  %vm2860_vm6 = vcmp.lt.f32.partialorder %v2859_v11, 0.0004427343  ;;  %v12701_v11 = vld [vmem:[%s15115_s10 + $0x5] ss:$0 sm:$0xff] }
 0xa83   :  { %v2790_v45 = vsub.f32 0.0, %v2782_v59 }
 0xa84   :  { %v2858_v42 = vmul.f32 %v12832_v62, %v2857_v18  ;;  %v2772_v62 = vmax.f32 %v13825_v48, 0.0  ;;  %v3083_v18 = vpop.f32.mrf.mxu1  ;;  %v12699_v48 = vld [vmem:[%s15115_s10 + $0x3] ss:$0 sm:$0xff] }
 0xa85   :  { %v12834_v28 = vpop.eup %12833  ;;  %v2804_v26 = vmul.f32 1.442695, %v2790_v45  ;;  %v2774_v45 = vmax.f32 %v2766_v51, 0.0  ;;  %v12700_v51 = vld [vmem:[%s15115_s10 + $0x4] ss:$0 sm:$0xff] }
 0xa86   :  { %v2844_v13 = vadd.f32 1.0, %v12834_v28  ;;  %v2847_v20 = vmul.f32 -0.5, %v12834_v28  ;;  %v2850_v50 = vand.u32 2147483647, %v12834_v28 }
 0xa87   :  { %v12836_v61 = vpop.eup %12835  ;;  %12839 = vpow2.f32 %v2804_v26 }
 0xa88   :  { %v12838_v27 = vpop.eup %12837  ;;  %v2871_v60 = vadd.f32 1.0, %v12836_v61  ;;  %12841 = vlog2.f32 %v2844_v13  ;;  %v2874_v56 = vmul.f32 -0.5, %v12836_v61  ;;  %v2877_v6 = vand.u32 2147483647, %v12836_v61 }
 0xa89   :  { %v2855_v47 = vmul.f32 0.6931472, %v12838_v27  ;;  %v2848_v43 = vadd.f32 1.0, %v2847_v20  ;;  %vm2851_vm8 = vcmp.lt.f32.partialorder %v2850_v50, 0.0004427343 }
 0xa8a   :  { %12843 = vlog2.f32 %v2871_v60  ;;  %v2875_v39 = vadd.f32 1.0, %v2874_v56  ;;  %vm2878_vm7 = vcmp.lt.f32.partialorder %v2877_v6, 0.0004427343  ;;  %v3064_v60 = vpop.f32.mrf.mxu2  ;;  %v2900_v56 = vmul.f32 0.0, %v12699_v48 }
 0xa8b   :  { %v2861_v41 = vsel %vm2860_vm6, %v2858_v42, %v2855_v47  ;;  %v2849_v54 = vmul.f32 %v12834_v28, %v2848_v43  ;;  %v2914_v42 = vmul.f32 0.0, %v12701_v11 }
 0xa8c   :  { %v2876_v52 = vmul.f32 %v12836_v61, %v2875_v39  ;;  %v2885_v15 = vadd.f32 %v2861_v41, %v2773_v12  ;;  %v3085_v20 = vpop.f32.mrf.mxu1 }
 0xa8d   :  { %v12840_v30 = vpop.eup %12839 }
 0xa8e   :  { %v12842_v9 = vpop.eup %12841  ;;  %v2862_v8 = vadd.f32 1.0, %v12840_v30  ;;  %v2865_v1 = vmul.f32 -0.5, %v12840_v30  ;;  %v2868_v46 = vand.u32 2147483647, %v12840_v30  ;;  %v9946_v29 = vadd.f32 -0.6931472, %v2885_v15 }
 0xa8f   :  { %v2846_v3 = vmul.f32 0.6931472, %v12842_v9  ;;  %v2904_v9 = vmul.f32 0.0, %v12700_v51 }
 0xa90   :  { %v12844_v44 = vpop.eup %12843  ;;  %12845 = vlog2.f32 %v2862_v8  ;;  %v2866_v7 = vadd.f32 1.0, %v2865_v1  ;;  %vm2869_vm9 = vcmp.lt.f32.partialorder %v2868_v46, 0.0004427343 }
 0xa91   :  { %v2873_v17 = vmul.f32 0.6931472, %v12844_v44  ;;  %v2852_v19 = vsel %vm2851_vm8, %v2849_v54, %v2846_v3  ;;  %v2911_v43 = vadd.f32 %v2904_v9, %v2900_v56  ;;  %v2908_v50 = vadd.f32 %v12699_v48, %v2904_v9 }
 0xa92   :  { %v2867_v59 = vmul.f32 %v12840_v30, %v2866_v7  ;;  %v2884_v4 = vadd.f32 %v2852_v19, %v2772_v62  ;;  %v3066_v47 = vpop.f32.mrf.mxu2  ;;  %v2910_v30 = vadd.f32 %v12700_v51, %v2900_v56 }
 0xa93   :  { %v2879_v38 = vsel %vm2878_vm7, %v2876_v52, %v2873_v17  ;;  %v2921_v12 = vadd.f32 %v12701_v11, %v2911_v43  ;;  %v2918_v15 = vadd.f32 %v2914_v42, %v2908_v50  ;;  %v12213_v43 = vld [vmem:[#allocation6 + $0x1b0] sm:$0xff] }
 0xa94   :  { %v2887_v16 = vadd.f32 %v2879_v38, %v2775_v57  ;;  %v9945_v28 = vadd.f32 -0.6931472, %v2884_v4  ;;  %v2920_v39 = vadd.f32 %v2914_v42, %v2910_v30  ;;  %v12214_v42 = vld [vmem:[#allocation6 + $0x1b8] sm:$0xff] }
 0xa95   :  { %v3067_v7 = vadd.f32 %v3066_v47, %v2918_v15 }
 0xa96   :  { %v12846_v5 = vpop.eup %12845  ;;  %v9948_v10 = vadd.f32 -0.6931472, %v2887_v16  ;;  %v3065_v16 = vadd.f32 %v3064_v60, %v2918_v15 }
 0xa97   :  { %v2864_v32 = vmul.f32 0.6931472, %v12846_v5  ;;  %v13846_v46 = vadd.f32 %v3085_v20, %v3067_v7  ;;  %v12219_v7 = vld [vmem:[#allocation6 + $0x1e0] sm:$0xff] }
 0xa98   :  { %v2958_v26 = vpack.c.bf16 %v9948_v10, %v9946_v29  ;;  %v13849_v5 = vadd.f32 %v3083_v18, %v3065_v16 }
 0xa99   :  { %v2870_v58 = vsel %vm2869_vm9, %v2867_v59, %v2864_v32  ;;  %v3098_v29 = vand.u32 2147483647, %v13846_v46 }
 0xa9a   :  { %3087 = vmatmul.bf16.gmra.mxu1 %v2958_v26  ;;  %v2886_v13 = vadd.f32 %v2870_v58, %v2774_v45  ;;  %v3097_v45 = vand.u32 2147483647, %v13849_v5 }
 0xa9b   :  { %v3102_v26 = vsub.f32 0.0, %v3098_v29 }
 0xa9c   :  { %v9947_v61 = vadd.f32 -0.6931472, %v2886_v13  ;;  %v3101_v13 = vsub.f32 0.0, %v3097_v45  ;;  %v12218_v45 = vld [vmem:[#allocation6 + $0x1d8] sm:$0xff] }
 0xa9e   :  { %v2957_v27 = vpack.c.bf16 %v9947_v61, %v9945_v28  ;;  %v3105_v48 = vmul.f32 1.442695, %v3101_v13 }
 0xaa0   :  { %3068 = vmatmul.bf16.gmra.mxu2 %v2957_v27  ;;  %v3107_v27 = vmul.f32 1.442695, %v3102_v26 }
 0xb17   :  { %v3088_v6 = vpop.f32.mrf.mxu1 }
 0xb1f   :  { %v3090_v38 = vpop.f32.mrf.mxu1 }
 0xb23   :  { %v3069_v8 = vpop.f32.mrf.mxu2 }
 0xb24   :  { %v3070_v41 = vadd.f32 %v3069_v8, %v2920_v39  ;;  %v12222_v39 = vld [vmem:[#allocation6 + $0x1f8] sm:$0xff] }
 0xb26   :  { %v3089_v1 = vadd.f32 %v3088_v6, %v3070_v41 }
 0xb28   :  { %v3099_v44 = vand.u32 2147483647, %v3089_v1  ;;  %v3095_v56 = vmax.f32 %v3089_v1, 0.0  ;;  %v12221_v1 = vld [vmem:[#allocation6 + $0x1f0] sm:$0xff] }
 0xb2a   :  { %v3103_v17 = vsub.f32 0.0, %v3099_v44 }
 0xb2b   :  { %v3071_v52 = vpop.f32.mrf.mxu2 }
 0xb2c   :  { %v3109_v3 = vmul.f32 1.442695, %v3103_v17  ;;  %v3072_v57 = vadd.f32 %v3071_v52, %v2921_v12  ;;  %v12212_v17 = vld [vmem:[#allocation6 + $0x1a8] sm:$0xff] }
 0xb2d   :  { %v12220_v52 = vld [vmem:[#allocation6 + $0x1e8] sm:$0xff] }
 0xb2e   :  { %12847 = vpow2.f32 %v3109_v3  ;;  %v13844_v54 = vadd.f32 %v3090_v38, %v3072_v57  ;;  %v12211_v38 = vld [vmem:[#allocation6 + $0x1a0] sm:$0xff] }
 0xb30   :  { %v3100_v19 = vand.u32 2147483647, %v13844_v54 }
 0xb32   :  { %v3104_v10 = vsub.f32 0.0, %v3100_v19 }
 0xb34   :  { %v12848_v62 = vpop.eup %12847  ;;  %v3111_v4 = vmul.f32 1.442695, %v3104_v10 }
 0xb35   :  { %v3131_v32 = vadd.f32 1.0, %v12848_v62  ;;  %v3134_v59 = vmul.f32 -0.5, %v12848_v62  ;;  %v3137_v28 = vand.u32 2147483647, %v12848_v62 }
 0xb37   :  { %12849 = vlog2.f32 %v3131_v32  ;;  %v3135_v58 = vadd.f32 1.0, %v3134_v59  ;;  %vm3138_vm10 = vcmp.lt.f32.partialorder %v3137_v28, 0.0004427343  ;;  %v12210_v59 = vld [vmem:[#allocation6 + $0x198] sm:$0xff] }
 0xb38   :  { %12851 = vpow2.f32 %v3111_v4 }
 0xb39   :  { %v3136_v18 = vmul.f32 %v12848_v62, %v3135_v58  ;;  %12853 = vpow2.f32 %v3107_v27  ;;  %v3096_v27 = vmax.f32 %v13844_v54, 0.0  ;;  %v3093_v54 = vmax.f32 %v13849_v5, 0.0 }
 0xb3a   :  { %12855 = vpow2.f32 %v3105_v48  ;;  %v12209_v48 = vld [vmem:[#allocation6 + $0x190] sm:$0xff] }
 0xb3d   :  { %v12850_v61 = vpop.eup %12849 }
 0xb3e   :  { %v3133_v60 = vmul.f32 0.6931472, %v12850_v61  ;;  %v12852_v47 = vpop.eup %12851 }
 0xb3f   :  { %v3140_v9 = vadd.f32 1.0, %v12852_v47  ;;  %v12854_v6 = vpop.eup %12853  ;;  %v3143_v50 = vmul.f32 -0.5, %v12852_v47  ;;  %v3146_v16 = vand.u32 2147483647, %v12852_v47 }
 0xb40   :  { %v3139_v51 = vsel %vm3138_vm10, %v3136_v18, %v3133_v60  ;;  %v12856_v41 = vpop.eup %12855  ;;  %v3122_v44 = vadd.f32 1.0, %v12854_v6  ;;  %v3125_v57 = vmul.f32 -0.5, %v12854_v6  ;;  %v3128_v4 = vand.u32 2147483647, %v12854_v6 }
 0xb41   :  { %v3151_v11 = vadd.f32 %v3139_v51, %v3095_v56  ;;  %12857 = vlog2.f32 %v3140_v9  ;;  %v3113_v12 = vadd.f32 1.0, %v12856_v41  ;;  %v3144_v15 = vadd.f32 1.0, %v3143_v50  ;;  %v12217_v56 = vld [vmem:[#allocation6 + $0x1d0] sm:$0xff]  ;;  %v12216_v9 = vld [vmem:[#allocation6 + $0x1c8] sm:$0xff] }
 0xb42   :  { %12859 = vlog2.f32 %v3122_v44  ;;  %v3116_v19 = vmul.f32 -0.5, %v12856_v41  ;;  %v3126_v10 = vadd.f32 1.0, %v3125_v57  ;;  %vm3147_vm11 = vcmp.lt.f32.partialorder %v3146_v16, 0.0004427343  ;;  %v12215_v44 = vld [vmem:[#allocation6 + $0x1c0] sm:$0xff]  ;;  %v12245_v57 = vld [vmem:[#allocation7 + $0x1b0] sm:$0xff] }
 0xb43   :  { %v10015_v20 = vadd.f32 -0.6931472, %v3151_v11  ;;  %12861 = vlog2.f32 %v3113_v12  ;;  %v3145_v32 = vmul.f32 %v12852_v47, %v3144_v15  ;;  %v3119_v61 = vand.u32 2147483647, %v12856_v41  ;;  %v12246_v12 = vld [vmem:[#allocation7 + $0x1b8] sm:$0xff]  ;;  %v12205_v15 = vld [vmem:[#allocation6 + $0x170] sm:$0xff] }
 0xb44   :  { %v3117_v58 = vadd.f32 1.0, %v3116_v19  ;;  %v3127_v18 = vmul.f32 %v12854_v6, %v3126_v10  ;;  %vm3129_vm12 = vcmp.lt.f32.partialorder %v3128_v4, 0.0004427343  ;;  %v12204_v16 = vld [vmem:[#allocation6 + $0x168] sm:$0xff]  ;;  %v12195_v10 = vld [vmem:[#allocation6 + $0x120] sm:$0xff] }
 0xb45   :  { %v13853_v30 = vpack.c.bf16 %v10015_v20, %v10015_v20  ;;  %vm3120_vm13 = vcmp.lt.f32.partialorder %v3119_v61, 0.0004427343  ;;  %v3094_v20 = vmax.f32 %v13846_v46, 0.0  ;;  %v12196_v19 = vld [vmem:[#allocation6 + $0x128] sm:$0xff]  ;;  %v12239_v4 = vld [vmem:[#allocation7 + $0x180] sm:$0xff]  ;;  %v12193_v61 = vld [vmem:[#allocation6 + $0x110] sm:$0xff] }
 0xb46   :  { %v3118_v11 = vmul.f32 %v12856_v41, %v3117_v58  ;;  %v12201_v58 = vld [vmem:[#allocation6 + $0x150] sm:$0xff] }
 0xb47   :  { %v3159_v8 = vsel %vm346_vm0, %v13853_v30, 0  ;;  %v12858_v3 = vpop.eup %12857 }
 0xb48   :  { %3168 = vmatpush.bf16.msrb.mxu3 %v3159_v8  ;;  %3182 = vmatpush.bf16.msrb.mxu0 %v3159_v8  ;;  %v3142_v62 = vmul.f32 0.6931472, %v12858_v3  ;;  %v12860_v29 = vpop.eup %12859 }
 0xb49   :  { %v12862_v26 = vpop.eup %12861  ;;  %v3124_v13 = vmul.f32 0.6931472, %v12860_v29  ;;  %v12203_v29 = vld [vmem:[#allocation6 + $0x160] sm:$0xff] }
 0xb4a   :  { %v3148_v28 = vsel %vm3147_vm11, %v3145_v32, %v3142_v62  ;;  %v3115_v60 = vmul.f32 0.6931472, %v12862_v26  ;;  %v12243_v62 = vld [vmem:[#allocation7 + $0x1a0] sm:$0xff]  ;;  %v12242_v32 = vld [vmem:[#allocation7 + $0x198] sm:$0xff]  ;;  %v12240_v26 = vld [vmem:[#allocation7 + $0x188] sm:$0xff] }
 0xb4b   :  { %10017 = vmatmul.msk.bf16.vlgmr.msrb.gmra.mxu3 %vm342_vm2, %v13612_v36  ;;  %10018 = vmatmul.msk.bf16.vlgmr.msrb.gmra.mxu0 %vm342_vm2, %v13614_v37  ;;  %v3152_v51 = vadd.f32 %v3148_v28, %v3096_v27  ;;  %v3130_v47 = vsel %vm3129_vm12, %v3127_v18, %v3124_v13  ;;  %v12194_v13 = vld [vmem:[#allocation6 + $0x118] sm:$0xff]  ;;  %v12200_v28 = vld [vmem:[#allocation6 + $0x148] sm:$0xff]  ;;  %v12199_v27 = vld [vmem:[#allocation6 + $0x140] sm:$0xff] }
 0xb4c   :  { %3482 = vmatpush.bf16.msra.mxu3 %v12214_v42  ;;  %3496 = vmatpush.bf16.msra.mxu0 %v12222_v39  ;;  %v3121_v42 = vsel %vm3120_vm13, %v3118_v11, %v3115_v60  ;;  %v12208_v39 = vld [vmem:[#allocation6 + $0x188] sm:$0xff]  ;;  %v3150_v8 = vadd.f32 %v3130_v47, %v3094_v20  ;;  %v12191_v18 = vld [vmem:[#allocation6 + $0x100] sm:$0xff] }
 0xb4d   :  { %v13864_v6 = vadd.f32 -0.6931472, %v3152_v51  ;;  %v12192_v60 = vld [vmem:[#allocation6 + $0x108] sm:$0xff] }
 0xb4e   :  { %v10014_v41 = vadd.f32 -0.6931472, %v3150_v8  ;;  %v12229_v8 = vld [vmem:[#allocation9 + $0x1b0] sm:$0xff] }
 0xb4f   :  { %v3189_v50 = vperm.slane %v13864_v6, 0 }
 0xb50   :  { %3483 = vmatpush.bf16.msra.mxu3 %v12213_v43  ;;  %3497 = vmatpush.bf16.msra.mxu0 %v12221_v1  ;;  %v3149_v43 = vadd.f32 %v3121_v42, %v3093_v54  ;;  %v12207_v1 = vld [vmem:[#allocation6 + $0x180] sm:$0xff]  ;;  %v12230_v54 = vld [vmem:[#allocation9 + $0x1b8] sm:$0xff] }
 0xb51   :  { %v13867_v5 = vpack.c.bf16 %v3189_v50, %v3189_v50 }
 0xb52   :  { %v10013_v46 = vadd.f32 -0.6931472, %v3149_v43  ;;  %v12228_v43 = vld [vmem:[#allocation9 + $0x1a8] sm:$0xff] }
 0xb54   :  { %3484 = vmatpush.bf16.msra.mxu3 %v12212_v17  ;;  %3498 = vmatpush.bf16.msra.mxu0 %v12220_v52  ;;  %v12206_v17 = vld [vmem:[#allocation6 + $0x178] sm:$0xff]  ;;  %v3258_v3 = vpack.c.bf16 %v10014_v41, %v10013_v46 }
 0xb55   :  { %v12198_v52 = vld [vmem:[#allocation6 + $0x138] sm:$0xff]  ;;  %3468 = vmatpush.bf16.msrb.mxu1 %v12206_v17 }
 0xb56   :  { %3454 = vmatpush.bf16.msrb.mxu2 %v12198_v52  ;;  %v12226_v41 = vld [vmem:[#allocation9 + $0x198] sm:$0xff]  ;;  %v12225_v52 = vld [vmem:[#allocation9 + $0x190] sm:$0xff] }
 0xb58   :  { %3485 = vmatpush.bf16.msra.mxu3 %v12211_v38  ;;  %3499 = vmatpush.bf16.msra.mxu0 %v12219_v7  ;;  %v12197_v38 = vld [vmem:[#allocation6 + $0x130] sm:$0xff]  ;;  %v12244_v7 = vld [vmem:[#allocation7 + $0x1a8] sm:$0xff] }
 0xb59   :  { %3469 = vmatpush.bf16.msrb.mxu1 %v12205_v15  ;;  %v12224_v15 = vld [vmem:[#allocation9 + $0x188] sm:$0xff] }
 0xb5a   :  { %3455 = vmatpush.bf16.msrb.mxu2 %v12197_v38 }
 0xb5c   :  { %3486 = vmatpush.bf16.msra.mxu3 %v12210_v59  ;;  %3500 = vmatpush.bf16.msra.mxu0 %v12218_v45  ;;  %v12202_v59 = vld [vmem:[#allocation6 + $0x158] sm:$0xff]  ;;  %v12241_v45 = vld [vmem:[#allocation7 + $0x190] sm:$0xff] }
 0xb5d   :  { %3470 = vmatpush.bf16.msrb.mxu1 %v12204_v16 }
 0xb5e   :  { %3456 = vmatpush.bf16.msrb.mxu2 %v12196_v19 }
 0xb60   :  { %3487 = vmatpush.bf16.msra.mxu3 %v12209_v48  ;;  %3501 = vmatpush.bf16.msra.mxu0 %v12217_v56 }
 0xb61   :  { %3471 = vmatpush.bf16.msrb.mxu1 %v12203_v29  ;;  %v12223_v29 = vld [vmem:[#allocation9 + $0x180] sm:$0xff] }
 0xb62   :  { %3457 = vmatpush.bf16.msrb.mxu2 %v12195_v10 }
 0xb64   :  { %3488 = vmatpush.bf16.msra.mxu3 %v12208_v39  ;;  %3502 = vmatpush.bf16.msra.mxu0 %v12216_v9 }
 0xb65   :  { %3472 = vmatpush.bf16.msrb.mxu1 %v12202_v59 }
 0xb66   :  { %3458 = vmatpush.bf16.msrb.mxu2 %v12194_v13 }
 0xb68   :  { %3489 = vmatpush.bf16.msra.mxu3 %v12207_v1  ;;  %3503 = vmatpush.bf16.msra.mxu0 %v12215_v44  ;;  %v12227_v1 = vld [vmem:[#allocation9 + $0x1a0] sm:$0xff]  ;;  %v12703_v44 = vld [vmem:[%s15119_s14 + $0x9] ss:$0 sm:$0xff] }
 0xb69   :  { %3473 = vmatpush.bf16.msrb.mxu1 %v12201_v58 }
 0xb6a   :  { %3459 = vmatpush.bf16.msrb.mxu2 %v12193_v61 }
 0xb6b   :  { %3490 = vmatmul.bf16.vlgmr.msra.gmra.mxu3 %v3258_v3  ;;  %3504 = vmatmul.bf16.vlgmr.msra.gmra.mxu0 %v13867_v5 }
 0xb6c   :  { %3981 = vmatpush.bf16.msrb.mxu0 %v12246_v12 }
 0xb6d   :  { %3474 = vmatpush.bf16.msrb.mxu1 %v12200_v28 }
 0xb6e   :  { %3460 = vmatpush.bf16.msrb.mxu2 %v12192_v60 }
 0xb70   :  { %3982 = vmatpush.bf16.msrb.mxu0 %v12245_v57 }
 0xb71   :  { %3475 = vmatpush.bf16.msrb.mxu1 %v12199_v27 }
 0xb72   :  { %3461 = vmatpush.bf16.msrb.mxu2 %v12191_v18 }
 0xb74   :  { %3983 = vmatpush.bf16.msrb.mxu0 %v12244_v7 }
 0xb76   :  { %3610 = vmatpush.bf16.msra.mxu2 %v12230_v54 }
 0xb78   :  { %3984 = vmatpush.bf16.msrb.mxu0 %v12243_v62 }
 0xb7a   :  { %3611 = vmatpush.bf16.msra.mxu2 %v12229_v8 }
 0xb7c   :  { %3985 = vmatpush.bf16.msrb.mxu0 %v12242_v32 }
 0xb7e   :  { %3612 = vmatpush.bf16.msra.mxu2 %v12228_v43 }
 0xb80   :  { %3986 = vmatpush.bf16.msrb.mxu0 %v12241_v45 }
 0xb82   :  { %3613 = vmatpush.bf16.msra.mxu2 %v12227_v1 }
 0xb84   :  { %3987 = vmatpush.bf16.msrb.mxu0 %v12240_v26 }
 0xb86   :  { %3614 = vmatpush.bf16.msra.mxu2 %v12226_v41 }
 0xb88   :  { %3988 = vmatpush.bf16.msrb.mxu0 %v12239_v4 }
 0xb8a   :  { %3615 = vmatpush.bf16.msra.mxu2 %v12225_v52 }
 0xb8b   :  { %3989 = vmatmul.bf16.vlgmr.msrb.gmra.mxu0 %v13853_v30 }
 0xb8e   :  { %3616 = vmatpush.bf16.msra.mxu2 %v12224_v15  ;;  %v12237_v15 = vld [vmem:[#allocation9 + $0x1f0] sm:$0xff] }
 0xb92   :  { %3617 = vmatpush.bf16.msra.mxu2 %v12223_v29 }
 0xbc8   :  { %v3184_v48 = vpop.f32.mrf.mxu0 }
 0xbce   :  { %v3170_v56 = vpop.f32.mrf.mxu3 }
 0xbd0   :  { %v3186_v51 = vpop.f32.mrf.mxu0 }
 0xbd1   :  { %v3257_v11 = vpack.c.bf16 %v3186_v51, %v3184_v48 }
 0xbd3   :  { %3476 = vmatmul.bf16.vlgmr.msrb.gmra.mxu1 %v3257_v11 }
 0xbd6   :  { %v3172_v30 = vpop.f32.mrf.mxu3 }
 0xbd7   :  { %v3256_v47 = vpack.c.bf16 %v3172_v30, %v3170_v56 }
 0xbd9   :  { %3462 = vmatmul.bf16.vlgmr.msrb.gmra.mxu2 %v3256_v47 }
 0xbe8   :  { %v3505_v20 = vpop.f32.mrf.mxu0 }
 0xbee   :  { %v3491_v17 = vpop.f32.mrf.mxu3 }
 0xbf0   :  { %v3507_v42 = vpop.f32.mrf.mxu0 }
 0xbf6   :  { %v3493_v59 = vpop.f32.mrf.mxu3 }
 0xc08   :  { %v13871_v39 = vpop.f32.mrf.mxu0 }
 0xc10   :  { %v3992_v9 = vpop.f32.mrf.mxu0 }
 0xc50   :  { %v3477_v12 = vpop.f32.mrf.mxu1 }
 0xc58   :  { %v3479_v62 = vpop.f32.mrf.mxu1 }
 0xc5c   :  { %v3463_v50 = vpop.f32.mrf.mxu2 }
 0xc5d   :  { %v3464_v46 = vadd.f32 %v12703_v44, %v3463_v50 }
 0xc5f   :  { %v3478_v3 = vadd.f32 %v3477_v12, %v3464_v46 }
 0xc61   :  { %v3492_v57 = vadd.f32 %v3491_v17, %v3478_v3 }
 0xc63   :  { %v3506_v38 = vadd.f32 %v3505_v20, %v3492_v57  ;;  %v12238_v57 = vld [vmem:[#allocation9 + $0x1f8] sm:$0xff] }
 0xc64   :  { %v3465_v7 = vpop.f32.mrf.mxu2  ;;  %3724 = vmatpush.bf16.msra.mxu1 %v12238_v57 }
 0xc65   :  { %v3512_v16 = vand.u32 2147483647, %v3506_v38  ;;  %v3466_v19 = vadd.f32 %v12703_v44, %v3465_v7  ;;  %v3510_v43 = vmax.f32 %v3506_v38, 0.0  ;;  %v12236_v7 = vld [vmem:[#allocation9 + $0x1e8] sm:$0xff]  ;;  %v12234_v38 = vld [vmem:[#allocation9 + $0x1d8] sm:$0xff] }
 0xc67   :  { %v3514_v10 = vsub.f32 0.0, %v3512_v16  ;;  %v3480_v32 = vadd.f32 %v3479_v62, %v3466_v19  ;;  %v12235_v16 = vld [vmem:[#allocation9 + $0x1e0] sm:$0xff]  ;;  %v12704_v19 = vld [vmem:[%s15119_s14 + $0xa] ss:$0 sm:$0xff]  ;;  %v12233_v62 = vld [vmem:[#allocation9 + $0x1d0] sm:$0xff] }
 0xc68   :  { %3725 = vmatpush.bf16.msra.mxu1 %v12237_v15 }
 0xc69   :  { %v3516_v45 = vmul.f32 1.442695, %v3514_v10  ;;  %v3494_v26 = vadd.f32 %v3493_v59, %v3480_v32  ;;  %v12232_v32 = vld [vmem:[#allocation9 + $0x1c8] sm:$0xff] }
 0xc6b   :  { %12863 = vpow2.f32 %v3516_v45  ;;  %v3508_v4 = vadd.f32 %v3507_v42, %v3494_v26  ;;  %v12231_v26 = vld [vmem:[#allocation9 + $0x1c0] sm:$0xff] }
 0xc6c   :  { %3726 = vmatpush.bf16.msra.mxu1 %v12236_v7  ;;  %v12705_v7 = vld [vmem:[%s15119_s14 + $0xb] ss:$0 sm:$0xff] }
 0xc6d   :  { %v3513_v58 = vand.u32 2147483647, %v3508_v4  ;;  %v3511_v41 = vmax.f32 %v3508_v4, 0.0 }
 0xc6f   :  { %v3515_v13 = vsub.f32 0.0, %v3513_v58 }
 0xc70   :  { %3727 = vmatpush.bf16.msra.mxu1 %v12235_v16 }
 0xc71   :  { %v12864_v28 = vpop.eup %12863  ;;  %v3518_v61 = vmul.f32 1.442695, %v3515_v13 }
 0xc72   :  { %v3520_v27 = vadd.f32 1.0, %v12864_v28  ;;  %v3523_v60 = vmul.f32 -0.5, %v12864_v28  ;;  %v3526_v30 = vand.u32 2147483647, %v12864_v28 }
 0xc73   :  { %12865 = vpow2.f32 %v3518_v61 }
 0xc74   :  { %12867 = vlog2.f32 %v3520_v27  ;;  %v3524_v51 = vadd.f32 1.0, %v3523_v60  ;;  %vm3527_vm15 = vcmp.lt.f32.partialorder %v3526_v30, 0.0004427343  ;;  %3728 = vmatpush.bf16.msra.mxu1 %v12234_v38 }
 0xc76   :  { %v3525_v20 = vmul.f32 %v12864_v28, %v3524_v51 }
 0xc78   :  { %3729 = vmatpush.bf16.msra.mxu1 %v12233_v62 }
 0xc79   :  { %v12866_v18 = vpop.eup %12865 }
 0xc7a   :  { %v12868_v48 = vpop.eup %12867  ;;  %v3529_v56 = vadd.f32 1.0, %v12866_v18  ;;  %v3532_v11 = vmul.f32 -0.5, %v12866_v18  ;;  %v3535_v42 = vand.u32 2147483647, %v12866_v18 }
 0xc7b   :  { %v3522_v47 = vmul.f32 0.6931472, %v12868_v48 }
 0xc7c   :  { %12869 = vlog2.f32 %v3529_v56  ;;  %v3533_v9 = vadd.f32 1.0, %v3532_v11  ;;  %vm3536_vm1 = vcmp.lt.f32.partialorder %v3535_v42, 0.0004427343  ;;  %3730 = vmatpush.bf16.msra.mxu1 %v12232_v32 }
 0xc7d   :  { %v3528_v54 = vsel %vm3527_vm15, %v3525_v20, %v3522_v47 }
 0xc7e   :  { %v3534_v44 = vmul.f32 %v12866_v18, %v3533_v9  ;;  %v3538_v12 = vadd.f32 %v3528_v54, %v3510_v43 }
 0xc80   :  { %v10147_v17 = vadd.f32 -0.6931472, %v3538_v12  ;;  %3731 = vmatpush.bf16.msra.mxu1 %v12231_v26 }
 0xc82   :  { %v12870_v8 = vpop.eup %12869 }
 0xc83   :  { %v3531_v1 = vmul.f32 0.6931472, %v12870_v8 }
 0xc85   :  { %v3537_v50 = vsel %vm3536_vm1, %v3534_v44, %v3531_v1 }
 0xc86   :  { %v3539_v46 = vadd.f32 %v3537_v50, %v3511_v41 }
 0xc88   :  { %v10148_v52 = vadd.f32 -0.6931472, %v3539_v46 }
 0xc8a   :  { %v3559_v3 = vpack.c.bf16 %v10148_v52, %v10147_v17 }
 0xc8c   :  { %3618 = vmatmul.bf16.vlgmr.msra.gmra.mxu2 %v3559_v3 }
 0xd0f   :  { %v3619_v29 = vpop.f32.mrf.mxu2 }
 0xd10   :  { %v3620_v10 = vadd.f32 %v12704_v19, %v3619_v29 }
 0xd12   :  { %v3626_v59 = vand.u32 2147483647, %v3620_v10  ;;  %v3624_v44 = vmax.f32 %v3620_v10, 0.0 }
 0xd14   :  { %v3628_v45 = vsub.f32 0.0, %v3626_v59 }
 0xd16   :  { %v3630_v4 = vmul.f32 1.442695, %v3628_v45 }
 0xd17   :  { %v3621_v58 = vpop.f32.mrf.mxu2 }
 0xd18   :  { %12871 = vpow2.f32 %v3630_v4  ;;  %v3622_v13 = vadd.f32 %v12704_v19, %v3621_v58 }
 0xd1a   :  { %v3627_v28 = vand.u32 2147483647, %v3622_v13  ;;  %v3625_v46 = vmax.f32 %v3622_v13, 0.0 }
 0xd1c   :  { %v3629_v61 = vsub.f32 0.0, %v3627_v28 }
 0xd1e   :  { %v12872_v27 = vpop.eup %12871  ;;  %v3632_v60 = vmul.f32 1.442695, %v3629_v61 }
 0xd1f   :  { %v3634_v18 = vadd.f32 1.0, %v12872_v27  ;;  %v3637_v48 = vmul.f32 -0.5, %v12872_v27  ;;  %v3640_v20 = vand.u32 2147483647, %v12872_v27 }
 0xd20   :  { %12873 = vpow2.f32 %v3632_v60 }
 0xd21   :  { %12875 = vlog2.f32 %v3634_v18  ;;  %v3638_v30 = vadd.f32 1.0, %v3637_v48  ;;  %vm3641_vm3 = vcmp.lt.f32.partialorder %v3640_v20, 0.0004427343 }
 0xd23   :  { %v3639_v42 = vmul.f32 %v12872_v27, %v3638_v30 }
 0xd26   :  { %v12874_v56 = vpop.eup %12873 }
 0xd27   :  { %v12876_v51 = vpop.eup %12875  ;;  %v3643_v11 = vadd.f32 1.0, %v12874_v56  ;;  %v3646_v47 = vmul.f32 -0.5, %v12874_v56  ;;  %v3649_v8 = vand.u32 2147483647, %v12874_v56 }
 0xd28   :  { %v3636_v9 = vmul.f32 0.6931472, %v12876_v51 }
 0xd29   :  { %12877 = vlog2.f32 %v3643_v11  ;;  %v3647_v54 = vadd.f32 1.0, %v3646_v47  ;;  %vm3650_vm4 = vcmp.lt.f32.partialorder %v3649_v8, 0.0004427343 }
 0xd2a   :  { %v3642_v43 = vsel %vm3641_vm3, %v3639_v42, %v3636_v9 }
 0xd2b   :  { %v3648_v12 = vmul.f32 %v12874_v56, %v3647_v54  ;;  %v3652_v50 = vadd.f32 %v3642_v43, %v3624_v44 }
 0xd2d   :  { %v10181_v3 = vadd.f32 -0.6931472, %v3652_v50  ;;  %v12262_v50 = vld [vmem:[#allocation7 + $0x238] sm:$0xff] }
 0xd2f   :  { %v12878_v1 = vpop.eup %12877 }
 0xd30   :  { %v3645_v41 = vmul.f32 0.6931472, %v12878_v1 }
 0xd32   :  { %v3651_v17 = vsel %vm3650_vm4, %v3648_v12, %v3645_v41 }
 0xd33   :  { %v3653_v52 = vadd.f32 %v3651_v17, %v3625_v46  ;;  %v12261_v17 = vld [vmem:[#allocation7 + $0x230] sm:$0xff] }
 0xd35   :  { %v10182_v57 = vadd.f32 -0.6931472, %v3653_v52  ;;  %v12260_v52 = vld [vmem:[#allocation7 + $0x228] sm:$0xff] }
 0xd37   :  { %v3673_v15 = vpack.c.bf16 %v10182_v57, %v10181_v3  ;;  %v12259_v3 = vld [vmem:[#allocation7 + $0x220] sm:$0xff]  ;;  %v12258_v57 = vld [vmem:[#allocation7 + $0x218] sm:$0xff] }
 0xd39   :  { %3732 = vmatmul.bf16.vlgmr.msra.gmra.mxu1 %v3673_v15  ;;  %v12254_v15 = vld [vmem:[#allocation7 + $0x1f8] sm:$0xff] }
 0xd3a   :  { %3994 = vmatpush.bf16.msrb.mxu2 %v12254_v15  ;;  %v12321_v15 = vld [vmem:[#allocation2 + $0x114] sm:$0xf] }
 0xdb6   :  { %v3733_v16 = vpop.f32.mrf.mxu1 }
 0xdb7   :  { %v3734_v38 = vadd.f32 %v12705_v7, %v3733_v16  ;;  %v12253_v16 = vld [vmem:[#allocation7 + $0x1f0] sm:$0xff] }
 0xdb8   :  { %3995 = vmatpush.bf16.msrb.mxu2 %v12253_v16 }
 0xdb9   :  { %v3740_v19 = vand.u32 2147483647, %v3734_v38  ;;  %v3738_v9 = vmax.f32 %v3734_v38, 0.0  ;;  %v12256_v38 = vld [vmem:[#allocation7 + $0x208] sm:$0xff] }
 0xdbb   :  { %v3742_v62 = vsub.f32 0.0, %v3740_v19  ;;  %v12252_v19 = vld [vmem:[#allocation7 + $0x1e8] sm:$0xff] }
 0xdbc   :  { %3996 = vmatpush.bf16.msrb.mxu2 %v12252_v19  ;;  %v10553_v19 = vld [vmem:[#allocation2 + $0x108] sm:$0xf0] }
 0xdbd   :  { %v3744_v29 = vmul.f32 1.442695, %v3742_v62  ;;  %v12255_v62 = vld [vmem:[#allocation7 + $0x200] sm:$0xff] }
 0xdbe   :  { %v3735_v10 = vpop.f32.mrf.mxu1 }
 0xdbf   :  { %12879 = vpow2.f32 %v3744_v29  ;;  %v3736_v32 = vadd.f32 %v12705_v7, %v3735_v10  ;;  %v12257_v7 = vld [vmem:[#allocation7 + $0x210] sm:$0xff]  ;;  %v12251_v29 = vld [vmem:[#allocation7 + $0x1e0] sm:$0xff]  ;;  %v12250_v10 = vld [vmem:[#allocation7 + $0x1d8] sm:$0xff] }
 0xdc0   :  { %3997 = vmatpush.bf16.msrb.mxu2 %v12251_v29 }
 0xdc1   :  { %v3741_v59 = vand.u32 2147483647, %v3736_v32  ;;  %v3739_v43 = vmax.f32 %v3736_v32, 0.0  ;;  %v12249_v32 = vld [vmem:[#allocation7 + $0x1d0] sm:$0xff] }
 0xdc3   :  { %v3743_v45 = vsub.f32 0.0, %v3741_v59  ;;  %v12248_v59 = vld [vmem:[#allocation7 + $0x1c8] sm:$0xff] }
 0xdc4   :  { %3998 = vmatpush.bf16.msrb.mxu2 %v12250_v10  ;;  %v12270_v10 = vld [vmem:[#allocation9 + $0x238] sm:$0xff] }
 0xdc5   :  { %v12880_v26 = vpop.eup %12879  ;;  %v3746_v4 = vmul.f32 1.442695, %v3743_v45  ;;  %v12247_v45 = vld [vmem:[#allocation7 + $0x1c0] sm:$0xff]  ;;  %4104 = vmatpush.bf16.msrb.mxu1 %v12270_v10 }
 0xdc6   :  { %v3748_v58 = vadd.f32 1.0, %v12880_v26  ;;  %v3751_v13 = vmul.f32 -0.5, %v12880_v26  ;;  %v3754_v48 = vand.u32 2147483647, %v12880_v26 }
 0xdc7   :  { %12881 = vpow2.f32 %v3746_v4  ;;  %v12301_v4 = vld [vmem:[#allocation7 + $0x2f0] sm:$0xff] }
 0xdc8   :  { %12883 = vlog2.f32 %v3748_v58  ;;  %v3752_v60 = vadd.f32 1.0, %v3751_v13  ;;  %vm3755_vm5 = vcmp.lt.f32.partialorder %v3754_v48, 0.0004427343  ;;  %3999 = vmatpush.bf16.msrb.mxu2 %v12249_v32  ;;  %v12300_v58 = vld [vmem:[#allocation7 + $0x2e8] sm:$0xff]  ;;  %v12299_v13 = vld [vmem:[#allocation7 + $0x2e0] sm:$0xff]  ;;  %v12269_v32 = vld [vmem:[#allocation9 + $0x230] sm:$0xff] }
 0xdc9   :  { %4105 = vmatpush.bf16.msrb.mxu1 %v12269_v32  ;;  %v4311_v32 = vpack.c.bf16 %v13864_v6, %v13864_v6  ;;  %v12706_v6 = vld [vmem:[%s15119_s14 + $0xd] ss:$0 sm:$0xff] }
 0xdca   :  { %v3753_v51 = vmul.f32 %v12880_v26, %v3752_v60  ;;  %v12302_v26 = vld [vmem:[#allocation7 + $0x2f8] sm:$0xff] }
 0xdcb   :  { %v10609_v60 = vld [vmem:[#allocation2 + $0x178] sm:$0xf0] }
 0xdcc   :  { %4000 = vmatpush.bf16.msrb.mxu2 %v12248_v59 }
 0xdcd   :  { %v12882_v28 = vpop.eup %12881 }
 0xdce   :  { %v12884_v61 = vpop.eup %12883  ;;  %v3757_v27 = vadd.f32 1.0, %v12882_v28  ;;  %v3760_v18 = vmul.f32 -0.5, %v12882_v28  ;;  %v3763_v30 = vand.u32 2147483647, %v12882_v28 }
 0xdcf   :  { %v3750_v56 = vmul.f32 0.6931472, %v12884_v61  ;;  %v12296_v61 = vld [vmem:[#allocation7 + $0x2c8] sm:$0xff] }
 0xdd0   :  { %12885 = vlog2.f32 %v3757_v27  ;;  %v3761_v11 = vadd.f32 1.0, %v3760_v18  ;;  %vm3764_vm6 = vcmp.lt.f32.partialorder %v3763_v30, 0.0004427343  ;;  %4001 = vmatpush.bf16.msrb.mxu2 %v12247_v45  ;;  %v12333_v27 = vld [vmem:[#allocation2 + $0x174] sm:$0xf]  ;;  %v12295_v18 = vld [vmem:[#allocation7 + $0x2c0] sm:$0xff] }
 0xdd1   :  { %v3756_v47 = vsel %vm3755_vm5, %v3753_v51, %v3750_v56  ;;  %v10612_v56 = vor.u32 %v12333_v27, %v10609_v60  ;;  %v12331_v30 = vld [vmem:[#allocation2 + $0x164] sm:$0xf]  ;;  %v12266_v60 = vld [vmem:[#allocation9 + $0x218] sm:$0xff] }
 0xdd2   :  { %v3762_v54 = vmul.f32 %v12882_v28, %v3761_v11  ;;  %v3766_v8 = vadd.f32 %v3756_v47, %v3738_v9  ;;  %v12298_v28 = vld [vmem:[#allocation7 + $0x2d8] sm:$0xff]  ;;  %v10601_v47 = vld [vmem:[#allocation2 + $0x168] sm:$0xf0]  ;;  %v12267_v27 = vld [vmem:[#allocation9 + $0x220] sm:$0xff] }
 0xdd3   :  { %v10604_v9 = vor.u32 %v12331_v30, %v10601_v47  ;;  %v12283_v30 = vld [vmem:[#allocation7 + $0x260] sm:$0xff] }
 0xdd4   :  { %v13882_v41 = vadd.f32 -0.6931472, %v3766_v8 }
 0xdd6   :  { %v12886_v20 = vpop.eup %12885 }
 0xdd7   :  { %v3759_v42 = vmul.f32 0.6931472, %v12886_v20  ;;  %v12329_v20 = vld [vmem:[#allocation2 + $0x154] sm:$0xf] }
 0xdd9   :  { %v3765_v1 = vsel %vm3764_vm6, %v3762_v54, %v3759_v42  ;;  %v10593_v42 = vld [vmem:[#allocation2 + $0x158] sm:$0xf0] }
 0xdda   :  { %v3767_v44 = vadd.f32 %v3765_v1, %v3739_v43  ;;  %v10596_v8 = vor.u32 %v12329_v20, %v10593_v42  ;;  %v12327_v43 = vld [vmem:[#allocation2 + $0x144] sm:$0xf]  ;;  %v10585_v1 = vld [vmem:[#allocation2 + $0x148] sm:$0xf0] }
 0xddc   :  { %v13884_v12 = vadd.f32 -0.6931472, %v3767_v44  ;;  %v10588_v44 = vor.u32 %v12327_v43, %v10585_v1 }
 0xdde   :  { %v3770_v46 = vpack.c.bf16 %v13884_v12, %v13882_v41 }
 0xde0   :  { %3778 = vmatpush.bf16.msrb.mxu3 %v3770_v46 }
 0xde3   :  { %10217 = vmatmul.msk.bf16.vlgmr.msrb.gmra.mxu3 %vm190_vm14, %v13676_v31 }
 0xde4   :  { %4007 = vmatpush.bf16.msra.mxu3 %v12262_v50  ;;  %v12325_v50 = vld [vmem:[#allocation2 + $0x134] sm:$0xf] }
 0xde8   :  { %4008 = vmatpush.bf16.msra.mxu3 %v12261_v17 }
 0xdec   :  { %4009 = vmatpush.bf16.msra.mxu3 %v12260_v52  ;;  %v12323_v52 = vld [vmem:[#allocation2 + $0x124] sm:$0xf] }
 0xdf0   :  { %4010 = vmatpush.bf16.msra.mxu3 %v12259_v3  ;;  %v10569_v3 = vld [vmem:[#allocation2 + $0x128] sm:$0xf0] }
 0xdf4   :  { %4011 = vmatpush.bf16.msra.mxu3 %v12258_v57  ;;  %v10572_v57 = vor.u32 %v12323_v52, %v10569_v3 }
 0xdf8   :  { %4012 = vmatpush.bf16.msra.mxu3 %v12257_v7  ;;  %v10561_v7 = vld [vmem:[#allocation2 + $0x118] sm:$0xf0] }
 0xdf9   :  { %v10564_v16 = vor.u32 %v12321_v15, %v10561_v7 }
 0xdfc   :  { %4013 = vmatpush.bf16.msra.mxu3 %v12256_v38  ;;  %v12319_v38 = vld [vmem:[#allocation2 + $0x104] sm:$0xf] }
 0xe00   :  { %4014 = vmatpush.bf16.msra.mxu3 %v12255_v62  ;;  %v10556_v62 = vor.u32 %v12319_v38, %v10553_v19 }
 0xe03   :  { %4015 = vmatmul.bf16.vlgmr.msra.gmra.mxu3 %v13867_v5  ;;  %v12297_v5 = vld [vmem:[#allocation7 + $0x2d0] sm:$0xff] }
 0xe04   :  { %4255 = vmatpush.bf16.msrb.mxu3 %v3770_v46  ;;  %v10577_v46 = vld [vmem:[#allocation2 + $0x138] sm:$0xf0] }
 0xe05   :  { %v10580_v17 = vor.u32 %v12325_v50, %v10577_v46  ;;  %v12279_v50 = vld [vmem:[#allocation7 + $0x240] sm:$0xff] }
 0xe08   :  { %4485 = vmatpush.bf16.msra.mxu3 %v12302_v26 }
 0xe0c   :  { %4486 = vmatpush.bf16.msra.mxu3 %v12301_v4 }
 0xe10   :  { %4487 = vmatpush.bf16.msra.mxu3 %v12300_v58 }
 0xe13   :  { %10382 = vmatmul.msk.bf16.vlgmr.msrb.gmra.mxu3 %vm190_vm14, %v13678_v35 }
 0xe14   :  { %4488 = vmatpush.bf16.msra.mxu3 %v12299_v13  ;;  %v13896_v13 = vadd.f32 %v13884_v12, %v13689_v14  ;;  %v12264_v14 = vld [vmem:[#allocation9 + $0x208] sm:$0xff]  ;;  %v12263_v12 = vld [vmem:[#allocation9 + $0x200] sm:$0xff] }
 0xe16   :  { %15244 = vst [vmem:[#allocation17_spill] sm:$0xff] %v13896_v13 }
 0xe18   :  { %4489 = vmatpush.bf16.msra.mxu3 %v12298_v28  ;;  %v13900_v28 = vadd.f32 %v13882_v41, %v13693_v21  ;;  %v12285_v21 = vld [vmem:[#allocation7 + $0x270] sm:$0xff]  ;;  %v12702_v41 = vld [vmem:[%s15119_s14 + $0xc] ss:$0 sm:$0xff] }
 0xe1a   :  { %15245 = vst [vmem:[#allocation18_spill] sm:$0xff] %v13900_v28 }
 0xe1c   :  { %4490 = vmatpush.bf16.msra.mxu3 %v12297_v5  ;;  %v13904_v5 = vpack.c.bf16 %v13896_v13, %v13900_v28  ;;  %v12494_v28 = vld [vmem:[#allocation10 + $0x74] sm:$0xf0] }
 0xe20   :  { %4491 = vmatpush.bf16.msra.mxu3 %v12296_v61  ;;  %v12268_v61 = vld [vmem:[#allocation9 + $0x228] sm:$0xff] }
 0xe21   :  { %4106 = vmatpush.bf16.msrb.mxu1 %v12268_v61  ;;  %v12274_v61 = vld [vmem:[#allocation9 + $0x258] sm:$0xff] }
 0xe24   :  { %4492 = vmatpush.bf16.msra.mxu3 %v12295_v18  ;;  %v12265_v18 = vld [vmem:[#allocation9 + $0x210] sm:$0xff] }
 0xe25   :  { %4107 = vmatpush.bf16.msrb.mxu1 %v12267_v27  ;;  %v12273_v27 = vld [vmem:[#allocation9 + $0x250] sm:$0xff] }
 0xe28   :  { %4891 = vmatpush.bf16.msrb.mxu3 %v10612_v56  ;;  %v12284_v56 = vld [vmem:[#allocation7 + $0x268] sm:$0xff] }
 0xe29   :  { %4108 = vmatpush.bf16.msrb.mxu1 %v12266_v60  ;;  %v12272_v60 = vld [vmem:[#allocation9 + $0x248] sm:$0xff] }
 0xe2c   :  { %4892 = vmatpush.bf16.msrb.mxu3 %v10604_v9  ;;  %v12282_v9 = vld [vmem:[#allocation7 + $0x258] sm:$0xff] }
 0xe2d   :  { %4109 = vmatpush.bf16.msrb.mxu1 %v12265_v18  ;;  %v12271_v18 = vld [vmem:[#allocation9 + $0x240] sm:$0xff] }
 0xe30   :  { %4893 = vmatpush.bf16.msrb.mxu3 %v10596_v8 }
 0xe31   :  { %4110 = vmatpush.bf16.msrb.mxu1 %v12264_v14 }
 0xe34   :  { %4894 = vmatpush.bf16.msrb.mxu3 %v10588_v44  ;;  %v12280_v44 = vld [vmem:[#allocation7 + $0x248] sm:$0xff] }
 0xe35   :  { %4111 = vmatpush.bf16.msrb.mxu1 %v12263_v12 }
 0xe38   :  { %4895 = vmatpush.bf16.msrb.mxu3 %v10580_v17 }
 0xe3c   :  { %4896 = vmatpush.bf16.msrb.mxu3 %v10572_v57 }
 0xe40   :  { %4897 = vmatpush.bf16.msrb.mxu3 %v10564_v16 }
 0xe44   :  { %4898 = vmatpush.bf16.msrb.mxu3 %v10556_v62 }
 0xe66   :  { %v3780_v48 = vpop.f32.mrf.mxu3 }
 0xe67   :  { %v3784_v51 = vmul.f32 %v3780_v48, %v13684_v40  ;;  %v12286_v48 = vld [vmem:[#allocation7 + $0x278] sm:$0xff] }
 0xe68   :  { %4459 = vmatpush.bf16.msra.mxu1 %v12286_v48 }
 0xe69   :  { %v3834_v11 = vpack.c.bf16 %v3784_v51, %v3784_v51  ;;  %v3991_v51 = vadd.f32 %v12702_v41, %v13871_v39 }
 0xe6b   :  { %4002 = vmatmul.bf16.vlgmr.msrb.gmra.mxu2 %v3834_v11 }
 0xe6c   :  { %4460 = vmatpush.bf16.msra.mxu1 %v12285_v21 }
 0xe6e   :  { %v3782_v54 = vpop.f32.mrf.mxu3 }
 0xe6f   :  { %v12281_v54 = vld [vmem:[#allocation7 + $0x250] sm:$0xff] }
 0xe70   :  { %4461 = vmatpush.bf16.msra.mxu1 %v12284_v56 }
 0xe74   :  { %4462 = vmatpush.bf16.msra.mxu1 %v12283_v30 }
 0xe78   :  { %4463 = vmatpush.bf16.msra.mxu1 %v12282_v9 }
 0xe7c   :  { %4464 = vmatpush.bf16.msra.mxu1 %v12281_v54 }
 0xe80   :  { %4465 = vmatpush.bf16.msra.mxu1 %v12280_v44 }
 0xe84   :  { %4466 = vmatpush.bf16.msra.mxu1 %v12279_v50 }
 0xe86   :  { %v4016_v29 = vpop.f32.mrf.mxu3 }
 0xe8e   :  { %v4018_v59 = vpop.f32.mrf.mxu3 }
 0xe96   :  { %v4257_v45 = vpop.f32.mrf.mxu3 }
 0xe97   :  { %v4261_v26 = vmul.f32 0.083333336, %v4257_v45  ;;  %v12278_v45 = vld [vmem:[#allocation9 + $0x278] sm:$0xff] }
 0xe98   :  { %4201 = vmatpush.bf16.msra.mxu0 %v12278_v45 }
 0xe99   :  { %v4313_v4 = vpack.c.bf16 %v4261_v26, %v4261_v26  ;;  %v12277_v26 = vld [vmem:[#allocation9 + $0x270] sm:$0xff] }
 0xe9b   :  { %4493 = vmatmul.bf16.vlgmr.msra.gmra.mxu3 %v4313_v4  ;;  %v12276_v4 = vld [vmem:[#allocation9 + $0x268] sm:$0xff] }
 0xe9c   :  { %4202 = vmatpush.bf16.msra.mxu0 %v12277_v26 }
 0xe9e   :  { %v4259_v58 = vpop.f32.mrf.mxu3 }
 0xe9f   :  { %v12275_v58 = vld [vmem:[#allocation9 + $0x260] sm:$0xff] }
 0xea0   :  { %4203 = vmatpush.bf16.msra.mxu0 %v12276_v4 }
 0xea4   :  { %4204 = vmatpush.bf16.msra.mxu0 %v12275_v58 }
 0xea8   :  { %4205 = vmatpush.bf16.msra.mxu0 %v12274_v61 }
 0xeab   :  { %4899 = vmatmul.bf16.vlgmr.msrb.gmra.mxu3 %v13904_v5 }
 0xeac   :  { %4206 = vmatpush.bf16.msra.mxu0 %v12273_v27 }
 0xeb0   :  { %4207 = vmatpush.bf16.msra.mxu0 %v12272_v60 }
 0xeb4   :  { %4208 = vmatpush.bf16.msra.mxu0 %v12271_v18 }
 0xeee   :  { %v4003_v11 = vpop.f32.mrf.mxu2 }
 0xeef   :  { %v4004_v47 = vadd.f32 %v4003_v11, %v3991_v51 }
 0xef1   :  { %v4017_v20 = vadd.f32 %v4016_v29, %v4004_v47 }
 0xef3   :  { %v4021_v42 = vand.u32 2147483647, %v4017_v20  ;;  %v4020_v16 = vmax.f32 %v4017_v20, 0.0 }
 0xef5   :  { %v4022_v8 = vsub.f32 0.0, %v4021_v42 }
 0xef6   :  { %v4005_v43 = vpop.f32.mrf.mxu2 }
 0xef7   :  { %v4023_v1 = vmul.f32 1.442695, %v4022_v8 }
 0xef9   :  { %12887 = vpow2.f32 %v4023_v1 }
 0xeff   :  { %v12888_v46 = vpop.eup %12887 }
 0xf00   :  { %v4025_v17 = vadd.f32 1.0, %v12888_v46  ;;  %v4028_v39 = vmul.f32 -0.5, %v12888_v46  ;;  %v4031_v3 = vand.u32 2147483647, %v12888_v46 }
 0xf02   :  { %12889 = vlog2.f32 %v4025_v17  ;;  %v4029_v52 = vadd.f32 1.0, %v4028_v39  ;;  %vm4032_vm7 = vcmp.lt.f32.partialorder %v4031_v3, 0.0004427343  ;;  %v12707_v39 = vld [vmem:[%s15119_s14 + $0xe] ss:$0 sm:$0xff] }
 0xf04   :  { %v4030_v7 = vmul.f32 %v12888_v46, %v4029_v52 }
 0xf08   :  { %v12890_v57 = vpop.eup %12889 }
 0xf09   :  { %v4027_v15 = vmul.f32 0.6931472, %v12890_v57 }
 0xf0b   :  { %v4033_v38 = vsel %vm4032_vm7, %v4030_v7, %v4027_v15 }
 0xf0c   :  { %v4034_v19 = vadd.f32 %v4033_v38, %v4020_v16 }
 0xf0e   :  { %v10314_v62 = vadd.f32 -0.6931472, %v4034_v19 }
 0xf10   :  { %v4053_v29 = vpack.c.bf16 %v10314_v62, %v10314_v62 }
 0xf12   :  { %4112 = vmatmul.bf16.vlgmr.msrb.gmra.mxu1 %v4053_v29 }
 0xf1e   :  { %v13911_v10 = vpop.f32.mrf.mxu3 }
 0xf22   :  { %4467 = vmatmul.bf16.vlgmr.msra.gmra.mxu1 %v4311_v32 }
 0xf26   :  { %v4496_v59 = vpop.f32.mrf.mxu3 }
 0xf8f   :  { %v4113_v14 = vpop.f32.mrf.mxu1 }
 0xf90   :  { %v4114_v12 = vadd.f32 %v12706_v6, %v4113_v14  ;;  %v12294_v6 = vld [vmem:[#allocation7 + $0x2b8] sm:$0xff]  ;;  %v12293_v14 = vld [vmem:[#allocation7 + $0x2b0] sm:$0xff] }
 0xf92   :  { %v4118_v48 = vand.u32 2147483647, %v4114_v12  ;;  %v4117_v1 = vmax.f32 %v4114_v12, 0.0  ;;  %v12292_v12 = vld [vmem:[#allocation7 + $0x2a8] sm:$0xff] }
 0xf94   :  { %v4119_v21 = vsub.f32 0.0, %v4118_v48  ;;  %v12291_v48 = vld [vmem:[#allocation7 + $0x2a0] sm:$0xff] }
 0xf96   :  { %v4120_v41 = vmul.f32 1.442695, %v4119_v21  ;;  %v12290_v21 = vld [vmem:[#allocation7 + $0x298] sm:$0xff] }
 0xf97   :  { %v4115_v56 = vpop.f32.mrf.mxu1 }
 0xf98   :  { %12891 = vpow2.f32 %v4120_v41  ;;  %v12289_v41 = vld [vmem:[#allocation7 + $0x290] sm:$0xff]  ;;  %v12288_v56 = vld [vmem:[#allocation7 + $0x288] sm:$0xff] }
 0xf9e   :  { %v12892_v51 = vpop.eup %12891 }
 0xf9f   :  { %v4122_v11 = vadd.f32 1.0, %v12892_v51  ;;  %v13918_v30 = vpop.f32.mrf.mxu1  ;;  %v4125_v47 = vmul.f32 -0.5, %v12892_v51  ;;  %v4128_v9 = vand.u32 2147483647, %v12892_v51 }
 0xfa1   :  { %12893 = vlog2.f32 %v4122_v11  ;;  %v4126_v20 = vadd.f32 1.0, %v4125_v47  ;;  %vm4129_vm8 = vcmp.lt.f32.partialorder %v4128_v9, 0.0004427343  ;;  %v12334_v11 = vld [vmem:[#allocation2 + $0x174] sm:$0xf0]  ;;  %v12287_v47 = vld [vmem:[#allocation7 + $0x280] sm:$0xff] }
 0xfa2   :  { %v10599_v9 = vld [vmem:[#allocation2 + $0x160] sm:$0xf] }
 0xfa3   :  { %v4127_v43 = vmul.f32 %v12892_v51, %v4126_v20  ;;  %v10607_v51 = vld [vmem:[#allocation2 + $0x170] sm:$0xf] }
 0xfa4   :  { %v10608_v20 = vor.u32 %v12334_v11, %v10607_v51  ;;  %v13938_v11 = vld [vmem:[%s15114_s9 + $0x7] ss:$8 sm:$0x3] }
 0xfa7   :  { %v12894_v42 = vpop.eup %12893  ;;  %v4470_v54 = vpop.f32.mrf.mxu1 }
 0xfa8   :  { %v4124_v8 = vmul.f32 0.6931472, %v12894_v42  ;;  %v12332_v42 = vld [vmem:[#allocation2 + $0x164] sm:$0xf0] }
 0xfa9   :  { %v10600_v54 = vor.u32 %v12332_v42, %v10599_v9  ;;  %v12340_v9 = vld [vmem:[#allocation4 + $0x128] sm:$0xff] }
 0xfaa   :  { %v4130_v44 = vsel %vm4129_vm8, %v4127_v43, %v4124_v8  ;;  %v10591_v8 = vld [vmem:[#allocation2 + $0x150] sm:$0xf]  ;;  %v12330_v43 = vld [vmem:[#allocation2 + $0x154] sm:$0xf0] }
 0xfab   :  { %v4131_v50 = vadd.f32 %v4130_v44, %v4117_v1  ;;  %v10592_v1 = vor.u32 %v12330_v43, %v10591_v8  ;;  %v10583_v44 = vld [vmem:[#allocation2 + $0x140] sm:$0xf] }
 0xfad   :  { %v10347_v46 = vadd.f32 -0.6931472, %v4131_v50  ;;  %v12328_v50 = vld [vmem:[#allocation2 + $0x144] sm:$0xf0] }
 0xfaf   :  { %v4150_v17 = vpack.c.bf16 %v10347_v46, %v10347_v46  ;;  %v10584_v46 = vor.u32 %v12328_v50, %v10583_v44  ;;  %v12339_v50 = vld [vmem:[#allocation4 + $0x120] sm:$0xff] }
 0xfb1   :  { %4209 = vmatmul.bf16.vlgmr.msra.gmra.mxu0 %v4150_v17  ;;  %v10575_v17 = vld [vmem:[#allocation2 + $0x130] sm:$0xf] }
0x102e   :  { %v4210_v52 = vpop.f32.mrf.mxu0 }
0x102f   :  { %v4211_v3 = vadd.f32 %v12707_v39, %v4210_v52  ;;  %v12326_v39 = vld [vmem:[#allocation2 + $0x134] sm:$0xf0] }
0x1030   :  { %v10576_v52 = vor.u32 %v12326_v39, %v10575_v17 }
0x1031   :  { %v4215_v57 = vand.u32 2147483647, %v4211_v3  ;;  %v4214_v4 = vmax.f32 %v4211_v3, 0.0  ;;  %v10567_v3 = vld [vmem:[#allocation2 + $0x120] sm:$0xf] }
0x1033   :  { %v4216_v15 = vsub.f32 0.0, %v4215_v57  ;;  %v12324_v57 = vld [vmem:[#allocation2 + $0x124] sm:$0xf0] }
0x1035   :  { %v4217_v7 = vmul.f32 1.442695, %v4216_v15  ;;  %v10559_v15 = vld [vmem:[#allocation2 + $0x110] sm:$0xf] }
0x1036   :  { %v4212_v16 = vpop.f32.mrf.mxu0 }
0x1037   :  { %12895 = vpow2.f32 %v4217_v7  ;;  %v10568_v7 = vor.u32 %v12324_v57, %v10567_v3  ;;  %v12322_v16 = vld [vmem:[#allocation2 + $0x114] sm:$0xf0] }
0x103d   :  { %v12896_v38 = vpop.eup %12895 }
0x103e   :  { %v4219_v19 = vadd.f32 1.0, %v12896_v38  ;;  %v4222_v62 = vmul.f32 -0.5, %v12896_v38  ;;  %v4225_v32 = vand.u32 2147483647, %v12896_v38 }
0x1040   :  { %12897 = vlog2.f32 %v4219_v19  ;;  %v4223_v29 = vadd.f32 1.0, %v4222_v62  ;;  %vm4226_vm9 = vcmp.lt.f32.partialorder %v4225_v32, 0.0004427343  ;;  %v10551_v19 = vld [vmem:[#allocation2 + $0x100] sm:$0xf] }
0x1041   :  { %v12320_v62 = vld [vmem:[#allocation2 + $0x104] sm:$0xf0] }
0x1042   :  { %v4224_v26 = vmul.f32 %v12896_v38, %v4223_v29  ;;  %v10560_v38 = vor.u32 %v12322_v16, %v10559_v15  ;;  %v10552_v29 = vor.u32 %v12320_v62, %v10551_v19  ;;  %v12337_v15 = vld [vmem:[#allocation4 + $0x110] sm:$0xff] }
0x1046   :  { %v12898_v59 = vpop.eup %12897 }
0x1047   :  { %v4221_v45 = vmul.f32 0.6931472, %v12898_v59 }
0x1049   :  { %v4227_v58 = vsel %vm4226_vm9, %v4224_v26, %v4221_v45 }
0x104a   :  { %v4228_v61 = vadd.f32 %v4227_v58, %v4214_v4  ;;  %v12310_v4 = vld [vmem:[#allocation9 + $0x2b8] sm:$0xff]  ;;  %v12309_v58 = vld [vmem:[#allocation9 + $0x2b0] sm:$0xff] }
0x104b   :  { %4581 = vmatpush.bf16.msrb.mxu0 %v12310_v4 }
0x104c   :  { %v13923_v27 = vadd.f32 -0.6931472, %v4228_v61  ;;  %v12308_v61 = vld [vmem:[#allocation9 + $0x2a8] sm:$0xff] }
0x104e   :  { %v4230_v60 = vpack.c.bf16 %v13923_v27, %v13923_v27 }
0x104f   :  { %4582 = vmatpush.bf16.msrb.mxu0 %v12309_v58  ;;  %v12335_v58 = vld [vmem:[#allocation4 + $0x100] sm:$0xff] }
0x1050   :  { %v4232_v18 = vsel %vm346_vm0, %v4230_v60, 0  ;;  %v12307_v60 = vld [vmem:[#allocation9 + $0x2a0] sm:$0xff] }
0x1051   :  { %4241 = vmatpush.bf16.msra.mxu2 %v4232_v18  ;;  %v12305_v18 = vld [vmem:[#allocation9 + $0x290] sm:$0xff] }
0x1053   :  { %4583 = vmatpush.bf16.msrb.mxu0 %v12308_v61 }
0x1054   :  { %10381 = vmatmul.msk.bf16.vlgmr.msra.gmra.mxu2 %vm342_vm2, %v13724_v53 }
0x1055   :  { %4472 = vmatpush.bf16.msrb.mxu2 %v12294_v6  ;;  %v12306_v6 = vld [vmem:[#allocation9 + $0x298] sm:$0xff] }
0x1057   :  { %4584 = vmatpush.bf16.msrb.mxu0 %v12307_v60 }
0x1059   :  { %4473 = vmatpush.bf16.msrb.mxu2 %v12293_v14  ;;  %v12304_v14 = vld [vmem:[#allocation9 + $0x288] sm:$0xff] }
0x105b   :  { %4585 = vmatpush.bf16.msrb.mxu0 %v12306_v6 }
0x105d   :  { %4474 = vmatpush.bf16.msrb.mxu2 %v12292_v12  ;;  %v12303_v12 = vld [vmem:[#allocation9 + $0x280] sm:$0xff] }
0x105f   :  { %4586 = vmatpush.bf16.msrb.mxu0 %v12305_v18 }
0x1061   :  { %4475 = vmatpush.bf16.msrb.mxu2 %v12291_v48  ;;  %v4314_v48 = vld [vmem:[%s15119_s14 + $0xf] sm:$0x1] }
0x1063   :  { %4587 = vmatpush.bf16.msrb.mxu0 %v12304_v14 }
0x1065   :  { %4476 = vmatpush.bf16.msrb.mxu2 %v12290_v21  ;;  %v4469_v21 = vadd.f32 %v13918_v30, %v4314_v48  ;;  %v13950_v30 = vld [vmem:[%s15114_s9 + $0x10] ss:$8 sm:$0x3] }
0x1067   :  { %4588 = vmatpush.bf16.msrb.mxu0 %v12303_v12 }
0x1069   :  { %4477 = vmatpush.bf16.msrb.mxu2 %v12289_v41 }
0x106d   :  { %4478 = vmatpush.bf16.msrb.mxu2 %v12288_v56  ;;  %v12341_v56 = vld [vmem:[#allocation4 + $0x130] sm:$0xff] }
0x1071   :  { %4479 = vmatpush.bf16.msrb.mxu2 %v12287_v47 }
0x1075   :  { %4872 = vmatpush.bf16.msra.mxu2 %v10608_v20  ;;  %v4730_v20 = vperm.slane %v13938_v11, 0 }
0x1079   :  { %4873 = vmatpush.bf16.msra.mxu2 %v10600_v54  ;;  %v13945_v54 = vld [vmem:[%s15114_s9 + $0x6] ss:$8 sm:$0x3] }
0x107a   :  { %v4715_v43 = vperm.slane %v13945_v54, 0 }
0x107d   :  { %4874 = vmatpush.bf16.msra.mxu2 %v10592_v1  ;;  %v4753_v1 = vperm.slane %v13950_v30, 0 }
0x107f   :  { %v13963_v39 = vmul.f32 0.0, %v4753_v1 }
0x1081   :  { %4875 = vmatpush.bf16.msra.mxu2 %v10584_v46 }
0x1085   :  { %4876 = vmatpush.bf16.msra.mxu2 %v10576_v52  ;;  %v12338_v52 = vld [vmem:[#allocation4 + $0x118] sm:$0xff] }
0x1089   :  { %4877 = vmatpush.bf16.msra.mxu2 %v10568_v7 }
0x108d   :  { %4878 = vmatpush.bf16.msra.mxu2 %v10560_v38 }
0x1091   :  { %4879 = vmatpush.bf16.msra.mxu2 %v10552_v29  ;;  %v12336_v29 = vld [vmem:[#allocation4 + $0x108] sm:$0xff] }
0x10d7   :  { %v4243_v32 = vpop.f32.mrf.mxu2 }
0x10d8   :  { %v4247_v59 = vmul.f32 0.16666667, %v4243_v32 }
0x10da   :  { %v4312_v45 = vpack.c.bf16 %v4247_v59, %v4247_v59 }
0x10dc   :  { %4480 = vmatmul.bf16.vlgmr.msrb.gmra.mxu2 %v4312_v45 }
0x10df   :  { %v4245_v26 = vpop.f32.mrf.mxu2 }
0x10ec   :  { %4880 = vmatmul.bf16.vlgmr.msra.gmra.mxu2 %v13904_v5  ;;  %v12342_v5 = vld [vmem:[#allocation4 + $0x138] sm:$0xff] }
0x10ed   :  { %5213 = vmatpush.bf16.msra.mxu0 %v12342_v5  ;;  %v12318_v5 = vld [vmem:[#allocation9 + $0x2f8] sm:$0xff] }
0x10ee   :  { %4677 = vmatpush.bf16.msrb.mxu1 %v12318_v5  ;;  %v12315_v5 = vld [vmem:[#allocation9 + $0x2e0] sm:$0xff] }
0x10f1   :  { %5214 = vmatpush.bf16.msra.mxu0 %v12341_v56 }
0x10f5   :  { %5215 = vmatpush.bf16.msra.mxu0 %v12340_v9 }
0x10f9   :  { %5216 = vmatpush.bf16.msra.mxu0 %v12339_v50 }
0x10fd   :  { %5217 = vmatpush.bf16.msra.mxu0 %v12338_v52 }
0x1101   :  { %5218 = vmatpush.bf16.msra.mxu0 %v12337_v15 }
0x1105   :  { %5219 = vmatpush.bf16.msra.mxu0 %v12336_v29 }
0x1109   :  { %5220 = vmatpush.bf16.msra.mxu0 %v12335_v58 }
0x115f   :  { %v4481_v41 = vpop.f32.mrf.mxu2 }
0x1160   :  { %v4482_v51 = vadd.f32 %v4481_v41, %v4469_v21 }
0x1162   :  { %v4495_v47 = vadd.f32 %v13911_v10, %v4482_v51  ;;  %v13955_v10 = vmul.f32 0.0, %v4730_v20  ;;  %v12317_v51 = vld [vmem:[#allocation9 + $0x2f0] sm:$0xff] }
0x1163   :  { %4678 = vmatpush.bf16.msrb.mxu1 %v12317_v51  ;;  %v12312_v51 = vld [vmem:[#allocation9 + $0x2c8] sm:$0xff] }
0x1164   :  { %v4499_v42 = vand.u32 2147483647, %v4495_v47  ;;  %v4742_v17 = vadd.f32 %v13955_v10, %v4715_v43  ;;  %v4498_v48 = vmax.f32 %v4495_v47, 0.0 }
0x1166   :  { %v4500_v8 = vsub.f32 0.0, %v4499_v42  ;;  %v4765_v3 = vadd.f32 %v13963_v39, %v4742_v17 }
0x1167   :  { %v4483_v44 = vpop.f32.mrf.mxu2 }
0x1168   :  { %v4501_v46 = vmul.f32 1.442695, %v4500_v8 }
0x116a   :  { %12899 = vpow2.f32 %v4501_v46  ;;  %v12316_v46 = vld [vmem:[#allocation9 + $0x2e8] sm:$0xff] }
0x116b   :  { %4679 = vmatpush.bf16.msrb.mxu1 %v12316_v46 }
0x116f   :  { %v4881_v57 = vpop.f32.mrf.mxu2  ;;  %4680 = vmatpush.bf16.msrb.mxu1 %v12315_v5 }
0x1170   :  { %v12900_v7 = vpop.eup %12899  ;;  %v4910_v16 = vmul.f32 %v4881_v57, %v13492_v34 }
0x1171   :  { %v4503_v38 = vadd.f32 1.0, %v12900_v7  ;;  %v4506_v19 = vmul.f32 -0.5, %v12900_v7  ;;  %v4509_v26 = vand.u32 2147483647, %v12900_v7 }
0x1172   :  { %v4918_v62 = vadd.f32 %v4910_v16, %v4765_v3 }
0x1173   :  { %12901 = vlog2.f32 %v4503_v38  ;;  %v4507_v59 = vadd.f32 1.0, %v4506_v19  ;;  %vm4510_vm10 = vcmp.lt.f32.partialorder %v4509_v26, 0.0004427343 }
0x1174   :  { %v4934_v32 = vand.u32 2147483647, %v4918_v62 }
0x1175   :  { %v4508_v14 = vmul.f32 %v12900_v7, %v4507_v59 }
0x1176   :  { %v4942_v45 = vsub.f32 0.0, %v4934_v32 }
0x1177   :  { %v4883_v4 = vpop.f32.mrf.mxu2 }
0x1178   :  { %v4950_v61 = vmul.f32 1.442695, %v4942_v45  ;;  %v4912_v60 = vmul.f32 %v4883_v4, %v13492_v34  ;;  %v4926_v45 = vmax.f32 %v4918_v62, 0.0  ;;  %v4731_v62 = vperm.slane %v13938_v11, 1 }
0x1179   :  { %v12902_v6 = vpop.eup %12901 }
0x117a   :  { %v4505_v18 = vmul.f32 0.6931472, %v12902_v6  ;;  %12903 = vpow2.f32 %v4950_v61  ;;  %v4920_v12 = vadd.f32 %v4912_v60, %v4765_v3 }
0x117c   :  { %v4511_v21 = vsel %vm4510_vm10, %v4508_v14, %v4505_v18  ;;  %v4936_v41 = vand.u32 2147483647, %v4920_v12  ;;  %v4928_v61 = vmax.f32 %v4920_v12, 0.0  ;;  %v4716_v12 = vperm.slane %v13945_v54, 1 }
0x117d   :  { %v4512_v56 = vadd.f32 %v4511_v21, %v4498_v48  ;;  %v12314_v21 = vld [vmem:[#allocation9 + $0x2d8] sm:$0xff] }
0x117e   :  { %v4944_v9 = vsub.f32 0.0, %v4936_v41  ;;  %4681 = vmatpush.bf16.msrb.mxu1 %v12314_v21  ;;  %v12313_v41 = vld [vmem:[#allocation9 + $0x2d0] sm:$0xff]  ;;  %v12343_v21 = vld [vmem:[#allocation4 + $0x140] sm:$0xff] }
0x117f   :  { %v10479_v42 = vadd.f32 -0.6931472, %v4512_v56  ;;  %v4900_v56 = vpop.f32.mrf.mxu3 }
0x1180   :  { %v12904_v8 = vpop.eup %12903  ;;  %v4954_v44 = vmul.f32 1.442695, %v4944_v9  ;;  %v13972_v9 = vmul.f32 0.0, %v4731_v62 }
0x1181   :  { %v4531_v50 = vpack.c.bf16 %v10479_v42, %v10479_v42  ;;  %v4966_v34 = vadd.f32 1.0, %v12904_v8  ;;  %v4969_v47 = vmul.f32 -0.5, %v12904_v8  ;;  %v4972_v7 = vand.u32 2147483647, %v12904_v8 }
0x1182   :  { %12905 = vpow2.f32 %v4954_v44  ;;  %4682 = vmatpush.bf16.msrb.mxu1 %v12313_v41  ;;  %v4754_v42 = vperm.slane %v13950_v30, 1  ;;  %v12350_v44 = vld [vmem:[#allocation4 + $0x178] sm:$0xff] }
0x1183   :  { %12907 = vlog2.f32 %v4966_v34  ;;  %4589 = vmatmul.bf16.vlgmr.msrb.gmra.mxu0 %v4531_v50  ;;  %v4970_v57 = vadd.f32 1.0, %v4969_v47  ;;  %vm4973_vm11 = vcmp.lt.f32.partialorder %v4972_v7, 0.0004427343  ;;  %v4743_v34 = vadd.f32 %v13972_v9, %v4716_v12  ;;  %v12349_v47 = vld [vmem:[#allocation4 + $0x170] sm:$0xff] }
0x1184   :  { %v13980_v46 = vmul.f32 0.0, %v4754_v42 }
0x1185   :  { %v4971_v38 = vmul.f32 %v12904_v8, %v4970_v57  ;;  %v12311_v8 = vld [vmem:[#allocation9 + $0x2c0] sm:$0xff]  ;;  %v12348_v57 = vld [vmem:[#allocation4 + $0x168] sm:$0xff] }
0x1186   :  { %4683 = vmatpush.bf16.msrb.mxu1 %v12312_v51 }
0x1187   :  { %v4902_v50 = vpop.f32.mrf.mxu3 }
0x1188   :  { %v12906_v17 = vpop.eup %12905 }
0x1189   :  { %v12908_v52 = vpop.eup %12907  ;;  %v4984_v3 = vadd.f32 1.0, %v12906_v17  ;;  %v4987_v15 = vmul.f32 -0.5, %v12906_v17  ;;  %v4990_v29 = vand.u32 2147483647, %v12906_v17 }
0x118a   :  { %v4968_v16 = vmul.f32 0.6931472, %v12908_v52  ;;  %4684 = vmatpush.bf16.msrb.mxu1 %v12311_v8  ;;  %v4766_v52 = vadd.f32 %v13980_v46, %v4743_v34 }
0x118b   :  { %12909 = vlog2.f32 %v4984_v3  ;;  %v4988_v19 = vadd.f32 1.0, %v4987_v15  ;;  %vm4991_vm12 = vcmp.lt.f32.partialorder %v4990_v29, 0.0004427343  ;;  %v4911_v3 = vmul.f32 %v4900_v56, %v13489_v33 }
0x118c   :  { %v4974_v32 = vsel %vm4973_vm11, %v4971_v38, %v4968_v16  ;;  %v4532_v16 = vld [vmem:[%s15119_s14 + $0x10] sm:$0x1]  ;;  %v12347_v38 = vld [vmem:[#allocation4 + $0x160] sm:$0xff] }
0x118d   :  { %v4989_v4 = vmul.f32 %v12906_v17, %v4988_v19  ;;  %v5038_v58 = vadd.f32 %v4974_v32, %v4926_v45  ;;  %v4913_v17 = vmul.f32 %v4902_v50, %v13489_v33  ;;  %v13987_v7 = vadd.f32 %v4911_v3, %v4766_v52  ;;  %v12346_v45 = vld [vmem:[#allocation4 + $0x158] sm:$0xff] }
0x118e   :  { %5232 = vmatpush.bf16.msra.mxu1 %v12350_v44 }
0x118f   :  { %v10613_v18 = vadd.f32 -0.6931472, %v5038_v58  ;;  %v13985_v15 = vadd.f32 %v4913_v17, %v4766_v52  ;;  %v4935_v32 = vand.u32 2147483647, %v13987_v7  ;;  %v12345_v58 = vld [vmem:[#allocation4 + $0x150] sm:$0xff] }
0x1191   :  { %v12910_v59 = vpop.eup %12909  ;;  %v4937_v19 = vand.u32 2147483647, %v13985_v15 }
0x1192   :  { %v4986_v26 = vmul.f32 0.6931472, %v12910_v59  ;;  %5233 = vmatpush.bf16.msra.mxu1 %v12349_v47 }
0x1194   :  { %v4992_v60 = vsel %vm4991_vm12, %v4989_v4, %v4986_v26  ;;  %v4945_v26 = vsub.f32 0.0, %v4937_v19 }
0x1195   :  { %v5040_v6 = vadd.f32 %v4992_v60, %v4928_v61  ;;  %v4943_v61 = vsub.f32 0.0, %v4935_v32 }
0x1196   :  { %5234 = vmatpush.bf16.msra.mxu1 %v12348_v57 }
0x1197   :  { %v10615_v14 = vadd.f32 -0.6931472, %v5040_v6  ;;  %v4956_v6 = vmul.f32 1.442695, %v4945_v26  ;;  %v4952_v5 = vmul.f32 1.442695, %v4943_v61 }
0x1199   :  { %v5113_v48 = vpack.c.bf16 %v10615_v14, %v10613_v18 }
0x119a   :  { %5235 = vmatpush.bf16.msra.mxu1 %v12347_v38 }
0x119b   :  { %5221 = vmatmul.bf16.vlgmr.msra.gmra.mxu0 %v5113_v48  ;;  %v12344_v48 = vld [vmem:[#allocation4 + $0x148] sm:$0xff] }
0x119e   :  { %5236 = vmatpush.bf16.msra.mxu1 %v12346_v45 }
0x11a2   :  { %5237 = vmatpush.bf16.msra.mxu1 %v12345_v58 }
0x11a6   :  { %5238 = vmatpush.bf16.msra.mxu1 %v12344_v48 }
0x11aa   :  { %5239 = vmatpush.bf16.msra.mxu1 %v12343_v21 }
0x1200   :  { %v4590_v29 = vpop.f32.mrf.mxu0 }
0x1201   :  { %v4591_v59 = vadd.f32 %v4590_v29, %v4532_v16 }
0x1203   :  { %v4595_v4 = vand.u32 2147483647, %v4591_v59  ;;  %v4594_v16 = vmax.f32 %v4591_v59, 0.0 }
0x1205   :  { %v4596_v60 = vsub.f32 0.0, %v4595_v4 }
0x1207   :  { %v4597_v18 = vmul.f32 1.442695, %v4596_v60 }
0x1208   :  { %v4592_v14 = vpop.f32.mrf.mxu0 }
0x1209   :  { %12911 = vpow2.f32 %v4597_v18 }
0x120a   :  { %12913 = vpow2.f32 %v4956_v6 }
0x120b   :  { %12915 = vpow2.f32 %v4952_v5 }
0x120f   :  { %v12912_v41 = vpop.eup %12911 }
0x1210   :  { %v4599_v56 = vadd.f32 1.0, %v12912_v41  ;;  %v12914_v51 = vpop.eup %12913  ;;  %v4602_v8 = vmul.f32 -0.5, %v12912_v41  ;;  %v4605_v17 = vand.u32 2147483647, %v12912_v41 }
0x1211   :  { %v12916_v44 = vpop.eup %12915  ;;  %v4993_v50 = vadd.f32 1.0, %v12914_v51  ;;  %v4996_v38 = vmul.f32 -0.5, %v12914_v51  ;;  %v4999_v61 = vand.u32 2147483647, %v12914_v51 }
0x1212   :  { %12917 = vlog2.f32 %v4599_v56  ;;  %v4603_v34 = vadd.f32 1.0, %v4602_v8  ;;  %v4975_v47 = vadd.f32 1.0, %v12916_v44  ;;  %vm4606_vm13 = vcmp.lt.f32.partialorder %v4605_v17, 0.0004427343 }
0x1213   :  { %12919 = vlog2.f32 %v4993_v50  ;;  %v4978_v32 = vmul.f32 -0.5, %v12916_v44  ;;  %v4997_v4 = vadd.f32 1.0, %v4996_v38  ;;  %v4981_v14 = vand.u32 2147483647, %v12916_v44 }
0x1214   :  { %v4604_v57 = vmul.f32 %v12912_v41, %v4603_v34  ;;  %12921 = vlog2.f32 %v4975_v47  ;;  %vm5000_vm15 = vcmp.lt.f32.partialorder %v4999_v61, 0.0004427343  ;;  %v4929_v41 = vmax.f32 %v13985_v15, 0.0 }
0x1215   :  { %v4979_v6 = vadd.f32 1.0, %v4978_v32  ;;  %v4998_v5 = vmul.f32 %v12914_v51, %v4997_v4  ;;  %vm4982_vm1 = vcmp.lt.f32.partialorder %v4981_v14, 0.0004427343  ;;  %v4927_v8 = vmax.f32 %v13987_v7, 0.0 }
0x1217   :  { %v4980_v21 = vmul.f32 %v12916_v44, %v4979_v6 }
0x1218   :  { %v12918_v52 = vpop.eup %12917 }
0x1219   :  { %v4601_v3 = vmul.f32 0.6931472, %v12918_v52  ;;  %v12920_v45 = vpop.eup %12919 }
0x121a   :  { %v12922_v58 = vpop.eup %12921  ;;  %v4995_v18 = vmul.f32 0.6931472, %v12920_v45 }
0x121b   :  { %v4607_v19 = vsel %vm4606_vm13, %v4604_v57, %v4601_v3  ;;  %v4977_v48 = vmul.f32 0.6931472, %v12922_v58  ;;  %v4628_v3 = vld [vmem:[%s15119_s14 + $0x11] sm:$0x1] }
0x121c   :  { %v4608_v29 = vadd.f32 %v4607_v19, %v4594_v16  ;;  %v5001_v59 = vsel %vm5000_vm15, %v4998_v5, %v4995_v18  ;;  %v14005_v5 = vadd.f32 %v13923_v27, %v13803_v22 }
0x121d   :  { %v4983_v56 = vsel %vm4982_vm1, %v4980_v21, %v4977_v48  ;;  %v5041_v50 = vadd.f32 %v5001_v59, %v4929_v41  ;;  %v4723_v41 = vmul.f32 0.0, %v4715_v43 }
0x121e   :  { %v10512_v26 = vadd.f32 -0.6931472, %v4608_v29  ;;  %v5039_v34 = vadd.f32 %v4983_v56, %v4927_v8  ;;  %15247 = vst [vmem:[#allocation20_spill] sm:$0xff] %v14005_v5  ;;  %v4724_v56 = vmul.f32 0.0, %v4716_v12 }
0x121f   :  { %v10616_v47 = vadd.f32 -0.6931472, %v5041_v50  ;;  %v4748_v12 = vadd.f32 %v13955_v10, %v4723_v41 }
0x1220   :  { %v4627_v60 = vpack.c.bf16 %v10512_v26, %v10512_v26  ;;  %v10614_v17 = vadd.f32 -0.6931472, %v5039_v34  ;;  %v4747_v8 = vadd.f32 %v4731_v62, %v4724_v56 }
0x1222   :  { %4685 = vmatmul.bf16.vlgmr.msrb.gmra.mxu1 %v4627_v60  ;;  %v5114_v52 = vpack.c.bf16 %v10616_v47, %v10614_v17  ;;  %v4771_v17 = vadd.f32 %v4753_v1, %v4748_v12 }
0x1232   :  { %5240 = vmatmul.bf16.vlgmr.msra.gmra.mxu1 %v5114_v52 }
0x129f   :  { %v4686_v51 = vpop.f32.mrf.mxu1 }
0x12a0   :  { %v4687_v57 = vadd.f32 %v4686_v51, %v4628_v3 }
0x12a2   :  { %v4691_v44 = vand.u32 2147483647, %v4687_v57  ;;  %v4690_v61 = vmax.f32 %v4687_v57, 0.0 }
0x12a4   :  { %v4692_v16 = vsub.f32 0.0, %v4691_v44 }
0x12a6   :  { %v4693_v38 = vmul.f32 1.442695, %v4692_v16 }
0x12a7   :  { %v4688_v19 = vpop.f32.mrf.mxu1 }
0x12a8   :  { %12923 = vpow2.f32 %v4693_v38 }
0x12ae   :  { %v12924_v15 = vpop.eup %12923 }
0x12af   :  { %v4695_v29 = vadd.f32 1.0, %v12924_v15  ;;  %v4698_v7 = vmul.f32 -0.5, %v12924_v15  ;;  %v4701_v45 = vand.u32 2147483647, %v12924_v15 }
0x12b1   :  { %12925 = vlog2.f32 %v4695_v29  ;;  %v4699_v32 = vadd.f32 1.0, %v4698_v7  ;;  %vm4702_vm3 = vcmp.lt.f32.partialorder %v4701_v45, 0.0004427343 }
0x12b3   :  { %v4700_v58 = vmul.f32 %v12924_v15, %v4699_v32 }
0x12b7   :  { %v12926_v26 = vpop.eup %12925 }
0x12b8   :  { %v4697_v4 = vmul.f32 0.6931472, %v12926_v26 }
0x12ba   :  { %v4703_v60 = vsel %vm4702_vm3, %v4700_v58, %v4697_v4 }
0x12bb   :  { %v4704_v6 = vadd.f32 %v4703_v60, %v4690_v61 }
0x12bd   :  { %v10545_v18 = vadd.f32 -0.6931472, %v4704_v6 }
0x12bf   :  { %v14000_v14 = vadd.f32 %v10545_v18, %v13798_v24  ;;  %v4746_v24 = vadd.f32 %v4730_v20, %v4723_v41  ;;  %v4749_v20 = vadd.f32 %v13972_v9, %v4724_v56 }
0x12c1   :  { %15246 = vst [vmem:[#allocation19_spill] sm:$0xff] %v14000_v14  ;;  %v4710_v48 = vperm.slane %v14000_v14, 0  ;;  %v4769_v22 = vadd.f32 %v13963_v39, %v4746_v24  ;;  %v12524_v14 = vld [vmem:[#allocation10 + $0x16c] sm:$0xf] }
0x12c3   :  { %v4711_v21 = vmul.f32 %v13431_v2, %v4710_v48  ;;  %v4770_v2 = vadd.f32 %v13980_v46, %v4747_v8 }
0x12c5   :  { %v4791_v59 = vpack.c.bf16 %v4711_v21, %v14005_v5  ;;  %v11372_v5 = vld [vmem:[#allocation10 + $0x28] sm:$0xf] }
0x12c7   :  { %4885 = vmatmul.bf16.gmra.mxu2 %v4791_v59  ;;  %4904 = vmatmul.bf16.gmra.mxu3 %v4791_v59 }
0x134a   :  { %v4886_v27 = vpop.f32.mrf.mxu2  ;;  %v4905_v50 = vpop.f32.mrf.mxu3 }
0x134b   :  { %v4914_v34 = vmul.f32 %v4886_v27, %v13518_v23  ;;  %v4915_v47 = vmul.f32 %v4905_v50, %v13489_v33  ;;  %v4772_v33 = vadd.f32 %v4754_v42, %v4749_v20 }
0x134d   :  { %v14021_v43 = vadd.f32 %v4914_v34, %v4769_v22  ;;  %v14023_v54 = vadd.f32 %v4915_v47, %v4770_v2 }
0x134f   :  { %v4938_v11 = vand.u32 2147483647, %v14021_v43  ;;  %v4939_v39 = vand.u32 2147483647, %v14023_v54 }
0x1351   :  { %v4946_v62 = vsub.f32 0.0, %v4938_v11  ;;  %v4947_v46 = vsub.f32 0.0, %v4939_v39  ;;  %v4930_v39 = vmax.f32 %v14021_v43, 0.0 }
0x1352   :  { %v4888_v23 = vpop.f32.mrf.mxu2  ;;  %v4907_v52 = vpop.f32.mrf.mxu3 }
0x1353   :  { %v4958_v3 = vmul.f32 1.442695, %v4946_v62  ;;  %v4960_v51 = vmul.f32 1.442695, %v4947_v46  ;;  %v4916_v10 = vmul.f32 %v4888_v23, %v13553_v55  ;;  %v4917_v9 = vmul.f32 %v13473_v25, %v4907_v52 }
0x1355   :  { %12927 = vpow2.f32 %v4958_v3  ;;  %v4924_v57 = vadd.f32 %v4916_v10, %v4771_v17  ;;  %v4925_v44 = vadd.f32 %v4917_v9, %v4772_v33  ;;  %v4931_v17 = vmax.f32 %v14023_v54, 0.0 }
0x1356   :  { %12929 = vpow2.f32 %v4960_v51 }
0x1357   :  { %v4940_v16 = vand.u32 2147483647, %v4924_v57  ;;  %v4941_v38 = vand.u32 2147483647, %v4925_v44  ;;  %v4932_v33 = vmax.f32 %v4924_v57, 0.0  ;;  %v4933_v9 = vmax.f32 %v4925_v44, 0.0  ;;  %v5222_v57 = vpop.f32.mrf.mxu0 }
0x1358   :  { %v12708_v44 = vld [vmem:[%s15115_s10 + $0x6] ss:$0 sm:$0xff] }
0x1359   :  { %v4948_v19 = vsub.f32 0.0, %v4940_v16  ;;  %v4949_v15 = vsub.f32 0.0, %v4941_v38 }
0x135b   :  { %v12928_v1 = vpop.eup %12927  ;;  %v4962_v29 = vmul.f32 1.442695, %v4948_v19  ;;  %v4964_v30 = vmul.f32 1.442695, %v4949_v15 }
0x135c   :  { %v12930_v42 = vpop.eup %12929  ;;  %v5002_v7 = vadd.f32 1.0, %v12928_v1  ;;  %v5005_v55 = vmul.f32 -0.5, %v12928_v1  ;;  %v5008_v48 = vand.u32 2147483647, %v12928_v1 }
0x135d   :  { %12931 = vpow2.f32 %v4962_v29  ;;  %v5011_v32 = vadd.f32 1.0, %v12930_v42  ;;  %v5014_v25 = vmul.f32 -0.5, %v12930_v42  ;;  %v5017_v56 = vand.u32 2147483647, %v12930_v42 }
0x135e   :  { %12933 = vpow2.f32 %v4964_v30  ;;  %v5006_v61 = vadd.f32 1.0, %v5005_v55  ;;  %vm14035_vm4 = vcmp.lt.f32.partialorder %v5008_v48, 0.0004427343  ;;  %v5058_v55 = vmul.f32 0.0, %v12708_v44 }
0x135f   :  { %12935 = vlog2.f32 %v5002_v7  ;;  %v5015_v21 = vadd.f32 1.0, %v5014_v25  ;;  %vm14041_vm5 = vcmp.lt.f32.partialorder %v5017_v56, 0.0004427343  ;;  %v12709_v25 = vld [vmem:[%s15115_s10 + $0x7] ss:$0 sm:$0xff] }
0x1360   :  { %12937 = vlog2.f32 %v5011_v32  ;;  %v5007_v8 = vmul.f32 %v12928_v1, %v5006_v61  ;;  %v5241_v32 = vpop.f32.mrf.mxu1 }
0x1361   :  { %v5016_v50 = vmul.f32 %v12930_v42, %v5015_v21 }
0x1363   :  { %v12932_v45 = vpop.eup %12931 }
0x1364   :  { %v12934_v26 = vpop.eup %12933  ;;  %v5020_v4 = vadd.f32 1.0, %v12932_v45  ;;  %v5023_v60 = vmul.f32 -0.5, %v12932_v45  ;;  %v5026_v27 = vand.u32 2147483647, %v12932_v45 }
0x1365   :  { %v12936_v58 = vpop.eup %12935  ;;  %v5029_v6 = vadd.f32 1.0, %v12934_v26  ;;  %v5032_v59 = vmul.f32 -0.5, %v12934_v26  ;;  %v5035_v20 = vand.u32 2147483647, %v12934_v26 }
0x1366   :  { %v12938_v18 = vpop.eup %12937  ;;  %12939 = vlog2.f32 %v5020_v4  ;;  %v5004_v41 = vmul.f32 0.6931472, %v12936_v58  ;;  %v5024_v22 = vadd.f32 1.0, %v5023_v60  ;;  %vm5027_vm6 = vcmp.lt.f32.partialorder %v5026_v27, 0.0004427343 }
0x1367   :  { %12941 = vlog2.f32 %v5029_v6  ;;  %v5013_v24 = vmul.f32 0.6931472, %v12938_v18  ;;  %v5033_v34 = vadd.f32 1.0, %v5032_v59  ;;  %vm5036_vm7 = vcmp.lt.f32.partialorder %v5035_v20, 0.0004427343 }
0x1368   :  { %v5010_v47 = vsel %vm14035_vm4, %v5007_v8, %v5004_v41  ;;  %v5025_v52 = vmul.f32 %v12932_v45, %v5024_v22  ;;  %v12710_v45 = vld [vmem:[%s15115_s10 + $0x8] ss:$0 sm:$0xff]  ;;  %v5243_v4 = vpop.f32.mrf.mxu1  ;;  %v5068_v58 = vadd.f32 %v12709_v25, %v5058_v55  ;;  %v5062_v6 = vmul.f32 0.0, %v12709_v25  ;;  %v12382_v25 = vld [vmem:[#allocation6 + $0x2f8] sm:$0xff] }
0x1369   :  { %v5019_v62 = vsel %vm14041_vm5, %v5016_v50, %v5013_v24  ;;  %v5042_v3 = vadd.f32 %v5010_v47, %v4930_v39  ;;  %v5034_v10 = vmul.f32 %v12934_v26, %v5033_v34  ;;  %v5224_v26 = vpop.f32.mrf.mxu0  ;;  %v5072_v61 = vmul.f32 0.0, %v12710_v45 }
0x136a   :  { %v5043_v38 = vadd.f32 %v5019_v62, %v4931_v17  ;;  %v5069_v59 = vadd.f32 %v5062_v6, %v5058_v55  ;;  %v5066_v8 = vadd.f32 %v12708_v44, %v5062_v6  ;;  %v12374_v55 = vld [vmem:[#allocation6 + $0x2b8] sm:$0xff] }
0x136b   :  { %v10617_v1 = vadd.f32 -0.6931472, %v5042_v3  ;;  %v5078_v60 = vadd.f32 %v5072_v61, %v5068_v58 }
0x136c   :  { %v12940_v11 = vpop.eup %12939  ;;  %v10618_v30 = vadd.f32 -0.6931472, %v5043_v38  ;;  %v5079_v24 = vadd.f32 %v12710_v45, %v5069_v59  ;;  %v5076_v34 = vadd.f32 %v5072_v61, %v5066_v8  ;;  %v12373_v61 = vld [vmem:[#allocation6 + $0x2b0] sm:$0xff]  ;;  %v12380_v59 = vld [vmem:[#allocation6 + $0x2e8] sm:$0xff]  ;;  %v12371_v8 = vld [vmem:[#allocation6 + $0x2a0] sm:$0xff] }
0x136d   :  { %v12942_v46 = vpop.eup %12941  ;;  %v5022_v23 = vmul.f32 0.6931472, %v12940_v11 }
0x136e   :  { %v5031_v51 = vmul.f32 0.6931472, %v12942_v46  ;;  %v5225_v20 = vadd.f32 %v5224_v26, %v5076_v34  ;;  %v5223_v11 = vadd.f32 %v5222_v57, %v5076_v34 }
0x136f   :  { %v5028_v16 = vsel %vm5027_vm6, %v5025_v52, %v5022_v23 }
0x1370   :  { %v5044_v19 = vadd.f32 %v5028_v16, %v4932_v33  ;;  %v5037_v15 = vsel %vm5036_vm7, %v5034_v10, %v5031_v51  ;;  %v14060_v39 = vadd.f32 %v5243_v4, %v5225_v20  ;;  %v14063_v46 = vadd.f32 %v5241_v32, %v5223_v11  ;;  %v12378_v20 = vld [vmem:[#allocation6 + $0x2d8] sm:$0xff] }
0x1371   :  { %v5045_v43 = vadd.f32 %v5037_v15, %v4933_v9 }
0x1372   :  { %v10619_v29 = vadd.f32 -0.6931472, %v5044_v19  ;;  %v5256_v33 = vand.u32 2147483647, %v14060_v39  ;;  %v5255_v51 = vand.u32 2147483647, %v14063_v46 }
0x1373   :  { %v10620_v42 = vadd.f32 -0.6931472, %v5045_v43 }
0x1374   :  { %v5115_v7 = vpack.c.bf16 %v10619_v29, %v10617_v1  ;;  %v5260_v10 = vsub.f32 0.0, %v5256_v33  ;;  %v5259_v38 = vsub.f32 0.0, %v5255_v51 }
0x1375   :  { %v5116_v54 = vpack.c.bf16 %v10620_v42, %v10618_v30 }
0x1376   :  { %5226 = vmatmul.bf16.gmra.mxu0 %v5115_v7  ;;  %v5265_v43 = vmul.f32 1.442695, %v5260_v10  ;;  %v5263_v30 = vmul.f32 1.442695, %v5259_v38 }
0x1377   :  { %5245 = vmatmul.bf16.gmra.mxu1 %v5116_v54 }
0x13f3   :  { %v5227_v18 = vpop.f32.mrf.mxu0 }
0x13f4   :  { %v5228_v48 = vadd.f32 %v5227_v18, %v5078_v60  ;;  %v5246_v21 = vpop.f32.mrf.mxu1  ;;  %v12381_v60 = vld [vmem:[#allocation6 + $0x2f0] sm:$0xff] }
0x13f6   :  { %v5247_v41 = vadd.f32 %v5246_v21, %v5228_v48  ;;  %v12372_v21 = vld [vmem:[#allocation6 + $0x2a8] sm:$0xff] }
0x13f8   :  { %v5257_v56 = vand.u32 2147483647, %v5247_v41  ;;  %v5253_v42 = vmax.f32 %v5247_v41, 0.0 }
0x13fa   :  { %v5261_v22 = vsub.f32 0.0, %v5257_v56 }
0x13fb   :  { %v5229_v2 = vpop.f32.mrf.mxu0 }
0x13fc   :  { %v5267_v27 = vmul.f32 1.442695, %v5261_v22  ;;  %v5230_v50 = vadd.f32 %v5229_v2, %v5079_v24  ;;  %v5248_v47 = vpop.f32.mrf.mxu1  ;;  %v12379_v22 = vld [vmem:[#allocation6 + $0x2e0] sm:$0xff] }
0x13fe   :  { %12943 = vpow2.f32 %v5267_v27  ;;  %v14058_v12 = vadd.f32 %v5248_v47, %v5230_v50  ;;  %v12370_v47 = vld [vmem:[#allocation6 + $0x298] sm:$0xff] }
0x1400   :  { %v5258_v62 = vand.u32 2147483647, %v14058_v12 }
0x1402   :  { %v5262_v52 = vsub.f32 0.0, %v5258_v62 }
0x1404   :  { %v12944_v17 = vpop.eup %12943  ;;  %v5269_v9 = vmul.f32 1.442695, %v5262_v52 }
0x1405   :  { %v5289_v23 = vadd.f32 1.0, %v12944_v17  ;;  %v5292_v3 = vmul.f32 -0.5, %v12944_v17  ;;  %v5295_v19 = vand.u32 2147483647, %v12944_v17 }
0x1407   :  { %12945 = vlog2.f32 %v5289_v23  ;;  %v5293_v16 = vadd.f32 1.0, %v5292_v3  ;;  %vm5296_vm8 = vcmp.lt.f32.partialorder %v5295_v19, 0.0004427343  ;;  %v5254_v3 = vmax.f32 %v14058_v12, 0.0 }
0x1408   :  { %12947 = vpow2.f32 %v5269_v9  ;;  %v12369_v9 = vld [vmem:[#allocation6 + $0x290] sm:$0xff]  ;;  %v5251_v12 = vmax.f32 %v14063_v46, 0.0 }
0x1409   :  { %v5294_v29 = vmul.f32 %v12944_v17, %v5293_v16  ;;  %12949 = vpow2.f32 %v5265_v43  ;;  %v12377_v16 = vld [vmem:[#allocation6 + $0x2d0] sm:$0xff]  ;;  %v5252_v43 = vmax.f32 %v14060_v39, 0.0 }
0x140a   :  { %12951 = vpow2.f32 %v5263_v30  ;;  %v12376_v30 = vld [vmem:[#allocation6 + $0x2c8] sm:$0xff]  ;;  %v12405_v46 = vld [vmem:[#allocation7 + $0x330] sm:$0xff] }
0x140d   :  { %v12946_v15 = vpop.eup %12945 }
0x140e   :  { %v5291_v1 = vmul.f32 0.6931472, %v12946_v15  ;;  %v12948_v57 = vpop.eup %12947 }
0x140f   :  { %v5298_v45 = vadd.f32 1.0, %v12948_v57  ;;  %v12950_v26 = vpop.eup %12949  ;;  %v5301_v48 = vmul.f32 -0.5, %v12948_v57  ;;  %v5304_v2 = vand.u32 2147483647, %v12948_v57 }
0x1410   :  { %v5297_v7 = vsel %vm5296_vm8, %v5294_v29, %v5291_v1  ;;  %v12952_v58 = vpop.eup %12951  ;;  %v5280_v6 = vadd.f32 1.0, %v12950_v26  ;;  %v5283_v56 = vmul.f32 -0.5, %v12950_v26  ;;  %v5286_v62 = vand.u32 2147483647, %v12950_v26  ;;  %v12368_v29 = vld [vmem:[#allocation6 + $0x288] sm:$0xff] }
0x1411   :  { %v5309_v54 = vadd.f32 %v5297_v7, %v5253_v42  ;;  %12953 = vlog2.f32 %v5298_v45  ;;  %v5271_v18 = vadd.f32 1.0, %v12952_v58  ;;  %v5302_v24 = vadd.f32 1.0, %v5301_v48  ;;  %v12406_v45 = vld [vmem:[#allocation7 + $0x338] sm:$0xff]  ;;  %v12356_v48 = vld [vmem:[#allocation6 + $0x228] sm:$0xff] }
0x1412   :  { %12955 = vlog2.f32 %v5280_v6  ;;  %vm5305_vm9 = vcmp.lt.f32.partialorder %v5304_v2, 0.0004427343  ;;  %v5277_v52 = vand.u32 2147483647, %v12952_v58  ;;  %vm5287_vm10 = vcmp.lt.f32.partialorder %v5286_v62, 0.0004427343 }
0x1413   :  { %v10687_v32 = vadd.f32 -0.6931472, %v5309_v54  ;;  %12957 = vlog2.f32 %v5271_v18  ;;  %v5303_v34 = vmul.f32 %v12948_v57, %v5302_v24  ;;  %v12367_v57 = vld [vmem:[#allocation6 + $0x280] sm:$0xff]  ;;  %v12365_v6 = vld [vmem:[#allocation6 + $0x270] sm:$0xff]  ;;  %v12404_v18 = vld [vmem:[#allocation7 + $0x328] sm:$0xff] }
0x1414   :  { %vm5278_vm11 = vcmp.lt.f32.partialorder %v5277_v52, 0.0004427343  ;;  %v12402_v24 = vld [vmem:[#allocation7 + $0x318] sm:$0xff]  ;;  %v12401_v2 = vld [vmem:[#allocation7 + $0x310] sm:$0xff] }
0x1415   :  { %v14067_v44 = vpack.c.bf16 %v10687_v32, %v10687_v32  ;;  %v12375_v32 = vld [vmem:[#allocation6 + $0x2c0] sm:$0xff] }
0x1417   :  { %v5317_v4 = vsel %vm346_vm0, %v14067_v44, 0  ;;  %v12954_v41 = vpop.eup %12953 }
0x1418   :  { %5326 = vmatpush.bf16.msrb.mxu2 %v5317_v4  ;;  %5340 = vmatpush.bf16.msra.mxu3 %v5317_v4  ;;  %v5300_v27 = vmul.f32 0.6931472, %v12954_v41  ;;  %v12956_v50 = vpop.eup %12955  ;;  %v12366_v4 = vld [vmem:[#allocation6 + $0x278] sm:$0xff]  ;;  %v12355_v41 = vld [vmem:[#allocation6 + $0x220] sm:$0xff] }
0x1419   :  { %v12958_v11 = vpop.eup %12957  ;;  %v5282_v33 = vmul.f32 0.6931472, %v12956_v50  ;;  %5626 = vmatpush.bf16.msrb.mxu1 %v12366_v4  ;;  %v12353_v50 = vld [vmem:[#allocation6 + $0x210] sm:$0xff] }
0x141a   :  { %v5306_v23 = vsel %vm5305_vm9, %v5303_v34, %v5300_v27  ;;  %v5273_v51 = vmul.f32 0.6931472, %v12958_v11  ;;  %v12399_v27 = vld [vmem:[#allocation7 + $0x300] sm:$0xff]  ;;  %v12352_v34 = vld [vmem:[#allocation6 + $0x208] sm:$0xff] }
0x141b   :  { %10689 = vmatmul.msk.bf16.vlgmr.msrb.gmra.mxu2 %vm342_vm2, %v13612_v36  ;;  %10690 = vmatmul.msk.bf16.vlgmr.msra.gmra.mxu3 %vm342_vm2, %v13614_v37  ;;  %v5274_v36 = vmul.f32 -0.5, %v12952_v58  ;;  %v5284_v37 = vadd.f32 1.0, %v5283_v56  ;;  %v5310_v38 = vadd.f32 %v5306_v23, %v5254_v3  ;;  %v12363_v56 = vld [vmem:[#allocation6 + $0x260] sm:$0xff] }
0x141c   :  { %5640 = vmatpush.bf16.msra.mxu2 %v12374_v55  ;;  %5654 = vmatpush.bf16.msrb.mxu3 %v12382_v25  ;;  %v12359_v11 = vld [vmem:[#allocation6 + $0x240] sm:$0xff] }
0x141d   :  { %v5275_v17 = vadd.f32 1.0, %v5274_v36  ;;  %v5285_v10 = vmul.f32 %v12950_v26, %v5284_v37  ;;  %v14078_v7 = vadd.f32 -0.6931472, %v5310_v38  ;;  %v12358_v26 = vld [vmem:[#allocation6 + $0x238] sm:$0xff]  ;;  %5627 = vmatpush.bf16.msrb.mxu1 %v12365_v6  ;;  %v12400_v36 = vld [vmem:[#allocation7 + $0x308] sm:$0xff]  ;;  %v12361_v37 = vld [vmem:[#allocation6 + $0x250] sm:$0xff] }
0x141e   :  { %5612 = vmatpush.bf16.msrb.mxu0 %v12358_v26  ;;  %v12389_v38 = vld [vmem:[#allocation9 + $0x330] sm:$0xff]  ;;  %v12384_v26 = vld [vmem:[#allocation9 + $0x308] sm:$0xff]  ;;  %v12383_v6 = vld [vmem:[#allocation9 + $0x300] sm:$0xff] }
0x141f   :  { %v5276_v19 = vmul.f32 %v12952_v58, %v5275_v17  ;;  %v5288_v15 = vsel %vm5287_vm10, %v5285_v10, %v5282_v33  ;;  %v5347_v25 = vperm.slane %v14078_v7, 0 }
0x1420   :  { %5641 = vmatpush.bf16.msra.mxu2 %v12373_v61  ;;  %5655 = vmatpush.bf16.msrb.mxu3 %v12381_v60  ;;  %v5308_v42 = vadd.f32 %v5288_v15, %v5252_v43  ;;  %v12357_v60 = vld [vmem:[#allocation6 + $0x230] sm:$0xff]  ;;  %v12387_v43 = vld [vmem:[#allocation9 + $0x320] sm:$0xff] }
0x1421   :  { %v5279_v1 = vsel %vm5278_vm11, %v5276_v19, %v5273_v51  ;;  %v14081_v61 = vpack.c.bf16 %v5347_v25, %v5347_v25  ;;  %v12388_v19 = vld [vmem:[#allocation9 + $0x328] sm:$0xff]  ;;  %v12712_v15 = vld [vmem:[%s15119_s14 + $0x12] ss:$0 sm:$0xff] }
0x1422   :  { %v5307_v54 = vadd.f32 %v5279_v1, %v5251_v12  ;;  %v10686_v55 = vadd.f32 -0.6931472, %v5308_v42  ;;  %5613 = vmatpush.bf16.msrb.mxu0 %v12357_v60  ;;  %v12386_v12 = vld [vmem:[#allocation9 + $0x318] sm:$0xff] }
0x1424   :  { %5642 = vmatpush.bf16.msra.mxu2 %v12372_v21  ;;  %5656 = vmatpush.bf16.msrb.mxu3 %v12380_v59  ;;  %v10685_v39 = vadd.f32 -0.6931472, %v5307_v54  ;;  %v12364_v21 = vld [vmem:[#allocation6 + $0x268] sm:$0xff]  ;;  %v12403_v59 = vld [vmem:[#allocation7 + $0x320] sm:$0xff] }
0x1425   :  { %5628 = vmatpush.bf16.msrb.mxu1 %v12364_v21 }
0x1426   :  { %v5416_v58 = vpack.c.bf16 %v10686_v55, %v10685_v39  ;;  %5614 = vmatpush.bf16.msrb.mxu0 %v12356_v48 }
0x1428   :  { %5643 = vmatpush.bf16.msra.mxu2 %v12371_v8  ;;  %5657 = vmatpush.bf16.msrb.mxu3 %v12379_v22  ;;  %v12354_v8 = vld [vmem:[#allocation6 + $0x218] sm:$0xff] }
0x1429   :  { %5629 = vmatpush.bf16.msrb.mxu1 %v12363_v56  ;;  %v12362_v22 = vld [vmem:[#allocation6 + $0x258] sm:$0xff] }
0x142a   :  { %5615 = vmatpush.bf16.msrb.mxu0 %v12355_v41 }
0x142c   :  { %5644 = vmatpush.bf16.msra.mxu2 %v12370_v47  ;;  %5658 = vmatpush.bf16.msrb.mxu3 %v12378_v20  ;;  %v12360_v47 = vld [vmem:[#allocation6 + $0x248] sm:$0xff]  ;;  %v12351_v20 = vld [vmem:[#allocation6 + $0x200] sm:$0xff] }
0x142d   :  { %5630 = vmatpush.bf16.msrb.mxu1 %v12362_v22 }
0x142e   :  { %5616 = vmatpush.bf16.msrb.mxu0 %v12354_v8 }
0x1430   :  { %5645 = vmatpush.bf16.msra.mxu2 %v12369_v9  ;;  %5659 = vmatpush.bf16.msrb.mxu3 %v12377_v16  ;;  %v12390_v16 = vld [vmem:[#allocation9 + $0x338] sm:$0xff] }
0x1431   :  { %5631 = vmatpush.bf16.msrb.mxu1 %v12361_v37 }
0x1432   :  { %5617 = vmatpush.bf16.msrb.mxu0 %v12353_v50 }
0x1434   :  { %5646 = vmatpush.bf16.msra.mxu2 %v12368_v29  ;;  %5660 = vmatpush.bf16.msrb.mxu3 %v12376_v30 }
0x1435   :  { %5632 = vmatpush.bf16.msrb.mxu1 %v12360_v47 }
0x1436   :  { %5618 = vmatpush.bf16.msrb.mxu0 %v12352_v34 }
0x1438   :  { %5647 = vmatpush.bf16.msra.mxu2 %v12367_v57  ;;  %5661 = vmatpush.bf16.msrb.mxu3 %v12375_v32  ;;  %v12385_v32 = vld [vmem:[#allocation9 + $0x310] sm:$0xff] }
0x1439   :  { %5633 = vmatpush.bf16.msrb.mxu1 %v12359_v11 }
0x143a   :  { %5619 = vmatpush.bf16.msrb.mxu0 %v12351_v20 }
0x143b   :  { %5648 = vmatmul.bf16.vlgmr.msra.gmra.mxu2 %v5416_v58  ;;  %5662 = vmatmul.bf16.vlgmr.msrb.gmra.mxu3 %v14081_v61 }
0x143c   :  { %6139 = vmatpush.bf16.msra.mxu3 %v12406_v45 }
0x143e   :  { %5768 = vmatpush.bf16.msra.mxu0 %v12390_v16 }
0x1440   :  { %6140 = vmatpush.bf16.msra.mxu3 %v12405_v46 }
0x1442   :  { %5769 = vmatpush.bf16.msra.mxu0 %v12389_v38 }
0x1444   :  { %6141 = vmatpush.bf16.msra.mxu3 %v12404_v18 }
0x1446   :  { %5770 = vmatpush.bf16.msra.mxu0 %v12388_v19 }
0x1448   :  { %6142 = vmatpush.bf16.msra.mxu3 %v12403_v59 }
0x144a   :  { %5771 = vmatpush.bf16.msra.mxu0 %v12387_v43  ;;  %v12398_v43 = vld [vmem:[#allocation9 + $0x378] sm:$0xff] }
0x144b   :  { %5882 = vmatpush.bf16.msra.mxu1 %v12398_v43 }
0x144c   :  { %6143 = vmatpush.bf16.msra.mxu3 %v12402_v24 }
0x144e   :  { %5772 = vmatpush.bf16.msra.mxu0 %v12386_v12  ;;  %v12394_v12 = vld [vmem:[#allocation9 + $0x358] sm:$0xff] }
0x1450   :  { %6144 = vmatpush.bf16.msra.mxu3 %v12401_v2 }
0x1452   :  { %5773 = vmatpush.bf16.msra.mxu0 %v12385_v32 }
0x1454   :  { %6145 = vmatpush.bf16.msra.mxu3 %v12400_v36 }
0x1456   :  { %5774 = vmatpush.bf16.msra.mxu0 %v12384_v26  ;;  %v12391_v26 = vld [vmem:[#allocation9 + $0x340] sm:$0xff] }
0x1458   :  { %6146 = vmatpush.bf16.msra.mxu3 %v12399_v27 }
0x145a   :  { %5775 = vmatpush.bf16.msra.mxu0 %v12383_v6 }
0x145b   :  { %6147 = vmatmul.bf16.vlgmr.msra.gmra.mxu3 %v14067_v44 }
0x149e   :  { %v5328_v62 = vpop.f32.mrf.mxu2  ;;  %v5342_v17 = vpop.f32.mrf.mxu3 }
0x14a6   :  { %v5330_v33 = vpop.f32.mrf.mxu2  ;;  %v5344_v23 = vpop.f32.mrf.mxu3 }
0x14a7   :  { %v5414_v52 = vpack.c.bf16 %v5330_v33, %v5328_v62  ;;  %v5415_v3 = vpack.c.bf16 %v5344_v23, %v5342_v17 }
0x14a9   :  { %5620 = vmatmul.bf16.vlgmr.msrb.gmra.mxu0 %v5414_v52  ;;  %5634 = vmatmul.bf16.vlgmr.msrb.gmra.mxu1 %v5415_v3 }
0x14be   :  { %v5663_v44 = vpop.f32.mrf.mxu3  ;;  %v5649_v42 = vpop.f32.mrf.mxu2 }
0x14c6   :  { %v5665_v51 = vpop.f32.mrf.mxu3  ;;  %v5651_v60 = vpop.f32.mrf.mxu2 }
0x14de   :  { %v14085_v10 = vpop.f32.mrf.mxu3 }
0x14e6   :  { %v6150_v9 = vpop.f32.mrf.mxu3 }
0x1526   :  { %v5621_v1 = vpop.f32.mrf.mxu0  ;;  %v5635_v29 = vpop.f32.mrf.mxu1 }
0x1527   :  { %v5622_v30 = vadd.f32 %v12712_v15, %v5621_v1  ;;  %v12397_v1 = vld [vmem:[#allocation9 + $0x370] sm:$0xff] }
0x1528   :  { %5883 = vmatpush.bf16.msra.mxu1 %v12397_v1 }
0x1529   :  { %v5636_v54 = vadd.f32 %v5635_v29, %v5622_v30  ;;  %v12396_v29 = vld [vmem:[#allocation9 + $0x368] sm:$0xff]  ;;  %v12395_v30 = vld [vmem:[#allocation9 + $0x360] sm:$0xff] }
0x152b   :  { %v5650_v57 = vadd.f32 %v5649_v42, %v5636_v54  ;;  %v12713_v42 = vld [vmem:[%s15119_s14 + $0x13] ss:$0 sm:$0xff] }
0x152c   :  { %5884 = vmatpush.bf16.msra.mxu1 %v12396_v29  ;;  %v12393_v54 = vld [vmem:[#allocation9 + $0x350] sm:$0xff] }
0x152d   :  { %v5664_v55 = vadd.f32 %v5663_v44, %v5650_v57 }
0x152e   :  { %v5623_v25 = vpop.f32.mrf.mxu0  ;;  %v5637_v4 = vpop.f32.mrf.mxu1 }
0x152f   :  { %v5670_v45 = vand.u32 2147483647, %v5664_v55  ;;  %v5624_v39 = vadd.f32 %v12712_v15, %v5623_v25  ;;  %v5668_v23 = vmax.f32 %v5664_v55, 0.0  ;;  %v12392_v25 = vld [vmem:[#allocation9 + $0x348] sm:$0xff] }
0x1530   :  { %5885 = vmatpush.bf16.msra.mxu1 %v12395_v30 }
0x1531   :  { %v5672_v58 = vsub.f32 0.0, %v5670_v45  ;;  %v5638_v46 = vadd.f32 %v5637_v4, %v5624_v39 }
0x1533   :  { %v5674_v18 = vmul.f32 1.442695, %v5672_v58  ;;  %v5652_v48 = vadd.f32 %v5651_v60, %v5638_v46 }
0x1534   :  { %5886 = vmatpush.bf16.msra.mxu1 %v12394_v12 }
0x1535   :  { %12959 = vpow2.f32 %v5674_v18  ;;  %v5666_v21 = vadd.f32 %v5665_v51, %v5652_v48 }
0x1537   :  { %v5671_v59 = vand.u32 2147483647, %v5666_v21  ;;  %v5669_v51 = vmax.f32 %v5666_v21, 0.0 }
0x1538   :  { %5887 = vmatpush.bf16.msra.mxu1 %v12393_v54 }
0x1539   :  { %v5673_v41 = vsub.f32 0.0, %v5671_v59 }
0x153b   :  { %v12960_v56 = vpop.eup %12959  ;;  %v5676_v24 = vmul.f32 1.442695, %v5673_v41 }
0x153c   :  { %v5678_v8 = vadd.f32 1.0, %v12960_v56  ;;  %v5681_v22 = vmul.f32 -0.5, %v12960_v56  ;;  %v5684_v34 = vand.u32 2147483647, %v12960_v56  ;;  %5888 = vmatpush.bf16.msra.mxu1 %v12392_v25 }
0x153d   :  { %12961 = vpow2.f32 %v5676_v24 }
0x153e   :  { %12963 = vlog2.f32 %v5678_v8  ;;  %v5682_v50 = vadd.f32 1.0, %v5681_v22  ;;  %vm5685_vm12 = vcmp.lt.f32.partialorder %v5684_v34, 0.0004427343 }
0x1540   :  { %v5683_v20 = vmul.f32 %v12960_v56, %v5682_v50  ;;  %5889 = vmatpush.bf16.msra.mxu1 %v12391_v26 }
0x1543   :  { %v12962_v2 = vpop.eup %12961 }
0x1544   :  { %v12964_v36 = vpop.eup %12963  ;;  %v5687_v27 = vadd.f32 1.0, %v12962_v2  ;;  %v5690_v37 = vmul.f32 -0.5, %v12962_v2  ;;  %v5693_v62 = vand.u32 2147483647, %v12962_v2 }
0x1545   :  { %v5680_v47 = vmul.f32 0.6931472, %v12964_v36 }
0x1546   :  { %12965 = vlog2.f32 %v5687_v27  ;;  %v5691_v11 = vadd.f32 1.0, %v5690_v37  ;;  %vm5694_vm13 = vcmp.lt.f32.partialorder %v5693_v62, 0.0004427343 }
0x1547   :  { %v5686_v17 = vsel %vm5685_vm12, %v5683_v20, %v5680_v47 }
0x1548   :  { %v5692_v3 = vmul.f32 %v12962_v2, %v5691_v11  ;;  %v5696_v44 = vadd.f32 %v5686_v17, %v5668_v23 }
0x154a   :  { %v10819_v38 = vadd.f32 -0.6931472, %v5696_v44 }
0x154c   :  { %v12966_v33 = vpop.eup %12965 }
0x154d   :  { %v5689_v52 = vmul.f32 0.6931472, %v12966_v33 }
0x154f   :  { %v5695_v9 = vsel %vm5694_vm13, %v5692_v3, %v5689_v52 }
0x1550   :  { %v5697_v16 = vadd.f32 %v5695_v9, %v5669_v51  ;;  %v12714_v51 = vld [vmem:[%s15119_s14 + $0x14] ss:$0 sm:$0xff] }
0x1552   :  { %v10820_v19 = vadd.f32 -0.6931472, %v5697_v16 }
0x1554   :  { %v5717_v15 = vpack.c.bf16 %v10820_v19, %v10819_v38 }
0x1556   :  { %5776 = vmatmul.bf16.vlgmr.msra.gmra.mxu0 %v5717_v15 }
0x15d3   :  { %v5777_v57 = vpop.f32.mrf.mxu0 }
0x15d4   :  { %v5778_v32 = vadd.f32 %v12713_v42, %v5777_v57 }
0x15d6   :  { %v5784_v55 = vand.u32 2147483647, %v5778_v32  ;;  %v5782_v47 = vmax.f32 %v5778_v32, 0.0 }
0x15d8   :  { %v5786_v45 = vsub.f32 0.0, %v5784_v55 }
0x15da   :  { %v5788_v39 = vmul.f32 1.442695, %v5786_v45 }
0x15db   :  { %v5779_v4 = vpop.f32.mrf.mxu0 }
0x15dc   :  { %12967 = vpow2.f32 %v5788_v39  ;;  %v5780_v58 = vadd.f32 %v12713_v42, %v5779_v4 }
0x15de   :  { %v5785_v46 = vand.u32 2147483647, %v5780_v58  ;;  %v5783_v17 = vmax.f32 %v5780_v58, 0.0 }
0x15e0   :  { %v5787_v60 = vsub.f32 0.0, %v5785_v46 }
0x15e2   :  { %v12968_v6 = vpop.eup %12967  ;;  %v5790_v18 = vmul.f32 1.442695, %v5787_v60 }
0x15e3   :  { %v5792_v48 = vadd.f32 1.0, %v12968_v6  ;;  %v5795_v21 = vmul.f32 -0.5, %v12968_v6  ;;  %v5798_v22 = vand.u32 2147483647, %v12968_v6 }
0x15e4   :  { %12969 = vpow2.f32 %v5790_v18 }
0x15e5   :  { %12971 = vlog2.f32 %v5792_v48  ;;  %v5796_v24 = vadd.f32 1.0, %v5795_v21  ;;  %vm5799_vm15 = vcmp.lt.f32.partialorder %v5798_v22, 0.0004427343 }
0x15e7   :  { %v5797_v36 = vmul.f32 %v12968_v6, %v5796_v24 }
0x15ea   :  { %v12970_v59 = vpop.eup %12969 }
0x15eb   :  { %v12972_v41 = vpop.eup %12971  ;;  %v5801_v56 = vadd.f32 1.0, %v12970_v59  ;;  %v5804_v8 = vmul.f32 -0.5, %v12970_v59  ;;  %v5807_v50 = vand.u32 2147483647, %v12970_v59 }
0x15ec   :  { %v5794_v2 = vmul.f32 0.6931472, %v12972_v41 }
0x15ed   :  { %12973 = vlog2.f32 %v5801_v56  ;;  %v5805_v27 = vadd.f32 1.0, %v5804_v8  ;;  %vm5808_vm1 = vcmp.lt.f32.partialorder %v5807_v50, 0.0004427343  ;;  %v12414_v50 = vld [vmem:[#allocation7 + $0x378] sm:$0xff] }
0x15ee   :  { %v5800_v37 = vsel %vm5799_vm15, %v5797_v36, %v5794_v2  ;;  %v12422_v36 = vld [vmem:[#allocation7 + $0x3b8] sm:$0xff]  ;;  %6152 = vmatpush.bf16.msrb.mxu0 %v12414_v50  ;;  %v12436_v50 = vld [vmem:[#allocation9 + $0x3e8] sm:$0xff] }
0x15ef   :  { %v5806_v11 = vmul.f32 %v12970_v59, %v5805_v27  ;;  %v5810_v62 = vadd.f32 %v5800_v37, %v5782_v47  ;;  %v12421_v37 = vld [vmem:[#allocation7 + $0x3b0] sm:$0xff]  ;;  %v12420_v47 = vld [vmem:[#allocation7 + $0x3a8] sm:$0xff] }
0x15f1   :  { %v10853_v52 = vadd.f32 -0.6931472, %v5810_v62  ;;  %v12411_v62 = vld [vmem:[#allocation7 + $0x360] sm:$0xff] }
0x15f3   :  { %v12974_v34 = vpop.eup %12973 }
0x15f4   :  { %v5803_v20 = vmul.f32 0.6931472, %v12974_v34  ;;  %v12413_v34 = vld [vmem:[#allocation7 + $0x370] sm:$0xff] }
0x15f5   :  { %6153 = vmatpush.bf16.msrb.mxu0 %v12413_v34  ;;  %v12434_v34 = vld [vmem:[#allocation9 + $0x3d8] sm:$0xff] }
0x15f6   :  { %v5809_v33 = vsel %vm5808_vm1, %v5806_v11, %v5803_v20  ;;  %v12412_v20 = vld [vmem:[#allocation7 + $0x368] sm:$0xff]  ;;  %v12419_v11 = vld [vmem:[#allocation7 + $0x3a0] sm:$0xff] }
0x15f7   :  { %v5811_v23 = vadd.f32 %v5809_v33, %v5783_v17  ;;  %v12418_v17 = vld [vmem:[#allocation7 + $0x398] sm:$0xff] }
0x15f8   :  { %v12410_v33 = vld [vmem:[#allocation7 + $0x358] sm:$0xff] }
0x15f9   :  { %v10854_v3 = vadd.f32 -0.6931472, %v5811_v23  ;;  %6154 = vmatpush.bf16.msrb.mxu0 %v12412_v20  ;;  %v12417_v23 = vld [vmem:[#allocation7 + $0x390] sm:$0xff]  ;;  %v12432_v20 = vld [vmem:[#allocation9 + $0x3c8] sm:$0xff] }
0x15fb   :  { %v5831_v44 = vpack.c.bf16 %v10854_v3, %v10853_v52  ;;  %v12409_v52 = vld [vmem:[#allocation7 + $0x350] sm:$0xff]  ;;  %v12416_v3 = vld [vmem:[#allocation7 + $0x388] sm:$0xff] }
0x15fd   :  { %5890 = vmatmul.bf16.vlgmr.msra.gmra.mxu1 %v5831_v44  ;;  %6155 = vmatpush.bf16.msrb.mxu0 %v12411_v62  ;;  %v12415_v44 = vld [vmem:[#allocation7 + $0x380] sm:$0xff] }
0x15fe   :  { %v12431_v62 = vld [vmem:[#allocation9 + $0x3c0] sm:$0xff] }
0x1601   :  { %6156 = vmatpush.bf16.msrb.mxu0 %v12410_v33 }
0x1605   :  { %6157 = vmatpush.bf16.msrb.mxu0 %v12409_v52 }
0x167a   :  { %v5891_v9 = vpop.f32.mrf.mxu1 }
0x167b   :  { %v5892_v16 = vadd.f32 %v12714_v51, %v5891_v9 }
0x167d   :  { %v5898_v38 = vand.u32 2147483647, %v5892_v16  ;;  %v5896_v48 = vmax.f32 %v5892_v16, 0.0 }
0x167f   :  { %v5900_v19 = vsub.f32 0.0, %v5898_v38 }
0x1681   :  { %v5902_v15 = vmul.f32 1.442695, %v5900_v19 }
0x1682   :  { %v5893_v43 = vpop.f32.mrf.mxu1 }
0x1683   :  { %12975 = vpow2.f32 %v5902_v15  ;;  %v5894_v1 = vadd.f32 %v12714_v51, %v5893_v43  ;;  %v12407_v51 = vld [vmem:[#allocation7 + $0x340] sm:$0xff] }
0x1685   :  { %v5899_v29 = vand.u32 2147483647, %v5894_v1  ;;  %v5897_v56 = vmax.f32 %v5894_v1, 0.0  ;;  %v12430_v1 = vld [vmem:[#allocation9 + $0x3b8] sm:$0xff] }
0x1686   :  { %6262 = vmatpush.bf16.msrb.mxu1 %v12430_v1 }
0x1687   :  { %v5901_v30 = vsub.f32 0.0, %v5899_v29  ;;  %v12429_v29 = vld [vmem:[#allocation9 + $0x3b0] sm:$0xff] }
0x1689   :  { %v12976_v12 = vpop.eup %12975  ;;  %v5904_v42 = vmul.f32 1.442695, %v5901_v30  ;;  %v12428_v30 = vld [vmem:[#allocation9 + $0x3a8] sm:$0xff] }
0x168a   :  { %v5906_v54 = vadd.f32 1.0, %v12976_v12  ;;  %v5909_v57 = vmul.f32 -0.5, %v12976_v12  ;;  %v5912_v26 = vand.u32 2147483647, %v12976_v12  ;;  %6263 = vmatpush.bf16.msrb.mxu1 %v12429_v29 }
0x168b   :  { %12977 = vpow2.f32 %v5904_v42  ;;  %v12424_v42 = vld [vmem:[#allocation9 + $0x388] sm:$0xff] }
0x168c   :  { %12979 = vlog2.f32 %v5906_v54  ;;  %v5910_v45 = vadd.f32 1.0, %v5909_v57  ;;  %vm5913_vm3 = vcmp.lt.f32.partialorder %v5912_v26, 0.0004427343 }
0x168e   :  { %v5911_v58 = vmul.f32 %v12976_v12, %v5910_v45  ;;  %6264 = vmatpush.bf16.msrb.mxu1 %v12428_v30  ;;  %v12426_v12 = vld [vmem:[#allocation9 + $0x398] sm:$0xff] }
0x1691   :  { %v12978_v32 = vpop.eup %12977 }
0x1692   :  { %v12980_v55 = vpop.eup %12979  ;;  %v5915_v25 = vadd.f32 1.0, %v12978_v32  ;;  %v5918_v39 = vmul.f32 -0.5, %v12978_v32  ;;  %v5921_v60 = vand.u32 2147483647, %v12978_v32 }
0x1693   :  { %v5908_v4 = vmul.f32 0.6931472, %v12980_v55  ;;  %v12423_v55 = vld [vmem:[#allocation9 + $0x380] sm:$0xff] }
0x1694   :  { %12981 = vlog2.f32 %v5915_v25  ;;  %v5919_v46 = vadd.f32 1.0, %v5918_v39  ;;  %vm5922_vm4 = vcmp.lt.f32.partialorder %v5921_v60, 0.0004427343 }
0x1695   :  { %v5914_v6 = vsel %vm5913_vm3, %v5911_v58, %v5908_v4 }
0x1696   :  { %v5920_v59 = vmul.f32 %v12978_v32, %v5919_v46  ;;  %v5924_v41 = vadd.f32 %v5914_v6, %v5896_v48 }
0x1698   :  { %v14096_v22 = vadd.f32 -0.6931472, %v5924_v41 }
0x169a   :  { %v12982_v18 = vpop.eup %12981  ;;  %15252 = vst [vmem:[#allocation21_spill] sm:$0xff] %v14096_v22 }
0x169b   :  { %v5917_v21 = vmul.f32 0.6931472, %v12982_v18 }
0x169d   :  { %v5923_v24 = vsel %vm5922_vm4, %v5920_v59, %v5917_v21 }
0x169e   :  { %v5925_v8 = vadd.f32 %v5923_v24, %v5897_v56 }
0x16a0   :  { %v14098_v2 = vadd.f32 -0.6931472, %v5925_v8 }
0x16a2   :  { %15253 = vst [vmem:[#allocation22_spill] sm:$0xff] %v14098_v2  ;;  %v5928_v27 = vpack.c.bf16 %v14098_v2, %v14096_v22  ;;  %v11588_v2 = vld [vmem:[#allocation10 + $0x2e0] sm:$0xf]  ;;  %v12573_v22 = vld [vmem:[#allocation10 + $0x2ec] sm:$0xf0] }
0x16a4   :  { %5936 = vmatpush.bf16.msrb.mxu2 %v5928_v27 }
0x16a7   :  { %10889 = vmatmul.msk.bf16.vlgmr.msrb.gmra.mxu2 %vm190_vm14, %v13676_v31  ;;  %v12408_v31 = vld [vmem:[#allocation7 + $0x348] sm:$0xff] }
0x16a8   :  { %6165 = vmatpush.bf16.msra.mxu2 %v12422_v36  ;;  %6158 = vmatpush.bf16.msrb.mxu0 %v12408_v31  ;;  %v12438_v36 = vld [vmem:[#allocation9 + $0x3f8] sm:$0xff] }
0x16a9   :  { %6359 = vmatpush.bf16.msrb.mxu3 %v12438_v36  ;;  %v12454_v36 = vld [vmem:[#allocation7 + $0x438] sm:$0xff] }
0x16ac   :  { %6166 = vmatpush.bf16.msra.mxu2 %v12421_v37  ;;  %6159 = vmatpush.bf16.msrb.mxu0 %v12407_v51  ;;  %v12435_v37 = vld [vmem:[#allocation9 + $0x3e0] sm:$0xff] }
0x16b0   :  { %6167 = vmatpush.bf16.msra.mxu2 %v12420_v47  ;;  %v12433_v47 = vld [vmem:[#allocation9 + $0x3d0] sm:$0xff] }
0x16b4   :  { %6168 = vmatpush.bf16.msra.mxu2 %v12419_v11  ;;  %v12715_v11 = vld [vmem:[%s15119_s14 + $0x16] ss:$0 sm:$0xff] }
0x16b8   :  { %6169 = vmatpush.bf16.msra.mxu2 %v12418_v17 }
0x16bc   :  { %6170 = vmatpush.bf16.msra.mxu2 %v12417_v23 }
0x16c0   :  { %6171 = vmatpush.bf16.msra.mxu2 %v12416_v3 }
0x16c4   :  { %6172 = vmatpush.bf16.msra.mxu2 %v12415_v44 }
0x16c7   :  { %6173 = vmatmul.bf16.vlgmr.msra.gmra.mxu2 %v14081_v61  ;;  %v12427_v61 = vld [vmem:[#allocation9 + $0x3a0] sm:$0xff] }
0x16c8   :  { %6413 = vmatpush.bf16.msrb.mxu2 %v5928_v27  ;;  %6265 = vmatpush.bf16.msrb.mxu1 %v12427_v61  ;;  %v12437_v27 = vld [vmem:[#allocation9 + $0x3f0] sm:$0xff] }
0x16c9   :  { %6360 = vmatpush.bf16.msrb.mxu3 %v12437_v27  ;;  %v12461_v27 = vld [vmem:[#allocation7 + $0x470] sm:$0xff] }
0x16cc   :  { %6266 = vmatpush.bf16.msrb.mxu1 %v12426_v12 }
0x16cd   :  { %6361 = vmatpush.bf16.msrb.mxu3 %v12436_v50  ;;  %v12453_v50 = vld [vmem:[#allocation7 + $0x430] sm:$0xff] }
0x16d1   :  { %6362 = vmatpush.bf16.msrb.mxu3 %v12435_v37  ;;  %v12444_v37 = vld [vmem:[#allocation7 + $0x3e8] sm:$0xff] }
0x16d5   :  { %6363 = vmatpush.bf16.msrb.mxu3 %v12434_v34  ;;  %v12460_v34 = vld [vmem:[#allocation7 + $0x468] sm:$0xff] }
0x16d7   :  { %11054 = vmatmul.msk.bf16.vlgmr.msrb.gmra.mxu2 %vm190_vm14, %v13678_v35  ;;  %v12425_v35 = vld [vmem:[#allocation9 + $0x390] sm:$0xff] }
0x16d8   :  { %6267 = vmatpush.bf16.msrb.mxu1 %v12425_v35  ;;  %v12716_v35 = vld [vmem:[%s15119_s14 + $0x17] ss:$0 sm:$0xff] }
0x16d9   :  { %6364 = vmatpush.bf16.msrb.mxu3 %v12433_v47  ;;  %v12452_v47 = vld [vmem:[#allocation7 + $0x428] sm:$0xff] }
0x16dc   :  { %6268 = vmatpush.bf16.msrb.mxu1 %v12424_v42 }
0x16dd   :  { %6365 = vmatpush.bf16.msrb.mxu3 %v12432_v20 }
0x16e0   :  { %6269 = vmatpush.bf16.msrb.mxu1 %v12423_v55 }
0x16e1   :  { %6366 = vmatpush.bf16.msrb.mxu3 %v12431_v62  ;;  %v12459_v62 = vld [vmem:[#allocation7 + $0x460] sm:$0xff] }
0x16e4   :  { %6630 = vmatpush.bf16.msra.mxu1 %v12454_v36  ;;  %v12541_v36 = vld [vmem:[#allocation10 + $0x1ec] sm:$0xf0] }
0x16e8   :  { %6631 = vmatpush.bf16.msra.mxu1 %v12453_v50 }
0x16ec   :  { %6632 = vmatpush.bf16.msra.mxu1 %v12452_v47 }
0x172a   :  { %v5938_v9 = vpop.f32.mrf.mxu2 }
0x172b   :  { %v5942_v16 = vmul.f32 %v5938_v9, %v13684_v40  ;;  %v12711_v40 = vld [vmem:[%s15119_s14 + $0x15] ss:$0 sm:$0xff] }
0x172c   :  { %v6149_v54 = vadd.f32 %v12711_v40, %v14085_v10 }
0x172d   :  { %v5992_v38 = vpack.c.bf16 %v5942_v16, %v5942_v16 }
0x172f   :  { %6160 = vmatmul.bf16.vlgmr.msrb.gmra.mxu0 %v5992_v38 }
0x1732   :  { %v5940_v19 = vpop.f32.mrf.mxu2 }
0x174a   :  { %v6174_v15 = vpop.f32.mrf.mxu2 }
0x1752   :  { %v6176_v43 = vpop.f32.mrf.mxu2 }
0x17ac   :  { %v6161_v57 = vpop.f32.mrf.mxu0 }
0x17ad   :  { %v6162_v32 = vadd.f32 %v6161_v57, %v6149_v54 }
0x17af   :  { %v6175_v25 = vadd.f32 %v6174_v15, %v6162_v32 }
0x17b1   :  { %v6179_v45 = vand.u32 2147483647, %v6175_v25  ;;  %v6178_v59 = vmax.f32 %v6175_v25, 0.0 }
0x17b3   :  { %v6180_v39 = vsub.f32 0.0, %v6179_v45 }
0x17b4   :  { %v6163_v26 = vpop.f32.mrf.mxu0 }
0x17b5   :  { %v6181_v4 = vmul.f32 1.442695, %v6180_v39 }
0x17b7   :  { %12983 = vpow2.f32 %v6181_v4 }
0x17bd   :  { %v12984_v58 = vpop.eup %12983 }
0x17be   :  { %v6183_v46 = vadd.f32 1.0, %v12984_v58  ;;  %v6186_v60 = vmul.f32 -0.5, %v12984_v58  ;;  %v6189_v18 = vand.u32 2147483647, %v12984_v58 }
0x17c0   :  { %12985 = vlog2.f32 %v6183_v46  ;;  %v6187_v6 = vadd.f32 1.0, %v6186_v60  ;;  %vm6190_vm14 = vcmp.lt.f32.partialorder %v6189_v18, 0.0004427343 }
0x17c2   :  { %v6188_v10 = vmul.f32 %v12984_v58, %v6187_v6 }
0x17c6   :  { %v12986_v48 = vpop.eup %12985 }
0x17c7   :  { %v6185_v21 = vmul.f32 0.6931472, %v12986_v48 }
0x17c9   :  { %v6191_v41 = vsel %vm6190_vm14, %v6188_v10, %v6185_v21 }
0x17ca   :  { %v6192_v56 = vadd.f32 %v6191_v41, %v6178_v59  ;;  %v12446_v59 = vld [vmem:[#allocation7 + $0x3f8] sm:$0xff] }
0x17cc   :  { %v10986_v24 = vadd.f32 -0.6931472, %v6192_v56  ;;  %v12462_v56 = vld [vmem:[#allocation7 + $0x478] sm:$0xff] }
0x17cd   :  { %6643 = vmatpush.bf16.msra.mxu2 %v12462_v56  ;;  %v11318_v56 = vld [vmem:[#allocation10 + $0x1d0] sm:$0xf0] }
0x17ce   :  { %v6211_v8 = vpack.c.bf16 %v10986_v24, %v10986_v24  ;;  %v6415_v24 = vpop.f32.mrf.mxu2 }
0x17d0   :  { %6270 = vmatmul.bf16.vlgmr.msrb.gmra.mxu1 %v6211_v8  ;;  %v12445_v8 = vld [vmem:[#allocation7 + $0x3f0] sm:$0xff] }
0x17d1   :  { %6644 = vmatpush.bf16.msra.mxu2 %v12461_v27 }
0x17d5   :  { %6645 = vmatpush.bf16.msra.mxu2 %v12460_v34  ;;  %v11316_v34 = vld [vmem:[#allocation10 + $0x1c0] sm:$0xf] }
0x17d6   :  { %v6417_v20 = vpop.f32.mrf.mxu2 }
0x17d7   :  { %v12531_v20 = vld [vmem:[#allocation10 + $0x1a4] sm:$0xf] }
0x17d9   :  { %6646 = vmatpush.bf16.msra.mxu2 %v12459_v62  ;;  %v12537_v62 = vld [vmem:[#allocation10 + $0x1cc] sm:$0xf0] }
0x184d   :  { %v6271_v17 = vpop.f32.mrf.mxu1 }
0x184e   :  { %v6272_v33 = vadd.f32 %v12715_v11, %v6271_v17  ;;  %v12443_v11 = vld [vmem:[#allocation7 + $0x3e0] sm:$0xff] }
0x184f   :  { %v12451_v17 = vld [vmem:[#allocation7 + $0x420] sm:$0xff] }
0x1850   :  { %v6276_v23 = vand.u32 2147483647, %v6272_v33  ;;  %v6275_v1 = vmax.f32 %v6272_v33, 0.0  ;;  %v12442_v33 = vld [vmem:[#allocation7 + $0x3d8] sm:$0xff]  ;;  %6633 = vmatpush.bf16.msra.mxu1 %v12451_v17 }
0x1852   :  { %v6277_v52 = vsub.f32 0.0, %v6276_v23  ;;  %v12458_v23 = vld [vmem:[#allocation7 + $0x458] sm:$0xff] }
0x1853   :  { %6647 = vmatpush.bf16.msra.mxu2 %v12458_v23  ;;  %v11300_v23 = vld [vmem:[#allocation10 + $0x1a0] sm:$0xf] }
0x1854   :  { %v6278_v3 = vmul.f32 1.442695, %v6277_v52  ;;  %v12441_v52 = vld [vmem:[#allocation7 + $0x3d0] sm:$0xff] }
0x1855   :  { %v6273_v31 = vpop.f32.mrf.mxu1 }
0x1856   :  { %12987 = vpow2.f32 %v6278_v3  ;;  %v12457_v3 = vld [vmem:[#allocation7 + $0x450] sm:$0xff] }
0x1857   :  { %v12449_v31 = vld [vmem:[#allocation7 + $0x410] sm:$0xff]  ;;  %6648 = vmatpush.bf16.msra.mxu2 %v12457_v3  ;;  %v12527_v3 = vld [vmem:[#allocation10 + $0x184] sm:$0xf] }
0x185c   :  { %v12988_v44 = vpop.eup %12987 }
0x185d   :  { %v6280_v51 = vadd.f32 1.0, %v12988_v44  ;;  %v6283_v9 = vmul.f32 -0.5, %v12988_v44  ;;  %v6286_v38 = vand.u32 2147483647, %v12988_v44 }
0x185f   :  { %12989 = vlog2.f32 %v6280_v51  ;;  %v6284_v16 = vadd.f32 1.0, %v6283_v9  ;;  %vm6287_vm5 = vcmp.lt.f32.partialorder %v6286_v38, 0.0004427343  ;;  %v12456_v51 = vld [vmem:[#allocation7 + $0x448] sm:$0xff]  ;;  %v6419_v38 = vmul.f32 0.083333336, %v6415_v24 }
0x1860   :  { %v12448_v9 = vld [vmem:[#allocation7 + $0x408] sm:$0xff]  ;;  %6649 = vmatpush.bf16.msra.mxu2 %v12456_v51  ;;  %v12478_v24 = vld [vmem:[#allocation9 + $0x478] sm:$0xff] }
0x1861   :  { %v6285_v43 = vmul.f32 %v12988_v44, %v6284_v16  ;;  %v12440_v44 = vld [vmem:[#allocation7 + $0x3c8] sm:$0xff]  ;;  %v12439_v16 = vld [vmem:[#allocation7 + $0x3c0] sm:$0xff]  ;;  %v12542_v51 = vld [vmem:[#allocation10 + $0x1f4] sm:$0xf0] }
0x1865   :  { %v12990_v19 = vpop.eup %12989 }
0x1866   :  { %v6282_v15 = vmul.f32 0.6931472, %v12990_v19  ;;  %v12455_v19 = vld [vmem:[#allocation7 + $0x440] sm:$0xff] }
0x1867   :  { %6650 = vmatpush.bf16.msra.mxu2 %v12455_v19  ;;  %v12529_v19 = vld [vmem:[#allocation10 + $0x18c] sm:$0xf0] }
0x1868   :  { %v6288_v29 = vsel %vm6287_vm5, %v6285_v43, %v6282_v15  ;;  %v6471_v15 = vpack.c.bf16 %v6419_v38, %v6419_v38  ;;  %v6469_v43 = vpack.c.bf16 %v14078_v7, %v14078_v7  ;;  %v12467_v7 = vld [vmem:[#allocation9 + $0x420] sm:$0xff] }
0x1869   :  { %v6289_v30 = vadd.f32 %v6288_v29, %v6275_v1  ;;  %v12447_v1 = vld [vmem:[#allocation7 + $0x400] sm:$0xff] }
0x186a   :  { %6651 = vmatmul.bf16.vlgmr.msra.gmra.mxu2 %v6471_v15  ;;  %v11324_v15 = vld [vmem:[#allocation10 + $0x1c8] sm:$0xf] }
0x186b   :  { %v11019_v61 = vadd.f32 -0.6931472, %v6289_v30 }
0x186d   :  { %v6308_v12 = vpack.c.bf16 %v11019_v61, %v11019_v61 }
0x186f   :  { %6367 = vmatmul.bf16.vlgmr.msrb.gmra.mxu3 %v6308_v12 }
0x18f2   :  { %v6368_v40 = vpop.f32.mrf.mxu3 }
0x18f3   :  { %v6369_v42 = vadd.f32 %v12716_v35, %v6368_v40  ;;  %v6652_v40 = vpop.f32.mrf.mxu2 }
0x18f5   :  { %v6373_v54 = vand.u32 2147483647, %v6369_v42  ;;  %v6372_v6 = vmax.f32 %v6369_v42, 0.0 }
0x18f7   :  { %v6374_v57 = vsub.f32 0.0, %v6373_v54 }
0x18f9   :  { %v6375_v32 = vmul.f32 1.442695, %v6374_v57  ;;  %v12470_v57 = vld [vmem:[#allocation9 + $0x438] sm:$0xff] }
0x18fa   :  { %v6370_v55 = vpop.f32.mrf.mxu3  ;;  %6739 = vmatpush.bf16.msra.mxu3 %v12470_v57  ;;  %v11268_v57 = vld [vmem:[#allocation10 + $0x160] sm:$0xf] }
0x18fb   :  { %12991 = vpow2.f32 %v6375_v32  ;;  %v6654_v54 = vpop.f32.mrf.mxu2  ;;  %v12469_v32 = vld [vmem:[#allocation9 + $0x430] sm:$0xff]  ;;  %v12468_v55 = vld [vmem:[#allocation9 + $0x428] sm:$0xff] }
0x18fe   :  { %6740 = vmatpush.bf16.msra.mxu3 %v12469_v32  ;;  %v12525_v32 = vld [vmem:[#allocation10 + $0x16c] sm:$0xf0] }
0x1901   :  { %v12992_v25 = vpop.eup %12991 }
0x1902   :  { %v6377_v45 = vadd.f32 1.0, %v12992_v25  ;;  %v6380_v39 = vmul.f32 -0.5, %v12992_v25  ;;  %v6383_v4 = vand.u32 2147483647, %v12992_v25  ;;  %6741 = vmatpush.bf16.msra.mxu3 %v12468_v55 }
0x1904   :  { %12993 = vlog2.f32 %v6377_v45  ;;  %v6381_v26 = vadd.f32 1.0, %v6380_v39  ;;  %vm6384_vm6 = vcmp.lt.f32.partialorder %v6383_v4, 0.0004427343  ;;  %v12465_v45 = vld [vmem:[#allocation9 + $0x410] sm:$0xff]  ;;  %v6472_v39 = vld [vmem:[%s15119_s14 + $0x18] sm:$0x1] }
0x1906   :  { %v6382_v60 = vmul.f32 %v12992_v25, %v6381_v26  ;;  %6742 = vmatpush.bf16.msra.mxu3 %v12467_v7  ;;  %v12466_v25 = vld [vmem:[#allocation9 + $0x418] sm:$0xff]  ;;  %v12464_v26 = vld [vmem:[#allocation9 + $0x408] sm:$0xff] }
0x190a   :  { %v12994_v58 = vpop.eup %12993  ;;  %6743 = vmatpush.bf16.msra.mxu3 %v12466_v25  ;;  %v12519_v25 = vld [vmem:[#allocation10 + $0x144] sm:$0xf] }
0x190b   :  { %v6379_v46 = vmul.f32 0.6931472, %v12994_v58 }
0x190d   :  { %v6385_v18 = vsel %vm6384_vm6, %v6382_v60, %v6379_v46  ;;  %v12463_v60 = vld [vmem:[#allocation9 + $0x400] sm:$0xff] }
0x190e   :  { %v6386_v48 = vadd.f32 %v6385_v18, %v6372_v6  ;;  %6744 = vmatpush.bf16.msra.mxu3 %v12465_v45  ;;  %v12539_v18 = vld [vmem:[#allocation10 + $0x1e4] sm:$0xf]  ;;  %v11254_v45 = vld [vmem:[#allocation10 + $0x150] sm:$0xf0] }
0x1910   :  { %v14118_v21 = vadd.f32 -0.6931472, %v6386_v48  ;;  %v11334_v48 = vld [vmem:[#allocation10 + $0x1f0] sm:$0xf0] }
0x1912   :  { %15254 = vst [vmem:[#allocation23_spill] sm:$0xff] %v14118_v21  ;;  %v6388_v10 = vpack.c.bf16 %v14118_v21, %v14118_v21  ;;  %6745 = vmatpush.bf16.msra.mxu3 %v12464_v26  ;;  %v11292_v26 = vld [vmem:[#allocation10 + $0x188] sm:$0xf]  ;;  %v11556_v21 = vld [vmem:[#allocation10 + $0x2a0] sm:$0xf] }
0x1914   :  { %v6390_v41 = vsel %vm346_vm0, %v6388_v10, 0  ;;  %v12535_v10 = vld [vmem:[#allocation10 + $0x1c4] sm:$0xf] }
0x1915   :  { %6399 = vmatpush.bf16.msra.mxu0 %v6390_v41  ;;  %v14133_v41 = vor.u32 %v12539_v18, %v11334_v48  ;;  %v14136_v50 = vor.u32 %v12535_v10, %v11318_v56  ;;  %v12521_v18 = vld [vmem:[#allocation10 + $0x14c] sm:$0xf0]  ;;  %v14170_v10 = vor.u32 %v12519_v25, %v11254_v45  ;;  %v11238_v56 = vld [vmem:[#allocation10 + $0x130] sm:$0xf0] }
0x1916   :  { %6746 = vmatpush.bf16.msra.mxu3 %v12463_v60  ;;  %v11252_v60 = vld [vmem:[#allocation10 + $0x140] sm:$0xf] }
0x1917   :  { %7140 = vmatpush.bf16.msrb.mxu2 %v14133_v41 }
0x1918   :  { %11053 = vmatmul.msk.bf16.vlgmr.msra.gmra.mxu0 %vm342_vm2, %v13724_v53  ;;  %v12450_v53 = vld [vmem:[#allocation7 + $0x418] sm:$0xff] }
0x1919   :  { %6617 = vmatpush.bf16.msrb.mxu0 %v12446_v59  ;;  %6634 = vmatpush.bf16.msra.mxu1 %v12450_v53  ;;  %v12533_v53 = vld [vmem:[#allocation10 + $0x1ac] sm:$0xf0] }
0x191b   :  { %7141 = vmatpush.bf16.msrb.mxu2 %v14136_v50 }
0x191d   :  { %6618 = vmatpush.bf16.msrb.mxu0 %v12445_v8  ;;  %6635 = vmatpush.bf16.msra.mxu1 %v12449_v31  ;;  %v11332_v8 = vld [vmem:[#allocation10 + $0x1e0] sm:$0xf]  ;;  %v11286_v31 = vld [vmem:[#allocation10 + $0x190] sm:$0xf0] }
0x1921   :  { %6619 = vmatpush.bf16.msrb.mxu0 %v12444_v37  ;;  %6636 = vmatpush.bf16.msra.mxu1 %v12448_v9  ;;  %v14138_v37 = vor.u32 %v12541_v36, %v11332_v8  ;;  %v14147_v9 = vor.u32 %v12533_v53, %v11300_v23  ;;  %v12476_v8 = vld [vmem:[#allocation9 + $0x468] sm:$0xff]  ;;  %v12475_v23 = vld [vmem:[#allocation9 + $0x460] sm:$0xff] }
0x1925   :  { %6620 = vmatpush.bf16.msrb.mxu0 %v12443_v11  ;;  %6637 = vmatpush.bf16.msra.mxu1 %v12447_v1  ;;  %v11302_v11 = vld [vmem:[#allocation10 + $0x1b0] sm:$0xf0]  ;;  %v14152_v1 = vor.u32 %v12527_v3, %v11286_v31 }
0x1929   :  { %6621 = vmatpush.bf16.msrb.mxu0 %v12442_v33  ;;  %7127 = vmatpush.bf16.msrb.mxu1 %v14138_v37  ;;  %v14141_v33 = vor.u32 %v12537_v62, %v11316_v34  ;;  %v12526_v34 = vld [vmem:[#allocation10 + $0x174] sm:$0xf0]  ;;  %v11236_v62 = vld [vmem:[#allocation10 + $0x120] sm:$0xf] }
0x192d   :  { %6622 = vmatpush.bf16.msrb.mxu0 %v12441_v52  ;;  %v14144_v52 = vor.u32 %v12531_v20, %v11302_v11  ;;  %7128 = vmatpush.bf16.msrb.mxu1 %v14141_v33 }
0x192f   :  { %7142 = vmatpush.bf16.msrb.mxu2 %v14144_v52 }
0x1931   :  { %6623 = vmatpush.bf16.msrb.mxu0 %v12440_v44  ;;  %v11340_v44 = vld [vmem:[#allocation10 + $0x1e8] sm:$0xf]  ;;  %7129 = vmatpush.bf16.msrb.mxu1 %v14147_v9 }
0x1932   :  { %v14149_v38 = vor.u32 %v12542_v51, %v11340_v44  ;;  %v12511_v44 = vld [vmem:[#allocation10 + $0x104] sm:$0xf]  ;;  %v11222_v51 = vld [vmem:[#allocation10 + $0x110] sm:$0xf0] }
0x1933   :  { %7143 = vmatpush.bf16.msrb.mxu2 %v14152_v1 }
0x1934   :  { %7153 = vmatpush.bf16.msrb.mxu3 %v14149_v38 }
0x1935   :  { %6624 = vmatpush.bf16.msrb.mxu0 %v12439_v16  ;;  %v11284_v16 = vld [vmem:[#allocation10 + $0x180] sm:$0xf] }
0x1938   :  { %6625 = vmatmul.bf16.vlgmr.msrb.gmra.mxu0 %v6469_v43  ;;  %v12538_v43 = vld [vmem:[#allocation10 + $0x1d4] sm:$0xf0] }
0x1939   :  { %6835 = vmatpush.bf16.msra.mxu0 %v12478_v24 }
0x1995   :  { %v6401_v29 = vpop.f32.mrf.mxu0 }
0x1996   :  { %v6405_v30 = vmul.f32 0.16666667, %v6401_v29  ;;  %v12523_v29 = vld [vmem:[#allocation10 + $0x164] sm:$0xf] }
0x1998   :  { %v6470_v61 = vpack.c.bf16 %v6405_v30, %v6405_v30  ;;  %v14155_v30 = vor.u32 %v12538_v43, %v11324_v15  ;;  %v12522_v15 = vld [vmem:[#allocation10 + $0x154] sm:$0xf0]  ;;  %v12507_v43 = vld [vmem:[#allocation10 + $0xe4] sm:$0xf] }
0x199a   :  { %6638 = vmatmul.bf16.vlgmr.msra.gmra.mxu1 %v6470_v61  ;;  %v11270_v61 = vld [vmem:[#allocation10 + $0x170] sm:$0xf0]  ;;  %7154 = vmatpush.bf16.msrb.mxu3 %v14155_v30 }
0x199b   :  { %v14161_v7 = vor.u32 %v12523_v29, %v11270_v61  ;;  %v11462_v29 = vld [vmem:[#allocation10 + $0xf0] sm:$0xf0] }
0x199d   :  { %v6403_v12 = vpop.f32.mrf.mxu0  ;;  %7144 = vmatpush.bf16.msrb.mxu2 %v14161_v7 }
0x199e   :  { %v11308_v12 = vld [vmem:[#allocation10 + $0x1a8] sm:$0xf] }
0x19a1   :  { %7145 = vmatpush.bf16.msrb.mxu2 %v14170_v10 }
0x19b5   :  { %v6626_v35 = vpop.f32.mrf.mxu0 }
0x19b6   :  { %v6627_v4 = vadd.f32 %v6626_v35, %v6472_v39  ;;  %v12534_v35 = vld [vmem:[#allocation10 + $0x1b4] sm:$0xf0] }
0x19b7   :  { %v14164_v39 = vor.u32 %v12534_v35, %v11308_v12  ;;  %v11220_v35 = vld [vmem:[#allocation10 + $0x100] sm:$0xf] }
0x19b9   :  { %7155 = vmatpush.bf16.msrb.mxu3 %v14164_v39 }
0x19bd   :  { %v6628_v42 = vpop.f32.mrf.mxu0 }
0x19be   :  { %v14158_v42 = vor.u32 %v12529_v19, %v11284_v16  ;;  %v11260_v19 = vld [vmem:[#allocation10 + $0x148] sm:$0xf] }
0x19bf   :  { %v14192_v25 = vor.u32 %v12522_v15, %v11260_v19  ;;  %v12501_v19 = vld [vmem:[#allocation10 + $0xac] sm:$0xf0] }
0x19c0   :  { %7130 = vmatpush.bf16.msrb.mxu1 %v14158_v42 }
0x1a17   :  { %v6639_v58 = vpop.f32.mrf.mxu1 }
0x1a18   :  { %v6640_v46 = vadd.f32 %v6639_v58, %v6627_v4  ;;  %v12530_v4 = vld [vmem:[#allocation10 + $0x194] sm:$0xf0]  ;;  %v12477_v58 = vld [vmem:[#allocation9 + $0x470] sm:$0xff] }
0x1a19   :  { %6836 = vmatpush.bf16.msra.mxu0 %v12477_v58  ;;  %v14173_v24 = vor.u32 %v12530_v4, %v11292_v26  ;;  %v14194_v26 = vor.u32 %v12507_v43, %v11462_v29  ;;  %v11244_v4 = vld [vmem:[#allocation10 + $0x128] sm:$0xf]  ;;  %v12518_v58 = vld [vmem:[#allocation10 + $0x134] sm:$0xf0]  ;;  %v12495_v43 = vld [vmem:[#allocation10 + $0x84] sm:$0xf] }
0x1a1a   :  { %v14130_v6 = vadd.f32 %v6652_v40, %v6640_v46  ;;  %v14167_v46 = vor.u32 %v12525_v32, %v11268_v57  ;;  %v14189_v57 = vor.u32 %v12511_v44, %v11222_v51  ;;  %v11460_v32 = vld [vmem:[#allocation10 + $0xe0] sm:$0xf] }
0x1a1b   :  { %7156 = vmatpush.bf16.msrb.mxu3 %v14173_v24  ;;  %v11428_v51 = vld [vmem:[#allocation10 + $0xa0] sm:$0xf] }
0x1a1c   :  { %v6657_v59 = vand.u32 2147483647, %v14130_v6  ;;  %7131 = vmatpush.bf16.msrb.mxu1 %v14167_v46  ;;  %v6656_v11 = vmax.f32 %v14130_v6, 0.0 }
0x1a1d   :  { %6837 = vmatpush.bf16.msra.mxu0 %v12476_v8  ;;  %v12473_v8 = vld [vmem:[#allocation9 + $0x450] sm:$0xff] }
0x1a1e   :  { %v6658_v27 = vsub.f32 0.0, %v6657_v59  ;;  %v12515_v59 = vld [vmem:[#allocation10 + $0x124] sm:$0xf] }
0x1a1f   :  { %v6641_v47 = vpop.f32.mrf.mxu1  ;;  %v14180_v31 = vor.u32 %v12515_v59, %v11238_v56 }
0x1a20   :  { %v6659_v17 = vmul.f32 1.442695, %v6658_v27  ;;  %v11276_v27 = vld [vmem:[#allocation10 + $0x168] sm:$0xf]  ;;  %v14176_v47 = vor.u32 %v12521_v18, %v11252_v60  ;;  %v12503_v60 = vld [vmem:[#allocation10 + $0xc4] sm:$0xf] }
0x1a21   :  { %v14183_v16 = vor.u32 %v12526_v34, %v11276_v27  ;;  %6838 = vmatpush.bf16.msra.mxu0 %v12475_v23  ;;  %7146 = vmatpush.bf16.msrb.mxu2 %v14180_v31  ;;  %v11446_v18 = vld [vmem:[#allocation10 + $0xd0] sm:$0xf0]  ;;  %v12505_v27 = vld [vmem:[#allocation10 + $0xcc] sm:$0xf0]  ;;  %v14203_v34 = vor.u32 %v12518_v58, %v11244_v4  ;;  %v12491_v58 = vld [vmem:[#allocation10 + $0x64] sm:$0xf] }
0x1a22   :  { %12995 = vpow2.f32 %v6659_v17  ;;  %v12517_v17 = vld [vmem:[#allocation10 + $0x12c] sm:$0xf0]  ;;  %7132 = vmatpush.bf16.msrb.mxu1 %v14176_v47  ;;  %v11430_v23 = vld [vmem:[#allocation10 + $0xb0] sm:$0xf0] }
0x1a23   :  { %v14186_v61 = vor.u32 %v12517_v17, %v11236_v62  ;;  %7157 = vmatpush.bf16.msrb.mxu3 %v14183_v16  ;;  %v11228_v62 = vld [vmem:[#allocation10 + $0x108] sm:$0xf]  ;;  %v12514_v17 = vld [vmem:[#allocation10 + $0x114] sm:$0xf0] }
0x1a24   :  { %v14213_v15 = vor.u32 %v12514_v17, %v11228_v62 }
0x1a25   :  { %7147 = vmatpush.bf16.msrb.mxu2 %v14189_v57 }
0x1a26   :  { %7133 = vmatpush.bf16.msrb.mxu1 %v14186_v61 }
0x1a27   :  { %7158 = vmatpush.bf16.msrb.mxu3 %v14192_v25 }
0x1a28   :  { %v12996_v40 = vpop.eup %12995  ;;  %7148 = vmatmul.bf16.vlgmr.msrb.gmra.mxu2 %v15132_v0 }
0x1a29   :  { %v6661_v54 = vadd.f32 1.0, %v12996_v40  ;;  %v6664_v55 = vmul.f32 -0.5, %v12996_v40  ;;  %v6667_v36 = vand.u32 2147483647, %v12996_v40  ;;  %7352 = vmatpush.bf16.msra.mxu2 %v14194_v26 }
0x1a2b   :  { %12997 = vlog2.f32 %v6661_v54  ;;  %v6665_v48 = vadd.f32 1.0, %v6664_v55  ;;  %vm6668_vm0 = vcmp.lt.f32.partialorder %v6667_v36, 0.0004427343  ;;  %v12474_v54 = vld [vmem:[#allocation9 + $0x458] sm:$0xff]  ;;  %v12509_v55 = vld [vmem:[#allocation10 + $0xec] sm:$0xf0]  ;;  %7159 = vmatpush.bf16.msrb.mxu3 %v14203_v34 }
0x1a2c   :  { %v14199_v56 = vor.u32 %v12509_v55, %v11460_v32  ;;  %6839 = vmatpush.bf16.msra.mxu0 %v12474_v54  ;;  %v11444_v36 = vld [vmem:[#allocation10 + $0xc0] sm:$0xf]  ;;  %v14223_v54 = vor.u32 %v12501_v19, %v11428_v51  ;;  %v12497_v55 = vld [vmem:[#allocation10 + $0x8c] sm:$0xf0] }
0x1a2d   :  { %v6666_v3 = vmul.f32 %v12996_v40, %v6665_v48  ;;  %v12513_v40 = vld [vmem:[#allocation10 + $0x10c] sm:$0xf0]  ;;  %v14210_v44 = vor.u32 %v12505_v27, %v11444_v36  ;;  %v11412_v32 = vld [vmem:[#allocation10 + $0x80] sm:$0xf]  ;;  %v12487_v27 = vld [vmem:[#allocation10 + $0x44] sm:$0xf] }
0x1a2e   :  { %v14197_v48 = vor.u32 %v12513_v40, %v11220_v35  ;;  %v11452_v35 = vld [vmem:[#allocation10 + $0xc8] sm:$0xf]  ;;  %v12506_v40 = vld [vmem:[#allocation10 + $0xd4] sm:$0xf0]  ;;  %v11380_v51 = vld [vmem:[#allocation10 + $0x40] sm:$0xf] }
0x1a2f   :  { %7160 = vmatpush.bf16.msrb.mxu3 %v14213_v15  ;;  %v14230_v4 = vor.u32 %v12506_v40, %v11452_v35  ;;  %v12489_v19 = vld [vmem:[#allocation10 + $0x4c] sm:$0xf0]  ;;  %v12479_v35 = vld [vmem:[#allocation10 + $0x4] sm:$0xf]  ;;  %v11350_v40 = vld [vmem:[#allocation10 + $0x10] sm:$0xf0] }
0x1a30   :  { %7134 = vmatpush.bf16.msrb.mxu1 %v14197_v48  ;;  %6840 = vmatpush.bf16.msra.mxu0 %v12473_v8  ;;  %v12493_v8 = vld [vmem:[#allocation10 + $0x6c] sm:$0xf0] }
0x1a31   :  { %v12998_v20 = vpop.eup %12997 }
0x1a32   :  { %v6663_v53 = vmul.f32 0.6931472, %v12998_v20  ;;  %v14206_v20 = vor.u32 %v12503_v60, %v11446_v18  ;;  %v11398_v60 = vld [vmem:[#allocation10 + $0x70] sm:$0xf0]  ;;  %v14233_v18 = vor.u32 %v12497_v55, %v11412_v32  ;;  %v14254_v32 = vor.u32 %v12479_v35, %v11350_v40  ;;  %v11436_v55 = vld [vmem:[#allocation10 + $0xa8] sm:$0xf] }
0x1a33   :  { %7135 = vmatmul.bf16.vlgmr.msrb.gmra.mxu1 %v15132_v0  ;;  %v14236_v36 = vor.u32 %v12491_v58, %v11398_v60  ;;  %v12502_v58 = vld [vmem:[#allocation10 + $0xb4] sm:$0xf0]  ;;  %v12571_v60 = vld [vmem:[#allocation10 + $0x2e4] sm:$0xf]  ;;  %v11420_v40 = vld [vmem:[#allocation10 + $0x88] sm:$0xf] }
0x1a34   :  { %v6669_v6 = vsel %vm6668_vm0, %v6666_v3, %v6663_v53  ;;  %v11468_v53 = vld [vmem:[#allocation10 + $0xe8] sm:$0xf]  ;;  %v12510_v3 = vld [vmem:[#allocation10 + $0xf4] sm:$0xf0]  ;;  %7339 = vmatpush.bf16.msra.mxu1 %v14199_v56  ;;  %7353 = vmatpush.bf16.msra.mxu2 %v14206_v20 }
0x1a35   :  { %v6670_v12 = vadd.f32 %v6669_v6, %v6656_v11  ;;  %v12499_v11 = vld [vmem:[#allocation10 + $0xa4] sm:$0xf]  ;;  %v14219_v29 = vor.u32 %v12510_v3, %v11468_v53  ;;  %v11366_v53 = vld [vmem:[#allocation10 + $0x30] sm:$0xf0] }
0x1a36   :  { %v14217_v6 = vor.u32 %v12499_v11, %v11430_v23  ;;  %v11382_v11 = vld [vmem:[#allocation10 + $0x50] sm:$0xf0]  ;;  %v12483_v23 = vld [vmem:[#allocation10 + $0x24] sm:$0xf] }
0x1a37   :  { %v11151_v45 = vadd.f32 -0.6931472, %v6670_v12  ;;  %v11414_v12 = vld [vmem:[#allocation10 + $0x90] sm:$0xf0]  ;;  %v14243_v17 = vor.u32 %v12487_v27, %v11382_v11  ;;  %v14248_v3 = vor.u32 %v12483_v23, %v11366_v53  ;;  %v11364_v27 = vld [vmem:[#allocation10 + $0x20] sm:$0xf] }
0x1a38   :  { %7340 = vmatpush.bf16.msra.mxu1 %v14210_v44  ;;  %7354 = vmatpush.bf16.msra.mxu2 %v14217_v6  ;;  %v12485_v11 = vld [vmem:[#allocation10 + $0x2c] sm:$0xf0]  ;;  %v12471_v53 = vld [vmem:[#allocation9 + $0x440] sm:$0xff] }
0x1a39   :  { %v6689_v59 = vpack.c.bf16 %v11151_v45, %v11151_v45  ;;  %v14227_v45 = vor.u32 %v12495_v43, %v11414_v12  ;;  %v12472_v43 = vld [vmem:[#allocation9 + $0x448] sm:$0xff]  ;;  %v14251_v12 = vor.u32 %v12489_v19, %v11380_v51  ;;  %v14261_v51 = vor.u32 %v12485_v11, %v11364_v27  ;;  %v11348_v27 = vld [vmem:[#allocation10] sm:$0xf]  ;;  %v12481_v11 = vld [vmem:[#allocation10 + $0xc] sm:$0xf0] }
0x1a3a   :  { %6841 = vmatpush.bf16.msra.mxu0 %v12472_v43  ;;  %v12540_v19 = vld [vmem:[#allocation10 + $0x1ec] sm:$0xf]  ;;  %v11342_v43 = vld [vmem:[#allocation10 + $0x1f8] sm:$0xf0] }
0x1a3b   :  { %6747 = vmatmul.bf16.vlgmr.msra.gmra.mxu3 %v6689_v59  ;;  %v11396_v59 = vld [vmem:[#allocation10 + $0x60] sm:$0xf]  ;;  %v14264_v35 = vor.u32 %v12540_v19, %v11342_v43  ;;  %v12536_v19 = vld [vmem:[#allocation10 + $0x1cc] sm:$0xf]  ;;  %v11326_v43 = vld [vmem:[#allocation10 + $0x1d8] sm:$0xf0] }
0x1a3c   :  { %7365 = vmatpush.bf16.msra.mxu3 %v14219_v29  ;;  %7341 = vmatpush.bf16.msra.mxu1 %v14223_v54  ;;  %v14240_v62 = vor.u32 %v12493_v8, %v11396_v59  ;;  %v14256_v59 = vor.u32 %v12502_v58, %v11436_v55  ;;  %v11590_v8 = vld [vmem:[#allocation10 + $0x2f0] sm:$0xf0]  ;;  %v12498_v55 = vld [vmem:[#allocation10 + $0x94] sm:$0xf0]  ;;  %v12567_v58 = vld [vmem:[#allocation10 + $0x2c4] sm:$0xf]  ;;  %v14277_v13 = vor.u32 %v12536_v19, %v11326_v43 }
0x1a3d   :  { %7355 = vmatpush.bf16.msra.mxu2 %v14227_v45  ;;  %v14259_v23 = vor.u32 %v12571_v60, %v11590_v8  ;;  %15256 = vst [vmem:[#allocation25_spill] sm:$0xff] %v14264_v35  ;;  %v14269_v60 = vor.u32 %v12498_v55, %v11420_v40  ;;  %v11574_v8 = vld [vmem:[#allocation10 + $0x2d0] sm:$0xf0]  ;;  %v14280_v40 = vor.u32 %v12573_v22, %v11588_v2  ;;  %v11404_v55 = vld [vmem:[#allocation10 + $0x68] sm:$0xf] }
0x1a3e   :  { %6842 = vmatpush.bf16.msra.mxu0 %v12471_v53  ;;  %v14271_v49 = vor.u32 %v12567_v58, %v11574_v8  ;;  %v15258_v53 = vmov 0   ;;  %15259 = vst [vmem:[#allocation27_spill] sm:$0xff] %v14277_v13  ;;  %v12563_v58 = vld [vmem:[#allocation10 + $0x2a4] sm:$0xf]  ;;  %v14284_v8 = vor.u32 %v12494_v28, %v11404_v55  ;;  %v12532_v19 = vld [vmem:[#allocation10 + $0x1ac] sm:$0xf] }
0x1a3f   :  { %15255 = vst [vmem:[#allocation24_spill] sm:$0xff] %v14259_v23  ;;  %v11310_v43 = vld [vmem:[#allocation10 + $0x1b8] sm:$0xf0]  ;;  %v12569_v2 = vld [vmem:[#allocation10 + $0x2cc] sm:$0xf0] }
0x1a40   :  { %7366 = vmatpush.bf16.msra.mxu3 %v14230_v4  ;;  %7342 = vmatpush.bf16.msra.mxu1 %v14233_v18  ;;  %15257 = vst [vmem:[#allocation26_spill] sm:$0xff] %v14271_v49  ;;  %v14290_v22 = vor.u32 %v12532_v19, %v11310_v43  ;;  %v12490_v28 = vld [vmem:[#allocation10 + $0x54] sm:$0xf0]  ;;  %v12559_v55 = vld [vmem:[#allocation10 + $0x284] sm:$0xf] }
0x1a41   :  { %7356 = vmatpush.bf16.msra.mxu2 %v14236_v36  ;;  %15260 = vst [vmem:[#allocation28_spill] sm:$0xff] %v14280_v40  ;;  %v12528_v19 = vld [vmem:[#allocation10 + $0x18c] sm:$0xf]  ;;  %v11294_v43 = vld [vmem:[#allocation10 + $0x198] sm:$0xf0] }
0x1a42   :  { %7166 = vmatpush.bf16.msrb.mxu0 %v14264_v35  ;;  %15262 = vst [vmem:[#allocation30_spill] sm:$0xff] %v14290_v22  ;;  %v12557_v35 = vld [vmem:[#allocation10 + $0x26c] sm:$0xf0] }
0x1a44   :  { %7343 = vmatpush.bf16.msra.mxu1 %v14240_v62  ;;  %7367 = vmatpush.bf16.msra.mxu3 %v14256_v59 }
0x1a45   :  { %7357 = vmatpush.bf16.msra.mxu2 %v14243_v17 }
0x1a46   :  { %7167 = vmatpush.bf16.msrb.mxu0 %v14277_v13 }
0x1a48   :  { %7344 = vmatpush.bf16.msra.mxu1 %v14251_v12  ;;  %7368 = vmatpush.bf16.msra.mxu3 %v14269_v60 }
0x1a49   :  { %7358 = vmatpush.bf16.msra.mxu2 %v14248_v3 }
0x1a4a   :  { %7168 = vmatpush.bf16.msrb.mxu0 %v14290_v22  ;;  %v12574_v22 = vld [vmem:[#allocation10 + $0x2f4] sm:$0xf0] }
0x1a4b   :  { %7161 = vmatmul.bf16.vlgmr.msrb.gmra.mxu3 %v15132_v0  ;;  %v14273_v0 = vor.u32 %v12481_v11, %v11348_v27  ;;  %v11558_v27 = vld [vmem:[#allocation10 + $0x2b0] sm:$0xf0] }
0x1a4c   :  { %7345 = vmatpush.bf16.msra.mxu1 %v14261_v51  ;;  %v14287_v11 = vor.u32 %v12563_v58, %v11558_v27  ;;  %7369 = vmatpush.bf16.msra.mxu3 %v14284_v8  ;;  %v14297_v58 = vor.u32 %v12490_v28, %v11388_v63  ;;  %v11542_v27 = vld [vmem:[#allocation10 + $0x290] sm:$0xf0]  ;;  %v12486_v63 = vld [vmem:[#allocation10 + $0x34] sm:$0xf0]  ;;  %v12555_v28 = vld [vmem:[#allocation10 + $0x264] sm:$0xf] }
0x1a4d   :  { %7359 = vmatpush.bf16.msra.mxu2 %v14254_v32 }
0x1a4e   :  { %15261 = vst [vmem:[#allocation29_spill] sm:$0xff] %v14287_v11 }
0x1a50   :  { %7360 = vmatmul.bf16.vlgmr.msra.gmra.mxu2 %v15258_v53  ;;  %7346 = vmatpush.bf16.msra.mxu1 %v14273_v0 }
0x1a51   :  { %7564 = vmatpush.bf16.msrb.mxu2 %v14259_v23  ;;  %v11572_v23 = vld [vmem:[#allocation10 + $0x2c0] sm:$0xf]  ;;  %7370 = vmatpush.bf16.msra.mxu3 %v14297_v58 }
0x1a53   :  { %7347 = vmatmul.bf16.vlgmr.msra.gmra.mxu1 %v15258_v53 }
0x1a54   :  { %7551 = vmatpush.bf16.msrb.mxu1 %v14280_v40  ;;  %v14300_v40 = vor.u32 %v12559_v55, %v11542_v27  ;;  %v11526_v55 = vld [vmem:[#allocation10 + $0x270] sm:$0xf0] }
0x1a55   :  { %7565 = vmatpush.bf16.msrb.mxu2 %v14271_v49  ;;  %v14293_v49 = vor.u32 %v12569_v2, %v11572_v23  ;;  %v14303_v23 = vor.u32 %v12528_v19, %v11294_v43  ;;  %v12565_v2 = vld [vmem:[#allocation10 + $0x2ac] sm:$0xf0]  ;;  %v14312_v27 = vor.u32 %v12555_v28, %v11526_v55  ;;  %v11278_v19 = vld [vmem:[#allocation10 + $0x178] sm:$0xf0]  ;;  %v11540_v43 = vld [vmem:[#allocation10 + $0x280] sm:$0xf] }
0x1a56   :  { %15264 = vst [vmem:[#allocation32_spill] sm:$0xff] %v14300_v40  ;;  %v11510_v28 = vld [vmem:[#allocation10 + $0x250] sm:$0xf0]  ;;  %v11596_v55 = vld [vmem:[#allocation10 + $0x2e8] sm:$0xf] }
0x1a57   :  { %15263 = vst [vmem:[#allocation31_spill] sm:$0xff] %v14293_v49  ;;  %7169 = vmatpush.bf16.msrb.mxu0 %v14303_v23 }
0x1a58   :  { %7552 = vmatpush.bf16.msrb.mxu1 %v14293_v49  ;;  %15265 = vst [vmem:[#allocation33_spill] sm:$0xff] %v14303_v23  ;;  %v14309_v49 = vor.u32 %v12486_v63, %v11372_v5  ;;  %v11356_v23 = vld [vmem:[#allocation10 + $0x8] sm:$0xf]  ;;  %v12482_v5 = vld [vmem:[#allocation10 + $0x14] sm:$0xf0] }
0x1a59   :  { %7566 = vmatpush.bf16.msrb.mxu2 %v14287_v11  ;;  %v14306_v11 = vor.u32 %v12565_v2, %v11556_v21  ;;  %15268 = vst [vmem:[#allocation36_spill] sm:$0xff] %v14312_v27  ;;  %v12561_v21 = vld [vmem:[#allocation10 + $0x28c] sm:$0xf0]  ;;  %v12551_v63 = vld [vmem:[#allocation10 + $0x244] sm:$0xf] }
0x1a5a   :  { %15267 = vst [vmem:[#allocation35_spill] sm:$0xff] %v14309_v49  ;;  %7371 = vmatpush.bf16.msra.mxu3 %v14309_v49  ;;  %v14318_v2 = vor.u32 %v12561_v21, %v11540_v43  ;;  %v14324_v13 = vor.u32 %v12551_v63, %v11510_v28  ;;  %v11524_v43 = vld [vmem:[#allocation10 + $0x260] sm:$0xf]  ;;  %v11580_v63 = vld [vmem:[#allocation10 + $0x2c8] sm:$0xf] }
0x1a5b   :  { %15266 = vst [vmem:[#allocation34_spill] sm:$0xff] %v14306_v11  ;;  %v12570_v28 = vld [vmem:[#allocation10 + $0x2d4] sm:$0xf0] }
0x1a5c   :  { %7553 = vmatpush.bf16.msrb.mxu1 %v14306_v11  ;;  %15270 = vst [vmem:[#allocation38_spill] sm:$0xff] %v14318_v2  ;;  %v14321_v11 = vor.u32 %v12482_v5, %v11356_v23  ;;  %v14333_v23 = vor.u32 %v12557_v35, %v11524_v43  ;;  %v12547_v5 = vld [vmem:[#allocation10 + $0x224] sm:$0xf]  ;;  %v12553_v35 = vld [vmem:[#allocation10 + $0x24c] sm:$0xf0] }
0x1a5d   :  { %7567 = vmatpush.bf16.msrb.mxu2 %v14300_v40  ;;  %v14315_v40 = vor.u32 %v12524_v14, %v11278_v19  ;;  %15272 = vst [vmem:[#allocation40_spill] sm:$0xff] %v14324_v13  ;;  %v14326_v14 = vor.u32 %v12574_v22, %v11596_v55  ;;  %v12520_v19 = vld [vmem:[#allocation10 + $0x14c] sm:$0xf]  ;;  %v14339_v55 = vor.u32 %v12570_v28, %v11580_v63  ;;  %v6690_v43 = vld [vmem:[%s15119_s14 + $0x19] sm:$0x1] }
0x1a5e   :  { %15271 = vst [vmem:[#allocation39_spill] sm:$0xff] %v14321_v11  ;;  %7372 = vmatpush.bf16.msra.mxu3 %v14321_v11  ;;  %v11478_v63 = vld [vmem:[#allocation10 + $0x210] sm:$0xf0]  ;;  %v11230_v11 = vld [vmem:[#allocation10 + $0x118] sm:$0xf0] }
0x1a5f   :  { %15269 = vst [vmem:[#allocation37_spill] sm:$0xff] %v14315_v40  ;;  %7170 = vmatpush.bf16.msrb.mxu0 %v14315_v40  ;;  %v11508_v40 = vld [vmem:[#allocation10 + $0x240] sm:$0xf] }
0x1a60   :  { %7554 = vmatpush.bf16.msrb.mxu1 %v14318_v2  ;;  %15273 = vst [vmem:[#allocation41_spill] sm:$0xff] %v14326_v14  ;;  %v11494_v2 = vld [vmem:[#allocation10 + $0x230] sm:$0xf0] }
0x1a61   :  { %7568 = vmatpush.bf16.msrb.mxu2 %v14312_v27  ;;  %v11262_v27 = vld [vmem:[#allocation10 + $0x158] sm:$0xf0]  ;;  %15275 = vst [vmem:[#allocation43_spill] sm:$0xff] %v14333_v23  ;;  %v14336_v22 = vor.u32 %v12547_v5, %v11494_v2  ;;  %7373 = vmatmul.bf16.vlgmr.msra.gmra.mxu3 %v15258_v53  ;;  %v14349_v2 = vor.u32 %v12553_v35, %v11508_v40  ;;  %v12543_v5 = vld [vmem:[#allocation10 + $0x204] sm:$0xf] }
0x1a62   :  { %v14329_v21 = vor.u32 %v12520_v19, %v11262_v27  ;;  %7577 = vmatpush.bf16.msrb.mxu3 %v14326_v14  ;;  %v12516_v27 = vld [vmem:[#allocation10 + $0x12c] sm:$0xf]  ;;  %v11246_v19 = vld [vmem:[#allocation10 + $0x138] sm:$0xf0]  ;;  %v14352_v28 = vor.u32 %v12543_v5, %v11478_v63  ;;  %v12549_v35 = vld [vmem:[#allocation10 + $0x22c] sm:$0xf0] }
0x1a63   :  { %15276 = vst [vmem:[#allocation44_spill] sm:$0xff] %v14336_v22 }
0x1a64   :  { %15274 = vst [vmem:[#allocation42_spill] sm:$0xff] %v14329_v21  ;;  %7171 = vmatpush.bf16.msrb.mxu0 %v14329_v21  ;;  %7555 = vmatpush.bf16.msrb.mxu1 %v14333_v23  ;;  %v11564_v23 = vld [vmem:[#allocation10 + $0x2a8] sm:$0xf]  ;;  %v12512_v21 = vld [vmem:[#allocation10 + $0x10c] sm:$0xf] }
0x1a65   :  { %7569 = vmatpush.bf16.msrb.mxu2 %v14324_v13  ;;  %v14342_v13 = vor.u32 %v12516_v27, %v11246_v19  ;;  %15277 = vst [vmem:[#allocation45_spill] sm:$0xff] %v14349_v2  ;;  %v12566_v27 = vld [vmem:[#allocation10 + $0x2b4] sm:$0xf0]  ;;  %v14359_v40 = vor.u32 %v12512_v21, %v11230_v11  ;;  %v12545_v11 = vld [vmem:[#allocation10 + $0x20c] sm:$0xf0] }
0x1a66   :  { %7578 = vmatpush.bf16.msrb.mxu3 %v14339_v55  ;;  %15278 = vst [vmem:[#allocation46_spill] sm:$0xff] %v14352_v28  ;;  %v14355_v14 = vor.u32 %v12566_v27, %v11564_v23  ;;  %v11548_v23 = vld [vmem:[#allocation10 + $0x288] sm:$0xf]  ;;  %v11476_v27 = vld [vmem:[#allocation10 + $0x200] sm:$0xf] }
0x1a68   :  { %7172 = vmatpush.bf16.msrb.mxu0 %v14342_v13  ;;  %7556 = vmatpush.bf16.msrb.mxu1 %v14349_v2  ;;  %v12558_v2 = vld [vmem:[#allocation10 + $0x274] sm:$0xf0] }
0x1a69   :  { %7570 = vmatpush.bf16.msrb.mxu2 %v14336_v22  ;;  %v11492_v22 = vld [vmem:[#allocation10 + $0x220] sm:$0xf] }
0x1a6a   :  { %7579 = vmatpush.bf16.msrb.mxu3 %v14355_v14  ;;  %v14363_v5 = vor.u32 %v12549_v35, %v11492_v22  ;;  %v11532_v35 = vld [vmem:[#allocation10 + $0x268] sm:$0xf] }
0x1a6c   :  { %15279 = vst [vmem:[#allocation47_spill] sm:$0xff] %v14363_v5  ;;  %7173 = vmatpush.bf16.msrb.mxu0 %v14359_v40  ;;  %7557 = vmatpush.bf16.msrb.mxu1 %v14363_v5  ;;  %v14377_v5 = vor.u32 %v12558_v2, %v11532_v35  ;;  %v11500_v2 = vld [vmem:[#allocation10 + $0x228] sm:$0xf] }
0x1a6d   :  { %7571 = vmatpush.bf16.msrb.mxu2 %v14352_v28  ;;  %v14372_v28 = vor.u32 %v12545_v11, %v11476_v27  ;;  %v12550_v27 = vld [vmem:[#allocation10 + $0x234] sm:$0xf0] }
0x1a70   :  { %7572 = vmatmul.bf16.vlgmr.msrb.gmra.mxu2 %v15258_v53  ;;  %7558 = vmatpush.bf16.msrb.mxu1 %v14372_v28 }
0x1a71   :  { %7742 = vmatpush.bf16.msra.mxu2 %v14133_v41 }
0x1a73   :  { %7559 = vmatmul.bf16.vlgmr.msrb.gmra.mxu1 %v15258_v53 }
0x1a74   :  { %7729 = vmatpush.bf16.msra.mxu1 %v14138_v37 }
0x1a75   :  { %7743 = vmatpush.bf16.msra.mxu2 %v14136_v50 }
0x1a78   :  { %7730 = vmatpush.bf16.msra.mxu1 %v14141_v33 }
0x1a79   :  { %7744 = vmatpush.bf16.msra.mxu2 %v14144_v52  ;;  %v12546_v52 = vld [vmem:[#allocation10 + $0x214] sm:$0xf0] }
0x1a7c   :  { %7731 = vmatpush.bf16.msra.mxu1 %v14147_v9 }
0x1a7d   :  { %7745 = vmatpush.bf16.msra.mxu2 %v14152_v1 }
0x1a80   :  { %7732 = vmatpush.bf16.msra.mxu1 %v14158_v42  ;;  %v12508_v42 = vld [vmem:[#allocation10 + $0xec] sm:$0xf] }
0x1a81   :  { %7746 = vmatpush.bf16.msra.mxu2 %v14161_v7 }
0x1a84   :  { %7733 = vmatpush.bf16.msra.mxu1 %v14167_v46  ;;  %v12504_v46 = vld [vmem:[#allocation10 + $0xcc] sm:$0xf] }
0x1a85   :  { %7747 = vmatpush.bf16.msra.mxu2 %v14170_v10 }
0x1a88   :  { %7734 = vmatpush.bf16.msra.mxu1 %v14176_v47  ;;  %v11438_v47 = vld [vmem:[#allocation10 + $0xb8] sm:$0xf0] }
0x1a89   :  { %7748 = vmatpush.bf16.msra.mxu2 %v14180_v31  ;;  %v12496_v31 = vld [vmem:[#allocation10 + $0x8c] sm:$0xf] }
0x1a8c   :  { %7735 = vmatpush.bf16.msra.mxu1 %v14186_v61  ;;  %v11422_v61 = vld [vmem:[#allocation10 + $0x98] sm:$0xf0] }
0x1a8d   :  { %7749 = vmatpush.bf16.msra.mxu2 %v14189_v57  ;;  %v12492_v57 = vld [vmem:[#allocation10 + $0x6c] sm:$0xf] }
0x1a90   :  { %7736 = vmatpush.bf16.msra.mxu1 %v14197_v48 }
0x1a91   :  { %7794 = vmatpush.bf16.msrb.mxu2 %v14194_v26  ;;  %v11406_v26 = vld [vmem:[#allocation10 + $0x78] sm:$0xf0] }
0x1a92   :  { %v14431_v48 = vor.u32 %v12492_v57, %v11406_v26 }
0x1a94   :  { %7781 = vmatpush.bf16.msrb.mxu1 %v14199_v56  ;;  %v11390_v56 = vld [vmem:[#allocation10 + $0x58] sm:$0xf0] }
0x1a95   :  { %7795 = vmatpush.bf16.msrb.mxu2 %v14206_v20  ;;  %v12484_v20 = vld [vmem:[#allocation10 + $0x2c] sm:$0xf] }
0x1a98   :  { %7782 = vmatpush.bf16.msrb.mxu1 %v14210_v44  ;;  %v11374_v44 = vld [vmem:[#allocation10 + $0x38] sm:$0xf0] }
0x1a99   :  { %7796 = vmatpush.bf16.msrb.mxu2 %v14217_v6  ;;  %v12480_v6 = vld [vmem:[#allocation10 + $0xc] sm:$0xf] }
0x1a9c   :  { %7783 = vmatpush.bf16.msrb.mxu1 %v14223_v54  ;;  %v11358_v54 = vld [vmem:[#allocation10 + $0x18] sm:$0xf0] }
0x1a9d   :  { %7797 = vmatpush.bf16.msrb.mxu2 %v14227_v45  ;;  %v12572_v45 = vld [vmem:[#allocation10 + $0x2ec] sm:$0xf] }
0x1aa0   :  { %7784 = vmatpush.bf16.msrb.mxu1 %v14233_v18  ;;  %v11598_v18 = vld [vmem:[#allocation10 + $0x2f8] sm:$0xf0] }
0x1aa1   :  { %7798 = vmatpush.bf16.msrb.mxu2 %v14236_v36  ;;  %v12568_v36 = vld [vmem:[#allocation10 + $0x2cc] sm:$0xf] }
0x1aa4   :  { %7785 = vmatpush.bf16.msrb.mxu1 %v14240_v62  ;;  %v11582_v62 = vld [vmem:[#allocation10 + $0x2d8] sm:$0xf0] }
0x1aa5   :  { %7799 = vmatpush.bf16.msrb.mxu2 %v14243_v17 }
0x1aa8   :  { %7786 = vmatpush.bf16.msrb.mxu1 %v14251_v12  ;;  %v12564_v12 = vld [vmem:[#allocation10 + $0x2ac] sm:$0xf] }
0x1aa9   :  { %7800 = vmatpush.bf16.msrb.mxu2 %v14248_v3  ;;  %v14460_v3 = vor.u32 %v12568_v36, %v11582_v62 }
0x1aab   :  { %v7149_v17 = vpop.f32.mrf.mxu2 }
0x1aac   :  { %7787 = vmatpush.bf16.msrb.mxu1 %v14261_v51  ;;  %v11550_v51 = vld [vmem:[#allocation10 + $0x298] sm:$0xf0] }
0x1aad   :  { %7801 = vmatpush.bf16.msrb.mxu2 %v14254_v32 }
0x1ab0   :  { %7788 = vmatpush.bf16.msrb.mxu1 %v14273_v0 }
0x1abe   :  { %v6748_v19 = vpop.f32.mrf.mxu3 }
0x1abf   :  { %v14357_v49 = vadd.f32 %v6748_v19, %v6690_v43  ;;  %v12562_v43 = vld [vmem:[#allocation10 + $0x294] sm:$0xf0] }
0x1ac0   :  { %v14370_v19 = vor.u32 %v12562_v43, %v11548_v23  ;;  %v12554_v23 = vld [vmem:[#allocation10 + $0x254] sm:$0xf0] }
0x1ac1   :  { %v6753_v63 = vand.u32 2147483647, %v14357_v49 }
0x1ac2   :  { %7580 = vmatpush.bf16.msrb.mxu3 %v14370_v19 }
0x1ac3   :  { %v6754_v21 = vsub.f32 0.0, %v6753_v63  ;;  %v11516_v63 = vld [vmem:[#allocation10 + $0x248] sm:$0xf] }
0x1ac4   :  { %v14382_v43 = vor.u32 %v12554_v23, %v11516_v63  ;;  %v6752_v23 = vmax.f32 %v14357_v49, 0.0 }
0x1ac5   :  { %v6755_v22 = vmul.f32 1.442695, %v6754_v21  ;;  %v14387_v21 = vor.u32 %v12550_v27, %v11500_v2  ;;  %v11470_v27 = vld [vmem:[#allocation10 + $0xf8] sm:$0xf0] }
0x1ac6   :  { %v6750_v41 = vpop.f32.mrf.mxu3  ;;  %7581 = vmatpush.bf16.msrb.mxu3 %v14377_v5  ;;  %v14405_v10 = vor.u32 %v12508_v42, %v11470_v27  ;;  %v15281_v42 = vld [vmem:[#allocation39_spill] sm:$0xff] }
0x1ac7   :  { %12999 = vpow2.f32 %v6755_v22  ;;  %v11484_v22 = vld [vmem:[#allocation10 + $0x208] sm:$0xf] }
0x1ac8   :  { %v14392_v35 = vor.u32 %v12546_v52, %v11484_v22  ;;  %v7151_v52 = vpop.f32.mrf.mxu2 }
0x1aca   :  { %7582 = vmatpush.bf16.msrb.mxu3 %v14382_v43 }
0x1acd   :  { %v13000_v50 = vpop.eup %12999 }
0x1ace   :  { %v6757_v11 = vadd.f32 1.0, %v13000_v50  ;;  %v6760_v37 = vmul.f32 -0.5, %v13000_v50  ;;  %7583 = vmatpush.bf16.msrb.mxu3 %v14387_v21  ;;  %v6763_v41 = vand.u32 2147483647, %v13000_v50 }
0x1ad0   :  { %13001 = vlog2.f32 %v6757_v11  ;;  %v6761_v33 = vadd.f32 1.0, %v6760_v37  ;;  %vm6764_vm2 = vcmp.lt.f32.partialorder %v6763_v41, 0.0004427343  ;;  %v11454_v11 = vld [vmem:[#allocation10 + $0xd8] sm:$0xf0] }
0x1ad1   :  { %v14412_v49 = vor.u32 %v12504_v46, %v11454_v11  ;;  %v11566_v37 = vld [vmem:[#allocation10 + $0x2b8] sm:$0xf0]  ;;  %v12556_v41 = vld [vmem:[#allocation10 + $0x26c] sm:$0xf] }
0x1ad2   :  { %7584 = vmatpush.bf16.msrb.mxu3 %v14392_v35  ;;  %v6762_v1 = vmul.f32 %v13000_v50, %v6761_v33  ;;  %v14466_v32 = vor.u32 %v12564_v12, %v11566_v37  ;;  %v15282_v11 = vld [vmem:[#allocation25_spill] sm:$0xff] }
0x1ad3   :  { %v7361_v57 = vpop.f32.mrf.mxu2 }
0x1ad5   :  { %7585 = vmatmul.bf16.vlgmr.msrb.gmra.mxu3 %v15258_v53 }
0x1ad6   :  { %v13002_v63 = vpop.eup %13001  ;;  %7755 = vmatpush.bf16.msra.mxu3 %v14149_v38 }
0x1ad7   :  { %v6759_v9 = vmul.f32 0.6931472, %v13002_v63  ;;  %v14476_v63 = vpop.f32.mrf.mxu3 }
0x1ad9   :  { %v6765_v7 = vsel %vm6764_vm2, %v6762_v1, %v6759_v9  ;;  %v12552_v9 = vld [vmem:[#allocation10 + $0x24c] sm:$0xf]  ;;  %v11518_v1 = vld [vmem:[#allocation10 + $0x258] sm:$0xf0] }
0x1ada   :  { %v6766_v2 = vadd.f32 %v6765_v7, %v6752_v23  ;;  %7756 = vmatpush.bf16.msra.mxu3 %v14155_v30  ;;  %v12500_v30 = vld [vmem:[#allocation10 + $0xac] sm:$0xf]  ;;  %v15280_v23 = vld [vmem:[#allocation35_spill] sm:$0xff] }
0x1adb   :  { %v12548_v7 = vld [vmem:[#allocation10 + $0x22c] sm:$0xf] }
0x1adc   :  { %v11184_v38 = vadd.f32 -0.6931472, %v6766_v2  ;;  %v11502_v2 = vld [vmem:[#allocation10 + $0x238] sm:$0xf0] }
0x1ade   :  { %v6785_v50 = vpack.c.bf16 %v11184_v38, %v11184_v38  ;;  %7757 = vmatpush.bf16.msra.mxu3 %v14164_v39  ;;  %v14419_v39 = vor.u32 %v12500_v30, %v11438_v47  ;;  %v12544_v38 = vld [vmem:[#allocation10 + $0x20c] sm:$0xf]  ;;  %v15283_v30 = vld [vmem:[#allocation27_spill] sm:$0xff]  ;;  %v15284_v47 = vld [vmem:[#allocation30_spill] sm:$0xff] }
0x1adf   :  { %v7164_v27 = vpop.f32.mrf.mxu3 }
0x1ae0   :  { %6843 = vmatmul.bf16.vlgmr.msra.gmra.mxu0 %v6785_v50  ;;  %v11486_v50 = vld [vmem:[#allocation10 + $0x218] sm:$0xf0] }
0x1ae1   :  { %7378 = vmatpush.bf16.msra.mxu0 %v14405_v10  ;;  %v14487_v46 = vor.u32 %v12544_v38, %v11486_v50 }
0x1ae2   :  { %7758 = vmatpush.bf16.msra.mxu3 %v14173_v24  ;;  %v14425_v24 = vor.u32 %v12496_v31, %v11422_v61  ;;  %v15285_v31 = vld [vmem:[#allocation33_spill] sm:$0xff] }
0x1ae5   :  { %7379 = vmatpush.bf16.msra.mxu0 %v14412_v49 }
0x1ae6   :  { %7759 = vmatpush.bf16.msra.mxu3 %v14183_v16  ;;  %v12488_v16 = vld [vmem:[#allocation10 + $0x4c] sm:$0xf] }
0x1ae9   :  { %7380 = vmatpush.bf16.msra.mxu0 %v14419_v39 }
0x1aea   :  { %7760 = vmatpush.bf16.msra.mxu3 %v14192_v25  ;;  %v14438_v25 = vor.u32 %v12488_v16, %v11390_v56  ;;  %v7362_v16 = vadd.f32 %v7361_v57, %v7149_v17  ;;  %v15286_v56 = vld [vmem:[#allocation37_spill] sm:$0xff] }
0x1aed   :  { %7381 = vmatpush.bf16.msra.mxu0 %v14425_v24 }
0x1aee   :  { %7761 = vmatpush.bf16.msra.mxu3 %v14203_v34  ;;  %v14445_v34 = vor.u32 %v12484_v20, %v11374_v44  ;;  %v15287_v20 = vld [vmem:[#allocation42_spill] sm:$0xff] }
0x1af0   :  { %7174 = vmatmul.bf16.vlgmr.msrb.gmra.mxu0 %v15258_v53 }
0x1af1   :  { %7382 = vmatpush.bf16.msra.mxu0 %v14431_v48 }
0x1af2   :  { %7762 = vmatpush.bf16.msra.mxu3 %v14213_v15  ;;  %v14451_v15 = vor.u32 %v12480_v6, %v11358_v54  ;;  %v7363_v6 = vpop.f32.mrf.mxu2  ;;  %v14506_v54 = vld [vmem:[%s15121_s16] ss:$2 sm:$0xf] }
0x1af3   :  { %15288 = vst [vmem:[#allocation35_spill] sm:$0xff] %v14506_v54 }
0x1af5   :  { %7383 = vmatpush.bf16.msra.mxu0 %v14438_v25 }
0x1af6   :  { %7807 = vmatpush.bf16.msrb.mxu3 %v14219_v29  ;;  %v14453_v29 = vor.u32 %v12572_v45, %v11598_v18  ;;  %v15170_v18 = vperm.slane %v14506_v54, 0 }
0x1af9   :  { %7384 = vmatpush.bf16.msra.mxu0 %v14445_v34 }
0x1afa   :  { %7808 = vmatpush.bf16.msrb.mxu3 %v14230_v4  ;;  %v7136_v4 = vpop.f32.mrf.mxu1  ;;  %v7573_v36 = vpop.f32.mrf.mxu2 }
0x1afb   :  { %v7604_v62 = vadd.f32 %v7573_v36, %v7362_v16 }
0x1afd   :  { %7385 = vmatpush.bf16.msra.mxu0 %v14451_v15 }
0x1afe   :  { %7809 = vmatpush.bf16.msrb.mxu3 %v14256_v59  ;;  %v12560_v59 = vld [vmem:[#allocation10 + $0x28c] sm:$0xf] }
0x1aff   :  { %v14470_v33 = vor.u32 %v12560_v59, %v11550_v51 }
0x1b00   :  { %7386 = vmatmul.bf16.vlgmr.msra.gmra.mxu0 %v15258_v53 }
0x1b01   :  { %7590 = vmatpush.bf16.msrb.mxu0 %v14453_v29 }
0x1b02   :  { %7810 = vmatpush.bf16.msrb.mxu3 %v14269_v60  ;;  %v7138_v22 = vpop.f32.mrf.mxu1  ;;  %v11534_v60 = vld [vmem:[#allocation10 + $0x278] sm:$0xf0]  ;;  %v7575_v12 = vpop.f32.mrf.mxu2 }
0x1b03   :  { %v14474_v0 = vor.u32 %v12556_v41, %v11534_v60  ;;  %v15167_v60 = vperm.slane %v14506_v54, 2 }
0x1b05   :  { %7591 = vmatpush.bf16.msrb.mxu0 %v14460_v3 }
0x1b06   :  { %7811 = vmatpush.bf16.msrb.mxu3 %v14284_v8  ;;  %v14480_v8 = vor.u32 %v12552_v9, %v11518_v1 }
0x1b09   :  { %7592 = vmatpush.bf16.msrb.mxu0 %v14466_v32 }
0x1b0a   :  { %7812 = vmatpush.bf16.msrb.mxu3 %v14297_v58  ;;  %v14484_v58 = vor.u32 %v12548_v7, %v11502_v2  ;;  %v7348_v61 = vpop.f32.mrf.mxu1 }
0x1b0b   :  { %v7349_v26 = vadd.f32 %v7348_v61, %v7136_v4 }
0x1b0d   :  { %7593 = vmatpush.bf16.msrb.mxu0 %v14470_v33 }
0x1b0e   :  { %7813 = vmatpush.bf16.msrb.mxu3 %v15280_v23 }
0x1b11   :  { %7594 = vmatpush.bf16.msrb.mxu0 %v14474_v0 }
0x1b12   :  { %7814 = vmatpush.bf16.msrb.mxu3 %v15281_v42  ;;  %v7350_v44 = vpop.f32.mrf.mxu1 }
0x1b15   :  { %7595 = vmatpush.bf16.msrb.mxu0 %v14480_v8 }
0x1b19   :  { %7596 = vmatpush.bf16.msrb.mxu0 %v14484_v58 }
0x1b1a   :  { %v7560_v45 = vpop.f32.mrf.mxu1 }
0x1b1d   :  { %7597 = vmatpush.bf16.msrb.mxu0 %v14487_v46 }
0x1b20   :  { %7598 = vmatmul.bf16.vlgmr.msrb.gmra.mxu0 %v15258_v53 }
0x1b21   :  { %7768 = vmatpush.bf16.msra.mxu0 %v15282_v11 }
0x1b22   :  { %v7562_v17 = vpop.f32.mrf.mxu1 }
0x1b25   :  { %7769 = vmatpush.bf16.msra.mxu0 %v15283_v30 }
0x1b29   :  { %7770 = vmatpush.bf16.msra.mxu0 %v15284_v47 }
0x1b2d   :  { %7771 = vmatpush.bf16.msra.mxu0 %v15285_v31 }
0x1b31   :  { %7772 = vmatpush.bf16.msra.mxu0 %v15286_v56 }
0x1b35   :  { %7773 = vmatpush.bf16.msra.mxu0 %v15287_v20 }
0x1b39   :  { %7774 = vmatpush.bf16.msra.mxu0 %v14342_v13  ;;  %v15168_v13 = vperm.slane %v14506_v54, 1 }
0x1b3d   :  { %7775 = vmatpush.bf16.msra.mxu0 %v14359_v40  ;;  %v7603_v40 = vadd.f32 %v7560_v45, %v7349_v26 }
0x1b41   :  { %7820 = vmatpush.bf16.msrb.mxu0 %v14405_v10  ;;  %v7616_v10 = vadd.f32 %v15170_v18, %v7603_v40  ;;  %v11811_v18 = vld [vmem:[#allocation10 + $0x388] sm:$0xf] }
0x1b45   :  { %7821 = vmatpush.bf16.msrb.mxu0 %v14412_v49  ;;  %v7617_v49 = vadd.f32 %v15168_v13, %v7604_v62  ;;  %v12596_v13 = vld [vmem:[#allocation10 + $0x3ac] sm:$0xf] }
0x1b47   :  { %v11603_v4 = vmul.f32 -1.442695, %v7617_v49 }
0x1b49   :  { %7822 = vmatpush.bf16.msrb.mxu0 %v14419_v39  ;;  %v7374_v39 = vpop.f32.mrf.mxu3 }
0x1b4a   :  { %v7375_v52 = vadd.f32 %v7374_v39, %v14476_v63 }
0x1b4d   :  { %7823 = vmatpush.bf16.msrb.mxu0 %v14425_v24  ;;  %v11602_v24 = vmul.f32 -1.442695, %v7616_v10 }
0x1b4f   :  { %13003 = vpow2.f32 %v11602_v24 }
0x1b50   :  { %13005 = vpow2.f32 %v11603_v4 }
0x1b51   :  { %7824 = vmatpush.bf16.msrb.mxu0 %v14431_v48  ;;  %v7376_v37 = vpop.f32.mrf.mxu3 }
0x1b55   :  { %7825 = vmatpush.bf16.msrb.mxu0 %v14438_v25  ;;  %v13004_v59 = vpop.eup %13003  ;;  %v6786_v25 = vld [vmem:[%s15119_s14 + $0x1a] sm:$0x1] }
0x1b56   :  { %v13006_v48 = vpop.eup %13005  ;;  %v7623_v51 = vadd.f32 1.0, %v13004_v59 }
0x1b57   :  { %v7642_v22 = vadd.f32 1.0, %v13006_v48 }
0x1b58   :  { %13007 = vrcp.f32 %v7623_v51  ;;  %vm7629_vm7 = vweird.f32 %v7623_v51  ;;  %v7633_v30 = vand.u32 2147483647, %v7623_v51  ;;  %v7635_v47 = vand.u32 2147483648, %v7623_v51 }
0x1b59   :  { %7826 = vmatpush.bf16.msrb.mxu0 %v14445_v34  ;;  %13009 = vrcp.f32 %v7642_v22  ;;  %v7586_v41 = vpop.f32.mrf.mxu3  ;;  %v7654_v27 = vand.u32 2147483648, %v7642_v22  ;;  %vm7648_vm8 = vweird.f32 %v7642_v22  ;;  %v7652_v26 = vand.u32 2147483647, %v7642_v22 }
0x1b5a   :  { %v7605_v34 = vadd.f32 %v7586_v41, %v7375_v52  ;;  %v7636_v20 = vor.u32 1.1754944e-38, %v7635_v47  ;;  %vm7634_vm13 = vcmp.eq.f32.partialorder %v7633_v30, 8.507059e+37 }
0x1b5b   :  { %v7655_v16 = vor.u32 1.1754944e-38, %v7654_v27  ;;  %vm7653_vm15 = vcmp.eq.f32.partialorder %v7652_v26, 8.507059e+37 }
0x1b5c   :  { %v7618_v38 = vadd.f32 %v15167_v60, %v7605_v34  ;;  %v12598_v60 = vld [vmem:[#allocation10 + $0x3b4] sm:$0xf0] }
0x1b5d   :  { %7827 = vmatpush.bf16.msrb.mxu0 %v14451_v15  ;;  %v6844_v23 = vpop.f32.mrf.mxu0 }
0x1b5e   :  { %v13008_v9 = vpop.eup %13007  ;;  %v6845_v2 = vadd.f32 %v6844_v23, %v6786_v25  ;;  %13011 = vtanh.f32 %v7618_v38 }
0x1b5f   :  { %v13010_v1 = vpop.eup %13009  ;;  %v7625_v7 = vmul.f32 %v13008_v9, %v7623_v51  ;;  %vm7630_vm9 = vweird.f32 %v13008_v9 }
0x1b60   :  { %v7644_v42 = vmul.f32 %v13010_v1, %v7642_v22  ;;  %v6849_v63 = vand.u32 2147483647, %v6845_v2  ;;  %vm14525_vm10 = vmor %vm7629_vm7, %vm7630_vm9  ;;  %vm7649_vm11 = vweird.f32 %v13010_v1  ;;  %v6848_v34 = vmax.f32 %v6845_v2, 0.0 }
0x1b61   :  { %v7626_v15 = vsub.f32 1.0, %v7625_v7  ;;  %vm7650_vm12 = vmor %vm7648_vm8, %vm7649_vm11  ;;  %v7588_v44 = vpop.f32.mrf.mxu3 }
0x1b62   :  { %v7645_v50 = vsub.f32 1.0, %v7644_v42  ;;  %v6850_v31 = vsub.f32 0.0, %v6849_v63  ;;  %v15292_v42 = vld [vmem:[#allocation19_spill] sm:$0xff] }
0x1b63   :  { %v7627_v11 = vmul.f32 %v13008_v9, %v7626_v15 }
0x1b64   :  { %v7646_v61 = vmul.f32 %v13010_v1, %v7645_v50  ;;  %v6851_v6 = vmul.f32 1.442695, %v6850_v31  ;;  %v13012_v24 = vpop.eup %13011  ;;  %v15169_v50 = vperm.slane %v14506_v54, 3  ;;  %v12588_v54 = vld [vmem:[#allocation10 + $0x36c] sm:$0xf] }
0x1b65   :  { %v7628_v56 = vadd.f32 %v13008_v9, %v7627_v11  ;;  %v6846_v36 = vpop.f32.mrf.mxu0 }
0x1b66   :  { %v7647_v45 = vadd.f32 %v13010_v1, %v7646_v61  ;;  %13013 = vpow2.f32 %v6851_v6 }
0x1b67   :  { %v7632_v40 = vsel %vm14525_vm10, %v13008_v9, %v7628_v56 }
0x1b68   :  { %v7651_v62 = vsel %vm7650_vm12, %v13010_v1, %v7647_v45  ;;  %v7637_v10 = vsel %vm7634_vm13, %v7636_v20, %v7632_v40 }
0x1b69   :  { %v7656_v49 = vsel %vm7653_vm15, %v7655_v16, %v7651_v62  ;;  %v7679_v4 = vmul.f32 %v13012_v24, %v7637_v10  ;;  %v15294_v24 = vld [vmem:[#allocation23_spill] sm:$0xff] }
0x1b6a   :  { %v7678_v39 = vmul.f32 0.0, %v7656_v49 }
0x1b6c   :  { %v13014_v17 = vpop.eup %13013  ;;  %v14531_v12 = vadd.f32 %v7679_v4, %v7678_v39  ;;  %v15293_v39 = vld [vmem:[#allocation20_spill] sm:$0xff] }
0x1b6d   :  { %v6853_v37 = vadd.f32 1.0, %v13014_v17  ;;  %v7175_v59 = vpop.f32.mrf.mxu0  ;;  %v6856_v48 = vmul.f32 -0.5, %v13014_v17  ;;  %v6859_v22 = vand.u32 2147483647, %v13014_v17  ;;  %v14545_v4 = vadd.f32 %v15294_v24, %v15293_v39 }
0x1b6e   :  { %15291 = vst [vmem:[#allocation39_spill] sm:$0xff] %v14531_v12 }
0x1b6f   :  { %13015 = vlog2.f32 %v6853_v37  ;;  %v6857_v51 = vadd.f32 1.0, %v6856_v48  ;;  %vm6860_vm1 = vcmp.lt.f32.partialorder %v6859_v22, 0.0004427343  ;;  %15295 = vst [vmem:[#allocation25_spill] sm:$0xff] %v14545_v4  ;;  %v15297_v48 = vmov 0.0  }
0x1b71   :  { %v6858_v9 = vmul.f32 %v13014_v17, %v6857_v51 }
0x1b75   :  { %v13016_v52 = vpop.eup %13015  ;;  %v7177_v25 = vpop.f32.mrf.mxu0 }
0x1b76   :  { %v6855_v41 = vmul.f32 0.6931472, %v13016_v52 }
0x1b78   :  { %v6861_v1 = vsel %vm6860_vm1, %v6858_v9, %v6855_v41 }
0x1b79   :  { %v6862_v23 = vadd.f32 %v6861_v1, %v6848_v34 }
0x1b7b   :  { %v11217_v7 = vadd.f32 -0.6931472, %v6862_v23 }
0x1b7d   :  { %v6867_v15 = vadd.f32 %v11217_v7, %v15292_v42  ;;  %v7387_v27 = vpop.f32.mrf.mxu0 }
0x1b7e   :  { %v7388_v63 = vadd.f32 %v7387_v27, %v7175_v59  ;;  %v15296_v59 = vld [vmem:[#allocation16_spill] sm:$0xff] }
0x1b7f   :  { %9163 = vst [vmem:[%s15126_s21] sm:$0x1] %v6867_v15  ;;  %vm210_vm6 = vcmp.lt.s32.totalorder %v15296_v59, 6  ;;  %v11813_v59 = vld [vmem:[#allocation10 + $0x398] sm:$0xf0] }
0x1b80   :  { %v14551_v51 = vsel %vm210_vm6, 1.0, %v15297_v48  ;;  %v12592_v48 = vld [vmem:[#allocation10 + $0x38c] sm:$0xf] }
0x1b81   :  { %15298 = vst [vmem:[#allocation27_spill] sm:$0xff] %v14551_v51  ;;  %vm7687_vm0 = vcmp.gt.f32.partialorder %v14551_v51, 0.0 }
0x1b85   :  { %v7389_v38 = vpop.f32.mrf.mxu0 }
0x1b9d   :  { %v7599_v11 = vpop.f32.mrf.mxu0 }
0x1b9e   :  { %v7606_v30 = vadd.f32 %v7599_v11, %v7388_v63 }
0x1ba0   :  { %v7619_v2 = vadd.f32 %v15169_v50, %v7606_v30  ;;  %v11829_v50 = vld [vmem:[#allocation10 + $0x3b8] sm:$0xf0] }
0x1ba2   :  { %v11604_v47 = vmul.f32 -1.442695, %v7619_v2 }
0x1ba4   :  { %13017 = vpow2.f32 %v11604_v47 }
0x1ba5   :  { %v7601_v31 = vpop.f32.mrf.mxu0 }
0x1baa   :  { %v13018_v61 = vpop.eup %13017 }
0x1bab   :  { %v7662_v57 = vadd.f32 1.0, %v13018_v61 }
0x1bad   :  { %13019 = vrcp.f32 %v7662_v57  ;;  %v7674_v20 = vand.u32 2147483648, %v7662_v57  ;;  %v7672_v6 = vand.u32 2147483647, %v7662_v57  ;;  %vm7668_vm4 = vweird.f32 %v7662_v57 }
0x1bae   :  { %13021 = vtanh.f32 %v14531_v12  ;;  %v12590_v12 = vld [vmem:[#allocation10 + $0x374] sm:$0xf0] }
0x1baf   :  { %v7675_v36 = vor.u32 1.1754944e-38, %v7674_v20  ;;  %vm7673_vm5 = vcmp.eq.f32.partialorder %v7672_v6, 8.507059e+37 }
0x1bb3   :  { %v13020_v26 = vpop.eup %13019 }
0x1bb4   :  { %v7664_v16 = vmul.f32 %v13020_v26, %v7662_v57  ;;  %vm7669_vm3 = vweird.f32 %v13020_v26  ;;  %v13022_v62 = vpop.eup %13021 }
0x1bb5   :  { %vm7670_vm14 = vmor %vm7668_vm4, %vm7669_vm3 }
0x1bb6   :  { %v7665_v56 = vsub.f32 1.0, %v7664_v16 }
0x1bb8   :  { %v7666_v44 = vmul.f32 %v13020_v26, %v7665_v56 }
0x1bba   :  { %v7667_v45 = vadd.f32 %v13020_v26, %v7666_v44 }
0x1bbc   :  { %v7671_v40 = vsel %vm7670_vm14, %v13020_v26, %v7667_v45 }
0x1bbd   :  { %v7676_v10 = vsel %vm7673_vm5, %v7675_v36, %v7671_v40 }
0x1bbe   :  { %v14541_v49 = vmul.f32 %v13022_v62, %v7676_v10 }
0x1bc0   :  { %v7683_v17 = vperm.slane %v14541_v49, 0 }
0x1bc2   :  { %v7684_v37 = vmul.f32 %v7683_v17, %v14545_v4 }
0x1bc4   :  { %7685 = vadd.xlane.f32.xlu0 %v7684_v37 }
0x1c37   :  { %v7686_v22 = vpop.xlane.xlu0 %7685 }
0x1c38   :  { %v7688_v52 = vsel %vm7687_vm0, %v7686_v22, -1e+30 }
0x1c39   :  { %v7689_v25 = vrot.slane %v7688_v52, 4 }
0x1c3b   :  { %v7690_v41 = vmax.f32 %v7688_v52, %v7689_v25  ;;  %v15300_v25 = vld [vmem:[#allocation24_spill] sm:$0xff] }
0x1c3d   :  { %v7691_v9 = vrot.slane %v7690_v41, 2 }
0x1c3f   :  { %v7692_v34 = vmax.f32 %v7690_v41, %v7691_v9  ;;  %v15301_v41 = vld [vmem:[#allocation41_spill] sm:$0xff]  ;;  %v15302_v9 = vld [vmem:[#allocation31_spill] sm:$0xff] }
0x1c41   :  { %v7693_v1 = vrot.slane %v7692_v34, 1 }
0x1c43   :  { %v7694_v23 = vmax.f32 %v7692_v34, %v7693_v1  ;;  %v15303_v34 = vld [vmem:[#allocation26_spill] sm:$0xff] }
0x1c44   :  { %v15304_v1 = vld [vmem:[#allocation34_spill] sm:$0xff] }
0x1c45   :  { %v7695_v7 = vsub.f32 %v7688_v52, %v7694_v23  ;;  %v15299_v52 = vld [vmem:[#allocation28_spill] sm:$0xff]  ;;  %v15305_v23 = vld [vmem:[#allocation29_spill] sm:$0xff] }
0x1c47   :  { %v7696_v42 = vmul.f32 1.442695, %v7695_v7  ;;  %v14572_v7 = vpack.c.bf16 %v14541_v49, %v14541_v49  ;;  %v12635_v49 = vld [vmem:[#allocation10 + $0x4e4] sm:$0xf] }
0x1c49   :  { %13023 = vpow2.f32 %v7696_v42  ;;  %v15307_v42 = vld [vmem:[#allocation32_spill] sm:$0xff] }
0x1c4f   :  { %v13024_v15 = vpop.eup %13023 }
0x1c50   :  { %v7698_v27 = vmul.f32 %v13024_v15, %v14551_v51  ;;  %v11725_v15 = vld [vmem:[#allocation10 + $0x4f0] sm:$0xf0]  ;;  %v12594_v51 = vld [vmem:[#allocation10 + $0x394] sm:$0xf0] }
0x1c52   :  { %v7699_v38 = vrot.slane %v7698_v27, 4 }
0x1c54   :  { %v7700_v63 = vadd.f32 %v7699_v38, %v7698_v27  ;;  %v15312_v38 = vld [vmem:[#allocation47_spill] sm:$0xff] }
0x1c56   :  { %v7701_v11 = vrot.slane %v7700_v63, 2 }
0x1c58   :  { %v7702_v30 = vadd.f32 %v7701_v11, %v7700_v63  ;;  %v15313_v63 = vld [vmem:[#allocation44_spill] sm:$0xff]  ;;  %v12636_v11 = vld [vmem:[#allocation10 + $0x4ec] sm:$0xf] }
0x1c5a   :  { %v7703_v2 = vrot.slane %v7702_v30, 1 }
0x1c5c   :  { %v7704_v47 = vadd.f32 %v7703_v2, %v7702_v30  ;;  %v12633_v2 = vld [vmem:[#allocation10 + $0x4cc] sm:$0xf0] }
0x1c5e   :  { %13025 = vrcp.f32 %v7704_v47  ;;  %v7716_v26 = vand.u32 2147483648, %v7704_v47  ;;  %v7714_v56 = vand.u32 2147483647, %v7704_v47  ;;  %vm7710_vm7 = vweird.f32 %v7704_v47 }
0x1c60   :  { %v7717_v44 = vor.u32 1.1754944e-38, %v7716_v26  ;;  %vm7715_vm9 = vcmp.eq.f32.partialorder %v7714_v56, 8.507059e+37  ;;  %v11715_v26 = vld [vmem:[#allocation10 + $0x4c8] sm:$0xf]  ;;  %v12632_v56 = vld [vmem:[#allocation10 + $0x4cc] sm:$0xf] }
0x1c64   :  { %v13026_v31 = vpop.eup %13025 }
0x1c65   :  { %v7706_v61 = vmul.f32 %v13026_v31, %v7704_v47  ;;  %vm7711_vm2 = vweird.f32 %v13026_v31 }
0x1c66   :  { %vm7712_vm8 = vmor %vm7710_vm7, %vm7711_vm2 }
0x1c67   :  { %v7707_v57 = vsub.f32 1.0, %v7706_v61  ;;  %v12631_v61 = vld [vmem:[#allocation10 + $0x4c4] sm:$0xf] }
0x1c69   :  { %v7708_v16 = vmul.f32 %v13026_v31, %v7707_v57  ;;  %v11709_v57 = vld [vmem:[#allocation10 + $0x4d0] sm:$0xf0] }
0x1c6b   :  { %v7709_v20 = vadd.f32 %v13026_v31, %v7708_v16  ;;  %v15314_v16 = vld [vmem:[#allocation46_spill] sm:$0xff] }
0x1c6d   :  { %v7713_v6 = vsel %vm7712_vm8, %v13026_v31, %v7709_v20 }
0x1c6e   :  { %v7718_v45 = vsel %vm7715_vm9, %v7717_v44, %v7713_v6  ;;  %v14610_v44 = vor.u32 %v12631_v61, %v11709_v57  ;;  %v11691_v6 = vld [vmem:[#allocation10 + $0x4a0] sm:$0xf]  ;;  %v12615_v61 = vld [vmem:[#allocation10 + $0x444] sm:$0xf]  ;;  %v11645_v57 = vld [vmem:[#allocation10 + $0x450] sm:$0xf0] }
0x1c6f   :  { %v7719_v36 = vmul.f32 %v7718_v45, %v7698_v27  ;;  %v11731_v27 = vld [vmem:[#allocation10 + $0x4e8] sm:$0xf]  ;;  %v12629_v45 = vld [vmem:[#allocation10 + $0x4ac] sm:$0xf0] }
0x1c71   :  { %v7720_v40 = vmul.f32 %v7719_v36, %v14545_v4  ;;  %v11795_v4 = vld [vmem:[#allocation10 + $0x368] sm:$0xf] }
0x1c73   :  { %v7721_v62 = vrot.slane %v7720_v40, 4 }
0x1c75   :  { %v7722_v10 = vadd.f32 %v7721_v62, %v7720_v40  ;;  %v11699_v40 = vld [vmem:[#allocation10 + $0x4a8] sm:$0xf]  ;;  %v12630_v62 = vld [vmem:[#allocation10 + $0x4b4] sm:$0xf0] }
0x1c77   :  { %v7723_v39 = vrot.slane %v7722_v10, 2 }
0x1c79   :  { %v7724_v24 = vadd.f32 %v7723_v39, %v7722_v10  ;;  %v12628_v10 = vld [vmem:[#allocation10 + $0x4ac] sm:$0xf]  ;;  %v11701_v39 = vld [vmem:[#allocation10 + $0x4b8] sm:$0xf0] }
0x1c7b   :  { %v7725_v17 = vrot.slane %v7724_v24, 1 }
0x1c7d   :  { %v7726_v37 = vadd.f32 %v7725_v17, %v7724_v24  ;;  %v14624_v24 = vor.u32 %v12629_v45, %v11691_v6  ;;  %v14662_v6 = vor.u32 %v12615_v61, %v11645_v57  ;;  %v11627_v45 = vld [vmem:[#allocation10 + $0x420] sm:$0xf]  ;;  %v11853_v61 = vld [vmem:[#allocation10 + $0x3f0] sm:$0xf0]  ;;  %v11859_v57 = vld [vmem:[#allocation10 + $0x3e8] sm:$0xf] }
0x1c7f   :  { %v7728_v22 = vpack.c.bf16 %v7726_v37, %v7726_v37  ;;  %v11675_v37 = vld [vmem:[#allocation10 + $0x480] sm:$0xf] }
0x1c81   :  { %7737 = vmatmul.bf16.vlgmr.msra.gmra.mxu1 %v7728_v22  ;;  %7750 = vmatmul.bf16.vlgmr.msra.gmra.mxu2 %v7728_v22 }
0x1c82   :  { %7763 = vmatmul.bf16.vlgmr.msra.gmra.mxu3 %v7728_v22  ;;  %7776 = vmatmul.bf16.vlgmr.msra.gmra.mxu0 %v7728_v22  ;;  %v12625_v22 = vld [vmem:[#allocation10 + $0x48c] sm:$0xf0] }
0x1c83   :  { %7833 = vmatpush.bf16.msra.mxu1 %v15299_v52  ;;  %7846 = vmatpush.bf16.msra.mxu2 %v15300_v25  ;;  %v14630_v52 = vor.u32 %v12630_v62, %v11699_v40  ;;  %v14632_v25 = vor.u32 %v12628_v10, %v11701_v39  ;;  %v12611_v62 = vld [vmem:[#allocation10 + $0x424] sm:$0xf]  ;;  %v11629_v10 = vld [vmem:[#allocation10 + $0x430] sm:$0xf0]  ;;  %v11635_v39 = vld [vmem:[#allocation10 + $0x428] sm:$0xf] }
0x1c84   :  { %7859 = vmatpush.bf16.msra.mxu3 %v15301_v41  ;;  %7872 = vmatpush.bf16.msra.mxu0 %v14453_v29  ;;  %v15306_v29 = vld [vmem:[#allocation38_spill] sm:$0xff]  ;;  %v12623_v41 = vld [vmem:[#allocation10 + $0x484] sm:$0xf] }
0x1c87   :  { %7834 = vmatpush.bf16.msra.mxu1 %v15302_v9  ;;  %7847 = vmatpush.bf16.msra.mxu2 %v15303_v34  ;;  %v11677_v9 = vld [vmem:[#allocation10 + $0x490] sm:$0xf0]  ;;  %v11683_v34 = vld [vmem:[#allocation10 + $0x488] sm:$0xf] }
0x1c88   :  { %7860 = vmatpush.bf16.msra.mxu3 %v14339_v55  ;;  %7873 = vmatpush.bf16.msra.mxu0 %v14460_v3  ;;  %v15309_v55 = vld [vmem:[#allocation36_spill] sm:$0xff]  ;;  %v15310_v3 = vld [vmem:[#allocation45_spill] sm:$0xff] }
0x1c8b   :  { %7835 = vmatpush.bf16.msra.mxu1 %v15304_v1  ;;  %7848 = vmatpush.bf16.msra.mxu2 %v15305_v23  ;;  %v12626_v1 = vld [vmem:[#allocation10 + $0x494] sm:$0xf0]  ;;  %v12624_v23 = vld [vmem:[#allocation10 + $0x48c] sm:$0xf] }
0x1c8c   :  { %7861 = vmatpush.bf16.msra.mxu3 %v14355_v14  ;;  %7874 = vmatpush.bf16.msra.mxu0 %v14466_v32  ;;  %v15308_v14 = vld [vmem:[#allocation43_spill] sm:$0xff]  ;;  %v11723_v32 = vld [vmem:[#allocation10 + $0x4e0] sm:$0xf] }
0x1c8f   :  { %7836 = vmatpush.bf16.msra.mxu1 %v15306_v29  ;;  %7849 = vmatpush.bf16.msra.mxu2 %v15307_v42  ;;  %v14636_v29 = vor.u32 %v12625_v22, %v11675_v37  ;;  %v14638_v42 = vor.u32 %v12623_v41, %v11677_v9  ;;  %v12614_v37 = vld [vmem:[#allocation10 + $0x434] sm:$0xf0]  ;;  %v12612_v22 = vld [vmem:[#allocation10 + $0x42c] sm:$0xf]  ;;  %v11637_v41 = vld [vmem:[#allocation10 + $0x438] sm:$0xf0] }
0x1c90   :  { %7862 = vmatpush.bf16.msra.mxu3 %v14370_v19  ;;  %7875 = vmatpush.bf16.msra.mxu0 %v14470_v33  ;;  %v15311_v19 = vld [vmem:[#allocation40_spill] sm:$0xff]  ;;  %v12637_v33 = vld [vmem:[#allocation10 + $0x4ec] sm:$0xf0] }
0x1c91   :  { %7789 = vmatmul.bf16.vlgmr.msrb.gmra.mxu1 %v14572_v7  ;;  %7802 = vmatmul.bf16.vlgmr.msrb.gmra.mxu2 %v14572_v7  ;;  %v14594_v30 = vor.u32 %v12637_v33, %v11723_v32  ;;  %v12619_v32 = vld [vmem:[#allocation10 + $0x464] sm:$0xf]  ;;  %v11661_v33 = vld [vmem:[#allocation10 + $0x470] sm:$0xf0]  ;;  %v11611_v9 = vld [vmem:[#allocation10 + $0x400] sm:$0xf] }
0x1c92   :  { %7815 = vmatmul.bf16.vlgmr.msrb.gmra.mxu3 %v14572_v7  ;;  %7828 = vmatmul.bf16.vlgmr.msrb.gmra.mxu0 %v14572_v7 }
0x1c93   :  { %7837 = vmatpush.bf16.msra.mxu1 %v15308_v14  ;;  %7850 = vmatpush.bf16.msra.mxu2 %v15309_v55  ;;  %v11659_v14 = vld [vmem:[#allocation10 + $0x460] sm:$0xf]  ;;  %v12621_v55 = vld [vmem:[#allocation10 + $0x46c] sm:$0xf0] }
0x1c94   :  { %7863 = vmatpush.bf16.msra.mxu3 %v14377_v5  ;;  %7876 = vmatpush.bf16.msra.mxu0 %v14474_v0  ;;  %v12638_v5 = vld [vmem:[#allocation10 + $0x4f4] sm:$0xf0]  ;;  %v11733_v0 = vld [vmem:[#allocation10 + $0x4f8] sm:$0xf0] }
0x1c95   :  { %v14598_v47 = vor.u32 %v12638_v5, %v11731_v27  ;;  %v14600_v31 = vor.u32 %v12636_v11, %v11733_v0  ;;  %v12620_v27 = vld [vmem:[#allocation10 + $0x46c] sm:$0xf]  ;;  %v14650_v5 = vor.u32 %v12619_v32, %v11661_v33  ;;  %v11643_v11 = vld [vmem:[#allocation10 + $0x440] sm:$0xf]  ;;  %v12617_v0 = vld [vmem:[#allocation10 + $0x44c] sm:$0xf0]  ;;  %v14680_v32 = vor.u32 %v12612_v22, %v11637_v41 }
0x1c96   :  { %v11619_v33 = vld [vmem:[#allocation10 + $0x408] sm:$0xf]  ;;  %v12601_v22 = vld [vmem:[#allocation10 + $0x3cc] sm:$0xf0] }
0x1c97   :  { %7838 = vmatpush.bf16.msra.mxu1 %v15310_v3  ;;  %7851 = vmatpush.bf16.msra.mxu2 %v15311_v19  ;;  %v14642_v3 = vor.u32 %v12626_v1, %v11683_v34  ;;  %v14674_v1 = vor.u32 %v12611_v62, %v11629_v10 }
0x1c98   :  { %7864 = vmatpush.bf16.msra.mxu3 %v14382_v43  ;;  %7877 = vmatpush.bf16.msra.mxu0 %v14480_v8  ;;  %v14596_v43 = vor.u32 %v12635_v49, %v11725_v15  ;;  %v11707_v8 = vld [vmem:[#allocation10 + $0x4c0] sm:$0xf]  ;;  %v11667_v49 = vld [vmem:[#allocation10 + $0x468] sm:$0xf]  ;;  %v12622_v15 = vld [vmem:[#allocation10 + $0x474] sm:$0xf0] }
0x1c99   :  { %v14608_v20 = vor.u32 %v12633_v2, %v11707_v8  ;;  %v14654_v8 = vor.u32 %v12622_v15, %v11667_v49  ;;  %v12610_v49 = vld [vmem:[#allocation10 + $0x414] sm:$0xf0]  ;;  %v12608_v15 = vld [vmem:[#allocation10 + $0x40c] sm:$0xf] }
0x1c9b   :  { %7839 = vmatpush.bf16.msra.mxu1 %v15312_v38  ;;  %7852 = vmatpush.bf16.msra.mxu2 %v15313_v63  ;;  %v11669_v38 = vld [vmem:[#allocation10 + $0x478] sm:$0xf0]  ;;  %v14648_v63 = vor.u32 %v12621_v55, %v11659_v14  ;;  %v11613_v14 = vld [vmem:[#allocation10 + $0x410] sm:$0xf0]  ;;  %v14678_v55 = vor.u32 %v12614_v37, %v11635_v39  ;;  %v11835_v37 = vld [vmem:[#allocation10 + $0x3c0] sm:$0xf] }
0x1c9c   :  { %7865 = vmatpush.bf16.msra.mxu3 %v14387_v21  ;;  %7878 = vmatpush.bf16.msra.mxu0 %v14484_v58  ;;  %v12634_v21 = vld [vmem:[#allocation10 + $0x4d4] sm:$0xf0]  ;;  %v11717_v58 = vld [vmem:[#allocation10 + $0x4d8] sm:$0xf0]  ;;  %v14656_v2 = vor.u32 %v12620_v27, %v11669_v38  ;;  %v11851_v38 = vld [vmem:[#allocation10 + $0x3e0] sm:$0xf] }
0x1c9d   :  { %v14616_v36 = vor.u32 %v12632_v56, %v11717_v58  ;;  %v11653_v56 = vld [vmem:[#allocation10 + $0x458] sm:$0xf0]  ;;  %v14660_v58 = vor.u32 %v12617_v0, %v11643_v11  ;;  %v12605_v11 = vld [vmem:[#allocation10 + $0x3ec] sm:$0xf0]  ;;  %v12603_v0 = vld [vmem:[#allocation10 + $0x3e4] sm:$0xf] }
0x1c9e   :  { %v11621_v27 = vld [vmem:[#allocation10 + $0x418] sm:$0xf0]  ;;  %v14694_v10 = vor.u32 %v12605_v11, %v11851_v38  ;;  %v14696_v39 = vor.u32 %v12603_v0, %v11853_v61  ;;  %v11819_v11 = vld [vmem:[#allocation10 + $0x3a0] sm:$0xf]  ;;  %v12597_v0 = vld [vmem:[#allocation10 + $0x3ac] sm:$0xf0] }
0x1c9f   :  { %7840 = vmatpush.bf16.msra.mxu1 %v14372_v28  ;;  %7853 = vmatpush.bf16.msra.mxu2 %v15314_v16  ;;  %v14614_v28 = vor.u32 %v12634_v21, %v11715_v26  ;;  %v11651_v26 = vld [vmem:[#allocation10 + $0x448] sm:$0xf]  ;;  %v12618_v16 = vld [vmem:[#allocation10 + $0x454] sm:$0xf0]  ;;  %v12616_v21 = vld [vmem:[#allocation10 + $0x44c] sm:$0xf]  ;;  %v14692_v62 = vor.u32 %v12608_v15, %v11621_v27  ;;  %v14708_v27 = vor.u32 %v12601_v22, %v11835_v37 }
0x1ca0   :  { %7866 = vmatpush.bf16.msra.mxu3 %v14392_v35  ;;  %7879 = vmatpush.bf16.msra.mxu0 %v14487_v46  ;;  %v12627_v35 = vld [vmem:[#allocation10 + $0x4a4] sm:$0xf]  ;;  %v11693_v46 = vld [vmem:[#allocation10 + $0x4b0] sm:$0xf0]  ;;  %v14668_v40 = vor.u32 %v12616_v21, %v11653_v56  ;;  %v12606_v21 = vld [vmem:[#allocation10 + $0x3f4] sm:$0xf0]  ;;  %v14724_v37 = vor.u32 %v12597_v0, %v11819_v11 }
0x1ca1   :  { %v14626_v17 = vor.u32 %v12627_v35, %v11693_v46  ;;  %v12613_v35 = vld [vmem:[#allocation10 + $0x42c] sm:$0xf0]  ;;  %v14666_v46 = vor.u32 %v12618_v16, %v11651_v26  ;;  %v12604_v56 = vld [vmem:[#allocation10 + $0x3ec] sm:$0xf]  ;;  %v14698_v41 = vor.u32 %v12606_v21, %v11859_v57  ;;  %v11845_v15 = vld [vmem:[#allocation10 + $0x3d8] sm:$0xf0] }
0x1ca2   :  { %7841 = vmatmul.bf16.vlgmr.msra.gmra.mxu1 %v14572_v7  ;;  %7854 = vmatmul.bf16.vlgmr.msra.gmra.mxu2 %v14572_v7  ;;  %v14672_v34 = vor.u32 %v12613_v35, %v11627_v45  ;;  %v11861_v45 = vld [vmem:[#allocation10 + $0x3f8] sm:$0xf0]  ;;  %v14690_v35 = vor.u32 %v12610_v49, %v11619_v33  ;;  %v12602_v33 = vld [vmem:[#allocation10 + $0x3d4] sm:$0xf0]  ;;  %v12600_v49 = vld [vmem:[#allocation10 + $0x3cc] sm:$0xf] }
0x1ca3   :  { %8260 = vmatpush.bf16.msrb.mxu1 %v14594_v30  ;;  %8273 = vmatpush.bf16.msrb.mxu2 %v14596_v43  ;;  %15315 = vst [vmem:[#allocation30_spill] sm:$0xff] %v14708_v27  ;;  %v14716_v57 = vor.u32 %v12600_v49, %v11845_v15  ;;  %v12595_v21 = vld [vmem:[#allocation10 + $0x3a4] sm:$0xf]  ;;  %v11805_v15 = vld [vmem:[#allocation10 + $0x390] sm:$0xf0] }
0x1ca4   :  { %8286 = vmatpush.bf16.msrb.mxu3 %v14598_v47  ;;  %8299 = vmatpush.bf16.msrb.mxu0 %v14600_v31  ;;  %15319 = vst [vmem:[#allocation19_spill] sm:$0xff] %v14724_v37  ;;  %v12591_v49 = vld [vmem:[#allocation10 + $0x384] sm:$0xf] }
0x1ca5   :  { %7867 = vmatmul.bf16.vlgmr.msra.gmra.mxu3 %v14572_v7  ;;  %7880 = vmatmul.bf16.vlgmr.msra.gmra.mxu0 %v14572_v7  ;;  %v11685_v7 = vld [vmem:[#allocation10 + $0x498] sm:$0xf0]  ;;  %15318 = vst [vmem:[#allocation42_spill] sm:$0xff] %v14716_v57  ;;  %v14738_v0 = vor.u32 %v12591_v49, %v11805_v15  ;;  %v11771_v49 = vld [vmem:[#allocation10 + $0x340] sm:$0xf] }
0x1ca6   :  { %v14644_v19 = vor.u32 %v12624_v23, %v11685_v7  ;;  %v12609_v23 = vld [vmem:[#allocation10 + $0x40c] sm:$0xf0]  ;;  %v12607_v7 = vld [vmem:[#allocation10 + $0x404] sm:$0xf] }
0x1ca7   :  { %8261 = vmatpush.bf16.msrb.mxu1 %v14608_v20  ;;  %8274 = vmatpush.bf16.msrb.mxu2 %v14610_v44  ;;  %v14684_v26 = vor.u32 %v12609_v23, %v11611_v9  ;;  %v14686_v16 = vor.u32 %v12607_v7, %v11613_v14  ;;  %v14700_v9 = vor.u32 %v12604_v56, %v11861_v45  ;;  %v12599_v23 = vld [vmem:[#allocation10 + $0x3c4] sm:$0xf]  ;;  %v11837_v7 = vld [vmem:[#allocation10 + $0x3d0] sm:$0xf0]  ;;  %v11843_v14 = vld [vmem:[#allocation10 + $0x3c8] sm:$0xf] }
0x1ca8   :  { %8287 = vmatpush.bf16.msrb.mxu3 %v14614_v28  ;;  %8300 = vmatpush.bf16.msrb.mxu0 %v14616_v36  ;;  %v14710_v38 = vor.u32 %v12599_v23, %v11837_v7  ;;  %v14714_v61 = vor.u32 %v12602_v33, %v11843_v14  ;;  %v11821_v56 = vld [vmem:[#allocation10 + $0x3b0] sm:$0xf0]  ;;  %v11827_v45 = vld [vmem:[#allocation10 + $0x3a8] sm:$0xf]  ;;  %v11803_v23 = vld [vmem:[#allocation10 + $0x380] sm:$0xf]  ;;  %v14732_v33 = vor.u32 %v12596_v13, %v11829_v50 }
0x1ca9   :  { %v14726_v22 = vor.u32 %v12595_v21, %v11821_v56  ;;  %v12593_v7 = vld [vmem:[#allocation10 + $0x38c] sm:$0xf0]  ;;  %v14730_v14 = vor.u32 %v12598_v60, %v11827_v45  ;;  %15324 = vst [vmem:[#allocation41_spill] sm:$0xff] %v14738_v0  ;;  %v11787_v21 = vld [vmem:[#allocation10 + $0x360] sm:$0xf]  ;;  %v14742_v13 = vor.u32 %v12594_v51, %v11811_v18  ;;  %v14744_v60 = vor.u32 %v12592_v48, %v11813_v59 }
0x1caa   :  { %15316 = vst [vmem:[#allocation33_spill] sm:$0xff] %v14710_v38  ;;  %v14736_v11 = vor.u32 %v12593_v7, %v11803_v23  ;;  %v12589_v56 = vld [vmem:[#allocation10 + $0x36c] sm:$0xf0]  ;;  %v12587_v50 = vld [vmem:[#allocation10 + $0x364] sm:$0xf]  ;;  %v14754_v18 = vor.u32 %v12590_v12, %v11795_v4 }
0x1cab   :  { %8262 = vmatpush.bf16.msrb.mxu1 %v14624_v24  ;;  %8275 = vmatpush.bf16.msrb.mxu2 %v14626_v17  ;;  %15317 = vst [vmem:[#allocation37_spill] sm:$0xff] %v14714_v61  ;;  %v11789_v45 = vld [vmem:[#allocation10 + $0x370] sm:$0xf0]  ;;  %v14748_v23 = vor.u32 %v12589_v56, %v11787_v21  ;;  %v12585_v15 = vld [vmem:[#allocation10 + $0x34c] sm:$0xf0] }
0x1cac   :  { %8288 = vmatpush.bf16.msrb.mxu3 %v14630_v52  ;;  %8301 = vmatpush.bf16.msrb.mxu0 %v14632_v25  ;;  %15320 = vst [vmem:[#allocation20_spill] sm:$0xff] %v14726_v22  ;;  %v14750_v7 = vor.u32 %v12587_v50, %v11789_v45  ;;  %v12583_v48 = vld [vmem:[#allocation10 + $0x344] sm:$0xf]  ;;  %v11773_v51 = vld [vmem:[#allocation10 + $0x350] sm:$0xf0]  ;;  %v14760_v21 = vor.u32 %v12585_v15, %v11771_v49 }
0x1cad   :  { %15321 = vst [vmem:[#allocation23_spill] sm:$0xff] %v14730_v14  ;;  %v14762_v56 = vor.u32 %v12583_v48, %v11773_v51  ;;  %v11755_v50 = vld [vmem:[#allocation10 + $0x320] sm:$0xf]  ;;  %v12581_v45 = vld [vmem:[#allocation10 + $0x32c] sm:$0xf0] }
0x1cae   :  { %15322 = vst [vmem:[#allocation28_spill] sm:$0xff] %v14732_v33  ;;  %v12579_v4 = vld [vmem:[#allocation10 + $0x324] sm:$0xf]  ;;  %v11739_v49 = vld [vmem:[#allocation10 + $0x300] sm:$0xf]  ;;  %v14772_v15 = vor.u32 %v12581_v45, %v11755_v50 }
0x1caf   :  { %8263 = vmatpush.bf16.msrb.mxu1 %v14636_v29  ;;  %8276 = vmatpush.bf16.msrb.mxu2 %v14638_v42  ;;  %15323 = vst [vmem:[#allocation24_spill] sm:$0xff] %v14736_v11  ;;  %v12577_v51 = vld [vmem:[#allocation10 + $0x30c] sm:$0xf0]  ;;  %v12667_v45 = vld [vmem:[#allocation10 + $0x5e4] sm:$0xf] }
0x1cb0   :  { %8289 = vmatpush.bf16.msrb.mxu3 %v14642_v3  ;;  %8302 = vmatpush.bf16.msrb.mxu0 %v14644_v19  ;;  %15325 = vst [vmem:[#allocation31_spill] sm:$0xff] %v14742_v13  ;;  %v12669_v50 = vld [vmem:[#allocation10 + $0x5ec] sm:$0xf0] }
0x1cb1   :  { %15326 = vst [vmem:[#allocation26_spill] sm:$0xff] %v14744_v60 }
0x1cb2   :  { %15327 = vst [vmem:[#allocation34_spill] sm:$0xff] %v14748_v23 }
0x1cb3   :  { %8264 = vmatpush.bf16.msrb.mxu1 %v14648_v63  ;;  %8277 = vmatpush.bf16.msrb.mxu2 %v14650_v5  ;;  %15328 = vst [vmem:[#allocation29_spill] sm:$0xff] %v14750_v7 }
0x1cb4   :  { %8290 = vmatpush.bf16.msrb.mxu3 %v14654_v8  ;;  %8303 = vmatpush.bf16.msrb.mxu0 %v14656_v2  ;;  %15329 = vst [vmem:[#allocation38_spill] sm:$0xff] %v14754_v18 }
0x1cb5   :  { %15331 = vst [vmem:[#allocation43_spill] sm:$0xff] %v14760_v21 }
0x1cb6   :  { %15332 = vst [vmem:[#allocation36_spill] sm:$0xff] %v14762_v56 }
0x1cb7   :  { %8265 = vmatpush.bf16.msrb.mxu1 %v14660_v58  ;;  %8278 = vmatpush.bf16.msrb.mxu2 %v14662_v6  ;;  %15335 = vst [vmem:[#allocation47_spill] sm:$0xff] %v14772_v15 }
0x1cb8   :  { %8291 = vmatpush.bf16.msrb.mxu3 %v14666_v46  ;;  %8304 = vmatpush.bf16.msrb.mxu0 %v14668_v40 }
0x1cbb   :  { %8266 = vmatpush.bf16.msrb.mxu1 %v14672_v34  ;;  %8279 = vmatpush.bf16.msrb.mxu2 %v14674_v1 }
0x1cbc   :  { %8292 = vmatpush.bf16.msrb.mxu3 %v14678_v55  ;;  %8305 = vmatpush.bf16.msrb.mxu0 %v14680_v32 }
0x1cbf   :  { %8267 = vmatpush.bf16.msrb.mxu1 %v14684_v26  ;;  %8280 = vmatpush.bf16.msrb.mxu2 %v14686_v16 }
0x1cc0   :  { %8293 = vmatpush.bf16.msrb.mxu3 %v14690_v35  ;;  %8306 = vmatpush.bf16.msrb.mxu0 %v14692_v62 }
0x1cc2   :  { %8281 = vmatmul.bf16.vlgmr.msrb.gmra.mxu2 %v15258_v53  ;;  %8268 = vmatmul.bf16.vlgmr.msrb.gmra.mxu1 %v15258_v53 }
0x1cc3   :  { %8472 = vmatpush.bf16.msra.mxu1 %v14694_v10  ;;  %8485 = vmatpush.bf16.msra.mxu2 %v14696_v39 }
0x1cc4   :  { %8498 = vmatpush.bf16.msra.mxu3 %v14698_v41  ;;  %8511 = vmatpush.bf16.msra.mxu0 %v14700_v9 }
0x1cc5   :  { %8294 = vmatmul.bf16.vlgmr.msrb.gmra.mxu3 %v15258_v53  ;;  %8307 = vmatmul.bf16.vlgmr.msrb.gmra.mxu0 %v15258_v53 }
0x1cc7   :  { %8473 = vmatpush.bf16.msra.mxu1 %v14708_v27  ;;  %8486 = vmatpush.bf16.msra.mxu2 %v14710_v38  ;;  %v11965_v38 = vld [vmem:[#allocation10 + $0x5d0] sm:$0xf0]  ;;  %v11971_v27 = vld [vmem:[#allocation10 + $0x5c8] sm:$0xf] }
0x1cc8   :  { %8499 = vmatpush.bf16.msra.mxu3 %v14714_v61  ;;  %8512 = vmatpush.bf16.msra.mxu0 %v14716_v57 }
0x1ccb   :  { %8474 = vmatpush.bf16.msra.mxu1 %v14724_v37  ;;  %8487 = vmatpush.bf16.msra.mxu2 %v14726_v22  ;;  %v11797_v22 = vld [vmem:[#allocation10 + $0x378] sm:$0xf0] }
0x1ccc   :  { %8500 = vmatpush.bf16.msra.mxu3 %v14730_v14  ;;  %8513 = vmatpush.bf16.msra.mxu0 %v14732_v33  ;;  %v14756_v59 = vor.u32 %v12588_v54, %v11797_v22  ;;  %v11779_v33 = vld [vmem:[#allocation10 + $0x348] sm:$0xf]  ;;  %v12584_v14 = vld [vmem:[#allocation10 + $0x34c] sm:$0xf]  ;;  %v11757_v22 = vld [vmem:[#allocation10 + $0x330] sm:$0xf0] }
0x1ccd   :  { %v14774_v48 = vor.u32 %v12579_v4, %v11757_v22  ;;  %v11749_v37 = vld [vmem:[#allocation10 + $0x318] sm:$0xf0]  ;;  %v11981_v4 = vld [vmem:[#allocation10 + $0x5f0] sm:$0xf0]  ;;  %v11987_v22 = vld [vmem:[#allocation10 + $0x5e8] sm:$0xf] }
0x1cce   :  { %15330 = vst [vmem:[#allocation32_spill] sm:$0xff] %v14756_v59 }
0x1ccf   :  { %8475 = vmatpush.bf16.msra.mxu1 %v14736_v11  ;;  %8488 = vmatpush.bf16.msra.mxu2 %v14738_v0  ;;  %v12586_v11 = vld [vmem:[#allocation10 + $0x354] sm:$0xf0]  ;;  %v11781_v0 = vld [vmem:[#allocation10 + $0x358] sm:$0xf0]  ;;  %15336 = vst [vmem:[#allocation44_spill] sm:$0xff] %v14774_v48 }
0x1cd0   :  { %8501 = vmatpush.bf16.msra.mxu3 %v14742_v13  ;;  %8514 = vmatpush.bf16.msra.mxu0 %v14744_v60  ;;  %v14766_v54 = vor.u32 %v12586_v11, %v11779_v33  ;;  %v14768_v12 = vor.u32 %v12584_v14, %v11781_v0  ;;  %v11763_v60 = vld [vmem:[#allocation10 + $0x328] sm:$0xf]  ;;  %v12580_v13 = vld [vmem:[#allocation10 + $0x32c] sm:$0xf]  ;;  %v12575_v33 = vld [vmem:[#allocation10 + $0x304] sm:$0xf] }
0x1cd1   :  { %v11741_v11 = vld [vmem:[#allocation10 + $0x310] sm:$0xf0] }
0x1cd2   :  { %15333 = vst [vmem:[#allocation45_spill] sm:$0xff] %v14766_v54 }
0x1cd3   :  { %8476 = vmatpush.bf16.msra.mxu1 %v14748_v23  ;;  %8489 = vmatpush.bf16.msra.mxu2 %v14750_v7  ;;  %15334 = vst [vmem:[#allocation40_spill] sm:$0xff] %v14768_v12  ;;  %v12582_v23 = vld [vmem:[#allocation10 + $0x334] sm:$0xf0]  ;;  %v11765_v7 = vld [vmem:[#allocation10 + $0x338] sm:$0xf0] }
0x1cd4   :  { %8502 = vmatpush.bf16.msra.mxu3 %v14754_v18  ;;  %8515 = vmatpush.bf16.msra.mxu0 %v14756_v59  ;;  %v14778_v14 = vor.u32 %v12582_v23, %v11763_v60  ;;  %v14780_v0 = vor.u32 %v12580_v13, %v11765_v7  ;;  %v11747_v59 = vld [vmem:[#allocation10 + $0x308] sm:$0xf]  ;;  %v12578_v18 = vld [vmem:[#allocation10 + $0x314] sm:$0xf0]  ;;  %v12668_v13 = vld [vmem:[#allocation10 + $0x5ec] sm:$0xf] }
0x1cd5   :  { %v12670_v60 = vld [vmem:[#allocation10 + $0x5f4] sm:$0xf0]  ;;  %v11989_v23 = vld [vmem:[#allocation10 + $0x5f8] sm:$0xf0]  ;;  %v14790_v7 = vor.u32 %v12578_v18, %v11747_v59 }
0x1cd6   :  { %v12666_v18 = vld [vmem:[#allocation10 + $0x5d4] sm:$0xf0]  ;;  %v11973_v59 = vld [vmem:[#allocation10 + $0x5d8] sm:$0xf0] }
0x1cd7   :  { %8477 = vmatpush.bf16.msra.mxu1 %v14760_v21  ;;  %8490 = vmatpush.bf16.msra.mxu2 %v14762_v56  ;;  %v12576_v21 = vld [vmem:[#allocation10 + $0x30c] sm:$0xf]  ;;  %v11979_v56 = vld [vmem:[#allocation10 + $0x5e0] sm:$0xf] }
0x1cd8   :  { %8503 = vmatpush.bf16.msra.mxu3 %v14766_v54  ;;  %8516 = vmatpush.bf16.msra.mxu0 %v14768_v12  ;;  %v14784_v54 = vor.u32 %v12577_v51, %v11739_v49  ;;  %v14786_v12 = vor.u32 %v12575_v33, %v11741_v11  ;;  %v14792_v57 = vor.u32 %v12576_v21, %v11749_v37  ;;  %v12665_v49 = vld [vmem:[#allocation10 + $0x5cc] sm:$0xf0]  ;;  %v12663_v11 = vld [vmem:[#allocation10 + $0x5c4] sm:$0xf]  ;;  %v12664_v37 = vld [vmem:[#allocation10 + $0x5cc] sm:$0xf] }
0x1cd9   :  { %v14794_v61 = vor.u32 %v12669_v50, %v11979_v56  ;;  %v14798_v51 = vor.u32 %v12670_v60, %v11987_v22  ;;  %v14800_v33 = vor.u32 %v12668_v13, %v11989_v23  ;;  %v14810_v56 = vor.u32 %v12663_v11, %v11965_v38  ;;  %v11947_v50 = vld [vmem:[#allocation10 + $0x5a0] sm:$0xf]  ;;  %v12659_v60 = vld [vmem:[#allocation10 + $0x5a4] sm:$0xf]  ;;  %v11949_v13 = vld [vmem:[#allocation10 + $0x5b0] sm:$0xf0] }
0x1cda   :  { %15337 = vst [vmem:[#allocation46_spill] sm:$0xff] %v14792_v57  ;;  %v14816_v22 = vor.u32 %v12664_v37, %v11973_v59  ;;  %v11955_v23 = vld [vmem:[#allocation10 + $0x5a8] sm:$0xf]  ;;  %v12660_v38 = vld [vmem:[#allocation10 + $0x5ac] sm:$0xf]  ;;  %v14826_v11 = vor.u32 %v12659_v60, %v11949_v13 }
0x1cdb   :  { %8478 = vmatpush.bf16.msra.mxu1 %v14772_v15  ;;  %8491 = vmatpush.bf16.msra.mxu2 %v14774_v48  ;;  %15338 = vst [vmem:[#allocation48_spill] sm:$0xff] %v14794_v61  ;;  %v14796_v15 = vor.u32 %v12667_v45, %v11981_v4  ;;  %v11963_v48 = vld [vmem:[#allocation10 + $0x5c0] sm:$0xf]  ;;  %v12661_v45 = vld [vmem:[#allocation10 + $0x5ac] sm:$0xf0]  ;;  %v14814_v4 = vor.u32 %v12666_v18, %v11971_v27 }
0x1cdc   :  { %8504 = vmatpush.bf16.msra.mxu3 %v14778_v14  ;;  %8517 = vmatpush.bf16.msra.mxu0 %v14780_v0  ;;  %15340 = vst [vmem:[#allocation50_spill] sm:$0xff] %v14798_v51  ;;  %v14808_v21 = vor.u32 %v12665_v49, %v11963_v48  ;;  %v12662_v48 = vld [vmem:[#allocation10 + $0x5b4] sm:$0xf0]  ;;  %v11957_v49 = vld [vmem:[#allocation10 + $0x5b8] sm:$0xf0]  ;;  %v14824_v27 = vor.u32 %v12661_v45, %v11947_v50 }
0x1cdd   :  { %15339 = vst [vmem:[#allocation49_spill] sm:$0xff] %v14796_v15  ;;  %v11931_v18 = vld [vmem:[#allocation10 + $0x580] sm:$0xf]  ;;  %v12657_v37 = vld [vmem:[#allocation10 + $0x58c] sm:$0xf0]  ;;  %v14830_v59 = vor.u32 %v12662_v48, %v11955_v23 }
0x1cde   :  { %15341 = vst [vmem:[#allocation51_spill] sm:$0xff] %v14800_v33  ;;  %v14836_v50 = vor.u32 %v12657_v37, %v11931_v18  ;;  %v11915_v60 = vld [vmem:[#allocation10 + $0x560] sm:$0xf]  ;;  %v12653_v13 = vld [vmem:[#allocation10 + $0x56c] sm:$0xf0] }
0x1cdf   :  { %8479 = vmatpush.bf16.msra.mxu1 %v14784_v54  ;;  %8492 = vmatpush.bf16.msra.mxu2 %v14786_v12  ;;  %15342 = vst [vmem:[#allocation52_spill] sm:$0xff] %v14808_v21  ;;  %v11899_v18 = vld [vmem:[#allocation10 + $0x540] sm:$0xf]  ;;  %v12649_v37 = vld [vmem:[#allocation10 + $0x54c] sm:$0xf0] }
0x1ce0   :  { %8505 = vmatpush.bf16.msra.mxu3 %v14790_v7  ;;  %8518 = vmatpush.bf16.msra.mxu0 %v14792_v57  ;;  %15343 = vst [vmem:[#allocation53_spill] sm:$0xff] %v14810_v56  ;;  %v12656_v57 = vld [vmem:[#allocation10 + $0x58c] sm:$0xf] }
0x1ce1   :  { %15344 = vst [vmem:[#allocation54_spill] sm:$0xff] %v14814_v4 }
0x1ce2   :  { %15345 = vst [vmem:[#allocation55_spill] sm:$0xff] %v14816_v22  ;;  %8493 = vmatmul.bf16.vlgmr.msra.gmra.mxu2 %v15258_v53  ;;  %8480 = vmatmul.bf16.vlgmr.msra.gmra.mxu1 %v15258_v53 }
0x1ce3   :  { %8684 = vmatpush.bf16.msrb.mxu1 %v14794_v61  ;;  %8697 = vmatpush.bf16.msrb.mxu2 %v14796_v15  ;;  %15346 = vst [vmem:[#allocation56_spill] sm:$0xff] %v14824_v27  ;;  %v11933_v15 = vld [vmem:[#allocation10 + $0x590] sm:$0xf0]  ;;  %v11939_v61 = vld [vmem:[#allocation10 + $0x588] sm:$0xf] }
0x1ce4   :  { %8710 = vmatpush.bf16.msrb.mxu3 %v14798_v51  ;;  %8723 = vmatpush.bf16.msrb.mxu0 %v14800_v33  ;;  %15347 = vst [vmem:[#allocation57_spill] sm:$0xff] %v14826_v11  ;;  %v14832_v33 = vor.u32 %v12660_v38, %v11957_v49  ;;  %v12655_v51 = vld [vmem:[#allocation10 + $0x584] sm:$0xf]  ;;  %v11917_v49 = vld [vmem:[#allocation10 + $0x570] sm:$0xf0] }
0x1ce5   :  { %8506 = vmatmul.bf16.vlgmr.msra.gmra.mxu3 %v15258_v53  ;;  %8519 = vmatmul.bf16.vlgmr.msra.gmra.mxu0 %v15258_v53  ;;  %15348 = vst [vmem:[#allocation58_spill] sm:$0xff] %v14830_v59  ;;  %v14838_v45 = vor.u32 %v12655_v51, %v11933_v15  ;;  %v12651_v38 = vld [vmem:[#allocation10 + $0x564] sm:$0xf]  ;;  %v14848_v15 = vor.u32 %v12653_v13, %v11915_v60 }
0x1ce6   :  { %15349 = vst [vmem:[#allocation59_spill] sm:$0xff] %v14832_v33  ;;  %v14850_v51 = vor.u32 %v12651_v38, %v11917_v49  ;;  %v14860_v60 = vor.u32 %v12649_v37, %v11899_v18  ;;  %v11883_v38 = vld [vmem:[#allocation10 + $0x520] sm:$0xf]  ;;  %v12645_v49 = vld [vmem:[#allocation10 + $0x52c] sm:$0xf0] }
0x1ce7   :  { %8685 = vmatpush.bf16.msrb.mxu1 %v14808_v21  ;;  %8698 = vmatpush.bf16.msrb.mxu2 %v14810_v56  ;;  %v12658_v21 = vld [vmem:[#allocation10 + $0x594] sm:$0xf0]  ;;  %v11941_v56 = vld [vmem:[#allocation10 + $0x598] sm:$0xf0]  ;;  %15350 = vst [vmem:[#allocation60_spill] sm:$0xff] %v14836_v50  ;;  %v14872_v18 = vor.u32 %v12645_v49, %v11883_v38 }
0x1ce8   :  { %8711 = vmatpush.bf16.msrb.mxu3 %v14814_v4  ;;  %8724 = vmatpush.bf16.msrb.mxu0 %v14816_v22  ;;  %15351 = vst [vmem:[#allocation61_spill] sm:$0xff] %v14838_v45  ;;  %v14842_v23 = vor.u32 %v12658_v21, %v11939_v61  ;;  %v14844_v48 = vor.u32 %v12656_v57, %v11941_v56  ;;  %v11923_v22 = vld [vmem:[#allocation10 + $0x568] sm:$0xf]  ;;  %v12652_v4 = vld [vmem:[#allocation10 + $0x56c] sm:$0xf] }
0x1ce9   :  { %15354 = vst [vmem:[#allocation64_spill] sm:$0xff] %v14848_v15  ;;  %v12647_v21 = vld [vmem:[#allocation10 + $0x544] sm:$0xf]  ;;  %v11901_v56 = vld [vmem:[#allocation10 + $0x550] sm:$0xf0] }
0x1cea   :  { %15352 = vst [vmem:[#allocation62_spill] sm:$0xff] %v14842_v23  ;;  %v14862_v13 = vor.u32 %v12647_v21, %v11901_v56  ;;  %v11867_v21 = vld [vmem:[#allocation10 + $0x500] sm:$0xf]  ;;  %v12641_v56 = vld [vmem:[#allocation10 + $0x50c] sm:$0xf0] }
0x1ceb   :  { %8686 = vmatpush.bf16.msrb.mxu1 %v14824_v27  ;;  %8699 = vmatpush.bf16.msrb.mxu2 %v14826_v11  ;;  %15353 = vst [vmem:[#allocation63_spill] sm:$0xff] %v14844_v48  ;;  %v12654_v27 = vld [vmem:[#allocation10 + $0x574] sm:$0xf0]  ;;  %v11925_v11 = vld [vmem:[#allocation10 + $0x578] sm:$0xf0]  ;;  %v14884_v38 = vor.u32 %v12641_v56, %v11867_v21  ;;  %v15375_v56 = vld [vmem:[#allocation34_spill] sm:$0xff] }
0x1cec   :  { %8712 = vmatpush.bf16.msrb.mxu3 %v14830_v59  ;;  %8725 = vmatpush.bf16.msrb.mxu0 %v14832_v33  ;;  %15355 = vst [vmem:[#allocation65_spill] sm:$0xff] %v14850_v51  ;;  %v14854_v61 = vor.u32 %v12654_v27, %v11923_v22  ;;  %v14856_v57 = vor.u32 %v12652_v4, %v11925_v11  ;;  %v11907_v33 = vld [vmem:[#allocation10 + $0x548] sm:$0xf]  ;;  %v12648_v59 = vld [vmem:[#allocation10 + $0x54c] sm:$0xf] }
0x1ced   :  { %15358 = vst [vmem:[#allocation68_spill] sm:$0xff] %v14860_v60  ;;  %v12643_v27 = vld [vmem:[#allocation10 + $0x524] sm:$0xf]  ;;  %v11885_v11 = vld [vmem:[#allocation10 + $0x530] sm:$0xf0] }
0x1cee   :  { %15356 = vst [vmem:[#allocation66_spill] sm:$0xff] %v14854_v61  ;;  %v14874_v37 = vor.u32 %v12643_v27, %v11885_v11  ;;  %v15373_v27 = vld [vmem:[#allocation31_spill] sm:$0xff]  ;;  %v15374_v11 = vld [vmem:[#allocation26_spill] sm:$0xff] }
0x1cef   :  { %8687 = vmatpush.bf16.msrb.mxu1 %v14836_v50  ;;  %8700 = vmatpush.bf16.msrb.mxu2 %v14838_v45  ;;  %15357 = vst [vmem:[#allocation67_spill] sm:$0xff] %v14856_v57  ;;  %v12650_v50 = vld [vmem:[#allocation10 + $0x554] sm:$0xf0]  ;;  %v11909_v45 = vld [vmem:[#allocation10 + $0x558] sm:$0xf0] }
0x1cf0   :  { %8713 = vmatpush.bf16.msrb.mxu3 %v14842_v23  ;;  %8726 = vmatpush.bf16.msrb.mxu0 %v14844_v48  ;;  %15359 = vst [vmem:[#allocation69_spill] sm:$0xff] %v14862_v13  ;;  %v14866_v4 = vor.u32 %v12650_v50, %v11907_v33  ;;  %v14868_v22 = vor.u32 %v12648_v59, %v11909_v45  ;;  %v11891_v48 = vld [vmem:[#allocation10 + $0x528] sm:$0xf]  ;;  %v12644_v23 = vld [vmem:[#allocation10 + $0x52c] sm:$0xf] }
0x1cf1   :  { %v12639_v50 = vld [vmem:[#allocation10 + $0x504] sm:$0xf]  ;;  %v11869_v45 = vld [vmem:[#allocation10 + $0x510] sm:$0xf0] }
0x1cf2   :  { %v14886_v49 = vor.u32 %v12639_v50, %v11869_v45  ;;  %v15376_v50 = vld [vmem:[#allocation29_spill] sm:$0xff] }
0x1cf3   :  { %8688 = vmatpush.bf16.msrb.mxu1 %v14848_v15  ;;  %8701 = vmatpush.bf16.msrb.mxu2 %v14850_v51  ;;  %v12646_v15 = vld [vmem:[#allocation10 + $0x534] sm:$0xf0]  ;;  %v11893_v51 = vld [vmem:[#allocation10 + $0x538] sm:$0xf0] }
0x1cf4   :  { %8714 = vmatpush.bf16.msrb.mxu3 %v14854_v61  ;;  %8727 = vmatpush.bf16.msrb.mxu0 %v14856_v57  ;;  %v14878_v33 = vor.u32 %v12646_v15, %v11891_v48  ;;  %v14880_v59 = vor.u32 %v12644_v23, %v11893_v51  ;;  %v11875_v57 = vld [vmem:[#allocation10 + $0x508] sm:$0xf]  ;;  %v12640_v61 = vld [vmem:[#allocation10 + $0x50c] sm:$0xf] }
0x1cf7   :  { %8689 = vmatpush.bf16.msrb.mxu1 %v14860_v60  ;;  %8702 = vmatpush.bf16.msrb.mxu2 %v14862_v13  ;;  %v12642_v60 = vld [vmem:[#allocation10 + $0x514] sm:$0xf0]  ;;  %v11877_v13 = vld [vmem:[#allocation10 + $0x518] sm:$0xf0] }
0x1cf8   :  { %8715 = vmatpush.bf16.msrb.mxu3 %v14866_v4  ;;  %8728 = vmatpush.bf16.msrb.mxu0 %v14868_v22  ;;  %v14890_v23 = vor.u32 %v12642_v60, %v11875_v57  ;;  %v14892_v48 = vor.u32 %v12640_v61, %v11877_v13 }
0x1cfb   :  { %8690 = vmatpush.bf16.msrb.mxu1 %v14872_v18  ;;  %8703 = vmatpush.bf16.msrb.mxu2 %v14874_v37 }
0x1cfc   :  { %8716 = vmatpush.bf16.msrb.mxu3 %v14878_v33  ;;  %8729 = vmatpush.bf16.msrb.mxu0 %v14880_v59 }
0x1cfe   :  { %v7738_v15 = vpop.f32.mrf.mxu1 }
0x1cff   :  { %8691 = vmatpush.bf16.msrb.mxu1 %v14884_v38  ;;  %8704 = vmatpush.bf16.msrb.mxu2 %v14886_v49  ;;  %v7777_v51 = vpop.f32.mrf.mxu0 }
0x1d00   :  { %8717 = vmatpush.bf16.msrb.mxu3 %v14890_v23  ;;  %8730 = vmatpush.bf16.msrb.mxu0 %v14892_v48 }
0x1d02   :  { %8692 = vmatmul.bf16.vlgmr.msrb.gmra.mxu1 %v15258_v53  ;;  %8705 = vmatmul.bf16.vlgmr.msrb.gmra.mxu2 %v15258_v53 }
0x1d03   :  { %8876 = vmatpush.bf16.msra.mxu1 %v14594_v30  ;;  %8889 = vmatpush.bf16.msra.mxu2 %v14596_v43 }
0x1d04   :  { %8718 = vmatmul.bf16.vlgmr.msrb.gmra.mxu3 %v15258_v53  ;;  %8731 = vmatmul.bf16.vlgmr.msrb.gmra.mxu0 %v15258_v53  ;;  %v7751_v30 = vpop.f32.mrf.mxu2 }
0x1d05   :  { %8902 = vmatpush.bf16.msra.mxu3 %v14598_v47  ;;  %8915 = vmatpush.bf16.msra.mxu0 %v14600_v31  ;;  %v14912_v53 = vpop.f32.mrf.mxu3 }
0x1d06   :  { %v7740_v43 = vpop.f32.mrf.mxu1 }
0x1d07   :  { %8877 = vmatpush.bf16.msra.mxu1 %v14608_v20  ;;  %8890 = vmatpush.bf16.msra.mxu2 %v14610_v44  ;;  %v7779_v47 = vpop.f32.mrf.mxu0  ;;  %v15378_v43 = vld [vmem:[#allocation38_spill] sm:$0xff] }
0x1d08   :  { %v15379_v47 = vld [vmem:[#allocation32_spill] sm:$0xff] }
0x1d09   :  { %8903 = vmatpush.bf16.msra.mxu3 %v14614_v28  ;;  %8916 = vmatpush.bf16.msra.mxu0 %v14616_v36 }
0x1d0b   :  { %8878 = vmatpush.bf16.msra.mxu1 %v14624_v24  ;;  %8891 = vmatpush.bf16.msra.mxu2 %v14626_v17 }
0x1d0c   :  { %v7753_v31 = vpop.f32.mrf.mxu2 }
0x1d0d   :  { %8904 = vmatpush.bf16.msra.mxu3 %v14630_v52  ;;  %8917 = vmatpush.bf16.msra.mxu0 %v14632_v25  ;;  %v7766_v20 = vpop.f32.mrf.mxu3  ;;  %v15380_v31 = vld [vmem:[#allocation43_spill] sm:$0xff] }
0x1d0e   :  { %v7790_v44 = vpop.f32.mrf.mxu1  ;;  %v15381_v20 = vld [vmem:[#allocation36_spill] sm:$0xff] }
0x1d0f   :  { %8879 = vmatpush.bf16.msra.mxu1 %v14636_v29  ;;  %8892 = vmatpush.bf16.msra.mxu2 %v14638_v42  ;;  %v7829_v28 = vpop.f32.mrf.mxu0  ;;  %v15360_v29 = vld [vmem:[#allocation30_spill] sm:$0xff]  ;;  %v15361_v42 = vld [vmem:[#allocation33_spill] sm:$0xff] }
0x1d11   :  { %8905 = vmatpush.bf16.msra.mxu3 %v14642_v3  ;;  %8918 = vmatpush.bf16.msra.mxu0 %v14644_v19  ;;  %v7791_v19 = vadd.f32 %v7790_v44, %v7738_v15 }
0x1d13   :  { %8880 = vmatpush.bf16.msra.mxu1 %v14648_v63  ;;  %8893 = vmatpush.bf16.msra.mxu2 %v14650_v5  ;;  %v15362_v63 = vld [vmem:[#allocation37_spill] sm:$0xff]  ;;  %v15363_v5 = vld [vmem:[#allocation42_spill] sm:$0xff] }
0x1d14   :  { %v7803_v36 = vpop.f32.mrf.mxu2 }
0x1d15   :  { %8906 = vmatpush.bf16.msra.mxu3 %v14654_v8  ;;  %8919 = vmatpush.bf16.msra.mxu0 %v14656_v2  ;;  %v14930_v24 = vpop.f32.mrf.mxu3  ;;  %v7830_v8 = vadd.f32 %v7829_v28, %v7777_v51 }
0x1d16   :  { %v7792_v17 = vpop.f32.mrf.mxu1 }
0x1d17   :  { %8881 = vmatpush.bf16.msra.mxu1 %v14660_v58  ;;  %8894 = vmatpush.bf16.msra.mxu2 %v14662_v6  ;;  %v7831_v52 = vpop.f32.mrf.mxu0  ;;  %v15364_v58 = vld [vmem:[#allocation19_spill] sm:$0xff]  ;;  %v15365_v6 = vld [vmem:[#allocation20_spill] sm:$0xff] }
0x1d19   :  { %8907 = vmatpush.bf16.msra.mxu3 %v14666_v46  ;;  %8920 = vmatpush.bf16.msra.mxu0 %v14668_v40 }
0x1d1b   :  { %8882 = vmatpush.bf16.msra.mxu1 %v14672_v34  ;;  %8895 = vmatpush.bf16.msra.mxu2 %v14674_v1  ;;  %v15366_v1 = vld [vmem:[#allocation35_spill] sm:$0xff] }
0x1d1c   :  { %v7805_v25 = vpop.f32.mrf.mxu2  ;;  %v15377_v45 = vperm.slane %v15366_v1, 1 }
0x1d1d   :  { %8908 = vmatpush.bf16.msra.mxu3 %v14678_v55  ;;  %8921 = vmatpush.bf16.msra.mxu0 %v14680_v32  ;;  %v7818_v3 = vpop.f32.mrf.mxu3  ;;  %v15367_v55 = vperm.slane %v15366_v1, 0  ;;  %v15382_v25 = vld [vmem:[#allocation45_spill] sm:$0xff] }
0x1d1e   :  { %v15385_v3 = vld [vmem:[#allocation44_spill] sm:$0xff] }
0x1d1f   :  { %8883 = vmatpush.bf16.msra.mxu1 %v14684_v26  ;;  %8896 = vmatpush.bf16.msra.mxu2 %v14686_v16  ;;  %v7842_v2 = vpop.f32.mrf.mxu1  ;;  %v15368_v26 = vld [vmem:[#allocation23_spill] sm:$0xff]  ;;  %v15369_v16 = vld [vmem:[#allocation28_spill] sm:$0xff] }
0x1d20   :  { %v7885_v46 = vadd.f32 %v7842_v2, %v7791_v19  ;;  %v7817_v2 = vadd.f32 %v14930_v24, %v14912_v53 }
0x1d21   :  { %8909 = vmatpush.bf16.msra.mxu3 %v14690_v35  ;;  %8922 = vmatpush.bf16.msra.mxu0 %v14692_v62  ;;  %v15370_v35 = vperm.slane %v15366_v1, 3 }
0x1d22   :  { %v7881_v40 = vpop.f32.mrf.mxu0  ;;  %v7889_v32 = vadd.f32 %v7885_v46, %v15367_v55 }
0x1d23   :  { %8928 = vmatpush.bf16.msrb.mxu1 %v14694_v10  ;;  %8941 = vmatpush.bf16.msrb.mxu2 %v14696_v39  ;;  %v7888_v34 = vadd.f32 %v7881_v40, %v7830_v8  ;;  %v15371_v10 = vld [vmem:[#allocation24_spill] sm:$0xff]  ;;  %v15372_v39 = vld [vmem:[#allocation41_spill] sm:$0xff] }
0x1d25   :  { %8954 = vmatpush.bf16.msrb.mxu3 %v14698_v41  ;;  %8967 = vmatpush.bf16.msrb.mxu0 %v14700_v9  ;;  %v7892_v62 = vadd.f32 %v7888_v34, %v15370_v35  ;;  %v7804_v41 = vadd.f32 %v7803_v36, %v7751_v30  ;;  %v11605_v9 = vmul.f32 -1.442695, %v7889_v32  ;;  %v7855_v57 = vpop.f32.mrf.mxu2 }
0x1d27   :  { %8929 = vmatpush.bf16.msrb.mxu1 %v15360_v29  ;;  %8942 = vmatpush.bf16.msrb.mxu2 %v15361_v42  ;;  %v11607_v61 = vmul.f32 -1.442695, %v7892_v62  ;;  %13027 = vpow2.f32 %v11605_v9  ;;  %v7886_v60 = vadd.f32 %v7855_v57, %v7804_v41  ;;  %v7844_v21 = vpop.f32.mrf.mxu1  ;;  %v15383_v29 = vld [vmem:[#allocation40_spill] sm:$0xff]  ;;  %v15384_v42 = vld [vmem:[#allocation47_spill] sm:$0xff] }
0x1d28   :  { %v7868_v13 = vpop.f32.mrf.mxu3 }
0x1d29   :  { %8955 = vmatpush.bf16.msrb.mxu3 %v15362_v63  ;;  %8968 = vmatpush.bf16.msrb.mxu0 %v15363_v5  ;;  %13029 = vpow2.f32 %v11607_v61  ;;  %v7890_v15 = vadd.f32 %v7886_v60, %v15377_v45 }
0x1d2a   :  { %v7883_v51 = vpop.f32.mrf.mxu0 }
0x1d2b   :  { %8930 = vmatpush.bf16.msrb.mxu1 %v15364_v58  ;;  %8943 = vmatpush.bf16.msrb.mxu2 %v15365_v6  ;;  %v11606_v30 = vmul.f32 -1.442695, %v7890_v15  ;;  %v15386_v6 = vld [vmem:[#allocation46_spill] sm:$0xff]  ;;  %v15388_v15 = vld [vmem:[#allocation39_spill] sm:$0xff] }
0x1d2d   :  { %8956 = vmatpush.bf16.msrb.mxu3 %v15368_v26  ;;  %8969 = vmatpush.bf16.msrb.mxu0 %v15369_v16  ;;  %v13028_v44 = vpop.eup %13027  ;;  %13031 = vpow2.f32 %v11606_v30  ;;  %v7857_v17 = vpop.f32.mrf.mxu2 }
0x1d2e   :  { %v7896_v36 = vadd.f32 1.0, %v13028_v44 }
0x1d2f   :  { %8931 = vmatpush.bf16.msrb.mxu1 %v15371_v10  ;;  %8944 = vmatpush.bf16.msrb.mxu2 %v15372_v39  ;;  %v13030_v28 = vpop.eup %13029 }
0x1d30   :  { %v7870_v52 = vpop.f32.mrf.mxu3  ;;  %13033 = vrcp.f32 %v7896_v36  ;;  %v14970_v19 = vadd.f32 1.0, %v13030_v28  ;;  %v7908_v26 = vand.u32 2147483648, %v7896_v36  ;;  %vm7902_vm11 = vweird.f32 %v7896_v36 }
0x1d31   :  { %8957 = vmatpush.bf16.msrb.mxu3 %v15373_v27  ;;  %8970 = vmatpush.bf16.msrb.mxu0 %v15374_v11 }
0x1d32   :  { %13035 = vrcp.f32 %v14970_v19  ;;  %vm7941_vm5 = vweird.f32 %v14970_v19  ;;  %v7945_v28 = vand.u32 2147483647, %v14970_v19 }
0x1d33   :  { %8932 = vmatpush.bf16.msrb.mxu1 %v15375_v56  ;;  %8945 = vmatpush.bf16.msrb.mxu2 %v15376_v50  ;;  %v13032_v63 = vpop.eup %13031 }
0x1d34   :  { %v7915_v5 = vadd.f32 1.0, %v13032_v63  ;;  %vm7946_vm2 = vcmp.eq.f32.partialorder %v7945_v28, 8.507059e+37 }
0x1d35   :  { %8958 = vmatpush.bf16.msrb.mxu3 %v15378_v43  ;;  %8971 = vmatpush.bf16.msrb.mxu0 %v15379_v47 }
0x1d36   :  { %v13034_v8 = vpop.eup %13033  ;;  %13037 = vrcp.f32 %v7915_v5  ;;  %v7927_v62 = vand.u32 2147483648, %v7915_v5  ;;  %v7925_v41 = vand.u32 2147483647, %v7915_v5  ;;  %vm7921_vm15 = vweird.f32 %v7915_v5 }
0x1d37   :  { %8933 = vmatpush.bf16.msrb.mxu1 %v15380_v31  ;;  %8946 = vmatpush.bf16.msrb.mxu2 %v15381_v20  ;;  %v7898_v58 = vmul.f32 %v13034_v8, %v7896_v36  ;;  %vm7903_vm10 = vweird.f32 %v13034_v8  ;;  %v7947_v20 = vand.u32 2147483648, %v14970_v19 }
0x1d38   :  { %vm7904_vm12 = vmor %vm7902_vm11, %vm7903_vm10  ;;  %v7928_v57 = vor.u32 1.1754944e-38, %v7927_v62  ;;  %vm7926_vm4 = vcmp.eq.f32.partialorder %v7925_v41, 8.507059e+37 }
0x1d39   :  { %8959 = vmatpush.bf16.msrb.mxu3 %v15382_v25  ;;  %8972 = vmatpush.bf16.msrb.mxu0 %v15383_v29  ;;  %v7899_v46 = vsub.f32 1.0, %v7898_v58  ;;  %v7948_v52 = vor.u32 1.1754944e-38, %v7947_v20 }
0x1d3b   :  { %8934 = vmatpush.bf16.msrb.mxu1 %v15384_v42  ;;  %8947 = vmatpush.bf16.msrb.mxu2 %v15385_v3  ;;  %v7900_v40 = vmul.f32 %v13034_v8, %v7899_v46 }
0x1d3d   :  { %8960 = vmatpush.bf16.msrb.mxu3 %v14778_v14  ;;  %8973 = vmatpush.bf16.msrb.mxu0 %v14780_v0  ;;  %v7887_v14 = vadd.f32 %v7868_v13, %v7817_v2  ;;  %v13036_v0 = vpop.eup %13035  ;;  %v7901_v32 = vadd.f32 %v13034_v8, %v7900_v40 }
0x1d3e   :  { %v13038_v34 = vpop.eup %13037  ;;  %v7937_v53 = vmul.f32 %v13036_v0, %v14970_v19  ;;  %vm7942_vm14 = vweird.f32 %v13036_v0 }
0x1d3f   :  { %8935 = vmatpush.bf16.msrb.mxu1 %v14784_v54  ;;  %8948 = vmatpush.bf16.msrb.mxu2 %v14786_v12  ;;  %v15387_v54 = vperm.slane %v15366_v1, 2  ;;  %v7917_v55 = vmul.f32 %v13038_v34, %v7915_v5  ;;  %v8269_v16 = vpop.f32.mrf.mxu1  ;;  %vm7922_vm13 = vweird.f32 %v13038_v34  ;;  %v7905_v39 = vsel %vm7904_vm12, %v13034_v8, %v7901_v32  ;;  %vm7943_vm6 = vmor %vm7941_vm5, %vm7942_vm14 }
0x1d40   :  { %v7909_v1 = vor.u32 1.1754944e-38, %v7908_v26  ;;  %v7938_v9 = vsub.f32 1.0, %v7937_v53  ;;  %vm7923_vm3 = vmor %vm7921_vm15, %vm7922_vm13 }
0x1d41   :  { %8961 = vmatpush.bf16.msrb.mxu3 %v14790_v7  ;;  %8974 = vmatpush.bf16.msrb.mxu0 %v15386_v6  ;;  %v7891_v12 = vadd.f32 %v7887_v14, %v15387_v54  ;;  %v7918_v24 = vsub.f32 1.0, %v7917_v55  ;;  %v7906_v7 = vand.u32 2147483647, %v7896_v36  ;;  %v14999_v14 = vld [vmem:[%s15121_s16 + $0x1] ss:$2 sm:$0xf] }
0x1d42   :  { %v8308_v35 = vpop.f32.mrf.mxu0  ;;  %v7939_v45 = vmul.f32 %v13036_v0, %v7938_v9  ;;  %v8744_v54 = vperm.slane %v14999_v14, 3  ;;  %v8742_v62 = vperm.slane %v14999_v14, 1 }
0x1d43   :  { %13039 = vtanh.f32 %v7891_v12  ;;  %v7919_v10 = vmul.f32 %v13038_v34, %v7918_v24  ;;  %vm7907_vm1 = vcmp.eq.f32.partialorder %v7906_v7, 8.507059e+37 }
0x1d44   :  { %v7910_v60 = vsel %vm7907_vm1, %v7909_v1, %v7905_v39  ;;  %v7940_v31 = vadd.f32 %v13036_v0, %v7939_v45 }
0x1d45   :  { %v7920_v61 = vadd.f32 %v13038_v34, %v7919_v10  ;;  %v8282_v13 = vpop.f32.mrf.mxu2 }
0x1d46   :  { %v7944_v17 = vsel %vm7943_vm6, %v13036_v0, %v7940_v31  ;;  %v8741_v0 = vperm.slane %v14999_v14, 0 }
0x1d47   :  { %v7924_v27 = vsel %vm7923_vm3, %v13038_v34, %v7920_v61  ;;  %v8271_v50 = vpop.f32.mrf.mxu1  ;;  %v7949_v29 = vsel %vm7946_vm2, %v7948_v52, %v7944_v17 }
0x1d48   :  { %v14984_v11 = vpop.f32.mrf.mxu3  ;;  %v7929_v56 = vsel %vm7926_vm4, %v7928_v57, %v7924_v27 }
0x1d49   :  { %v13040_v21 = vpop.eup %13039  ;;  %v7951_v51 = vmul.f32 %v7929_v56, %v15388_v15 }
0x1d4a   :  { %v7952_v30 = vmul.f32 %v13040_v21, %v7910_v60  ;;  %v8310_v43 = vpop.f32.mrf.mxu0 }
0x1d4c   :  { %v7953_v47 = vadd.f32 %v7952_v30, %v7951_v51 }
0x1d4d   :  { %v8284_v44 = vpop.f32.mrf.mxu2 }
0x1d4e   :  { %13041 = vtanh.f32 %v7953_v47  ;;  %v8743_v47 = vperm.slane %v14999_v14, 2 }
0x1d50   :  { %v8297_v36 = vpop.f32.mrf.mxu3 }
0x1d54   :  { %v13042_v25 = vpop.eup %13041 }
0x1d55   :  { %v14990_v42 = vmul.f32 %v13042_v25, %v7949_v29 }
0x1d57   :  { %9159 = vst [vmem:[%s15122_s17] sm:$0x1] %v14990_v42 }
0x1d5f   :  { %v8481_v3 = vpop.f32.mrf.mxu1 }
0x1d60   :  { %v8482_v46 = vadd.f32 %v8481_v3, %v8269_v16 }
0x1d62   :  { %v8520_v63 = vpop.f32.mrf.mxu0 }
0x1d63   :  { %v8521_v40 = vadd.f32 %v8520_v63, %v8308_v35 }
0x1d65   :  { %v8494_v5 = vpop.f32.mrf.mxu2 }
0x1d66   :  { %v8495_v24 = vadd.f32 %v8494_v5, %v8282_v13 }
0x1d67   :  { %v8483_v2 = vpop.f32.mrf.mxu1 }
0x1d68   :  { %v8507_v8 = vpop.f32.mrf.mxu3 }
0x1d69   :  { %v8508_v51 = vadd.f32 %v8507_v8, %v14984_v11 }
0x1d6a   :  { %v8522_v19 = vpop.f32.mrf.mxu0 }
0x1d6d   :  { %v8496_v58 = vpop.f32.mrf.mxu2 }
0x1d70   :  { %v8509_v6 = vpop.f32.mrf.mxu3 }
0x1d7f   :  { %v8693_v34 = vpop.f32.mrf.mxu1 }
0x1d80   :  { %v8736_v12 = vadd.f32 %v8693_v34, %v8482_v46 }
0x1d81   :  { %v8732_v55 = vpop.f32.mrf.mxu0 }
0x1d82   :  { %v8739_v32 = vadd.f32 %v8732_v55, %v8521_v40  ;;  %v8749_v26 = vadd.f32 %v8741_v0, %v8736_v12 }
0x1d84   :  { %v8752_v53 = vadd.f32 %v8744_v54, %v8739_v32  ;;  %v11993_v7 = vmul.f32 -1.442695, %v8749_v26 }
0x1d85   :  { %v8706_v10 = vpop.f32.mrf.mxu2 }
0x1d86   :  { %v11995_v16 = vmul.f32 -1.442695, %v8752_v53  ;;  %13043 = vpow2.f32 %v11993_v7  ;;  %v8737_v35 = vadd.f32 %v8706_v10, %v8495_v24 }
0x1d87   :  { %v8719_v39 = vpop.f32.mrf.mxu3  ;;  %v8695_v41 = vpop.f32.mrf.mxu1 }
0x1d88   :  { %13045 = vpow2.f32 %v11995_v16  ;;  %v8750_v1 = vadd.f32 %v8742_v62, %v8737_v35  ;;  %v8738_v43 = vadd.f32 %v8719_v39, %v8508_v51  ;;  %v15393_v51 = vld [vmem:[#allocation25_spill] sm:$0xff] }
0x1d89   :  { %v8734_v9 = vpop.f32.mrf.mxu0 }
0x1d8a   :  { %v11994_v61 = vmul.f32 -1.442695, %v8750_v1  ;;  %v8751_v36 = vadd.f32 %v8743_v47, %v8738_v43  ;;  %v15394_v43 = vld [vmem:[#allocation16_spill] sm:$0xff] }
0x1d8c   :  { %v13044_v57 = vpop.eup %13043  ;;  %13047 = vpow2.f32 %v11994_v61  ;;  %v15389_v61 = vld [vmem:[#allocation18_spill] sm:$0xff] }
0x1d8d   :  { %v8756_v27 = vadd.f32 1.0, %v13044_v57  ;;  %v8708_v13 = vpop.f32.mrf.mxu2  ;;  %v15390_v57 = vld [vmem:[#allocation21_spill] sm:$0xff] }
0x1d8e   :  { %v13046_v60 = vpop.eup %13045  ;;  %v15392_v13 = vld [vmem:[#allocation22_spill] sm:$0xff] }
0x1d8f   :  { %v8721_v21 = vpop.f32.mrf.mxu3  ;;  %13049 = vrcp.f32 %v8756_v27  ;;  %v8795_v56 = vadd.f32 1.0, %v13046_v60  ;;  %v8768_v25 = vand.u32 2147483648, %v8756_v27  ;;  %vm8762_vm8 = vweird.f32 %v8756_v27 }
0x1d90   :  { %v8766_v11 = vand.u32 2147483647, %v8756_v27  ;;  %v15021_v60 = vadd.f32 %v15390_v57, %v15389_v61 }
0x1d91   :  { %13051 = vrcp.f32 %v8795_v56  ;;  %v8769_v19 = vor.u32 1.1754944e-38, %v8768_v25  ;;  %v8807_v16 = vand.u32 2147483648, %v8795_v56  ;;  %vm8801_vm3 = vweird.f32 %v8795_v56 }
0x1d92   :  { %v13048_v50 = vpop.eup %13047  ;;  %vm8767_vm12 = vcmp.eq.f32.partialorder %v8766_v11, 8.507059e+37  ;;  %v8805_v10 = vand.u32 2147483647, %v8795_v56  ;;  %v15396_v11 = vld [vmem:[#allocation27_spill] sm:$0xff] }
0x1d93   :  { %v8775_v45 = vadd.f32 1.0, %v13048_v50  ;;  %v8808_v39 = vor.u32 1.1754944e-38, %v8807_v16 }
0x1d94   :  { %vm8806_vm14 = vcmp.eq.f32.partialorder %v8805_v10, 8.507059e+37 }
0x1d95   :  { %v13050_v15 = vpop.eup %13049  ;;  %13053 = vrcp.f32 %v8775_v45  ;;  %v8787_v63 = vand.u32 2147483648, %v8775_v45  ;;  %v8785_v2 = vand.u32 2147483647, %v8775_v45  ;;  %vm8781_vm11 = vweird.f32 %v8775_v45 }
0x1d96   :  { %v8758_v30 = vmul.f32 %v13050_v15, %v8756_v27  ;;  %vm8763_vm7 = vweird.f32 %v13050_v15  ;;  %13055 = vtanh.f32 %v8751_v36  ;;  %v15391_v27 = vld [vmem:[#allocation17_spill] sm:$0xff] }
0x1d97   :  { %v13052_v20 = vpop.eup %13051  ;;  %vm8764_vm9 = vmor %vm8762_vm8, %vm8763_vm7  ;;  %v8788_v46 = vor.u32 1.1754944e-38, %v8787_v63  ;;  %vm8786_vm15 = vcmp.eq.f32.partialorder %v8785_v2, 8.507059e+37  ;;  %v15025_v21 = vadd.f32 %v15392_v13, %v15391_v27 }
0x1d98   :  { %v8759_v31 = vsub.f32 1.0, %v8758_v30  ;;  %v8797_v29 = vmul.f32 %v13052_v20, %v8795_v56  ;;  %vm8802_vm1 = vweird.f32 %v13052_v20 }
0x1d99   :  { %vm8803_vm4 = vmor %vm8801_vm3, %vm8802_vm1 }
0x1d9a   :  { %v8760_v44 = vmul.f32 %v13050_v15, %v8759_v31  ;;  %v8798_v58 = vsub.f32 1.0, %v8797_v29  ;;  %v213_v31 = vadd.s32 8, %v15394_v43 }
0x1d9b   :  { %v13054_v28 = vpop.eup %13053 }
0x1d9c   :  { %v8777_v17 = vmul.f32 %v13054_v28, %v8775_v45  ;;  %v8761_v52 = vadd.f32 %v13050_v15, %v8760_v44  ;;  %vm8782_vm10 = vweird.f32 %v13054_v28  ;;  %v13056_v12 = vpop.eup %13055  ;;  %v8799_v32 = vmul.f32 %v13052_v20, %v8798_v58 }
0x1d9d   :  { %vm8783_vm13 = vmor %vm8781_vm11, %vm8782_vm10  ;;  %vm215_vm5 = vcmp.lt.s32.totalorder %v213_v31, 12 }
0x1d9e   :  { %v8778_v3 = vsub.f32 1.0, %v8777_v17  ;;  %v8765_v8 = vsel %vm8764_vm9, %v13050_v15, %v8761_v52  ;;  %v8800_v7 = vadd.f32 %v13052_v20, %v8799_v32  ;;  %v7956_v15 = vperm.slane %v14990_v42, 0 }
0x1d9f   :  { %v8770_v40 = vsel %vm8767_vm12, %v8769_v19, %v8765_v8 }
0x1da0   :  { %v8779_v5 = vmul.f32 %v13054_v28, %v8778_v3  ;;  %v8812_v53 = vmul.f32 %v13056_v12, %v8770_v40  ;;  %v8804_v35 = vsel %vm8803_vm4, %v13052_v20, %v8800_v7  ;;  %v7957_v30 = vmul.f32 %v7956_v15, %v15393_v51 }
0x1da1   :  { %v8809_v1 = vsel %vm8806_vm14, %v8808_v39, %v8804_v35  ;;  %v15395_v20 = vmov 0.0  }
0x1da2   :  { %v8780_v6 = vadd.f32 %v13054_v28, %v8779_v5  ;;  %v15034_v44 = vsel %vm215_vm5, 1.0, %v15395_v20 }
0x1da3   :  { %vm8824_vm6 = vcmp.gt.f32.partialorder %v15034_v44, 0.0 }
0x1da4   :  { %v8784_v34 = vsel %vm8783_vm13, %v13054_v28, %v8780_v6 }
0x1da5   :  { %v8789_v55 = vsel %vm8786_vm15, %v8788_v46, %v8784_v34 }
0x1da6   :  { %v8811_v26 = vmul.f32 0.0, %v8789_v55 }
0x1da8   :  { %v15014_v24 = vadd.f32 %v8812_v53, %v8811_v26 }
0x1daa   :  { %13057 = vtanh.f32 %v15014_v24 }
0x1db0   :  { %v13058_v41 = vpop.eup %13057 }
0x1db1   :  { %v15017_v9 = vmul.f32 %v13058_v41, %v8809_v1 }
0x1db3   :  { %v8816_v50 = vperm.slane %v15017_v9, 0 }
0x1db5   :  { %v8818_v56 = vmul.f32 %v8816_v50, %v15025_v21  ;;  %v8817_v45 = vmul.f32 %v8816_v50, %v15021_v60 }
0x1db7   :  { %8821 = vadd.xlane.f32.xlu1 %v8818_v56  ;;  %8819 = vadd.xlane.f32.xlu2 %v8817_v45 }
0x1dbf   :  { %7958 = vadd.xlane.f32.xlu1 %v7957_v30 }
0x1e2a   :  { %v8822_v28 = vpop.xlane.xlu1 %8821  ;;  %v8820_v36 = vpop.xlane.xlu2 %8819 }
0x1e2b   :  { %v8826_v17 = vsel %vm8824_vm6, %v8822_v28, -1e+30 }
0x1e2c   :  { %v8827_v52 = vmax.f32 %v8820_v36, %v8826_v17 }
0x1e2e   :  { %v8828_v25 = vrot.slane %v8827_v52, 4 }
0x1e30   :  { %v8829_v29 = vmax.f32 %v8827_v52, %v8828_v25 }
0x1e32   :  { %v8830_v42 = vrot.slane %v8829_v29, 2  ;;  %v7959_v3 = vpop.xlane.xlu1 %7958 }
0x1e33   :  { %v7960_v63 = vsel %vm7687_vm0, %v7959_v3, -1e+30 }
0x1e34   :  { %v8831_v5 = vmax.f32 %v8829_v29, %v8830_v42  ;;  %v7961_v8 = vrot.slane %v7960_v63, 4 }
0x1e36   :  { %v8832_v2 = vrot.slane %v8831_v5, 1  ;;  %v7962_v19 = vmax.f32 %v7960_v63, %v7961_v8 }
0x1e38   :  { %v8833_v58 = vmax.f32 %v8831_v5, %v8832_v2  ;;  %v7963_v6 = vrot.slane %v7962_v19, 2 }
0x1e3a   :  { %v8834_v46 = vsub.f32 %v8820_v36, %v8833_v58  ;;  %v8835_v40 = vsub.f32 %v8826_v17, %v8833_v58  ;;  %v7964_v34 = vmax.f32 %v7962_v19, %v7963_v6 }
0x1e3c   :  { %v8838_v12 = vmul.f32 1.442695, %v8835_v40  ;;  %v7965_v55 = vrot.slane %v7964_v34, 1  ;;  %v8836_v32 = vmul.f32 1.442695, %v8834_v46 }
0x1e3e   :  { %v7966_v26 = vmax.f32 %v7964_v34, %v7965_v55  ;;  %13059 = vpow2.f32 %v8838_v12 }
0x1e3f   :  { %13061 = vpow2.f32 %v8836_v32 }
0x1e40   :  { %v7967_v53 = vsub.f32 %v7960_v63, %v7966_v26 }
0x1e42   :  { %v7968_v7 = vmul.f32 1.442695, %v7967_v53 }
0x1e44   :  { %13063 = vpow2.f32 %v7968_v7  ;;  %v13060_v16 = vpop.eup %13059 }
0x1e45   :  { %v8841_v10 = vmul.f32 %v13060_v16, %v15034_v44  ;;  %v13062_v35 = vpop.eup %13061 }
0x1e47   :  { %v8842_v39 = vadd.f32 %v13062_v35, %v8841_v10 }
0x1e49   :  { %v8843_v1 = vrot.slane %v8842_v39, 4 }
0x1e4a   :  { %v13064_v41 = vpop.eup %13063 }
0x1e4b   :  { %v7970_v61 = vmul.f32 %v13064_v41, %v15396_v11  ;;  %v8844_v57 = vadd.f32 %v8843_v1, %v8842_v39 }
0x1e4d   :  { %v7971_v27 = vrot.slane %v7970_v61, 4  ;;  %v8845_v13 = vrot.slane %v8844_v57, 2 }
0x1e4f   :  { %v7972_v50 = vadd.f32 %v7971_v27, %v7970_v61  ;;  %v8846_v56 = vadd.f32 %v8845_v13, %v8844_v57 }
0x1e51   :  { %v7973_v45 = vrot.slane %v7972_v50, 2  ;;  %v8847_v15 = vrot.slane %v8846_v56, 1 }
0x1e53   :  { %v7974_v30 = vadd.f32 %v7973_v45, %v7972_v50  ;;  %v8848_v43 = vadd.f32 %v8847_v15, %v8846_v56 }
0x1e55   :  { %v7975_v31 = vrot.slane %v7974_v30, 1  ;;  %13065 = vrcp.f32 %v8848_v43  ;;  %v8860_v25 = vand.u32 2147483648, %v8848_v43  ;;  %v8858_v3 = vand.u32 2147483647, %v8848_v43 }
0x1e56   :  { %vm8854_vm2 = vweird.f32 %v8848_v43 }
0x1e57   :  { %v7976_v20 = vadd.f32 %v7975_v31, %v7974_v30  ;;  %v8861_v8 = vor.u32 1.1754944e-38, %v8860_v25  ;;  %vm8859_vm9 = vcmp.eq.f32.partialorder %v8858_v3, 8.507059e+37  ;;  %v15399_v31 = vld [vmem:[#allocation50_spill] sm:$0xff]  ;;  %v15405_v25 = vld [vmem:[#allocation56_spill] sm:$0xff]  ;;  %v15408_v3 = vld [vmem:[#allocation59_spill] sm:$0xff] }
0x1e59   :  { %13067 = vrcp.f32 %v7976_v20  ;;  %v7988_v5 = vand.u32 2147483648, %v7976_v20  ;;  %v7986_v19 = vand.u32 2147483647, %v7976_v20  ;;  %vm7982_vm10 = vweird.f32 %v7976_v20 }
0x1e5b   :  { %v13066_v28 = vpop.eup %13065  ;;  %v7989_v12 = vor.u32 1.1754944e-38, %v7988_v5  ;;  %vm7987_vm12 = vcmp.eq.f32.partialorder %v7986_v19, 8.507059e+37  ;;  %v15410_v5 = vld [vmem:[#allocation61_spill] sm:$0xff]  ;;  %v15413_v19 = vld [vmem:[#allocation64_spill] sm:$0xff] }
0x1e5c   :  { %v8850_v36 = vmul.f32 %v13066_v28, %v8848_v43  ;;  %vm8855_vm0 = vweird.f32 %v13066_v28 }
0x1e5d   :  { %vm8856_vm7 = vmor %vm8854_vm2, %vm8855_vm0 }
0x1e5e   :  { %v8851_v52 = vsub.f32 1.0, %v8850_v36  ;;  %v15402_v36 = vld [vmem:[#allocation53_spill] sm:$0xff] }
0x1e5f   :  { %v13068_v17 = vpop.eup %13067 }
0x1e60   :  { %v7978_v29 = vmul.f32 %v13068_v17, %v7976_v20  ;;  %v8852_v42 = vmul.f32 %v13066_v28, %v8851_v52  ;;  %vm7983_vm8 = vweird.f32 %v13068_v17  ;;  %v15400_v20 = vld [vmem:[#allocation51_spill] sm:$0xff] }
0x1e61   :  { %vm7984_vm11 = vmor %vm7982_vm10, %vm7983_vm8  ;;  %v15404_v52 = vld [vmem:[#allocation55_spill] sm:$0xff] }
0x1e62   :  { %v7979_v11 = vsub.f32 1.0, %v7978_v29  ;;  %v8853_v63 = vadd.f32 %v13066_v28, %v8852_v42  ;;  %v15406_v29 = vld [vmem:[#allocation57_spill] sm:$0xff]  ;;  %v15407_v42 = vld [vmem:[#allocation58_spill] sm:$0xff] }
0x1e64   :  { %v7980_v2 = vmul.f32 %v13068_v17, %v7979_v11  ;;  %v8857_v58 = vsel %vm8856_vm7, %v13066_v28, %v8853_v63  ;;  %v15401_v28 = vld [vmem:[#allocation52_spill] sm:$0xff]  ;;  %v8874_v11 = vpack.c.bf16 %v15017_v9, %v15017_v9 }
0x1e65   :  { %v8862_v6 = vsel %vm8859_vm9, %v8861_v8, %v8857_v58  ;;  %v15409_v63 = vld [vmem:[#allocation60_spill] sm:$0xff]  ;;  %v15411_v8 = vld [vmem:[#allocation62_spill] sm:$0xff]  ;;  %v15414_v58 = vld [vmem:[#allocation65_spill] sm:$0xff] }
0x1e66   :  { %v7981_v46 = vadd.f32 %v13068_v17, %v7980_v2  ;;  %v8863_v40 = vmul.f32 %v13062_v35, %v8862_v6  ;;  %v8864_v34 = vmul.f32 %v8862_v6, %v8841_v10  ;;  %v15412_v2 = vld [vmem:[#allocation63_spill] sm:$0xff]  ;;  %v15415_v6 = vld [vmem:[#allocation66_spill] sm:$0xff]  ;;  %v15417_v9 = vld [vmem:[#allocation68_spill] sm:$0xff] }
0x1e68   :  { %v7985_v55 = vsel %vm7984_vm11, %v13068_v17, %v7981_v46  ;;  %v8865_v32 = vmul.f32 %v8863_v40, %v15021_v60  ;;  %v8866_v26 = vmul.f32 %v8864_v34, %v15025_v21  ;;  %v15403_v17 = vld [vmem:[#allocation54_spill] sm:$0xff]  ;;  %v15416_v46 = vld [vmem:[#allocation67_spill] sm:$0xff]  ;;  %v15418_v40 = vld [vmem:[#allocation69_spill] sm:$0xff] }
0x1e69   :  { %v7990_v53 = vsel %vm7987_vm12, %v7989_v12, %v7985_v55 }
0x1e6a   :  { %v7991_v7 = vmul.f32 %v7990_v53, %v7970_v61  ;;  %v8867_v16 = vadd.f32 %v8866_v26, %v8865_v32  ;;  %v15398_v61 = vld [vmem:[#allocation49_spill] sm:$0xff] }
0x1e6c   :  { %v7992_v39 = vmul.f32 %v7991_v7, %v15393_v51  ;;  %v8868_v41 = vrot.slane %v8867_v16, 4  ;;  %v15397_v51 = vld [vmem:[#allocation48_spill] sm:$0xff] }
0x1e6e   :  { %v7993_v1 = vrot.slane %v7992_v39, 4  ;;  %v8869_v57 = vadd.f32 %v8868_v41, %v8867_v16 }
0x1e70   :  { %v7994_v27 = vadd.f32 %v7993_v1, %v7992_v39  ;;  %v8870_v13 = vrot.slane %v8869_v57, 2 }
0x1e72   :  { %v7995_v35 = vrot.slane %v7994_v27, 2  ;;  %v8871_v10 = vadd.f32 %v8870_v13, %v8869_v57 }
0x1e74   :  { %v7996_v50 = vadd.f32 %v7995_v35, %v7994_v27  ;;  %v8872_v56 = vrot.slane %v8871_v10, 1 }
0x1e76   :  { %v7997_v45 = vrot.slane %v7996_v50, 1  ;;  %v8873_v15 = vadd.f32 %v8872_v56, %v8871_v10 }
0x1e78   :  { %v7998_v30 = vadd.f32 %v7997_v45, %v7996_v50  ;;  %v8875_v43 = vpack.c.bf16 %v8873_v15, %v8873_v15 }
0x1e7a   :  { %9160 = vst [vmem:[%s15123_s18] sm:$0x1] %v7998_v30  ;;  %8884 = vmatmul.bf16.vlgmr.msra.gmra.mxu1 %v8875_v43  ;;  %8897 = vmatmul.bf16.vlgmr.msra.gmra.mxu2 %v8875_v43 }
0x1e7b   :  { %8910 = vmatmul.bf16.vlgmr.msra.gmra.mxu3 %v8875_v43  ;;  %8923 = vmatmul.bf16.vlgmr.msra.gmra.mxu0 %v8875_v43 }
0x1e7c   :  { %8980 = vmatpush.bf16.msra.mxu1 %v15397_v51  ;;  %8993 = vmatpush.bf16.msra.mxu2 %v15398_v61 }
0x1e7d   :  { %9006 = vmatpush.bf16.msra.mxu3 %v15399_v31  ;;  %9019 = vmatpush.bf16.msra.mxu0 %v15400_v20 }
0x1e80   :  { %8981 = vmatpush.bf16.msra.mxu1 %v15401_v28  ;;  %8994 = vmatpush.bf16.msra.mxu2 %v15402_v36 }
0x1e81   :  { %9007 = vmatpush.bf16.msra.mxu3 %v15403_v17  ;;  %9020 = vmatpush.bf16.msra.mxu0 %v15404_v52 }
0x1e84   :  { %8982 = vmatpush.bf16.msra.mxu1 %v15405_v25  ;;  %8995 = vmatpush.bf16.msra.mxu2 %v15406_v29 }
0x1e85   :  { %9008 = vmatpush.bf16.msra.mxu3 %v15407_v42  ;;  %9021 = vmatpush.bf16.msra.mxu0 %v15408_v3 }
0x1e88   :  { %8983 = vmatpush.bf16.msra.mxu1 %v15409_v63  ;;  %8996 = vmatpush.bf16.msra.mxu2 %v15410_v5 }
0x1e89   :  { %9009 = vmatpush.bf16.msra.mxu3 %v15411_v8  ;;  %9022 = vmatpush.bf16.msra.mxu0 %v15412_v2 }
0x1e8a   :  { %8936 = vmatmul.bf16.vlgmr.msrb.gmra.mxu1 %v8874_v11  ;;  %8949 = vmatmul.bf16.vlgmr.msrb.gmra.mxu2 %v8874_v11 }
0x1e8b   :  { %8962 = vmatmul.bf16.vlgmr.msrb.gmra.mxu3 %v8874_v11  ;;  %8975 = vmatmul.bf16.vlgmr.msrb.gmra.mxu0 %v8874_v11 }
0x1e8c   :  { %8984 = vmatpush.bf16.msra.mxu1 %v15413_v19  ;;  %8997 = vmatpush.bf16.msra.mxu2 %v15414_v58 }
0x1e8d   :  { %9010 = vmatpush.bf16.msra.mxu3 %v15415_v6  ;;  %9023 = vmatpush.bf16.msra.mxu0 %v15416_v46 }
0x1e90   :  { %8985 = vmatpush.bf16.msra.mxu1 %v15417_v9  ;;  %8998 = vmatpush.bf16.msra.mxu2 %v15418_v40 }
0x1e91   :  { %9011 = vmatpush.bf16.msra.mxu3 %v14866_v4  ;;  %9024 = vmatpush.bf16.msra.mxu0 %v14868_v22 }
0x1e94   :  { %8986 = vmatpush.bf16.msra.mxu1 %v14872_v18  ;;  %8999 = vmatpush.bf16.msra.mxu2 %v14874_v37 }
0x1e95   :  { %9012 = vmatpush.bf16.msra.mxu3 %v14878_v33  ;;  %9025 = vmatpush.bf16.msra.mxu0 %v14880_v59 }
0x1e98   :  { %8987 = vmatpush.bf16.msra.mxu1 %v14884_v38  ;;  %9000 = vmatpush.bf16.msra.mxu2 %v14886_v49 }
0x1e99   :  { %9013 = vmatpush.bf16.msra.mxu3 %v14890_v23  ;;  %9026 = vmatpush.bf16.msra.mxu0 %v14892_v48 }
0x1e9b   :  { %8988 = vmatmul.bf16.vlgmr.msra.gmra.mxu1 %v8874_v11  ;;  %9001 = vmatmul.bf16.vlgmr.msra.gmra.mxu2 %v8874_v11 }
0x1e9c   :  { %9014 = vmatmul.bf16.vlgmr.msra.gmra.mxu3 %v8874_v11  ;;  %9027 = vmatmul.bf16.vlgmr.msra.gmra.mxu0 %v8874_v11 }
0x1ef7   :  { %v8885_v4 = vpop.f32.mrf.mxu1 }
0x1ef8   :  { %v8924_v22 = vpop.f32.mrf.mxu0 }
0x1efd   :  { %v8898_v18 = vpop.f32.mrf.mxu2 }
0x1efe   :  { %v8911_v37 = vpop.f32.mrf.mxu3 }
0x1eff   :  { %v8887_v34 = vpop.f32.mrf.mxu1 }
0x1f00   :  { %v8926_v33 = vpop.f32.mrf.mxu0 }
0x1f05   :  { %v8900_v12 = vpop.f32.mrf.mxu2 }
0x1f06   :  { %v8913_v59 = vpop.f32.mrf.mxu3 }
0x1f07   :  { %v8937_v55 = vpop.f32.mrf.mxu1 }
0x1f08   :  { %v8976_v38 = vpop.f32.mrf.mxu0  ;;  %v8938_v7 = vadd.f32 %v8937_v55, %v8885_v4 }
0x1f09   :  { %v8977_v16 = vadd.f32 %v8976_v38, %v8924_v22 }
0x1f0d   :  { %v8950_v32 = vpop.f32.mrf.mxu2 }
0x1f0e   :  { %v8963_v49 = vpop.f32.mrf.mxu3  ;;  %v8951_v35 = vadd.f32 %v8950_v32, %v8898_v18 }
0x1f0f   :  { %v8939_v26 = vpop.f32.mrf.mxu1  ;;  %v8964_v29 = vadd.f32 %v8963_v49, %v8911_v37 }
0x1f10   :  { %v8978_v23 = vpop.f32.mrf.mxu0 }
0x1f15   :  { %v8952_v53 = vpop.f32.mrf.mxu2 }
0x1f16   :  { %v8965_v48 = vpop.f32.mrf.mxu3 }
0x1f18   :  { %v8989_v39 = vpop.f32.mrf.mxu1 }
0x1f19   :  { %v9032_v41 = vadd.f32 %v8989_v39, %v8938_v7  ;;  %v9028_v1 = vpop.f32.mrf.mxu0 }
0x1f1a   :  { %v9035_v57 = vadd.f32 %v9028_v1, %v8977_v16 }
0x1f1b   :  { %v9036_v27 = vadd.f32 %v9032_v41, %v8741_v0 }
0x1f1c   :  { %v9039_v13 = vadd.f32 %v9035_v57, %v8744_v54 }
0x1f1d   :  { %v11996_v10 = vmul.f32 -1.442695, %v9036_v27 }
0x1f1e   :  { %v11998_v50 = vmul.f32 -1.442695, %v9039_v13  ;;  %v9002_v56 = vpop.f32.mrf.mxu2 }
0x1f1f   :  { %13069 = vpow2.f32 %v11996_v10  ;;  %v9033_v45 = vadd.f32 %v9002_v56, %v8951_v35  ;;  %v9015_v15 = vpop.f32.mrf.mxu3 }
0x1f20   :  { %13071 = vpow2.f32 %v11998_v50  ;;  %v8991_v30 = vpop.f32.mrf.mxu1  ;;  %v9034_v3 = vadd.f32 %v9015_v15, %v8964_v29 }
0x1f21   :  { %v9037_v43 = vadd.f32 %v9033_v45, %v8742_v62  ;;  %v9030_v51 = vpop.f32.mrf.mxu0 }
0x1f22   :  { %v9038_v8 = vadd.f32 %v9034_v3, %v8743_v47 }
0x1f23   :  { %v11997_v61 = vmul.f32 -1.442695, %v9037_v43 }
0x1f25   :  { %v13070_v31 = vpop.eup %13069  ;;  %13073 = vpow2.f32 %v11997_v61 }
0x1f26   :  { %v13072_v0 = vpop.eup %13071  ;;  %v9043_v20 = vadd.f32 1.0, %v13070_v31  ;;  %v9004_v28 = vpop.f32.mrf.mxu2 }
0x1f27   :  { %v9017_v54 = vpop.f32.mrf.mxu3  ;;  %v9082_v36 = vadd.f32 1.0, %v13072_v0 }
0x1f28   :  { %13075 = vrcp.f32 %v9043_v20  ;;  %v9055_v58 = vand.u32 2147483648, %v9043_v20  ;;  %vm9049_vm15 = vweird.f32 %v9043_v20  ;;  %v9053_v9 = vand.u32 2147483647, %v9043_v20 }
0x1f29   :  { %13077 = vrcp.f32 %v9082_v36  ;;  %v9094_v53 = vand.u32 2147483648, %v9082_v36  ;;  %vm9088_vm7 = vweird.f32 %v9082_v36  ;;  %v9092_v48 = vand.u32 2147483647, %v9082_v36 }
0x1f2a   :  { %v9056_v37 = vor.u32 1.1754944e-38, %v9055_v58  ;;  %vm9054_vm14 = vcmp.eq.f32.partialorder %v9053_v9, 8.507059e+37 }
0x1f2b   :  { %v13074_v17 = vpop.eup %13073  ;;  %v9095_v16 = vor.u32 1.1754944e-38, %v9094_v53  ;;  %vm9093_vm9 = vcmp.eq.f32.partialorder %v9092_v48, 8.507059e+37 }
0x1f2c   :  { %v9062_v52 = vadd.f32 1.0, %v13074_v17 }
0x1f2e   :  { %v13076_v25 = vpop.eup %13075  ;;  %13079 = vrcp.f32 %v9062_v52  ;;  %v9074_v40 = vand.u32 2147483648, %v9062_v52  ;;  %v9072_v18 = vand.u32 2147483647, %v9062_v52  ;;  %vm9068_vm4 = vweird.f32 %v9062_v52 }
0x1f2f   :  { %v9045_v42 = vmul.f32 %v13076_v25, %v9043_v20  ;;  %v13078_v62 = vpop.eup %13077  ;;  %vm9050_vm13 = vweird.f32 %v13076_v25  ;;  %13081 = vtanh.f32 %v9038_v8 }
0x1f30   :  { %v9084_v6 = vmul.f32 %v13078_v62, %v9082_v36  ;;  %vm9051_vm1 = vmor %vm9049_vm15, %vm9050_vm13  ;;  %v9075_v47 = vor.u32 1.1754944e-38, %v9074_v40  ;;  %vm9073_vm0 = vcmp.eq.f32.partialorder %v9072_v18, 8.507059e+37  ;;  %vm9089_vm2 = vweird.f32 %v13078_v62 }
0x1f31   :  { %v9046_v11 = vsub.f32 1.0, %v9045_v42  ;;  %vm9090_vm8 = vmor %vm9088_vm7, %vm9089_vm2 }
0x1f32   :  { %v9085_v34 = vsub.f32 1.0, %v9084_v6 }
0x1f33   :  { %v9047_v63 = vmul.f32 %v13076_v25, %v9046_v11 }
0x1f34   :  { %v13080_v5 = vpop.eup %13079  ;;  %v9086_v38 = vmul.f32 %v13078_v62, %v9085_v34 }
0x1f35   :  { %v9064_v2 = vmul.f32 %v13080_v5, %v9062_v52  ;;  %v9048_v19 = vadd.f32 %v13076_v25, %v9047_v63  ;;  %vm9069_vm3 = vweird.f32 %v13080_v5  ;;  %v13082_v59 = vpop.eup %13081 }
0x1f36   :  { %vm9070_vm5 = vmor %vm9068_vm4, %vm9069_vm3  ;;  %v9087_v23 = vadd.f32 %v13078_v62, %v9086_v38 }
0x1f37   :  { %v9065_v46 = vsub.f32 1.0, %v9064_v2  ;;  %v9052_v22 = vsel %vm9051_vm1, %v13076_v25, %v9048_v19 }
0x1f38   :  { %v9057_v33 = vsel %vm9054_vm14, %v9056_v37, %v9052_v22  ;;  %v9091_v7 = vsel %vm9090_vm8, %v13078_v62, %v9087_v23 }
0x1f39   :  { %v9066_v4 = vmul.f32 %v13080_v5, %v9065_v46  ;;  %v9099_v49 = vmul.f32 %v13082_v59, %v9057_v33  ;;  %v9096_v41 = vsel %vm9093_vm9, %v9095_v16, %v9091_v7 }
0x1f3b   :  { %v9067_v14 = vadd.f32 %v13080_v5, %v9066_v4 }
0x1f3d   :  { %v9071_v12 = vsel %vm9070_vm5, %v13080_v5, %v9067_v14 }
0x1f3e   :  { %v9076_v55 = vsel %vm9073_vm0, %v9075_v47, %v9071_v12 }
0x1f3f   :  { %v9098_v32 = vmul.f32 %v9076_v55, %v15014_v24 }
0x1f41   :  { %v9100_v26 = vadd.f32 %v9099_v49, %v9098_v32 }
0x1f43   :  { %13083 = vtanh.f32 %v9100_v26 }
0x1f49   :  { %v13084_v39 = vpop.eup %13083 }
0x1f4a   :  { %v9102_v1 = vmul.f32 %v13084_v39, %v9096_v41 }
0x1f4c   :  { %v9103_v57 = vperm.slane %v9102_v1, 0  ;;  %9161 = vst [vmem:[%s15124_s19] sm:$0x1] %v9102_v1 }
0x1f4e   :  { %v9105_v24 = vmul.f32 %v9103_v57, %v15025_v21  ;;  %v9104_v27 = vmul.f32 %v9103_v57, %v15021_v60 }
0x1f50   :  { %9108 = vadd.xlane.f32.xlu2 %v9105_v24  ;;  %9106 = vadd.xlane.f32.xlu0 %v9104_v27 }
0x1fc3   :  { %v9109_v13 = vpop.xlane.xlu2 %9108  ;;  %v9107_v35 = vpop.xlane.xlu0 %9106 }
0x1fc4   :  { %v9111_v10 = vsel %vm8824_vm6, %v9109_v13, -1e+30 }
0x1fc5   :  { %v9112_v50 = vmax.f32 %v9107_v35, %v9111_v10 }
0x1fc7   :  { %v9113_v56 = vrot.slane %v9112_v50, 4 }
0x1fc9   :  { %v9114_v45 = vmax.f32 %v9112_v50, %v9113_v56 }
0x1fcb   :  { %v9115_v15 = vrot.slane %v9114_v45, 2 }
0x1fcd   :  { %v9116_v30 = vmax.f32 %v9114_v45, %v9115_v15 }
0x1fcf   :  { %v9117_v43 = vrot.slane %v9116_v30, 1 }
0x1fd1   :  { %v9118_v51 = vmax.f32 %v9116_v30, %v9117_v43 }
0x1fd3   :  { %v9119_v61 = vsub.f32 %v9107_v35, %v9118_v51  ;;  %v9120_v31 = vsub.f32 %v9111_v10, %v9118_v51 }
0x1fd5   :  { %v9123_v0 = vmul.f32 1.442695, %v9120_v31  ;;  %v9121_v20 = vmul.f32 1.442695, %v9119_v61 }
0x1fd7   :  { %13085 = vpow2.f32 %v9123_v0 }
0x1fd8   :  { %13087 = vpow2.f32 %v9121_v20 }
0x1fdd   :  { %v13086_v28 = vpop.eup %13085 }
0x1fde   :  { %v9126_v54 = vmul.f32 %v13086_v28, %v15034_v44  ;;  %v13088_v36 = vpop.eup %13087 }
0x1fe0   :  { %v9127_v17 = vadd.f32 %v13088_v36, %v9126_v54 }
0x1fe2   :  { %v9128_v52 = vrot.slane %v9127_v17, 4 }
0x1fe4   :  { %v9129_v25 = vadd.f32 %v9128_v52, %v9127_v17 }
0x1fe6   :  { %v9130_v29 = vrot.slane %v9129_v25, 2 }
0x1fe8   :  { %v9131_v42 = vadd.f32 %v9130_v29, %v9129_v25 }
0x1fea   :  { %v9132_v3 = vrot.slane %v9131_v42, 1 }
0x1fec   :  { %v9133_v11 = vadd.f32 %v9132_v3, %v9131_v42 }
0x1fee   :  { %13089 = vrcp.f32 %v9133_v11  ;;  %v9145_v8 = vand.u32 2147483648, %v9133_v11  ;;  %v9143_v19 = vand.u32 2147483647, %v9133_v11  ;;  %vm9139_vm10 = vweird.f32 %v9133_v11 }
0x1ff0   :  { %v9146_v44 = vor.u32 1.1754944e-38, %v9145_v8  ;;  %vm9144_vm12 = vcmp.eq.f32.partialorder %v9143_v19, 8.507059e+37 }
0x1ff4   :  { %v13090_v62 = vpop.eup %13089 }
0x1ff5   :  { %v9135_v63 = vmul.f32 %v13090_v62, %v9133_v11  ;;  %vm9140_vm6 = vweird.f32 %v13090_v62 }
0x1ff6   :  { %vm9141_vm11 = vmor %vm9139_vm10, %vm9140_vm6 }
0x1ff7   :  { %v9136_v5 = vsub.f32 1.0, %v9135_v63 }
0x1ff9   :  { %v9137_v2 = vmul.f32 %v13090_v62, %v9136_v5 }
0x1ffb   :  { %v9138_v58 = vadd.f32 %v13090_v62, %v9137_v2 }
0x1ffd   :  { %v9142_v6 = vsel %vm9141_vm11, %v13090_v62, %v9138_v58 }
0x1ffe   :  { %v9147_v46 = vsel %vm9144_vm12, %v9146_v44, %v9142_v6 }
0x1fff   :  { %v9148_v9 = vmul.f32 %v13088_v36, %v9147_v46  ;;  %v9149_v40 = vmul.f32 %v9147_v46, %v9126_v54 }
0x2001   :  { %v9150_v4 = vmul.f32 %v9148_v9, %v15021_v60  ;;  %v9151_v22 = vmul.f32 %v9149_v40, %v15025_v21 }
0x2003   :  { %v9152_v18 = vadd.f32 %v9151_v22, %v9150_v4 }
0x2005   :  { %v9153_v37 = vrot.slane %v9152_v18, 4 }
0x2007   :  { %v9154_v34 = vadd.f32 %v9153_v37, %v9152_v18 }
0x2009   :  { %v9155_v14 = vrot.slane %v9154_v34, 2 }
0x200b   :  { %v9156_v47 = vadd.f32 %v9155_v14, %v9154_v34 }
0x200d   :  { %v9157_v33 = vrot.slane %v9156_v47, 1 }
0x200f   :  { %v9158_v12 = vadd.f32 %v9157_v33, %v9156_v47 }
0x2011   :  { %9162 = vst [vmem:[%s15125_s20] sm:$0x1] %v9158_v12 }
0x2012   :  { %9184 = vsyncpa [#allocation3], 1 }
0x2013   :  { %9185 = vsyncpa [#allocation5], 1 }
0x2014   :  { %9186 = vsyncpa [#allocation8], 1 }
0x2015   :  { %9187 = vsyncpa [#allocation11], 1 }

</bundles_post_ra>
